<compile_context>
chip_gen: v7x
topology: tpu7x:2x2x1
jax: 0.10.0
libtpu: 0.0.40
codegen_flags: <defaults>
</compile_context>

<pallas_src>
import functools

import jax
import jax.numpy as jnp
from jax.experimental import pallas as pl
from jax.experimental.pallas import tpu as pltpu

EPS = 1e-5
_FRONT = 8   # aligned guard rows at the front of the in-kernel padded slab
_BACK = 8    # guard rows at the back (dx=+1 window peeks one row past the data)


def _choose_th(H, W, cin, cout, *, target_m=512, vmem_budget=20 << 20):
    """Largest divisor of H such that th*W >= target_m (if possible) and the rough
    per-step VMEM estimate stays under `vmem_budget` (conservative for v7x)."""
    best = 1
    for th in range(1, H + 1):
        if H % th:
            continue
        m = th * W
        blocks = 2 * (m * cin * 2 + 2 * W * cin * 2 + m * cout * 2)   # dbl-buffered bf16 I/O
        slab = (_FRONT + (th + 2) * W + _BACK) * cin * 2              # bf16 slab
        spans = 6 * (th + 2) * W * cin * 2                            # lft/ctr/rgt + concat values
        acc = m * cout * 4                                            # f32 accumulator
        est = blocks + slab + spans + acc + 2 * 9 * cin * cout * 2
        if th > 1 and est > vmem_budget:
            break
        best = th
        if m >= target_m:
            break
    return best


def _choose_rows(total, target=2048):
    """Largest multiple-of-8 divisor of `total` that is <= target (or total itself)."""
    if total <= target:
        return total
    best = 8
    for r in range(8, target + 1, 8):
        if total % r == 0:
            best = r
    return best


# ----------------------------------------------------------------------------
# Kernels 1+2: 3x3 conv (stride 1, "same" zero padding) with
#   * optional fused "BN-apply + ReLU" prologue on the input rows (conv2 only)
#   * fused per-channel / per-batch sum and sum-of-squares of the conv output.
# Grid = (N, H // TH); spatial rows stay flattened as (rows*W, C) so every matmul
# operand / store is plain 2-D (no in-kernel reshapes).
# ----------------------------------------------------------------------------
def _conv_bn_stats_kernel(x_mid_ref, x_top_ref, x_bot_ref, w_ref, scale_ref, shift_ref,
                          y_ref, sum_ref, sq_ref,            # outputs
                          pad_ref, acc_ref,                   # VMEM scratch
                          *, W, TH, fuse_input_bn):
    hb = pl.program_id(1)
    nh = pl.num_programs(1)
    M = TH * W                 # output rows per step
    L = (TH + 2) * W           # rows covered by the three dy windows for one dx shift
    C = pad_ref.shape[1]
    bf = pad_ref.dtype

    # per-batch stats accumulators: init on the first row-block of each image
    @pl.when(hb == 0)
    def _():
        sum_ref[...] = jnp.zeros_like(sum_ref)
        sq_ref[...] = jnp.zeros_like(sq_ref)

    def prologue(v):
        # fused BatchNorm-apply + ReLU of the *previous* layer (conv2 only),
        # plus the single f32 -> bf16 cast into the slab.
        v = v.astype(jnp.float32)
        if fuse_input_bn:
            v = jnp.maximum(v * scale_ref[...] + shift_ref[...], 0.0)
        return v.astype(bf)

    # ---- stage TH + 2 halo'd image rows into the bf16 slab ----------------------
    # slab row (_FRONT + s) <-> flattened input row (h0 - 1) * W + s.
    # Only the tiny guard regions and missing halo rows are zeroed.
    pad_ref[0:_FRONT, :] = jnp.zeros((_FRONT, C), bf)
    pad_ref[_FRONT + L:_FRONT + L + _BACK, :] = jnp.zeros((_BACK, C), bf)

    pad_ref[_FRONT + W:_FRONT + (TH + 1) * W, :] = prologue(x_mid_ref[...])

    @pl.when(hb > 0)
    def _():
        pad_ref[_FRONT:_FRONT + W, :] = prologue(x_top_ref[...])

    @pl.when(hb == 0)
    def _():
        pad_ref[_FRONT:_FRONT + W, :] = jnp.zeros((W, C), bf)

    @pl.when(hb < nh - 1)
    def _():
        pad_ref[_FRONT + (TH + 1) * W:_FRONT + L, :] = prologue(x_bot_ref[...])

    @pl.when(hb == nh - 1)
    def _():
        pad_ref[_FRONT + (TH + 1) * W:_FRONT + L, :] = jnp.zeros((W, C), bf)

    # ---- build the three dx-shifted row spans once (edge masks applied once) ----
    # In the flattened layout the dx=0 / dx=2 taps wrap across image rows at the
    # first / last column; those positions must read zero (conv zero padding).
    col = jax.lax.broadcasted_iota(jnp.int32, (L, 1), 0) % W
    ctr = pad_ref[_FRONT:_FRONT + L, :]                                   # aligned
    lft = jnp.where(col == 0, jnp.zeros((), bf),
                    pad_ref[_FRONT - 1:_FRONT - 1 + L, :])                # 1 unaligned read
    rgt = jnp.where(col == W - 1, jnp.zeros((), bf),
                    pad_ref[_FRONT + 1:_FRONT + 1 + L, :])                # 1 unaligned read

    # fold the 3 dx taps along K: (L, 3*Cin) bf16
    spans = jnp.concatenate([lft, ctr, rgt], axis=1)

    # ---- 3 MXU matmuls (one per dy) with K = 3*Cin, f32 accumulation ------------
    for dy in range(3):
        win = spans[dy * W:dy * W + M, :]
        part = jnp.dot(win, w_ref[dy], preferred_element_type=jnp.float32)
        if dy == 0:
            acc_ref[...] = part
        else:
            acc_ref[...] += part

    acc = acc_ref[...]
    y_ref[...] = acc.astype(y_ref.dtype)
    # fused per-channel batch statistics from the f32 accumulator
    sum_ref[...] += jnp.sum(acc, axis=0, keepdims=True)
    sq_ref[...] += jnp.sum(acc * acc, axis=0, keepdims=True)


def conv3x3_fused(x, w, scale, shift, *, H, W, fuse_input_bn, th):
    """x: (N, H*W, Cin) bf16, w: (3,3,Cin,Cout) f32, scale/shift: (1, Cin) f32.

    Returns y: (N, H*W, Cout) bf16 (pre-BN conv output), plus per-batch per-channel
    sum / sum-of-squares of y (f32, shape (N, 1, Cout)) computed from the f32 acc.
    """
    N, HW, Cin = x.shape
    Cout = w.shape[-1]
    assert HW == H * W and H % th == 0 and W % 8 == 0, (H, W, th)
    nh = H // th
    scr_rows = _FRONT + (th + 2) * W + _BACK
    wK = w.reshape(3, 3 * Cin, Cout).astype(jnp.bfloat16)   # K-folded (dx-major) weights

    # conservative per-step VMEM estimate -> explicit scoped-VMEM limit
    est = (2 * (th * W * Cin * 2 + 2 * W * Cin * 2 + th * W * Cout * 2)
           + scr_rows * Cin * 2 + 6 * (th + 2) * W * Cin * 2
           + th * W * Cout * 4 + 2 * 9 * Cin * Cout * 2)
    vmem_limit = int(min(48 << 20, max(32 << 20, 2 * est)))

    kernel = functools.partial(_conv_bn_stats_kernel, W=W, TH=th,
                               fuse_input_bn=fuse_input_bn)
    return pl.pallas_call(
        kernel,
        out_shape=(jax.ShapeDtypeStruct((N, H * W, Cout), jnp.bfloat16),
                   jax.ShapeDtypeStruct((N, 1, Cout), jnp.float32),
                   jax.ShapeDtypeStruct((N, 1, Cout), jnp.float32)),
        grid=(N, nh),
        in_specs=[
            # current TH-row block
            pl.BlockSpec((None, th * W, Cin), lambda n, hb: (n, hb, 0)),
            # top / bottom halo rows (clamped at the image boundary; the kernel
            # ignores them there and keeps the zero padding instead)
            pl.BlockSpec((None, W, Cin),
                         lambda n, hb: (n, jnp.maximum(hb * th - 1, 0), 0)),
            pl.BlockSpec((None, W, Cin),
                         lambda n, hb: (n, jnp.minimum(hb * th + th, H - 1), 0)),
            pl.BlockSpec((3, 3 * Cin, Cout), lambda n, hb: (0, 0, 0)),
            pl.BlockSpec((1, Cin), lambda n, hb: (0, 0)),
            pl.BlockSpec((1, Cin), lambda n, hb: (0, 0)),
        ],
        out_specs=(
            pl.BlockSpec((None, th * W, Cout), lambda n, hb: (n, hb, 0)),
            # per-batch stats blocks: resident across hb, distinct per n, so the
            # N axis can be "parallel" (v7x megacore) without racing accumulators.
            pl.BlockSpec((None, 1, Cout), lambda n, hb: (n, 0, 0)),
            pl.BlockSpec((None, 1, Cout), lambda n, hb: (n, 0, 0)),
        ),
        scratch_shapes=[pltpu.VMEM((scr_rows, Cin), jnp.bfloat16),
                        pltpu.VMEM((th * W, Cout), jnp.float32)],
        compiler_params=pltpu.CompilerParams(
            dimension_semantics=("parallel", "arbitrary"),
            vmem_limit_bytes=vmem_limit),
    )(x, x, x, wK, scale, shift)


# ----------------------------------------------------------------------------
# Kernel 3: final BatchNorm-apply + ReLU (elementwise), large row blocks over
# the collapsed (N*H*W) axis.
# ----------------------------------------------------------------------------
def _bn_relu_kernel(y_ref, scale_ref, shift_ref, o_ref):
    v = y_ref[...].astype(jnp.float32)
    o_ref[...] = jnp.maximum(v * scale_ref[...] + shift_ref[...], 0.0)


def bn_relu(y, scale, shift, *, block_rows):
    R, C = y.shape
    assert R % block_rows == 0
    return pl.pallas_call(
        _bn_relu_kernel,
        out_shape=jax.ShapeDtypeStruct((R, C), jnp.float32),
        grid=(R // block_rows,),
        in_specs=[pl.BlockSpec((block_rows, C), lambda r: (r, 0)),
                  pl.BlockSpec((1, C), lambda r: (0, 0)),
                  pl.BlockSpec((1, C), lambda r: (0, 0))],
        out_specs=pl.BlockSpec((block_rows, C), lambda r: (r, 0)),
        compiler_params=pltpu.CompilerParams(dimension_semantics=("parallel",)),
    )(y, scale, shift)


def bn_affine(s, sq, gamma, beta, count, eps=EPS):
    """Training-mode BN: batch mean + biased variance -> per-channel scale/shift.
    s, sq: (N, 1, C) per-batch partials from the conv kernel."""
    s = jnp.sum(s, axis=(0, 1))
    sq = jnp.sum(sq, axis=(0, 1))
    mean = s / count
    var = sq / count - mean * mean
    # NOTE: E[x^2] - m^2 in f32 is cancellation-prone for large-mean activations;
    # fine at these scales, switch to a two-pass reduction for very large shapes.
    scale = gamma * jax.lax.rsqrt(var + eps)
    shift = beta - mean * scale
    return scale[None, :].astype(jnp.float32), shift[None, :].astype(jnp.float32)


# ----------------------------------------------------------------------------
# DoubleConv forward (matches the PyTorch module in training mode).
# ----------------------------------------------------------------------------
def double_conv(x_nchw, params):
    N, Cin, H, W = x_nchw.shape
    Cout = params["w1"].shape[-1]
    cnt = float(N * H * W)

    # NCHW -> NHWC -> (N, H*W, C), bf16 activations between kernels
    x = jnp.transpose(x_nchw, (0, 2, 3, 1)).reshape(N, H * W, Cin).astype(jnp.bfloat16)

    dummy = jnp.zeros((1, Cin), jnp.float32)
    # conv1 + fused batch stats
    th1 = _choose_th(H, W, Cin, Cout)
    y1, s1, q1 = conv3x3_fused(x, params["w1"], dummy, dummy,
                               H=H, W=W, fuse_input_bn=False, th=th1)
    scale1, shift1 = bn_affine(s1, q1, params["g1"], params["b1"], cnt)

    # conv2 with BN1+ReLU fused into its input staging, + fused batch stats
    th2 = _choose_th(H, W, Cout, Cout)
    y2, s2, q2 = conv3x3_fused(y1, params["w2"], scale1, shift1,
                               H=H, W=W, fuse_input_bn=True, th=th2)
    scale2, shift2 = bn_affine(s2, q2, params["g2"], params["b2"], cnt)

    # final BN2-apply + ReLU over the collapsed row axis with big blocks
    rows = _choose_rows(N * H * W)
    z2 = bn_relu(y2.reshape(N * H * W, Cout), scale2, shift2, block_rows=rows)
    return jnp.transpose(z2.reshape(N, H, W, Cout), (0, 3, 1, 2))   # NHWC -> NCHW


# Pure-JAX reference with the same precision policy (bf16 MXU inputs, f32 math).
def reference(x_nchw, params, eps=EPS):
    x = jnp.transpose(x_nchw, (0, 2, 3, 1)).astype(jnp.float32)

    def conv(v, w):
        return jax.lax.conv_general_dilated(
            v.astype(jnp.bfloat16), w.astype(jnp.bfloat16),
            window_strides=(1, 1), padding=((1, 1), (1, 1)),
            dimension_numbers=("NHWC", "HWIO", "NHWC"),
            preferred_element_type=jnp.float32)

    def bnrelu(y, g, b):
        mean = jnp.mean(y, axis=(0, 1, 2))
        var = jnp.mean(jnp.square(y - mean), axis=(0, 1, 2))      # biased (training BN)
        return jnp.maximum((y - mean) * jax.lax.rsqrt(var + eps) * g + b, 0.0)

    z1 = bnrelu(conv(x, params["w1"]), params["g1"], params["b1"])
    z2 = bnrelu(conv(z1, params["w2"]), params["g2"], params["b2"])
    return jnp.transpose(z2, (0, 3, 1, 2))


if __name__ == "__main__":
    N, Cin, Cout, H, W = 2, 4, 8, 16, 16
    key = jax.random.PRNGKey(0)
    k1, k2, kx = jax.random.split(key, 3)

    # Shapes from DoubleConv.__init__; PyTorch-default BN affine (gamma=1, beta=0).
    params = {
        "w1": 0.1 * jax.random.normal(k1, (3, 3, Cin, Cout), jnp.float32),
        "w2": 0.1 * jax.random.normal(k2, (3, 3, Cout, Cout), jnp.float32),
        "g1": jnp.ones((Cout,), jnp.float32),
        "b1": jnp.zeros((Cout,), jnp.float32),
        "g2": jnp.ones((Cout,), jnp.float32),
        "b2": jnp.zeros((Cout,), jnp.float32),
    }
    x = jax.random.normal(kx, (N, Cin, H, W), jnp.float32)

    out = jax.block_until_ready(jax.jit(double_conv)(x, params))
    ref = reference(x, params)

    assert out.shape == (N, Cout, H, W), out.shape
    err = float(jnp.max(jnp.abs(out - ref)))
    # Both pipelines use bf16 MXU inputs with f32 accumulation; the kernel path
    # additionally stores y1/y2 as bf16 between stages (one extra rounding each),
    # so the tolerance is slightly wider than pure-f32 intermediates would need.
    assert jnp.allclose(out, ref, rtol=2e-2, atol=2e-2), err
    print("KERNEL_OK")
</pallas_src>

<mosaic_0001>
module attributes {stable_mosaic.version = 11 : i64} {
  func.func @_conv_bn_stats_kernel(%arg0: i32, %arg1: i32, %arg2: memref<1x256x4xbf16, #tpu.memory_space<vmem>>, %arg3: memref<1x16x4xbf16, #tpu.memory_space<vmem>>, %arg4: memref<1x16x4xbf16, #tpu.memory_space<vmem>>, %arg5: memref<3x12x8xbf16, #tpu.memory_space<vmem>>, %arg6: memref<1x4xf32, #tpu.memory_space<vmem>>, %arg7: memref<1x4xf32, #tpu.memory_space<vmem>>, %arg8: memref<1x256x8xbf16, #tpu.memory_space<vmem>>, %arg9: memref<1x1x8xf32, #tpu.memory_space<vmem>>, %arg10: memref<1x1x8xf32, #tpu.memory_space<vmem>>, %arg11: memref<304x4xbf16, #tpu.memory_space<vmem>>, %arg12: memref<256x8xf32, #tpu.memory_space<vmem>>) attributes {dimension_semantics = [#tpu.dimension_semantics<parallel>, #tpu.dimension_semantics<arbitrary>], iteration_bounds = array<i64: 2, 1>, scalar_prefetch = 0 : i64, scratch_operands = 2 : i64, tpu.core_type = #tpu.core_type<tc>, window_params = [{transform_indices = @transform_0, window_bounds = array<i64: 1, 256, 4>}, {transform_indices = @transform_1, window_bounds = array<i64: 1, 16, 4>}, {transform_indices = @transform_2, window_bounds = array<i64: 1, 16, 4>}, {pipeline_mode = #tpu.pipeline_mode<synchronous>, transform_indices = @transform_3, window_bounds = array<i64: 3, 12, 8>}, {pipeline_mode = #tpu.pipeline_mode<synchronous>, transform_indices = @transform_4, window_bounds = array<i64: 1, 4>}, {pipeline_mode = #tpu.pipeline_mode<synchronous>, transform_indices = @transform_5, window_bounds = array<i64: 1, 4>}, {transform_indices = @transform_6, window_bounds = array<i64: 1, 256, 8>}, {transform_indices = @transform_7, window_bounds = array<i64: 1, 1, 8>}, {transform_indices = @transform_8, window_bounds = array<i64: 1, 1, 8>}]} {
    %c0_i32 = arith.constant 0 : i32
    %0 = arith.cmpi eq, %arg1, %c0_i32 : i32
    %1 = arith.extui %0 : i1 to i32
    %c0_i32_0 = arith.constant 0 : i32
    %2 = arith.cmpi ne, %1, %c0_i32_0 : i32
    scf.if %2 {
      %cst_65 = arith.constant 0.000000e+00 : f32
      %98 = vector.broadcast %cst_65 : f32 to vector<1x8xf32>
      %c0_66 = arith.constant 0 : index
      %c0_67 = arith.constant 0 : index
      %c0_68 = arith.constant 0 : index
      %99 = vector.load %arg9[%c0_66, %c0_67, %c0_68] : memref<1x1x8xf32, #tpu.memory_space<vmem>>, vector<1x1x8xf32>
      %100 = vector.shape_cast %99 : vector<1x1x8xf32> to vector<1x8xf32>
      %101 = vector.shape_cast %98 : vector<1x8xf32> to vector<1x1x8xf32>
      tpu.vector_store %arg9[%c0_66, %c0_67, %c0_68], %101 {strides = array<i32>} : memref<1x1x8xf32, #tpu.memory_space<vmem>>, vector<1x1x8xf32>,
      %cst_69 = arith.constant 0.000000e+00 : f32
      %102 = vector.broadcast %cst_69 : f32 to vector<1x8xf32>
      %c0_70 = arith.constant 0 : index
      %c0_71 = arith.constant 0 : index
      %c0_72 = arith.constant 0 : index
      %103 = vector.load %arg10[%c0_70, %c0_71, %c0_72] : memref<1x1x8xf32, #tpu.memory_space<vmem>>, vector<1x1x8xf32>
      %104 = vector.shape_cast %103 : vector<1x1x8xf32> to vector<1x8xf32>
      %105 = vector.shape_cast %102 : vector<1x8xf32> to vector<1x1x8xf32>
      tpu.vector_store %arg10[%c0_70, %c0_71, %c0_72], %105 {strides = array<i32>} : memref<1x1x8xf32, #tpu.memory_space<vmem>>, vector<1x1x8xf32>,
    } else {
    }
    %cst = arith.constant 0.000000e+00 : bf16
    %3 = vector.broadcast %cst : bf16 to vector<8x4xbf16>
    %c0 = arith.constant 0 : index
    %c0_1 = arith.constant 0 : index
    %4 = vector.load %arg11[%c0, %c0_1] : memref<304x4xbf16, #tpu.memory_space<vmem>>, vector<8x4xbf16>
    tpu.vector_store %arg11[%c0, %c0_1], %3 {strides = array<i32>} : memref<304x4xbf16, #tpu.memory_space<vmem>>, vector<8x4xbf16>,
    %cst_2 = arith.constant 0.000000e+00 : bf16
    %5 = vector.broadcast %cst_2 : bf16 to vector<8x4xbf16>
    %c296 = arith.constant 296 : index
    %c0_3 = arith.constant 0 : index
    %6 = vector.load %arg11[%c296, %c0_3] : memref<304x4xbf16, #tpu.memory_space<vmem>>, vector<8x4xbf16>
    tpu.vector_store %arg11[%c296, %c0_3], %5 {strides = array<i32>} : memref<304x4xbf16, #tpu.memory_space<vmem>>, vector<8x4xbf16>,
    %c0_4 = arith.constant 0 : index
    %c0_5 = arith.constant 0 : index
    %c0_6 = arith.constant 0 : index
    %7 = vector.load %arg2[%c0_4, %c0_5, %c0_6] : memref<1x256x4xbf16, #tpu.memory_space<vmem>>, vector<1x256x4xbf16>
    %8 = vector.shape_cast %7 : vector<1x256x4xbf16> to vector<256x4xbf16>
    %9 = arith.extf %8 : vector<256x4xbf16> to vector<256x4xf32>
    %10 = arith.truncf %9 : vector<256x4xf32> to vector<256x4xbf16>
    %c24 = arith.constant 24 : index
    %c0_7 = arith.constant 0 : index
    %11 = vector.load %arg11[%c24, %c0_7] : memref<304x4xbf16, #tpu.memory_space<vmem>>, vector<256x4xbf16>
    tpu.vector_store %arg11[%c24, %c0_7], %10 {strides = array<i32>} : memref<304x4xbf16, #tpu.memory_space<vmem>>, vector<256x4xbf16>,
    %c0_i32_8 = arith.constant 0 : i32
    %12 = arith.cmpi sgt, %arg1, %c0_i32_8 : i32
    %13 = arith.extui %12 : i1 to i32
    %c0_i32_9 = arith.constant 0 : i32
    %14 = arith.cmpi ne, %13, %c0_i32_9 : i32
    scf.if %14 {
      %c0_65 = arith.constant 0 : index
      %c0_66 = arith.constant 0 : index
      %c0_67 = arith.constant 0 : index
      %98 = vector.load %arg3[%c0_65, %c0_66, %c0_67] : memref<1x16x4xbf16, #tpu.memory_space<vmem>>, vector<1x16x4xbf16>
      %99 = vector.shape_cast %98 : vector<1x16x4xbf16> to vector<16x4xbf16>
      %100 = arith.extf %99 : vector<16x4xbf16> to vector<16x4xf32>
      %101 = arith.truncf %100 : vector<16x4xf32> to vector<16x4xbf16>
      %c8_68 = arith.constant 8 : index
      %c0_69 = arith.constant 0 : index
      %102 = vector.load %arg11[%c8_68, %c0_69] : memref<304x4xbf16, #tpu.memory_space<vmem>>, vector<16x4xbf16>
      tpu.vector_store %arg11[%c8_68, %c0_69], %101 {strides = array<i32>} : memref<304x4xbf16, #tpu.memory_space<vmem>>, vector<16x4xbf16>,
    } else {
    }
    %c0_i32_10 = arith.constant 0 : i32
    %15 = arith.cmpi eq, %arg1, %c0_i32_10 : i32
    %16 = arith.extui %15 : i1 to i32
    %c0_i32_11 = arith.constant 0 : i32
    %17 = arith.cmpi ne, %16, %c0_i32_11 : i32
    scf.if %17 {
      %cst_65 = arith.constant 0.000000e+00 : bf16
      %98 = vector.broadcast %cst_65 : bf16 to vector<16x4xbf16>
      %c8_66 = arith.constant 8 : index
      %c0_67 = arith.constant 0 : index
      %99 = vector.load %arg11[%c8_66, %c0_67] : memref<304x4xbf16, #tpu.memory_space<vmem>>, vector<16x4xbf16>
      tpu.vector_store %arg11[%c8_66, %c0_67], %98 {strides = array<i32>} : memref<304x4xbf16, #tpu.memory_space<vmem>>, vector<16x4xbf16>,
    } else {
    }
    %c0_i32_12 = arith.constant 0 : i32
    %18 = arith.cmpi slt, %arg1, %c0_i32_12 : i32
    %19 = arith.extui %18 : i1 to i32
    %c0_i32_13 = arith.constant 0 : i32
    %20 = arith.cmpi ne, %19, %c0_i32_13 : i32
    scf.if %20 {
      %c0_65 = arith.constant 0 : index
      %c0_66 = arith.constant 0 : index
      %c0_67 = arith.constant 0 : index
      %98 = vector.load %arg4[%c0_65, %c0_66, %c0_67] : memref<1x16x4xbf16, #tpu.memory_space<vmem>>, vector<1x16x4xbf16>
      %99 = vector.shape_cast %98 : vector<1x16x4xbf16> to vector<16x4xbf16>
      %100 = arith.extf %99 : vector<16x4xbf16> to vector<16x4xf32>
      %101 = arith.truncf %100 : vector<16x4xf32> to vector<16x4xbf16>
      %c280 = arith.constant 280 : index
      %c0_68 = arith.constant 0 : index
      %102 = vector.load %arg11[%c280, %c0_68] : memref<304x4xbf16, #tpu.memory_space<vmem>>, vector<16x4xbf16>
      tpu.vector_store %arg11[%c280, %c0_68], %101 {strides = array<i32>} : memref<304x4xbf16, #tpu.memory_space<vmem>>, vector<16x4xbf16>,
    } else {
    }
    %c0_i32_14 = arith.constant 0 : i32
    %21 = arith.cmpi eq, %arg1, %c0_i32_14 : i32
    %22 = arith.extui %21 : i1 to i32
    %c0_i32_15 = arith.constant 0 : i32
    %23 = arith.cmpi ne, %22, %c0_i32_15 : i32
    scf.if %23 {
      %cst_65 = arith.constant 0.000000e+00 : bf16
      %98 = vector.broadcast %cst_65 : bf16 to vector<16x4xbf16>
      %c280 = arith.constant 280 : index
      %c0_66 = arith.constant 0 : index
      %99 = vector.load %arg11[%c280, %c0_66] : memref<304x4xbf16, #tpu.memory_space<vmem>>, vector<16x4xbf16>
      tpu.vector_store %arg11[%c280, %c0_66], %98 {strides = array<i32>} : memref<304x4xbf16, #tpu.memory_space<vmem>>, vector<16x4xbf16>,
    } else {
    }
    %24 = tpu.iota {dimensions = array<i32: 0>} : vector<288x1xi32>
    %c16_i32 = arith.constant 16 : i32
    %c0_i32_16 = arith.constant 0 : i32
    %25 = arith.cmpi eq, %c16_i32, %c0_i32_16 : i32
    %c1_i32 = arith.constant 1 : i32
    %26 = arith.select %25, %c1_i32, %c16_i32 : i32
    %27 = vector.broadcast %26 : i32 to vector<288x1xi32>
    %28 = arith.remsi %24, %27 : vector<288x1xi32>
    %c0_i32_17 = arith.constant 0 : i32
    %29 = vector.broadcast %c0_i32_17 : i32 to vector<288x1xi32>
    %30 = arith.cmpi ne, %28, %29 : vector<288x1xi32>
    %c0_i32_18 = arith.constant 0 : i32
    %31 = vector.broadcast %c0_i32_18 : i32 to vector<288x1xi32>
    %32 = arith.cmpi slt, %28, %31 : vector<288x1xi32>
    %c0_i32_19 = arith.constant 0 : i32
    %33 = arith.cmpi slt, %26, %c0_i32_19 : i32
    %34 = vector.broadcast %33 : i1 to vector<288x1xi1>
    %35 = vector.broadcast %34 : vector<288x1xi1> to vector<288x1xi1>
    %36 = arith.xori %32, %35 : vector<288x1xi1>
    %37 = arith.andi %36, %30 : vector<288x1xi1>
    %38 = vector.broadcast %26 : i32 to vector<288x1xi32>
    %39 = arith.addi %28, %38 : vector<288x1xi32>
    %40 = arith.select %37, %39, %28 : vector<288x1xi1>, vector<288x1xi32>
    %c8 = arith.constant 8 : index
    %c0_20 = arith.constant 0 : index
    %41 = vector.load %arg11[%c8, %c0_20] : memref<304x4xbf16, #tpu.memory_space<vmem>>, vector<288x4xbf16>
    %c0_i32_21 = arith.constant 0 : i32
    %42 = vector.broadcast %c0_i32_21 : i32 to vector<288x1xi32>
    %43 = arith.cmpi eq, %40, %42 : vector<288x1xi32>
    %c7 = arith.constant 7 : index
    %c0_22 = arith.constant 0 : index
    %44 = vector.load %arg11[%c7, %c0_22] : memref<304x4xbf16, #tpu.memory_space<vmem>>, vector<288x4xbf16>
    %cst_23 = arith.constant 0.000000e+00 : bf16
    %45 = vector.shape_cast %43 : vector<288x1xi1> to vector<288x1xi1>
    %46 = vector.broadcast %45 : vector<288x1xi1> to vector<288x4xi1>
    %47 = vector.broadcast %cst_23 : bf16 to vector<288x4xbf16>
    %48 = arith.select %46, %47, %44 : vector<288x4xi1>, vector<288x4xbf16>
    %c15_i32 = arith.constant 15 : i32
    %49 = vector.broadcast %c15_i32 : i32 to vector<288x1xi32>
    %50 = arith.cmpi eq, %40, %49 : vector<288x1xi32>
    %c9 = arith.constant 9 : index
    %c0_24 = arith.constant 0 : index
    %51 = vector.load %arg11[%c9, %c0_24] : memref<304x4xbf16, #tpu.memory_space<vmem>>, vector<288x4xbf16>
    %cst_25 = arith.constant 0.000000e+00 : bf16
    %52 = vector.shape_cast %50 : vector<288x1xi1> to vector<288x1xi1>
    %53 = vector.broadcast %52 : vector<288x1xi1> to vector<288x4xi1>
    %54 = vector.broadcast %cst_25 : bf16 to vector<288x4xbf16>
    %55 = arith.select %53, %54, %51 : vector<288x4xi1>, vector<288x4xbf16>
    %56 = tpu.concatenate %48, %41, %55 in 1 : vector<288x4xbf16>, vector<288x4xbf16>, vector<288x4xbf16> -> vector<288x12xbf16>
    %57 = vector.extract_strided_slice %56 {offsets = [0, 0], sizes = [256, 12], strides = [1, 1]} : vector<288x12xbf16> to vector<256x12xbf16>
    %c0_26 = arith.constant 0 : index
    %c0_27 = arith.constant 0 : index
    %c0_28 = arith.constant 0 : index
    %58 = vector.load %arg5[%c0_26, %c0_27, %c0_28] : memref<3x12x8xbf16, #tpu.memory_space<vmem>>, vector<1x12x8xbf16>
    %59 = vector.shape_cast %58 : vector<1x12x8xbf16> to vector<12x8xbf16>
    %cst_29 = arith.constant dense<0.000000e+00> : vector<256x8xf32>
    %60 = tpu.matmul %57, %59, %cst_29 {dimension_numbers = #tpu.dot_dimension_numbers<[1], [0], [0], [1], [0, 0, 1, 1], [], []>} : vector<256x12xbf16>, vector<12x8xbf16>, vector<256x8xf32> -> vector<256x8xf32>
    %c0_30 = arith.constant 0 : index
    %c0_31 = arith.constant 0 : index
    %61 = vector.load %arg12[%c0_30, %c0_31] : memref<256x8xf32, #tpu.memory_space<vmem>>, vector<256x8xf32>
    tpu.vector_store %arg12[%c0_30, %c0_31], %60 {strides = array<i32>} : memref<256x8xf32, #tpu.memory_space<vmem>>, vector<256x8xf32>,
    %62 = vector.extract_strided_slice %56 {offsets = [16, 0], sizes = [256, 12], strides = [1, 1]} : vector<288x12xbf16> to vector<256x12xbf16>
    %c1 = arith.constant 1 : index
    %c0_32 = arith.constant 0 : index
    %c0_33 = arith.constant 0 : index
    %63 = vector.load %arg5[%c1, %c0_32, %c0_33] : memref<3x12x8xbf16, #tpu.memory_space<vmem>>, vector<1x12x8xbf16>
    %64 = vector.shape_cast %63 : vector<1x12x8xbf16> to vector<12x8xbf16>
    %cst_34 = arith.constant dense<0.000000e+00> : vector<256x8xf32>
    %65 = tpu.matmul %62, %64, %cst_34 {dimension_numbers = #tpu.dot_dimension_numbers<[1], [0], [0], [1], [0, 0, 1, 1], [], []>} : vector<256x12xbf16>, vector<12x8xbf16>, vector<256x8xf32> -> vector<256x8xf32>
    %c0_35 = arith.constant 0 : index
    %c0_36 = arith.constant 0 : index
    %66 = vector.load %arg12[%c0_35, %c0_36] : memref<256x8xf32, #tpu.memory_space<vmem>>, vector<256x8xf32>
    %67 = arith.addf %66, %65 : vector<256x8xf32>
    %c0_37 = arith.constant 0 : index
    %c0_38 = arith.constant 0 : index
    %68 = vector.load %arg12[%c0_37, %c0_38] : memref<256x8xf32, #tpu.memory_space<vmem>>, vector<256x8xf32>
    tpu.vector_store %arg12[%c0_37, %c0_38], %67 {strides = array<i32>} : memref<256x8xf32, #tpu.memory_space<vmem>>, vector<256x8xf32>,
    %69 = vector.extract_strided_slice %56 {offsets = [32, 0], sizes = [256, 12], strides = [1, 1]} : vector<288x12xbf16> to vector<256x12xbf16>
    %c2 = arith.constant 2 : index
    %c0_39 = arith.constant 0 : index
    %c0_40 = arith.constant 0 : index
    %70 = vector.load %arg5[%c2, %c0_39, %c0_40] : memref<3x12x8xbf16, #tpu.memory_space<vmem>>, vector<1x12x8xbf16>
    %71 = vector.shape_cast %70 : vector<1x12x8xbf16> to vector<12x8xbf16>
    %cst_41 = arith.constant dense<0.000000e+00> : vector<256x8xf32>
    %72 = tpu.matmul %69, %71, %cst_41 {dimension_numbers = #tpu.dot_dimension_numbers<[1], [0], [0], [1], [0, 0, 1, 1], [], []>} : vector<256x12xbf16>, vector<12x8xbf16>, vector<256x8xf32> -> vector<256x8xf32>
    %c0_42 = arith.constant 0 : index
    %c0_43 = arith.constant 0 : index
    %73 = vector.load %arg12[%c0_42, %c0_43] : memref<256x8xf32, #tpu.memory_space<vmem>>, vector<256x8xf32>
    %74 = arith.addf %73, %72 : vector<256x8xf32>
    %c0_44 = arith.constant 0 : index
    %c0_45 = arith.constant 0 : index
    %75 = vector.load %arg12[%c0_44, %c0_45] : memref<256x8xf32, #tpu.memory_space<vmem>>, vector<256x8xf32>
    tpu.vector_store %arg12[%c0_44, %c0_45], %74 {strides = array<i32>} : memref<256x8xf32, #tpu.memory_space<vmem>>, vector<256x8xf32>,
    %c0_46 = arith.constant 0 : index
    %c0_47 = arith.constant 0 : index
    %76 = vector.load %arg12[%c0_46, %c0_47] : memref<256x8xf32, #tpu.memory_space<vmem>>, vector<256x8xf32>
    %77 = arith.truncf %76 : vector<256x8xf32> to vector<256x8xbf16>
    %c0_48 = arith.constant 0 : index
    %c0_49 = arith.constant 0 : index
    %c0_50 = arith.constant 0 : index
    %78 = vector.load %arg8[%c0_48, %c0_49, %c0_50] : memref<1x256x8xbf16, #tpu.memory_space<vmem>>, vector<1x256x8xbf16>
    %79 = vector.shape_cast %78 : vector<1x256x8xbf16> to vector<256x8xbf16>
    %80 = vector.shape_cast %77 : vector<256x8xbf16> to vector<1x256x8xbf16>
    tpu.vector_store %arg8[%c0_48, %c0_49, %c0_50], %80 {strides = array<i32>} : memref<1x256x8xbf16, #tpu.memory_space<vmem>>, vector<1x256x8xbf16>,
    %c0_51 = arith.constant 0 : index
    %c0_52 = arith.constant 0 : index
    %c0_53 = arith.constant 0 : index
    %81 = vector.load %arg9[%c0_51, %c0_52, %c0_53] : memref<1x1x8xf32, #tpu.memory_space<vmem>>, vector<1x1x8xf32>
    %82 = vector.shape_cast %81 : vector<1x1x8xf32> to vector<1x8xf32>
    %cst_54 = arith.constant dense<0.000000e+00> : vector<8xf32>
    %83 = vector.multi_reduction <add>, %76, %cst_54 [0] : vector<256x8xf32> to vector<8xf32>
    %84 = vector.shape_cast %83 : vector<8xf32> to vector<1x8xf32>
    %85 = arith.addf %82, %84 : vector<1x8xf32>
    %c0_55 = arith.constant 0 : index
    %c0_56 = arith.constant 0 : index
    %c0_57 = arith.constant 0 : index
    %86 = vector.load %arg9[%c0_55, %c0_56, %c0_57] : memref<1x1x8xf32, #tpu.memory_space<vmem>>, vector<1x1x8xf32>
    %87 = vector.shape_cast %86 : vector<1x1x8xf32> to vector<1x8xf32>
    %88 = vector.shape_cast %85 : vector<1x8xf32> to vector<1x1x8xf32>
    tpu.vector_store %arg9[%c0_55, %c0_56, %c0_57], %88 {strides = array<i32>} : memref<1x1x8xf32, #tpu.memory_space<vmem>>, vector<1x1x8xf32>,
    %c0_58 = arith.constant 0 : index
    %c0_59 = arith.constant 0 : index
    %c0_60 = arith.constant 0 : index
    %89 = vector.load %arg10[%c0_58, %c0_59, %c0_60] : memref<1x1x8xf32, #tpu.memory_space<vmem>>, vector<1x1x8xf32>
    %90 = vector.shape_cast %89 : vector<1x1x8xf32> to vector<1x8xf32>
    %91 = arith.mulf %76, %76 : vector<256x8xf32>
    %cst_61 = arith.constant dense<0.000000e+00> : vector<8xf32>
    %92 = vector.multi_reduction <add>, %91, %cst_61 [0] : vector<256x8xf32> to vector<8xf32>
    %93 = vector.shape_cast %92 : vector<8xf32> to vector<1x8xf32>
    %94 = arith.addf %90, %93 : vector<1x8xf32>
    %c0_62 = arith.constant 0 : index
    %c0_63 = arith.constant 0 : index
    %c0_64 = arith.constant 0 : index
    %95 = vector.load %arg10[%c0_62, %c0_63, %c0_64] : memref<1x1x8xf32, #tpu.memory_space<vmem>>, vector<1x1x8xf32>
    %96 = vector.shape_cast %95 : vector<1x1x8xf32> to vector<1x8xf32>
    %97 = vector.shape_cast %94 : vector<1x8xf32> to vector<1x1x8xf32>
    tpu.vector_store %arg10[%c0_62, %c0_63, %c0_64], %97 {strides = array<i32>} : memref<1x1x8xf32, #tpu.memory_space<vmem>>, vector<1x1x8xf32>,
    return
  }
  func.func @transform_0(%arg0: i32, %arg1: i32) -> (i32, i32, i32) {
    %c0_i32 = arith.constant 0 : i32
    %c0_i32_0 = arith.constant 0 : i32
    return %arg0, %arg1, %c0_i32 : i32, i32, i32
  }
  func.func @transform_1(%arg0: i32, %arg1: i32) -> (i32, i32, i32) {
    %c16_i32 = arith.constant 16 : i32
    %0 = arith.muli %arg1, %c16_i32 : i32
    %c1_i32 = arith.constant 1 : i32
    %1 = arith.subi %0, %c1_i32 : i32
    %c0_i32 = arith.constant 0 : i32
    %2 = arith.maxsi %1, %c0_i32 : i32
    %c0_i32_0 = arith.constant 0 : i32
    %c0_i32_1 = arith.constant 0 : i32
    return %arg0, %2, %c0_i32_0 : i32, i32, i32
  }
  func.func @transform_2(%arg0: i32, %arg1: i32) -> (i32, i32, i32) {
    %c16_i32 = arith.constant 16 : i32
    %0 = arith.muli %arg1, %c16_i32 : i32
    %c16_i32_0 = arith.constant 16 : i32
    %1 = arith.addi %0, %c16_i32_0 : i32
    %c15_i32 = arith.constant 15 : i32
    %2 = arith.minsi %1, %c15_i32 : i32
    %c0_i32 = arith.constant 0 : i32
    %c0_i32_1 = arith.constant 0 : i32
    return %arg0, %2, %c0_i32 : i32, i32, i32
  }
  func.func @transform_3(%arg0: i32, %arg1: i32) -> (i32, i32, i32) {
    %c0_i32 = arith.constant 0 : i32
    %c0_i32_0 = arith.constant 0 : i32
    %c0_i32_1 = arith.constant 0 : i32
    %c0_i32_2 = arith.constant 0 : i32
    return %c0_i32, %c0_i32_0, %c0_i32_1 : i32, i32, i32
  }
  func.func @transform_4(%arg0: i32, %arg1: i32) -> (i32, i32) {
    %c0_i32 = arith.constant 0 : i32
    %c0_i32_0 = arith.constant 0 : i32
    %c0_i32_1 = arith.constant 0 : i32
    return %c0_i32, %c0_i32_0 : i32, i32
  }
  func.func @transform_5(%arg0: i32, %arg1: i32) -> (i32, i32) {
    %c0_i32 = arith.constant 0 : i32
    %c0_i32_0 = arith.constant 0 : i32
    %c0_i32_1 = arith.constant 0 : i32
    return %c0_i32, %c0_i32_0 : i32, i32
  }
  func.func @transform_6(%arg0: i32, %arg1: i32) -> (i32, i32, i32) {
    %c0_i32 = arith.constant 0 : i32
    %c0_i32_0 = arith.constant 0 : i32
    return %arg0, %arg1, %c0_i32 : i32, i32, i32
  }
  func.func @transform_7(%arg0: i32, %arg1: i32) -> (i32, i32, i32) {
    %c0_i32 = arith.constant 0 : i32
    %c0_i32_0 = arith.constant 0 : i32
    %c0_i32_1 = arith.constant 0 : i32
    return %arg0, %c0_i32, %c0_i32_0 : i32, i32, i32
  }
  func.func @transform_8(%arg0: i32, %arg1: i32) -> (i32, i32, i32) {
    %c0_i32 = arith.constant 0 : i32
    %c0_i32_0 = arith.constant 0 : i32
    %c0_i32_1 = arith.constant 0 : i32
    return %arg0, %c0_i32, %c0_i32_0 : i32, i32, i32
  }
}

module attributes {stable_mosaic.version = 11 : i64} {
  func.func @_bn_relu_kernel(%arg0: i32, %arg1: memref<512x8xbf16, #tpu.memory_space<vmem>>, %arg2: memref<1x8xf32, #tpu.memory_space<vmem>>, %arg3: memref<1x8xf32, #tpu.memory_space<vmem>>, %arg4: memref<512x8xf32, #tpu.memory_space<vmem>>) attributes {dimension_semantics = [#tpu.dimension_semantics<parallel>], iteration_bounds = array<i64: 1>, scalar_prefetch = 0 : i64, scratch_operands = 0 : i64, tpu.core_type = #tpu.core_type<tc>, window_params = [{transform_indices = @transform_0, window_bounds = array<i64: 512, 8>}, {pipeline_mode = #tpu.pipeline_mode<synchronous>, transform_indices = @transform_1, window_bounds = array<i64: 1, 8>}, {pipeline_mode = #tpu.pipeline_mode<synchronous>, transform_indices = @transform_2, window_bounds = array<i64: 1, 8>}, {transform_indices = @transform_3, window_bounds = array<i64: 512, 8>}]} {
    %c0 = arith.constant 0 : index
    %c0_0 = arith.constant 0 : index
    %0 = vector.load %arg1[%c0, %c0_0] : memref<512x8xbf16, #tpu.memory_space<vmem>>, vector<512x8xbf16>
    %1 = arith.extf %0 : vector<512x8xbf16> to vector<512x8xf32>
    %c0_1 = arith.constant 0 : index
    %c0_2 = arith.constant 0 : index
    %2 = vector.load %arg2[%c0_1, %c0_2] : memref<1x8xf32, #tpu.memory_space<vmem>>, vector<1x8xf32>
    %3 = vector.broadcast %2 : vector<1x8xf32> to vector<512x8xf32>
    %4 = arith.mulf %1, %3 : vector<512x8xf32>
    %c0_3 = arith.constant 0 : index
    %c0_4 = arith.constant 0 : index
    %5 = vector.load %arg3[%c0_3, %c0_4] : memref<1x8xf32, #tpu.memory_space<vmem>>, vector<1x8xf32>
    %6 = vector.broadcast %5 : vector<1x8xf32> to vector<512x8xf32>
    %7 = arith.addf %4, %6 : vector<512x8xf32>
    %cst = arith.constant 0.000000e+00 : f32
    %8 = vector.broadcast %cst : f32 to vector<512x8xf32>
    %9 = arith.maximumf %7, %8 : vector<512x8xf32>
    %c0_5 = arith.constant 0 : index
    %c0_6 = arith.constant 0 : index
    %10 = vector.load %arg4[%c0_5, %c0_6] : memref<512x8xf32, #tpu.memory_space<vmem>>, vector<512x8xf32>
    tpu.vector_store %arg4[%c0_5, %c0_6], %9 {strides = array<i32>} : memref<512x8xf32, #tpu.memory_space<vmem>>, vector<512x8xf32>,
    return
  }
  func.func @transform_0(%arg0: i32) -> (i32, i32) {
    %c0_i32 = arith.constant 0 : i32
    %c0_i32_0 = arith.constant 0 : i32
    return %arg0, %c0_i32 : i32, i32
  }
  func.func @transform_1(%arg0: i32) -> (i32, i32) {
    %c0_i32 = arith.constant 0 : i32
    %c0_i32_0 = arith.constant 0 : i32
    %c0_i32_1 = arith.constant 0 : i32
    return %c0_i32, %c0_i32_0 : i32, i32
  }
  func.func @transform_2(%arg0: i32) -> (i32, i32) {
    %c0_i32 = arith.constant 0 : i32
    %c0_i32_0 = arith.constant 0 : i32
    %c0_i32_1 = arith.constant 0 : i32
    return %c0_i32, %c0_i32_0 : i32, i32
  }
  func.func @transform_3(%arg0: i32) -> (i32, i32) {
    %c0_i32 = arith.constant 0 : i32
    %c0_i32_0 = arith.constant 0 : i32
    return %arg0, %c0_i32 : i32, i32
  }
}

module attributes {stable_mosaic.version = 11 : i64} {
  func.func @_conv_bn_stats_kernel(%arg0: i32, %arg1: i32, %arg2: memref<1x256x8xbf16, #tpu.memory_space<vmem>>, %arg3: memref<1x16x8xbf16, #tpu.memory_space<vmem>>, %arg4: memref<1x16x8xbf16, #tpu.memory_space<vmem>>, %arg5: memref<3x24x8xbf16, #tpu.memory_space<vmem>>, %arg6: memref<1x8xf32, #tpu.memory_space<vmem>>, %arg7: memref<1x8xf32, #tpu.memory_space<vmem>>, %arg8: memref<1x256x8xbf16, #tpu.memory_space<vmem>>, %arg9: memref<1x1x8xf32, #tpu.memory_space<vmem>>, %arg10: memref<1x1x8xf32, #tpu.memory_space<vmem>>, %arg11: memref<304x8xbf16, #tpu.memory_space<vmem>>, %arg12: memref<256x8xf32, #tpu.memory_space<vmem>>) attributes {dimension_semantics = [#tpu.dimension_semantics<parallel>, #tpu.dimension_semantics<arbitrary>], iteration_bounds = array<i64: 2, 1>, scalar_prefetch = 0 : i64, scratch_operands = 2 : i64, tpu.core_type = #tpu.core_type<tc>, window_params = [{transform_indices = @transform_0, window_bounds = array<i64: 1, 256, 8>}, {transform_indices = @transform_1, window_bounds = array<i64: 1, 16, 8>}, {transform_indices = @transform_2, window_bounds = array<i64: 1, 16, 8>}, {pipeline_mode = #tpu.pipeline_mode<synchronous>, transform_indices = @transform_3, window_bounds = array<i64: 3, 24, 8>}, {pipeline_mode = #tpu.pipeline_mode<synchronous>, transform_indices = @transform_4, window_bounds = array<i64: 1, 8>}, {pipeline_mode = #tpu.pipeline_mode<synchronous>, transform_indices = @transform_5, window_bounds = array<i64: 1, 8>}, {transform_indices = @transform_6, window_bounds = array<i64: 1, 256, 8>}, {transform_indices = @transform_7, window_bounds = array<i64: 1, 1, 8>}, {transform_indices = @transform_8, window_bounds = array<i64: 1, 1, 8>}]} {
    %c0_i32 = arith.constant 0 : i32
    %0 = arith.cmpi eq, %arg1, %c0_i32 : i32
    %1 = arith.extui %0 : i1 to i32
    %c0_i32_0 = arith.constant 0 : i32
    %2 = arith.cmpi ne, %1, %c0_i32_0 : i32
    scf.if %2 {
      %cst_70 = arith.constant 0.000000e+00 : f32
      %106 = vector.broadcast %cst_70 : f32 to vector<1x8xf32>
      %c0_71 = arith.constant 0 : index
      %c0_72 = arith.constant 0 : index
      %c0_73 = arith.constant 0 : index
      %107 = vector.load %arg9[%c0_71, %c0_72, %c0_73] : memref<1x1x8xf32, #tpu.memory_space<vmem>>, vector<1x1x8xf32>
      %108 = vector.shape_cast %107 : vector<1x1x8xf32> to vector<1x8xf32>
      %109 = vector.shape_cast %106 : vector<1x8xf32> to vector<1x1x8xf32>
      tpu.vector_store %arg9[%c0_71, %c0_72, %c0_73], %109 {strides = array<i32>} : memref<1x1x8xf32, #tpu.memory_space<vmem>>, vector<1x1x8xf32>,
      %cst_74 = arith.constant 0.000000e+00 : f32
      %110 = vector.broadcast %cst_74 : f32 to vector<1x8xf32>
      %c0_75 = arith.constant 0 : index
      %c0_76 = arith.constant 0 : index
      %c0_77 = arith.constant 0 : index
      %111 = vector.load %arg10[%c0_75, %c0_76, %c0_77] : memref<1x1x8xf32, #tpu.memory_space<vmem>>, vector<1x1x8xf32>
      %112 = vector.shape_cast %111 : vector<1x1x8xf32> to vector<1x8xf32>
      %113 = vector.shape_cast %110 : vector<1x8xf32> to vector<1x1x8xf32>
      tpu.vector_store %arg10[%c0_75, %c0_76, %c0_77], %113 {strides = array<i32>} : memref<1x1x8xf32, #tpu.memory_space<vmem>>, vector<1x1x8xf32>,
    } else {
    }
    %cst = arith.constant 0.000000e+00 : bf16
    %3 = vector.broadcast %cst : bf16 to vector<8x8xbf16>
    %c0 = arith.constant 0 : index
    %c0_1 = arith.constant 0 : index
    %4 = vector.load %arg11[%c0, %c0_1] : memref<304x8xbf16, #tpu.memory_space<vmem>>, vector<8x8xbf16>
    tpu.vector_store %arg11[%c0, %c0_1], %3 {strides = array<i32>} : memref<304x8xbf16, #tpu.memory_space<vmem>>, vector<8x8xbf16>,
    %cst_2 = arith.constant 0.000000e+00 : bf16
    %5 = vector.broadcast %cst_2 : bf16 to vector<8x8xbf16>
    %c296 = arith.constant 296 : index
    %c0_3 = arith.constant 0 : index
    %6 = vector.load %arg11[%c296, %c0_3] : memref<304x8xbf16, #tpu.memory_space<vmem>>, vector<8x8xbf16>
    tpu.vector_store %arg11[%c296, %c0_3], %5 {strides = array<i32>} : memref<304x8xbf16, #tpu.memory_space<vmem>>, vector<8x8xbf16>,
    %c0_4 = arith.constant 0 : index
    %c0_5 = arith.constant 0 : index
    %c0_6 = arith.constant 0 : index
    %7 = vector.load %arg2[%c0_4, %c0_5, %c0_6] : memref<1x256x8xbf16, #tpu.memory_space<vmem>>, vector<1x256x8xbf16>
    %8 = vector.shape_cast %7 : vector<1x256x8xbf16> to vector<256x8xbf16>
    %9 = arith.extf %8 : vector<256x8xbf16> to vector<256x8xf32>
    %c0_7 = arith.constant 0 : index
    %c0_8 = arith.constant 0 : index
    %10 = vector.load %arg6[%c0_7, %c0_8] : memref<1x8xf32, #tpu.memory_space<vmem>>, vector<1x8xf32>
    %11 = vector.broadcast %10 : vector<1x8xf32> to vector<256x8xf32>
    %12 = arith.mulf %9, %11 : vector<256x8xf32>
    %c0_9 = arith.constant 0 : index
    %c0_10 = arith.constant 0 : index
    %13 = vector.load %arg7[%c0_9, %c0_10] : memref<1x8xf32, #tpu.memory_space<vmem>>, vector<1x8xf32>
    %14 = vector.broadcast %13 : vector<1x8xf32> to vector<256x8xf32>
    %15 = arith.addf %12, %14 : vector<256x8xf32>
    %cst_11 = arith.constant 0.000000e+00 : f32
    %16 = vector.broadcast %cst_11 : f32 to vector<256x8xf32>
    %17 = arith.maximumf %15, %16 : vector<256x8xf32>
    %18 = arith.truncf %17 : vector<256x8xf32> to vector<256x8xbf16>
    %c24 = arith.constant 24 : index
    %c0_12 = arith.constant 0 : index
    %19 = vector.load %arg11[%c24, %c0_12] : memref<304x8xbf16, #tpu.memory_space<vmem>>, vector<256x8xbf16>
    tpu.vector_store %arg11[%c24, %c0_12], %18 {strides = array<i32>} : memref<304x8xbf16, #tpu.memory_space<vmem>>, vector<256x8xbf16>,
    %c0_i32_13 = arith.constant 0 : i32
    %20 = arith.cmpi sgt, %arg1, %c0_i32_13 : i32
    %21 = arith.extui %20 : i1 to i32
    %c0_i32_14 = arith.constant 0 : i32
    %22 = arith.cmpi ne, %21, %c0_i32_14 : i32
    scf.if %22 {
      %c0_70 = arith.constant 0 : index
      %c0_71 = arith.constant 0 : index
      %c0_72 = arith.constant 0 : index
      %106 = vector.load %arg3[%c0_70, %c0_71, %c0_72] : memref<1x16x8xbf16, #tpu.memory_space<vmem>>, vector<1x16x8xbf16>
      %107 = vector.shape_cast %106 : vector<1x16x8xbf16> to vector<16x8xbf16>
      %108 = arith.extf %107 : vector<16x8xbf16> to vector<16x8xf32>
      %c0_73 = arith.constant 0 : index
      %c0_74 = arith.constant 0 : index
      %109 = vector.load %arg6[%c0_73, %c0_74] : memref<1x8xf32, #tpu.memory_space<vmem>>, vector<1x8xf32>
      %110 = vector.broadcast %109 : vector<1x8xf32> to vector<16x8xf32>
      %111 = arith.mulf %108, %110 : vector<16x8xf32>
      %c0_75 = arith.constant 0 : index
      %c0_76 = arith.constant 0 : index
      %112 = vector.load %arg7[%c0_75, %c0_76] : memref<1x8xf32, #tpu.memory_space<vmem>>, vector<1x8xf32>
      %113 = vector.broadcast %112 : vector<1x8xf32> to vector<16x8xf32>
      %114 = arith.addf %111, %113 : vector<16x8xf32>
      %cst_77 = arith.constant 0.000000e+00 : f32
      %115 = vector.broadcast %cst_77 : f32 to vector<16x8xf32>
      %116 = arith.maximumf %114, %115 : vector<16x8xf32>
      %117 = arith.truncf %116 : vector<16x8xf32> to vector<16x8xbf16>
      %c8_78 = arith.constant 8 : index
      %c0_79 = arith.constant 0 : index
      %118 = vector.load %arg11[%c8_78, %c0_79] : memref<304x8xbf16, #tpu.memory_space<vmem>>, vector<16x8xbf16>
      tpu.vector_store %arg11[%c8_78, %c0_79], %117 {strides = array<i32>} : memref<304x8xbf16, #tpu.memory_space<vmem>>, vector<16x8xbf16>,
    } else {
    }
    %c0_i32_15 = arith.constant 0 : i32
    %23 = arith.cmpi eq, %arg1, %c0_i32_15 : i32
    %24 = arith.extui %23 : i1 to i32
    %c0_i32_16 = arith.constant 0 : i32
    %25 = arith.cmpi ne, %24, %c0_i32_16 : i32
    scf.if %25 {
      %cst_70 = arith.constant 0.000000e+00 : bf16
      %106 = vector.broadcast %cst_70 : bf16 to vector<16x8xbf16>
      %c8_71 = arith.constant 8 : index
      %c0_72 = arith.constant 0 : index
      %107 = vector.load %arg11[%c8_71, %c0_72] : memref<304x8xbf16, #tpu.memory_space<vmem>>, vector<16x8xbf16>
      tpu.vector_store %arg11[%c8_71, %c0_72], %106 {strides = array<i32>} : memref<304x8xbf16, #tpu.memory_space<vmem>>, vector<16x8xbf16>,
    } else {
    }
    %c0_i32_17 = arith.constant 0 : i32
    %26 = arith.cmpi slt, %arg1, %c0_i32_17 : i32
    %27 = arith.extui %26 : i1 to i32
    %c0_i32_18 = arith.constant 0 : i32
    %28 = arith.cmpi ne, %27, %c0_i32_18 : i32
    scf.if %28 {
      %c0_70 = arith.constant 0 : index
      %c0_71 = arith.constant 0 : index
      %c0_72 = arith.constant 0 : index
      %106 = vector.load %arg4[%c0_70, %c0_71, %c0_72] : memref<1x16x8xbf16, #tpu.memory_space<vmem>>, vector<1x16x8xbf16>
      %107 = vector.shape_cast %106 : vector<1x16x8xbf16> to vector<16x8xbf16>
      %108 = arith.extf %107 : vector<16x8xbf16> to vector<16x8xf32>
      %c0_73 = arith.constant 0 : index
      %c0_74 = arith.constant 0 : index
      %109 = vector.load %arg6[%c0_73, %c0_74] : memref<1x8xf32, #tpu.memory_space<vmem>>, vector<1x8xf32>
      %110 = vector.broadcast %109 : vector<1x8xf32> to vector<16x8xf32>
      %111 = arith.mulf %108, %110 : vector<16x8xf32>
      %c0_75 = arith.constant 0 : index
      %c0_76 = arith.constant 0 : index
      %112 = vector.load %arg7[%c0_75, %c0_76] : memref<1x8xf32, #tpu.memory_space<vmem>>, vector<1x8xf32>
      %113 = vector.broadcast %112 : vector<1x8xf32> to vector<16x8xf32>
      %114 = arith.addf %111, %113 : vector<16x8xf32>
      %cst_77 = arith.constant 0.000000e+00 : f32
      %115 = vector.broadcast %cst_77 : f32 to vector<16x8xf32>
      %116 = arith.maximumf %114, %115 : vector<16x8xf32>
      %117 = arith.truncf %116 : vector<16x8xf32> to vector<16x8xbf16>
      %c280 = arith.constant 280 : index
      %c0_78 = arith.constant 0 : index
      %118 = vector.load %arg11[%c280, %c0_78] : memref<304x8xbf16, #tpu.memory_space<vmem>>, vector<16x8xbf16>
      tpu.vector_store %arg11[%c280, %c0_78], %117 {strides = array<i32>} : memref<304x8xbf16, #tpu.memory_space<vmem>>, vector<16x8xbf16>,
    } else {
    }
    %c0_i32_19 = arith.constant 0 : i32
    %29 = arith.cmpi eq, %arg1, %c0_i32_19 : i32
    %30 = arith.extui %29 : i1 to i32
    %c0_i32_20 = arith.constant 0 : i32
    %31 = arith.cmpi ne, %30, %c0_i32_20 : i32
    scf.if %31 {
      %cst_70 = arith.constant 0.000000e+00 : bf16
      %106 = vector.broadcast %cst_70 : bf16 to vector<16x8xbf16>
      %c280 = arith.constant 280 : index
      %c0_71 = arith.constant 0 : index
      %107 = vector.load %arg11[%c280, %c0_71] : memref<304x8xbf16, #tpu.memory_space<vmem>>, vector<16x8xbf16>
      tpu.vector_store %arg11[%c280, %c0_71], %106 {strides = array<i32>} : memref<304x8xbf16, #tpu.memory_space<vmem>>, vector<16x8xbf16>,
    } else {
    }
    %32 = tpu.iota {dimensions = array<i32: 0>} : vector<288x1xi32>
    %c16_i32 = arith.constant 16 : i32
    %c0_i32_21 = arith.constant 0 : i32
    %33 = arith.cmpi eq, %c16_i32, %c0_i32_21 : i32
    %c1_i32 = arith.constant 1 : i32
    %34 = arith.select %33, %c1_i32, %c16_i32 : i32
    %35 = vector.broadcast %34 : i32 to vector<288x1xi32>
    %36 = arith.remsi %32, %35 : vector<288x1xi32>
    %c0_i32_22 = arith.constant 0 : i32
    %37 = vector.broadcast %c0_i32_22 : i32 to vector<288x1xi32>
    %38 = arith.cmpi ne, %36, %37 : vector<288x1xi32>
    %c0_i32_23 = arith.constant 0 : i32
    %39 = vector.broadcast %c0_i32_23 : i32 to vector<288x1xi32>
    %40 = arith.cmpi slt, %36, %39 : vector<288x1xi32>
    %c0_i32_24 = arith.constant 0 : i32
    %41 = arith.cmpi slt, %34, %c0_i32_24 : i32
    %42 = vector.broadcast %41 : i1 to vector<288x1xi1>
    %43 = vector.broadcast %42 : vector<288x1xi1> to vector<288x1xi1>
    %44 = arith.xori %40, %43 : vector<288x1xi1>
    %45 = arith.andi %44, %38 : vector<288x1xi1>
    %46 = vector.broadcast %34 : i32 to vector<288x1xi32>
    %47 = arith.addi %36, %46 : vector<288x1xi32>
    %48 = arith.select %45, %47, %36 : vector<288x1xi1>, vector<288x1xi32>
    %c8 = arith.constant 8 : index
    %c0_25 = arith.constant 0 : index
    %49 = vector.load %arg11[%c8, %c0_25] : memref<304x8xbf16, #tpu.memory_space<vmem>>, vector<288x8xbf16>
    %c0_i32_26 = arith.constant 0 : i32
    %50 = vector.broadcast %c0_i32_26 : i32 to vector<288x1xi32>
    %51 = arith.cmpi eq, %48, %50 : vector<288x1xi32>
    %c7 = arith.constant 7 : index
    %c0_27 = arith.constant 0 : index
    %52 = vector.load %arg11[%c7, %c0_27] : memref<304x8xbf16, #tpu.memory_space<vmem>>, vector<288x8xbf16>
    %cst_28 = arith.constant 0.000000e+00 : bf16
    %53 = vector.shape_cast %51 : vector<288x1xi1> to vector<288x1xi1>
    %54 = vector.broadcast %53 : vector<288x1xi1> to vector<288x8xi1>
    %55 = vector.broadcast %cst_28 : bf16 to vector<288x8xbf16>
    %56 = arith.select %54, %55, %52 : vector<288x8xi1>, vector<288x8xbf16>
    %c15_i32 = arith.constant 15 : i32
    %57 = vector.broadcast %c15_i32 : i32 to vector<288x1xi32>
    %58 = arith.cmpi eq, %48, %57 : vector<288x1xi32>
    %c9 = arith.constant 9 : index
    %c0_29 = arith.constant 0 : index
    %59 = vector.load %arg11[%c9, %c0_29] : memref<304x8xbf16, #tpu.memory_space<vmem>>, vector<288x8xbf16>
    %cst_30 = arith.constant 0.000000e+00 : bf16
    %60 = vector.shape_cast %58 : vector<288x1xi1> to vector<288x1xi1>
    %61 = vector.broadcast %60 : vector<288x1xi1> to vector<288x8xi1>
    %62 = vector.broadcast %cst_30 : bf16 to vector<288x8xbf16>
    %63 = arith.select %61, %62, %59 : vector<288x8xi1>, vector<288x8xbf16>
    %64 = tpu.concatenate %56, %49, %63 in 1 : vector<288x8xbf16>, vector<288x8xbf16>, vector<288x8xbf16> -> vector<288x24xbf16>
    %65 = vector.extract_strided_slice %64 {offsets = [0, 0], sizes = [256, 24], strides = [1, 1]} : vector<288x24xbf16> to vector<256x24xbf16>
    %c0_31 = arith.constant 0 : index
    %c0_32 = arith.constant 0 : index
    %c0_33 = arith.constant 0 : index
    %66 = vector.load %arg5[%c0_31, %c0_32, %c0_33] : memref<3x24x8xbf16, #tpu.memory_space<vmem>>, vector<1x24x8xbf16>
    %67 = vector.shape_cast %66 : vector<1x24x8xbf16> to vector<24x8xbf16>
    %cst_34 = arith.constant dense<0.000000e+00> : vector<256x8xf32>
    %68 = tpu.matmul %65, %67, %cst_34 {dimension_numbers = #tpu.dot_dimension_numbers<[1], [0], [0], [1], [0, 0, 1, 1], [], []>} : vector<256x24xbf16>, vector<24x8xbf16>, vector<256x8xf32> -> vector<256x8xf32>
    %c0_35 = arith.constant 0 : index
    %c0_36 = arith.constant 0 : index
    %69 = vector.load %arg12[%c0_35, %c0_36] : memref<256x8xf32, #tpu.memory_space<vmem>>, vector<256x8xf32>
    tpu.vector_store %arg12[%c0_35, %c0_36], %68 {strides = array<i32>} : memref<256x8xf32, #tpu.memory_space<vmem>>, vector<256x8xf32>,
    %70 = vector.extract_strided_slice %64 {offsets = [16, 0], sizes = [256, 24], strides = [1, 1]} : vector<288x24xbf16> to vector<256x24xbf16>
    %c1 = arith.constant 1 : index
    %c0_37 = arith.constant 0 : index
    %c0_38 = arith.constant 0 : index
    %71 = vector.load %arg5[%c1, %c0_37, %c0_38] : memref<3x24x8xbf16, #tpu.memory_space<vmem>>, vector<1x24x8xbf16>
    %72 = vector.shape_cast %71 : vector<1x24x8xbf16> to vector<24x8xbf16>
    %cst_39 = arith.constant dense<0.000000e+00> : vector<256x8xf32>
    %73 = tpu.matmul %70, %72, %cst_39 {dimension_numbers = #tpu.dot_dimension_numbers<[1], [0], [0], [1], [0, 0, 1, 1], [], []>} : vector<256x24xbf16>, vector<24x8xbf16>, vector<256x8xf32> -> vector<256x8xf32>
    %c0_40 = arith.constant 0 : index
    %c0_41 = arith.constant 0 : index
    %74 = vector.load %arg12[%c0_40, %c0_41] : memref<256x8xf32, #tpu.memory_space<vmem>>, vector<256x8xf32>
    %75 = arith.addf %74, %73 : vector<256x8xf32>
    %c0_42 = arith.constant 0 : index
    %c0_43 = arith.constant 0 : index
    %76 = vector.load %arg12[%c0_42, %c0_43] : memref<256x8xf32, #tpu.memory_space<vmem>>, vector<256x8xf32>
    tpu.vector_store %arg12[%c0_42, %c0_43], %75 {strides = array<i32>} : memref<256x8xf32, #tpu.memory_space<vmem>>, vector<256x8xf32>,
    %77 = vector.extract_strided_slice %64 {offsets = [32, 0], sizes = [256, 24], strides = [1, 1]} : vector<288x24xbf16> to vector<256x24xbf16>
    %c2 = arith.constant 2 : index
    %c0_44 = arith.constant 0 : index
    %c0_45 = arith.constant 0 : index
    %78 = vector.load %arg5[%c2, %c0_44, %c0_45] : memref<3x24x8xbf16, #tpu.memory_space<vmem>>, vector<1x24x8xbf16>
    %79 = vector.shape_cast %78 : vector<1x24x8xbf16> to vector<24x8xbf16>
    %cst_46 = arith.constant dense<0.000000e+00> : vector<256x8xf32>
    %80 = tpu.matmul %77, %79, %cst_46 {dimension_numbers = #tpu.dot_dimension_numbers<[1], [0], [0], [1], [0, 0, 1, 1], [], []>} : vector<256x24xbf16>, vector<24x8xbf16>, vector<256x8xf32> -> vector<256x8xf32>
    %c0_47 = arith.constant 0 : index
    %c0_48 = arith.constant 0 : index
    %81 = vector.load %arg12[%c0_47, %c0_48] : memref<256x8xf32, #tpu.memory_space<vmem>>, vector<256x8xf32>
    %82 = arith.addf %81, %80 : vector<256x8xf32>
    %c0_49 = arith.constant 0 : index
    %c0_50 = arith.constant 0 : index
    %83 = vector.load %arg12[%c0_49, %c0_50] : memref<256x8xf32, #tpu.memory_space<vmem>>, vector<256x8xf32>
    tpu.vector_store %arg12[%c0_49, %c0_50], %82 {strides = array<i32>} : memref<256x8xf32, #tpu.memory_space<vmem>>, vector<256x8xf32>,
    %c0_51 = arith.constant 0 : index
    %c0_52 = arith.constant 0 : index
    %84 = vector.load %arg12[%c0_51, %c0_52] : memref<256x8xf32, #tpu.memory_space<vmem>>, vector<256x8xf32>
    %85 = arith.truncf %84 : vector<256x8xf32> to vector<256x8xbf16>
    %c0_53 = arith.constant 0 : index
    %c0_54 = arith.constant 0 : index
    %c0_55 = arith.constant 0 : index
    %86 = vector.load %arg8[%c0_53, %c0_54, %c0_55] : memref<1x256x8xbf16, #tpu.memory_space<vmem>>, vector<1x256x8xbf16>
    %87 = vector.shape_cast %86 : vector<1x256x8xbf16> to vector<256x8xbf16>
    %88 = vector.shape_cast %85 : vector<256x8xbf16> to vector<1x256x8xbf16>
    tpu.vector_store %arg8[%c0_53, %c0_54, %c0_55], %88 {strides = array<i32>} : memref<1x256x8xbf16, #tpu.memory_space<vmem>>, vector<1x256x8xbf16>,
    %c0_56 = arith.constant 0 : index
    %c0_57 = arith.constant 0 : index
    %c0_58 = arith.constant 0 : index
    %89 = vector.load %arg9[%c0_56, %c0_57, %c0_58] : memref<1x1x8xf32, #tpu.memory_space<vmem>>, vector<1x1x8xf32>
    %90 = vector.shape_cast %89 : vector<1x1x8xf32> to vector<1x8xf32>
    %cst_59 = arith.constant dense<0.000000e+00> : vector<8xf32>
    %91 = vector.multi_reduction <add>, %84, %cst_59 [0] : vector<256x8xf32> to vector<8xf32>
    %92 = vector.shape_cast %91 : vector<8xf32> to vector<1x8xf32>
    %93 = arith.addf %90, %92 : vector<1x8xf32>
    %c0_60 = arith.constant 0 : index
    %c0_61 = arith.constant 0 : index
    %c0_62 = arith.constant 0 : index
    %94 = vector.load %arg9[%c0_60, %c0_61, %c0_62] : memref<1x1x8xf32, #tpu.memory_space<vmem>>, vector<1x1x8xf32>
    %95 = vector.shape_cast %94 : vector<1x1x8xf32> to vector<1x8xf32>
    %96 = vector.shape_cast %93 : vector<1x8xf32> to vector<1x1x8xf32>
    tpu.vector_store %arg9[%c0_60, %c0_61, %c0_62], %96 {strides = array<i32>} : memref<1x1x8xf32, #tpu.memory_space<vmem>>, vector<1x1x8xf32>,
    %c0_63 = arith.constant 0 : index
    %c0_64 = arith.constant 0 : index
    %c0_65 = arith.constant 0 : index
    %97 = vector.load %arg10[%c0_63, %c0_64, %c0_65] : memref<1x1x8xf32, #tpu.memory_space<vmem>>, vector<1x1x8xf32>
    %98 = vector.shape_cast %97 : vector<1x1x8xf32> to vector<1x8xf32>
    %99 = arith.mulf %84, %84 : vector<256x8xf32>
    %cst_66 = arith.constant dense<0.000000e+00> : vector<8xf32>
    %100 = vector.multi_reduction <add>, %99, %cst_66 [0] : vector<256x8xf32> to vector<8xf32>
    %101 = vector.shape_cast %100 : vector<8xf32> to vector<1x8xf32>
    %102 = arith.addf %98, %101 : vector<1x8xf32>
    %c0_67 = arith.constant 0 : index
    %c0_68 = arith.constant 0 : index
    %c0_69 = arith.constant 0 : index
    %103 = vector.load %arg10[%c0_67, %c0_68, %c0_69] : memref<1x1x8xf32, #tpu.memory_space<vmem>>, vector<1x1x8xf32>
    %104 = vector.shape_cast %103 : vector<1x1x8xf32> to vector<1x8xf32>
    %105 = vector.shape_cast %102 : vector<1x8xf32> to vector<1x1x8xf32>
    tpu.vector_store %arg10[%c0_67, %c0_68, %c0_69], %105 {strides = array<i32>} : memref<1x1x8xf32, #tpu.memory_space<vmem>>, vector<1x1x8xf32>,
    return
  }
  func.func @transform_0(%arg0: i32, %arg1: i32) -> (i32, i32, i32) {
    %c0_i32 = arith.constant 0 : i32
    %c0_i32_0 = arith.constant 0 : i32
    return %arg0, %arg1, %c0_i32 : i32, i32, i32
  }
  func.func @transform_1(%arg0: i32, %arg1: i32) -> (i32, i32, i32) {
    %c16_i32 = arith.constant 16 : i32
    %0 = arith.muli %arg1, %c16_i32 : i32
    %c1_i32 = arith.constant 1 : i32
    %1 = arith.subi %0, %c1_i32 : i32
    %c0_i32 = arith.constant 0 : i32
    %2 = arith.maxsi %1, %c0_i32 : i32
    %c0_i32_0 = arith.constant 0 : i32
    %c0_i32_1 = arith.constant 0 : i32
    return %arg0, %2, %c0_i32_0 : i32, i32, i32
  }
  func.func @transform_2(%arg0: i32, %arg1: i32) -> (i32, i32, i32) {
    %c16_i32 = arith.constant 16 : i32
    %0 = arith.muli %arg1, %c16_i32 : i32
    %c16_i32_0 = arith.constant 16 : i32
    %1 = arith.addi %0, %c16_i32_0 : i32
    %c15_i32 = arith.constant 15 : i32
    %2 = arith.minsi %1, %c15_i32 : i32
    %c0_i32 = arith.constant 0 : i32
    %c0_i32_1 = arith.constant 0 : i32
    return %arg0, %2, %c0_i32 : i32, i32, i32
  }
  func.func @transform_3(%arg0: i32, %arg1: i32) -> (i32, i32, i32) {
    %c0_i32 = arith.constant 0 : i32
    %c0_i32_0 = arith.constant 0 : i32
    %c0_i32_1 = arith.constant 0 : i32
    %c0_i32_2 = arith.constant 0 : i32
    return %c0_i32, %c0_i32_0, %c0_i32_1 : i32, i32, i32
  }
  func.func @transform_4(%arg0: i32, %arg1: i32) -> (i32, i32) {
    %c0_i32 = arith.constant 0 : i32
    %c0_i32_0 = arith.constant 0 : i32
    %c0_i32_1 = arith.constant 0 : i32
    return %c0_i32, %c0_i32_0 : i32, i32
  }
  func.func @transform_5(%arg0: i32, %arg1: i32) -> (i32, i32) {
    %c0_i32 = arith.constant 0 : i32
    %c0_i32_0 = arith.constant 0 : i32
    %c0_i32_1 = arith.constant 0 : i32
    return %c0_i32, %c0_i32_0 : i32, i32
  }
  func.func @transform_6(%arg0: i32, %arg1: i32) -> (i32, i32, i32) {
    %c0_i32 = arith.constant 0 : i32
    %c0_i32_0 = arith.constant 0 : i32
    return %arg0, %arg1, %c0_i32 : i32, i32, i32
  }
  func.func @transform_7(%arg0: i32, %arg1: i32) -> (i32, i32, i32) {
    %c0_i32 = arith.constant 0 : i32
    %c0_i32_0 = arith.constant 0 : i32
    %c0_i32_1 = arith.constant 0 : i32
    return %arg0, %c0_i32, %c0_i32_0 : i32, i32, i32
  }
  func.func @transform_8(%arg0: i32, %arg1: i32) -> (i32, i32, i32) {
    %c0_i32 = arith.constant 0 : i32
    %c0_i32_0 = arith.constant 0 : i32
    %c0_i32_1 = arith.constant 0 : i32
    return %arg0, %c0_i32, %c0_i32_0 : i32, i32, i32
  }
}

</mosaic_0001>

<bundles_post_ra>
// kernel: double_conv.5
= control target key start
LH: loop header
LB: loop body
LE: loop exit
PB: predicated region body
PF: predicated region fallthrough
CT: control target
= control target key end

     0   :  { %vm348_vm0 = vcmask 64512   ;;  %s1088_s0 = inlined_call_operand.vmem [shape: bf16[512,8], index: 0, kind: input, shape index: {}]   ;;  %s1089_s1 = inlined_call_operand.vmem [shape: f32[1,8], index: 1, kind: input, shape index: {}]   ;;  %s1090_s2 = inlined_call_operand.vmem [shape: f32[1,8], index: 2, kind: input, shape index: {}]   ;;  %s1091_s3 = inlined_call_operand.vmem [shape: f32[512,8], index: 3, kind: output, shape index: {}]  }
   0x1   :  { %v420_v0 = vld [vmem:[%s1088_s0] sm:$0xff]   ;;  %v547_v4 = vld [vmem:[%s1088_s0 + $0x8] sm:$0xff]   ;;  %v548_v5 = vld [vmem:[%s1088_s0 + $0x10] sm:$0xff]  }
   0x2   :  { %v604_v1 = vld [vmem:[%s1089_s1] ss:$0 sm:$0xff]  ;;  %v421_v2 = vunpack.c.l.bf16 %v420_v0  ;;  %v422_v3 = vunpack.c.h.bf16 %v420_v0  ;;  %v549_v6 = vld [vmem:[%s1088_s0 + $0x18] sm:$0xff]   ;;  %v425_v8 = vunpack.c.l.bf16 %v547_v4  ;;  %v426_v9 = vunpack.c.h.bf16 %v547_v4  ;;  %v551_v33 = vld [vmem:[%s1088_s0 + $0x28] sm:$0xff]  }
   0x3   :  { %v618_v7 = vld [vmem:[%s1090_s2] ss:$0 sm:$0xff]  ;;  %v429_v10 = vunpack.c.l.bf16 %v548_v5  ;;  %v430_v11 = vunpack.c.h.bf16 %v548_v5  ;;  %v433_v14 = vunpack.c.l.bf16 %v549_v6  ;;  %v434_v15 = vunpack.c.h.bf16 %v549_v6  ;;  %v552_v34 = vld [vmem:[%s1088_s0 + $0x30] sm:$0xff]   ;;  %v553_v39 = vld [vmem:[%s1088_s0 + $0x38] sm:$0xff]  }
   0x4   :  { %v149_v12 = vmul.f32 %v421_v2, %v604_v1  ;;  %v150_v13 = vmul.f32 %v422_v3, %v604_v1  ;;  %v151_v16 = vmul.f32 %v425_v8, %v604_v1  ;;  %v152_v17 = vmul.f32 %v426_v9, %v604_v1  ;;  %v550_v28 = vld [vmem:[%s1088_s0 + $0x20] sm:$0xff]   ;;  %v555_v6 = vld [vmem:[%s1088_s0 + $0x48] sm:$0xff]   ;;  %v556_v8 = vld [vmem:[%s1088_s0 + $0x50] sm:$0xff]  }
   0x5   :  { %v153_v18 = vmul.f32 %v429_v10, %v604_v1  ;;  %v154_v19 = vmul.f32 %v430_v11, %v604_v1  ;;  %v155_v22 = vmul.f32 %v433_v14, %v604_v1  ;;  %v156_v23 = vmul.f32 %v434_v15, %v604_v1  ;;  %v554_v0 = vld [vmem:[%s1088_s0 + $0x40] sm:$0xff]  }
   0x6   :  { %v220_v20 = vadd.f32 %v618_v7, %v149_v12  ;;  %v221_v21 = vadd.f32 %v618_v7, %v150_v13  ;;  %v222_v24 = vadd.f32 %v618_v7, %v151_v16  ;;  %v223_v25 = vadd.f32 %v618_v7, %v152_v17  ;;  %v557_v13 = vld [vmem:[%s1088_s0 + $0x58] sm:$0xff]  }
   0x7   :  { %v224_v26 = vadd.f32 %v618_v7, %v153_v18  ;;  %v225_v27 = vadd.f32 %v618_v7, %v154_v19  ;;  %v226_v31 = vadd.f32 %v618_v7, %v155_v22  ;;  %v227_v32 = vadd.f32 %v618_v7, %v156_v23 }
   0x8   :  { %v284_v29 = vmax.f32 %v220_v20, 0.0  ;;  %v285_v30 = vmax.f32 %v221_v21, 0.0  ;;  %v286_v35 = vmax.f32 %v222_v24, 0.0  ;;  %v287_v36 = vmax.f32 %v223_v25, 0.0 }
   0x9   :  { %v288_v37 = vmax.f32 %v224_v26, 0.0  ;;  %v289_v38 = vmax.f32 %v225_v27, 0.0  ;;  %v290_v40 = vmax.f32 %v226_v31, 0.0  ;;  %v291_v41 = vmax.f32 %v227_v32, 0.0 }
   0xa   :  { %349 = vst.msk [vmem:[%s1091_s3] sm:$0xff] %vm348_vm0, %v284_v29  ;;  %350 = vst.msk [vmem:[%s1091_s3 + $0x8] sm:$0xff] %vm348_vm0, %v285_v30  ;;  %v437_v42 = vunpack.c.l.bf16 %v550_v28  ;;  %v438_v43 = vunpack.c.h.bf16 %v550_v28  ;;  %v441_v44 = vunpack.c.l.bf16 %v551_v33  ;;  %v442_v45 = vunpack.c.h.bf16 %v551_v33 }
   0xb   :  { %351 = vst.msk [vmem:[%s1091_s3 + $0x10] sm:$0xff] %vm348_vm0, %v286_v35  ;;  %352 = vst.msk [vmem:[%s1091_s3 + $0x18] sm:$0xff] %vm348_vm0, %v287_v36  ;;  %v445_v46 = vunpack.c.l.bf16 %v552_v34  ;;  %v446_v47 = vunpack.c.h.bf16 %v552_v34  ;;  %v449_v50 = vunpack.c.l.bf16 %v553_v39  ;;  %v450_v51 = vunpack.c.h.bf16 %v553_v39 }
   0xc   :  { %353 = vst.msk [vmem:[%s1091_s3 + $0x20] sm:$0xff] %vm348_vm0, %v288_v37  ;;  %354 = vst.msk [vmem:[%s1091_s3 + $0x28] sm:$0xff] %vm348_vm0, %v289_v38  ;;  %v157_v48 = vmul.f32 %v437_v42, %v604_v1  ;;  %v158_v49 = vmul.f32 %v438_v43, %v604_v1  ;;  %v159_v52 = vmul.f32 %v441_v44, %v604_v1  ;;  %v453_v16 = vunpack.c.l.bf16 %v554_v0  ;;  %v558_v38 = vld [vmem:[%s1088_s0 + $0x60] sm:$0xff]   ;;  %v559_v43 = vld [vmem:[%s1088_s0 + $0x68] sm:$0xff]  }
   0xd   :  { %355 = vst.msk [vmem:[%s1091_s3 + $0x30] sm:$0xff] %vm348_vm0, %v290_v40  ;;  %356 = vst.msk [vmem:[%s1091_s3 + $0x38] sm:$0xff] %vm348_vm0, %v291_v41  ;;  %v160_v53 = vmul.f32 %v442_v45, %v604_v1  ;;  %v161_v54 = vmul.f32 %v445_v46, %v604_v1  ;;  %v162_v55 = vmul.f32 %v446_v47, %v604_v1  ;;  %v454_v17 = vunpack.c.h.bf16 %v554_v0  ;;  %v560_v44 = vld [vmem:[%s1088_s0 + $0x70] sm:$0xff]  }
   0xe   :  { %v228_v56 = vadd.f32 %v618_v7, %v157_v48  ;;  %v229_v57 = vadd.f32 %v618_v7, %v158_v49  ;;  %v163_v58 = vmul.f32 %v449_v50, %v604_v1  ;;  %v164_v59 = vmul.f32 %v450_v51, %v604_v1  ;;  %v561_v49 = vld [vmem:[%s1088_s0 + $0x78] sm:$0xff]  }
   0xf   :  { %v230_v60 = vadd.f32 %v618_v7, %v159_v52  ;;  %v231_v61 = vadd.f32 %v618_v7, %v160_v53  ;;  %v232_v62 = vadd.f32 %v618_v7, %v161_v54  ;;  %v233_v63 = vadd.f32 %v618_v7, %v162_v55 }
  0x10   :  { %v292_v2 = vmax.f32 %v228_v56, 0.0  ;;  %v293_v3 = vmax.f32 %v229_v57, 0.0  ;;  %v234_v4 = vadd.f32 %v618_v7, %v163_v58  ;;  %v235_v5 = vadd.f32 %v618_v7, %v164_v59 }
  0x11   :  { %v294_v9 = vmax.f32 %v230_v60, 0.0  ;;  %v295_v10 = vmax.f32 %v231_v61, 0.0  ;;  %v296_v11 = vmax.f32 %v232_v62, 0.0  ;;  %v297_v12 = vmax.f32 %v233_v63, 0.0 }
  0x12   :  { %357 = vst.msk [vmem:[%s1091_s3 + $0x40] sm:$0xff] %vm348_vm0, %v292_v2  ;;  %358 = vst.msk [vmem:[%s1091_s3 + $0x48] sm:$0xff] %vm348_vm0, %v293_v3  ;;  %v298_v14 = vmax.f32 %v234_v4, 0.0  ;;  %v299_v15 = vmax.f32 %v235_v5, 0.0  ;;  %v457_v18 = vunpack.c.l.bf16 %v555_v6  ;;  %v458_v19 = vunpack.c.h.bf16 %v555_v6 }
  0x13   :  { %359 = vst.msk [vmem:[%s1091_s3 + $0x50] sm:$0xff] %vm348_vm0, %v294_v9  ;;  %360 = vst.msk [vmem:[%s1091_s3 + $0x58] sm:$0xff] %vm348_vm0, %v295_v10  ;;  %v461_v20 = vunpack.c.l.bf16 %v556_v8  ;;  %v462_v21 = vunpack.c.h.bf16 %v556_v8  ;;  %v165_v22 = vmul.f32 %v453_v16, %v604_v1  ;;  %v166_v23 = vmul.f32 %v454_v17, %v604_v1  ;;  %v563_v17 = vld [vmem:[%s1088_s0 + $0x88] sm:$0xff]  }
  0x14   :  { %361 = vst.msk [vmem:[%s1091_s3 + $0x60] sm:$0xff] %vm348_vm0, %v296_v11  ;;  %362 = vst.msk [vmem:[%s1091_s3 + $0x68] sm:$0xff] %vm348_vm0, %v297_v12  ;;  %v465_v24 = vunpack.c.l.bf16 %v557_v13  ;;  %v466_v25 = vunpack.c.h.bf16 %v557_v13  ;;  %v167_v26 = vmul.f32 %v457_v18, %v604_v1  ;;  %v168_v27 = vmul.f32 %v458_v19, %v604_v1  ;;  %v562_v12 = vld [vmem:[%s1088_s0 + $0x80] sm:$0xff]   ;;  %v564_v18 = vld [vmem:[%s1088_s0 + $0x90] sm:$0xff]  }
  0x15   :  { %363 = vst.msk [vmem:[%s1091_s3 + $0x70] sm:$0xff] %vm348_vm0, %v298_v14  ;;  %364 = vst.msk [vmem:[%s1091_s3 + $0x78] sm:$0xff] %vm348_vm0, %v299_v15  ;;  %v169_v28 = vmul.f32 %v461_v20, %v604_v1  ;;  %v170_v29 = vmul.f32 %v462_v21, %v604_v1  ;;  %v236_v30 = vadd.f32 %v618_v7, %v165_v22  ;;  %v469_v52 = vunpack.c.l.bf16 %v558_v38 }
  0x16   :  { %v237_v31 = vadd.f32 %v618_v7, %v166_v23  ;;  %v171_v32 = vmul.f32 %v465_v24, %v604_v1  ;;  %v172_v33 = vmul.f32 %v466_v25, %v604_v1  ;;  %v238_v34 = vadd.f32 %v618_v7, %v167_v26  ;;  %v565_v23 = vld [vmem:[%s1088_s0 + $0x98] sm:$0xff]  }
  0x17   :  { %v239_v35 = vadd.f32 %v618_v7, %v168_v27  ;;  %v240_v36 = vadd.f32 %v618_v7, %v169_v28  ;;  %v241_v37 = vadd.f32 %v618_v7, %v170_v29  ;;  %v300_v39 = vmax.f32 %v236_v30, 0.0 }
  0x18   :  { %v301_v40 = vmax.f32 %v237_v31, 0.0  ;;  %v242_v41 = vadd.f32 %v618_v7, %v171_v32  ;;  %v243_v42 = vadd.f32 %v618_v7, %v172_v33  ;;  %v302_v45 = vmax.f32 %v238_v34, 0.0 }
  0x19   :  { %v303_v46 = vmax.f32 %v239_v35, 0.0  ;;  %v304_v47 = vmax.f32 %v240_v36, 0.0  ;;  %v305_v48 = vmax.f32 %v241_v37, 0.0  ;;  %365 = vst.msk [vmem:[%s1091_s3 + $0x80] sm:$0xff] %vm348_vm0, %v300_v39  ;;  %v470_v53 = vunpack.c.h.bf16 %v558_v38 }
  0x1a   :  { %366 = vst.msk [vmem:[%s1091_s3 + $0x88] sm:$0xff] %vm348_vm0, %v301_v40  ;;  %v306_v50 = vmax.f32 %v242_v41, 0.0  ;;  %v307_v51 = vmax.f32 %v243_v42, 0.0  ;;  %367 = vst.msk [vmem:[%s1091_s3 + $0x90] sm:$0xff] %vm348_vm0, %v302_v45  ;;  %v473_v54 = vunpack.c.l.bf16 %v559_v43  ;;  %v474_v55 = vunpack.c.h.bf16 %v559_v43 }
  0x1b   :  { %368 = vst.msk [vmem:[%s1091_s3 + $0x98] sm:$0xff] %vm348_vm0, %v303_v46  ;;  %369 = vst.msk [vmem:[%s1091_s3 + $0xa0] sm:$0xff] %vm348_vm0, %v304_v47  ;;  %v477_v56 = vunpack.c.l.bf16 %v560_v44  ;;  %v478_v57 = vunpack.c.h.bf16 %v560_v44  ;;  %v173_v58 = vmul.f32 %v469_v52, %v604_v1  ;;  %v174_v59 = vmul.f32 %v470_v53, %v604_v1  ;;  %v567_v53 = vld [vmem:[%s1088_s0 + $0xa8] sm:$0xff]  }
  0x1c   :  { %370 = vst.msk [vmem:[%s1091_s3 + $0xa8] sm:$0xff] %vm348_vm0, %v305_v48  ;;  %371 = vst.msk [vmem:[%s1091_s3 + $0xb0] sm:$0xff] %vm348_vm0, %v306_v50  ;;  %v481_v60 = vunpack.c.l.bf16 %v561_v49  ;;  %v482_v61 = vunpack.c.h.bf16 %v561_v49  ;;  %v175_v62 = vmul.f32 %v473_v54, %v604_v1  ;;  %v176_v63 = vmul.f32 %v474_v55, %v604_v1  ;;  %v566_v48 = vld [vmem:[%s1088_s0 + $0xa0] sm:$0xff]   ;;  %v568_v54 = vld [vmem:[%s1088_s0 + $0xb0] sm:$0xff]  }
  0x1d   :  { %372 = vst.msk [vmem:[%s1091_s3 + $0xb8] sm:$0xff] %vm348_vm0, %v307_v51  ;;  %v177_v0 = vmul.f32 %v477_v56, %v604_v1  ;;  %v178_v2 = vmul.f32 %v478_v57, %v604_v1  ;;  %v244_v3 = vadd.f32 %v618_v7, %v173_v58  ;;  %v245_v4 = vadd.f32 %v618_v7, %v174_v59  ;;  %v569_v59 = vld [vmem:[%s1088_s0 + $0xb8] sm:$0xff]  }
  0x1e   :  { %v179_v5 = vmul.f32 %v481_v60, %v604_v1  ;;  %v180_v6 = vmul.f32 %v482_v61, %v604_v1  ;;  %v246_v8 = vadd.f32 %v618_v7, %v175_v62  ;;  %v247_v9 = vadd.f32 %v618_v7, %v176_v63 }
  0x1f   :  { %v248_v10 = vadd.f32 %v618_v7, %v177_v0  ;;  %v249_v11 = vadd.f32 %v618_v7, %v178_v2  ;;  %v308_v13 = vmax.f32 %v244_v3, 0.0  ;;  %v309_v14 = vmax.f32 %v245_v4, 0.0 }
  0x20   :  { %v250_v15 = vadd.f32 %v618_v7, %v179_v5  ;;  %v251_v16 = vadd.f32 %v618_v7, %v180_v6  ;;  %v310_v19 = vmax.f32 %v246_v8, 0.0  ;;  %v311_v20 = vmax.f32 %v247_v9, 0.0 }
  0x21   :  { %v312_v21 = vmax.f32 %v248_v10, 0.0  ;;  %v313_v22 = vmax.f32 %v249_v11, 0.0  ;;  %373 = vst.msk [vmem:[%s1091_s3 + $0xc0] sm:$0xff] %vm348_vm0, %v308_v13  ;;  %374 = vst.msk [vmem:[%s1091_s3 + $0xc8] sm:$0xff] %vm348_vm0, %v309_v14  ;;  %v485_v26 = vunpack.c.l.bf16 %v562_v12  ;;  %v486_v27 = vunpack.c.h.bf16 %v562_v12 }
  0x22   :  { %v314_v24 = vmax.f32 %v250_v15, 0.0  ;;  %v315_v25 = vmax.f32 %v251_v16, 0.0  ;;  %375 = vst.msk [vmem:[%s1091_s3 + $0xd0] sm:$0xff] %vm348_vm0, %v310_v19  ;;  %376 = vst.msk [vmem:[%s1091_s3 + $0xd8] sm:$0xff] %vm348_vm0, %v311_v20  ;;  %v489_v28 = vunpack.c.l.bf16 %v563_v17  ;;  %v490_v29 = vunpack.c.h.bf16 %v563_v17 }
  0x23   :  { %377 = vst.msk [vmem:[%s1091_s3 + $0xe0] sm:$0xff] %vm348_vm0, %v312_v21  ;;  %378 = vst.msk [vmem:[%s1091_s3 + $0xe8] sm:$0xff] %vm348_vm0, %v313_v22  ;;  %v493_v30 = vunpack.c.l.bf16 %v564_v18  ;;  %v494_v31 = vunpack.c.h.bf16 %v564_v18  ;;  %v181_v32 = vmul.f32 %v485_v26, %v604_v1  ;;  %v182_v33 = vmul.f32 %v486_v27, %v604_v1  ;;  %v570_v22 = vld [vmem:[%s1088_s0 + $0xc0] sm:$0xff]   ;;  %v571_v27 = vld [vmem:[%s1088_s0 + $0xc8] sm:$0xff]  }
  0x24   :  { %379 = vst.msk [vmem:[%s1091_s3 + $0xf0] sm:$0xff] %vm348_vm0, %v314_v24  ;;  %380 = vst.msk [vmem:[%s1091_s3 + $0xf8] sm:$0xff] %vm348_vm0, %v315_v25  ;;  %v497_v34 = vunpack.c.l.bf16 %v565_v23  ;;  %v498_v35 = vunpack.c.h.bf16 %v565_v23  ;;  %v183_v36 = vmul.f32 %v489_v28, %v604_v1  ;;  %v184_v37 = vmul.f32 %v490_v29, %v604_v1  ;;  %v572_v28 = vld [vmem:[%s1088_s0 + $0xd0] sm:$0xff]  }
  0x25   :  { %v185_v38 = vmul.f32 %v493_v30, %v604_v1  ;;  %v186_v39 = vmul.f32 %v494_v31, %v604_v1  ;;  %v252_v40 = vadd.f32 %v618_v7, %v181_v32  ;;  %v253_v41 = vadd.f32 %v618_v7, %v182_v33  ;;  %v573_v33 = vld [vmem:[%s1088_s0 + $0xd8] sm:$0xff]  }
  0x26   :  { %v187_v42 = vmul.f32 %v497_v34, %v604_v1  ;;  %v188_v43 = vmul.f32 %v498_v35, %v604_v1  ;;  %v254_v44 = vadd.f32 %v618_v7, %v183_v36  ;;  %v255_v45 = vadd.f32 %v618_v7, %v184_v37 }
  0x27   :  { %v256_v46 = vadd.f32 %v618_v7, %v185_v38  ;;  %v257_v47 = vadd.f32 %v618_v7, %v186_v39  ;;  %v316_v49 = vmax.f32 %v252_v40, 0.0  ;;  %v317_v50 = vmax.f32 %v253_v41, 0.0 }
  0x28   :  { %v258_v51 = vadd.f32 %v618_v7, %v187_v42  ;;  %v259_v52 = vadd.f32 %v618_v7, %v188_v43  ;;  %v318_v55 = vmax.f32 %v254_v44, 0.0  ;;  %v319_v56 = vmax.f32 %v255_v45, 0.0 }
  0x29   :  { %v320_v57 = vmax.f32 %v256_v46, 0.0  ;;  %v321_v58 = vmax.f32 %v257_v47, 0.0  ;;  %381 = vst.msk [vmem:[%s1091_s3 + $0x100] sm:$0xff] %vm348_vm0, %v316_v49  ;;  %382 = vst.msk [vmem:[%s1091_s3 + $0x108] sm:$0xff] %vm348_vm0, %v317_v50  ;;  %v501_v62 = vunpack.c.l.bf16 %v566_v48  ;;  %v502_v63 = vunpack.c.h.bf16 %v566_v48 }
  0x2a   :  { %v322_v60 = vmax.f32 %v258_v51, 0.0  ;;  %v323_v61 = vmax.f32 %v259_v52, 0.0  ;;  %383 = vst.msk [vmem:[%s1091_s3 + $0x110] sm:$0xff] %vm348_vm0, %v318_v55  ;;  %384 = vst.msk [vmem:[%s1091_s3 + $0x118] sm:$0xff] %vm348_vm0, %v319_v56  ;;  %v505_v0 = vunpack.c.l.bf16 %v567_v53  ;;  %v506_v2 = vunpack.c.h.bf16 %v567_v53 }
  0x2b   :  { %385 = vst.msk [vmem:[%s1091_s3 + $0x120] sm:$0xff] %vm348_vm0, %v320_v57  ;;  %386 = vst.msk [vmem:[%s1091_s3 + $0x128] sm:$0xff] %vm348_vm0, %v321_v58  ;;  %v509_v3 = vunpack.c.l.bf16 %v568_v54  ;;  %v510_v4 = vunpack.c.h.bf16 %v568_v54  ;;  %v189_v5 = vmul.f32 %v501_v62, %v604_v1  ;;  %v190_v6 = vmul.f32 %v502_v63, %v604_v1  ;;  %v574_v58 = vld [vmem:[%s1088_s0 + $0xe0] sm:$0xff]   ;;  %v575_v63 = vld [vmem:[%s1088_s0 + $0xe8] sm:$0xff]  }
  0x2c   :  { %387 = vst.msk [vmem:[%s1091_s3 + $0x130] sm:$0xff] %vm348_vm0, %v322_v60  ;;  %388 = vst.msk [vmem:[%s1091_s3 + $0x138] sm:$0xff] %vm348_vm0, %v323_v61  ;;  %v513_v8 = vunpack.c.l.bf16 %v569_v59  ;;  %v514_v9 = vunpack.c.h.bf16 %v569_v59  ;;  %v191_v10 = vmul.f32 %v505_v0, %v604_v1  ;;  %v192_v11 = vmul.f32 %v506_v2, %v604_v1  ;;  %v576_v0 = vld [vmem:[%s1088_s0 + $0xf0] sm:$0xff]  }
  0x2d   :  { %v193_v12 = vmul.f32 %v509_v3, %v604_v1  ;;  %v194_v13 = vmul.f32 %v510_v4, %v604_v1  ;;  %v260_v14 = vadd.f32 %v618_v7, %v189_v5  ;;  %v261_v15 = vadd.f32 %v618_v7, %v190_v6  ;;  %v577_v6 = vld [vmem:[%s1088_s0 + $0xf8] sm:$0xff]  }
  0x2e   :  { %v195_v16 = vmul.f32 %v513_v8, %v604_v1  ;;  %v196_v17 = vmul.f32 %v514_v9, %v604_v1  ;;  %v262_v18 = vadd.f32 %v618_v7, %v191_v10  ;;  %v263_v19 = vadd.f32 %v618_v7, %v192_v11 }
  0x2f   :  { %v264_v20 = vadd.f32 %v618_v7, %v193_v12  ;;  %v265_v21 = vadd.f32 %v618_v7, %v194_v13  ;;  %v324_v23 = vmax.f32 %v260_v14, 0.0  ;;  %v325_v24 = vmax.f32 %v261_v15, 0.0 }
  0x30   :  { %v266_v25 = vadd.f32 %v618_v7, %v195_v16  ;;  %v267_v26 = vadd.f32 %v618_v7, %v196_v17  ;;  %v326_v29 = vmax.f32 %v262_v18, 0.0  ;;  %v327_v30 = vmax.f32 %v263_v19, 0.0 }
  0x31   :  { %v328_v31 = vmax.f32 %v264_v20, 0.0  ;;  %v329_v32 = vmax.f32 %v265_v21, 0.0  ;;  %389 = vst.msk [vmem:[%s1091_s3 + $0x140] sm:$0xff] %vm348_vm0, %v324_v23  ;;  %390 = vst.msk [vmem:[%s1091_s3 + $0x148] sm:$0xff] %vm348_vm0, %v325_v24  ;;  %v517_v36 = vunpack.c.l.bf16 %v570_v22  ;;  %v518_v37 = vunpack.c.h.bf16 %v570_v22 }
  0x32   :  { %v330_v34 = vmax.f32 %v266_v25, 0.0  ;;  %v331_v35 = vmax.f32 %v267_v26, 0.0  ;;  %391 = vst.msk [vmem:[%s1091_s3 + $0x150] sm:$0xff] %vm348_vm0, %v326_v29  ;;  %392 = vst.msk [vmem:[%s1091_s3 + $0x158] sm:$0xff] %vm348_vm0, %v327_v30  ;;  %v521_v38 = vunpack.c.l.bf16 %v571_v27  ;;  %v522_v39 = vunpack.c.h.bf16 %v571_v27 }
  0x33   :  { %393 = vst.msk [vmem:[%s1091_s3 + $0x160] sm:$0xff] %vm348_vm0, %v328_v31  ;;  %394 = vst.msk [vmem:[%s1091_s3 + $0x168] sm:$0xff] %vm348_vm0, %v329_v32  ;;  %v525_v40 = vunpack.c.l.bf16 %v572_v28  ;;  %v526_v41 = vunpack.c.h.bf16 %v572_v28  ;;  %v197_v42 = vmul.f32 %v517_v36, %v604_v1  ;;  %v198_v43 = vmul.f32 %v518_v37, %v604_v1 }
  0x34   :  { %395 = vst.msk [vmem:[%s1091_s3 + $0x170] sm:$0xff] %vm348_vm0, %v330_v34  ;;  %396 = vst.msk [vmem:[%s1091_s3 + $0x178] sm:$0xff] %vm348_vm0, %v331_v35  ;;  %v529_v44 = vunpack.c.l.bf16 %v573_v33  ;;  %v530_v45 = vunpack.c.h.bf16 %v573_v33  ;;  %v199_v46 = vmul.f32 %v521_v38, %v604_v1  ;;  %v200_v47 = vmul.f32 %v522_v39, %v604_v1 }
  0x35   :  { %v201_v48 = vmul.f32 %v525_v40, %v604_v1  ;;  %v202_v49 = vmul.f32 %v526_v41, %v604_v1  ;;  %v268_v50 = vadd.f32 %v618_v7, %v197_v42  ;;  %v269_v51 = vadd.f32 %v618_v7, %v198_v43 }
  0x36   :  { %v203_v52 = vmul.f32 %v529_v44, %v604_v1  ;;  %v204_v53 = vmul.f32 %v530_v45, %v604_v1  ;;  %v270_v54 = vadd.f32 %v618_v7, %v199_v46  ;;  %v271_v55 = vadd.f32 %v618_v7, %v200_v47 }
  0x37   :  { %v272_v56 = vadd.f32 %v618_v7, %v201_v48  ;;  %v273_v57 = vadd.f32 %v618_v7, %v202_v49  ;;  %v332_v59 = vmax.f32 %v268_v50, 0.0  ;;  %v333_v60 = vmax.f32 %v269_v51, 0.0 }
  0x38   :  { %v274_v61 = vadd.f32 %v618_v7, %v203_v52  ;;  %v275_v62 = vadd.f32 %v618_v7, %v204_v53  ;;  %v334_v2 = vmax.f32 %v270_v54, 0.0  ;;  %v335_v3 = vmax.f32 %v271_v55, 0.0 }
  0x39   :  { %v336_v4 = vmax.f32 %v272_v56, 0.0  ;;  %v337_v5 = vmax.f32 %v273_v57, 0.0  ;;  %397 = vst.msk [vmem:[%s1091_s3 + $0x180] sm:$0xff] %vm348_vm0, %v332_v59  ;;  %398 = vst.msk [vmem:[%s1091_s3 + $0x188] sm:$0xff] %vm348_vm0, %v333_v60  ;;  %v533_v10 = vunpack.c.l.bf16 %v574_v58  ;;  %v534_v11 = vunpack.c.h.bf16 %v574_v58 }
  0x3a   :  { %v338_v8 = vmax.f32 %v274_v61, 0.0  ;;  %v339_v9 = vmax.f32 %v275_v62, 0.0  ;;  %399 = vst.msk [vmem:[%s1091_s3 + $0x190] sm:$0xff] %vm348_vm0, %v334_v2  ;;  %400 = vst.msk [vmem:[%s1091_s3 + $0x198] sm:$0xff] %vm348_vm0, %v335_v3  ;;  %v537_v12 = vunpack.c.l.bf16 %v575_v63  ;;  %v538_v13 = vunpack.c.h.bf16 %v575_v63 }
  0x3b   :  { %401 = vst.msk [vmem:[%s1091_s3 + $0x1a0] sm:$0xff] %vm348_vm0, %v336_v4  ;;  %402 = vst.msk [vmem:[%s1091_s3 + $0x1a8] sm:$0xff] %vm348_vm0, %v337_v5  ;;  %v541_v14 = vunpack.c.l.bf16 %v576_v0  ;;  %v542_v15 = vunpack.c.h.bf16 %v576_v0  ;;  %v205_v16 = vmul.f32 %v533_v10, %v604_v1  ;;  %v206_v17 = vmul.f32 %v534_v11, %v604_v1 }
  0x3c   :  { %403 = vst.msk [vmem:[%s1091_s3 + $0x1b0] sm:$0xff] %vm348_vm0, %v338_v8  ;;  %404 = vst.msk [vmem:[%s1091_s3 + $0x1b8] sm:$0xff] %vm348_vm0, %v339_v9  ;;  %v545_v18 = vunpack.c.l.bf16 %v577_v6  ;;  %v546_v19 = vunpack.c.h.bf16 %v577_v6  ;;  %v207_v20 = vmul.f32 %v537_v12, %v604_v1  ;;  %v208_v21 = vmul.f32 %v538_v13, %v604_v1 }
  0x3d   :  { %v209_v22 = vmul.f32 %v541_v14, %v604_v1  ;;  %v210_v23 = vmul.f32 %v542_v15, %v604_v1  ;;  %v276_v24 = vadd.f32 %v618_v7, %v205_v16  ;;  %v277_v25 = vadd.f32 %v618_v7, %v206_v17 }
  0x3e   :  { %v211_v26 = vmul.f32 %v545_v18, %v604_v1  ;;  %v212_v27 = vmul.f32 %v546_v19, %v604_v1  ;;  %v278_v28 = vadd.f32 %v618_v7, %v207_v20  ;;  %v279_v29 = vadd.f32 %v618_v7, %v208_v21 }
  0x3f   :  { %v280_v30 = vadd.f32 %v618_v7, %v209_v22  ;;  %v281_v31 = vadd.f32 %v618_v7, %v210_v23  ;;  %v340_v32 = vmax.f32 %v276_v24, 0.0  ;;  %v341_v33 = vmax.f32 %v277_v25, 0.0 }
  0x40   :  { %v282_v34 = vadd.f32 %v618_v7, %v211_v26  ;;  %v283_v35 = vadd.f32 %v618_v7, %v212_v27  ;;  %v342_v36 = vmax.f32 %v278_v28, 0.0  ;;  %v343_v37 = vmax.f32 %v279_v29, 0.0 }
  0x41   :  { %v344_v38 = vmax.f32 %v280_v30, 0.0  ;;  %v345_v39 = vmax.f32 %v281_v31, 0.0  ;;  %405 = vst.msk [vmem:[%s1091_s3 + $0x1c0] sm:$0xff] %vm348_vm0, %v340_v32  ;;  %406 = vst.msk [vmem:[%s1091_s3 + $0x1c8] sm:$0xff] %vm348_vm0, %v341_v33 }
  0x42   :  { %v346_v1 = vmax.f32 %v282_v34, 0.0  ;;  %v347_v40 = vmax.f32 %v283_v35, 0.0  ;;  %407 = vst.msk [vmem:[%s1091_s3 + $0x1d0] sm:$0xff] %vm348_vm0, %v342_v36  ;;  %408 = vst.msk [vmem:[%s1091_s3 + $0x1d8] sm:$0xff] %vm348_vm0, %v343_v37 }
  0x43   :  { %409 = vst.msk [vmem:[%s1091_s3 + $0x1e0] sm:$0xff] %vm348_vm0, %v344_v38  ;;  %410 = vst.msk [vmem:[%s1091_s3 + $0x1e8] sm:$0xff] %vm348_vm0, %v345_v39 }
  0x44   :  { %411 = vst.msk [vmem:[%s1091_s3 + $0x1f0] sm:$0xff] %vm348_vm0, %v346_v1  ;;  %412 = vst.msk [vmem:[%s1091_s3 + $0x1f8] sm:$0xff] %vm348_vm0, %v347_v40 }

// kernel: double_conv.4
= control target key start
LH: loop header
LB: loop body
LE: loop exit
PB: predicated region body
PF: predicated region fallthrough
CT: control target
= control target key end

     0   :  { %s4658_s26 = smov 0   ;;  %s4660_s2 = smov 0   ;;  %s6064_s0 = inlined_call_operand.vmem [shape: bf16[2,256,8], index: 0, kind: input, shape index: {}, may-alias: {0,1,2}]   ;;  %s6065_s1 = inlined_call_operand.vmem [shape: bf16[2,256,8], index: 1, kind: input, shape index: {}, may-alias: {0,1,2}]   ;;  %s6066_s2 = inlined_call_operand.vmem [shape: bf16[2,256,8], index: 2, kind: input, shape index: {}, may-alias: {0,1,2}]   ;;  %s6067_s3 = inlined_call_operand.vmem [shape: bf16[3,24,8], index: 3, kind: input, shape index: {}]   ;;  %s6068_s4 = inlined_call_operand.vmem [shape: f32[1,8], index: 4, kind: input, shape index: {}]   ;;  %s6069_s5 = inlined_call_operand.vmem [shape: f32[1,8], index: 5, kind: input, shape index: {}]   ;;  %s6070_s6 = inlined_call_operand.vmem [shape: bf16[2,256,8], index: 6, kind: output, shape index: {0}]   ;;  %s6071_s7 = inlined_call_operand.vmem [shape: f32[2,1,8], index: 7, kind: output, shape index: {1}]   ;;  %s6072_s8 = inlined_call_operand.vmem [shape: f32[2,1,8], index: 8, kind: output, shape index: {2}]  }
   0x1   :  { %s4662_s27 = smov 0  }
   0x2 LB: > { %s31_s28 = sadd.s32 1, %s4602_s2  ;;  %p4101_p0 = scmp.ge.s32.totalorder %s4606_s27, 1  ;;  %s4606_s27 = sphi %s4662_s27, %s19_s27   ;;  %s4602_s2 = sphi %s4660_s2, %s6110_s2   ;;  %s4598_s26 = sphi %s4658_s26, %s6109_s26  }
   0x3   : > { %p33_p1 = scmp.ge.s32.totalorder %s31_s28, 2  ;;  %p354_p2 = scmp.lt.s32.totalorder %s4606_s27, 3 }
   0x5   : > { %s6112_s28 = smov (%p33_p1, %s31_s28), 0  ;;  %p355_p3 = pnand %p4101_p0, %p354_p2 }
   0x6   : > { %p429_p4 = scmp.lt.s32.totalorder (!%p355_p3), %s4598_s26, 1  ;;  %vm500_vm0 = vcmask (!%p355_p3), 60416   ;;  %vm502_vm1 = vcmask (!%p355_p3), 64516   ;;  %v855_v0 = vlaneseq (!%p355_p3)  ;;  %v4608_v1 = vmov (!%p355_p3), 0   ;;  %v4699_v4 = vld [vmem:[%s6068_s4] ss:$0 sm:$0xff] (!%p355_p3) }
   0x7   : > { %358 = sbr.rel (%p355_p3) target bundleno = 602 (0x25a), region = 44  ;;  %814 = vst.msk [vmem:[#allocation2] sm:$0xf0] (!%p355_p3), %vm502_vm1, %v4608_v1  ;;  %503 = vst.msk [vmem:[#allocation2 + $0x90] sm:$0xf0] (!%p355_p3), %vm502_vm1, %v4608_v1  ;;  %vm4609_vm2 = vmmov (!%p355_p3), 0  }
   0x8   : > { %815 = vst.msk [vmem:[#allocation2 + $0x8] sm:$0xf] (!%p355_p3), %vm500_vm0, %v4608_v1  ;;  %501 = vst.msk [vmem:[#allocation2] sm:$0xf] (!%p355_p3), %vm500_vm0, %v4608_v1  ;;  %v4690_v2 = vshrl.u32 (!%p355_p3), %v855_v0, 7  ;;  %vm710_vm9 = vcmask (!%p355_p3), 1043456  }
   0x9   : > { %853 = vst.msk [vmem:[#allocation2 + $0x88] sm:$0xf0] (!%p355_p3), %vm502_vm1, %v4608_v1  ;;  %vm1453_vm3 = vmpackc.low (!%p355_p3), %vm4609_vm2, %vm4609_vm2  ;;  %v4736_v24 = vld [vmem:[%s6069_s5] ss:$0 sm:$0xff] (!%p355_p3)  ;;  %vm2013_vm7 = vsmask.f32 (!%p355_p3), 4352 }
   0xa   : > { %854 = vst.msk [vmem:[#allocation2 + $0x90] sm:$0xf] (!%p355_p3), %vm500_vm0, %v4608_v1  ;;  %v4693_v3 = vsel (!%p355_p3), %vm1453_vm3, 65537, %v4608_v1  ;;  %v857_v5 = vadd.s32 (!%p355_p3), 8, %v4690_v2  ;;  %v859_v6 = vadd.s32 (!%p355_p3), 24, %v4690_v2  ;;  %v4704_v7 = vadd.s32 (!%p355_p3), 136, %v4690_v2 }
   0xb   : > { %v4707_v8 = vadd.s32 (!%p355_p3), 152, %v4690_v2  ;;  %v4717_v9 = vadd.s32 (!%p355_p3), 168, %v4690_v2  ;;  %v4720_v10 = vadd.s32 (!%p355_p3), 120, %v4690_v2  ;;  %v4723_v11 = vadd.s32 (!%p355_p3), 184, %v4690_v2  ;;  %s4610_s15 = smov (!%p355_p3), 16   ;;  %s4611_s16 = smov (!%p355_p3), 8  }
   0xc   : > { %v4726_v12 = vadd.s32 (!%p355_p3), 200, %v4690_v2  ;;  %v903_v14 = vand.u32 (!%p355_p3), 15, %v857_v5  ;;  %v917_v15 = vand.u32 (!%p355_p3), 15, %v859_v6  ;;  %v1015_v18 = vand.u32 (!%p355_p3), 15, %v4704_v7 }
   0xd   : > { %vm760_vm10 = vcmask (!%p355_p3), 64512   ;;  %vm2422_vm12 = vcmask (!%p355_p3), 1046528   ;;  %v1001_v7 = vand.u32 (!%p355_p3), 15, %v4720_v10 }
   0xe   : > { %s6114_s26 = smov (!%p429_p4, %s4598_s26), 1  ;;  %vm1779_vm4 = vcmp.eq.s32.totalorder %v903_v14, 15  ;;  %vm4738_vm5 = vcmp.eq.s32.totalorder %v917_v15, 15  ;;  %v4767_v61 = vld [vmem:[#allocation2] sm:$0xf0]  ;;  %vm1795_vm14 = vcmp.eq.s32.totalorder %v1015_v18, 15 }
   0xf   : > { %s4246_s29 = sshll.u32 %s6114_s26, 7  ;;  %vm1888_vm6 = vmpackc.low %vm1779_vm4, %vm1779_vm4  ;;  %s5817_s19 = scalar_lea.vmem %s6072_s8, %s6114_s26 }
  0x10   : > { %s4714_s12 = scalar_lea.vmem %s6064_s0, %s4246_s29  ;;  %vm1890_vm8 = vmpackc.low %vm4738_vm5, %vm4738_vm5  ;;  %v1924_v32 = vsel %vm1888_vm6, 65537, %v4608_v1  ;;  %vm4818_vm5 = vcmp.eq.s32.totalorder %v1001_v7, 15  ;;  %s5864_s22 = scalar_lea.vmem %s6070_s6, %s4246_s29 }
  0x11   : > { %v4284_v13 = vld [vmem:[%s4714_s12] sm:$0xff]   ;;  %v4353_v16 = vld [vmem:[%s4714_s12 + $0x38] sm:$0xff]   ;;  %v4355_v23 = vld [vmem:[%s4714_s12 + $0x48] sm:$0xff]   ;;  %v1926_v38 = vsel %vm1890_vm8, 65537, %v4608_v1  ;;  %v4134_v39 = vcombine.low %v4693_v3, %v1924_v32 }
  0x12   : > { %v4354_v17 = vld [vmem:[%s4714_s12 + $0x40] sm:$0xff]   ;;  %v4285_v19 = vunpack.c.l.bf16 %v4284_v13  ;;  %v4286_v20 = vunpack.c.h.bf16 %v4284_v13  ;;  %v4313_v21 = vunpack.c.l.bf16 %v4353_v16  ;;  %v4314_v22 = vunpack.c.h.bf16 %v4353_v16  ;;  %vm1904_vm2 = vmpackc.low %vm1795_vm14, %vm1795_vm14 }
  0x13   : > { %v4317_v26 = vunpack.c.l.bf16 %v4354_v17  ;;  %v4318_v27 = vunpack.c.h.bf16 %v4354_v17  ;;  %v4321_v30 = vunpack.c.l.bf16 %v4355_v23  ;;  %v4322_v31 = vunpack.c.h.bf16 %v4355_v23  ;;  %v4352_v23 = vld [vmem:[%s4714_s12 + $0x30] sm:$0xff]   ;;  %vm1902_vm6 = vmpackc.low %vm4818_vm5, %vm4818_vm5 }
  0x14   : > { %v575_v28 = vmul.f32 %v4285_v19, %v4699_v4  ;;  %v576_v29 = vmul.f32 %v4286_v20, %v4699_v4  ;;  %v589_v33 = vmul.f32 %v4313_v21, %v4699_v4  ;;  %v590_v34 = vmul.f32 %v4314_v22, %v4699_v4 }
  0x15   : > { %v591_v35 = vmul.f32 %v4317_v26, %v4699_v4  ;;  %v4135_v40 = vcombine.low %v4693_v3, %v1926_v38  ;;  %v592_v41 = vmul.f32 %v4318_v27, %v4699_v4  ;;  %v593_v42 = vmul.f32 %v4321_v30, %v4699_v4 }
  0x16   : > { %v614_v36 = vadd.f32 %v4736_v24, %v575_v28  ;;  %v615_v37 = vadd.f32 %v4736_v24, %v576_v29  ;;  %v594_v43 = vmul.f32 %v4322_v31, %v4699_v4  ;;  %v2015_v46 = vshrl.u32 %v4134_v39, 16  ;;  %v4786_v28 = vld [vmem:[%s4714_s12 + $0x50] sm:$0xff]  }
  0x17   : > { %v2018_v47 = vshll.u32 %v4134_v39, 16  ;;  %v2023_v48 = vshrl.u32 %v4135_v40, 16  ;;  %v2026_v49 = vshll.u32 %v4135_v40, 16  ;;  %v628_v50 = vadd.f32 %v4736_v24, %v589_v33 }
  0x18   : > { %v646_v44 = vmax.f32 %v614_v36, 0.0  ;;  %v647_v45 = vmax.f32 %v615_v37, 0.0  ;;  %v629_v51 = vadd.f32 %v4736_v24, %v590_v34  ;;  %v2017_v53 = vrot.slane %v2015_v46, 3 }
  0x19   : > { %v2020_v54 = vrot.slane %v2018_v47, 4  ;;  %v630_v55 = vadd.f32 %v4736_v24, %v591_v35  ;;  %v2025_v56 = vrot.slane %v2023_v48, 3  ;;  %v2028_v57 = vrot.slane %v2026_v49, 4 }
  0x1a   : > { %v4761_v52 = vpack.c.bf16 %v647_v45, %v646_v44  ;;  %v631_v58 = vadd.f32 %v4736_v24, %v592_v41  ;;  %v632_v59 = vadd.f32 %v4736_v24, %v593_v42  ;;  %v633_v63 = vadd.f32 %v4736_v24, %v594_v43 }
  0x1b   : > { %v2021_v62 = vor.u32 %v2020_v54, %v2017_v53  ;;  %v660_v0 = vmax.f32 %v628_v50, 0.0  ;;  %v4770_v5 = vor.u32 %v2028_v57, %v2025_v56  ;;  %v661_v6 = vmax.f32 %v629_v51, 0.0 }
  0x1c   : > { %v711_v60 = vrot.slane %v4761_v52, 4  ;;  %v662_v13 = vmax.f32 %v630_v55, 0.0  ;;  %v663_v14 = vmax.f32 %v631_v58, 0.0  ;;  %v664_v15 = vmax.f32 %v632_v59, 0.0 }
  0x1d   : > { %vm2175_vm11 = vcmp.ne.s16.totalorder %v2021_v62, 0  ;;  %v665_v16 = vmax.f32 %v633_v63, 0.0  ;;  %v1029_v17 = vand.u32 15, %v4707_v8  ;;  %v2030_v19 = vsel %vm2013_vm7, %v2021_v62, %v4770_v5  ;;  %v4357_v62 = vld [vmem:[%s4714_s12 + $0x58] sm:$0xff]  }
  0x1e   : > { %759 = vst.msk [vmem:[#allocation2 + $0x8] sm:$0xf0] %vm502_vm1, %v711_v60  ;;  %v2194_v20 = vsel %vm2175_vm11, 0, %v4767_v61  ;;  %v4779_v21 = vpack.c.bf16 %v661_v6, %v660_v0  ;;  %v686_v22 = vpack.c.bf16 %v663_v14, %v662_v13  ;;  %vm2176_vm13 = vcmp.ne.s16.totalorder %v2030_v19, 0 }
  0x1f   : > { %v2423_v25 = vrot.slane %v2194_v20, 1  ;;  %v4782_v26 = vpack.c.bf16 %v665_v16, %v664_v15  ;;  %v1043_v27 = vand.u32 15, %v4717_v9  ;;  %vm1797_vm15 = vcmp.eq.s32.totalorder %v1029_v17, 15 }
  0x20   : > { %v724_v29 = vrot.slane %v4779_v21, 4  ;;  %v726_v8 = vrot.slane %v686_v22, 4  ;;  %v4309_v32 = vunpack.c.l.bf16 %v4352_v23  ;;  %v4310_v33 = vunpack.c.h.bf16 %v4352_v23  ;;  %vm1906_vm3 = vmpackc.low %vm1797_vm15, %vm1797_vm15 }
  0x21   : > { %v728_v30 = vrot.slane %v4782_v26, 4  ;;  %vm4792_vm1 = vcmp.eq.s32.totalorder %v1043_v27, 15  ;;  %v1940_v34 = vsel %vm1904_vm2, 65537, %v4608_v1  ;;  %v4325_v18 = vunpack.c.l.bf16 %v4786_v28 }
  0x22   : > { %v727_v9 = vsel %vm710_vm9, %v724_v29, %v726_v8  ;;  %vm1908_vm4 = vmpackc.low %vm4792_vm1, %vm4792_vm1  ;;  %v1942_v36 = vsel %vm1906_vm3, 65537, %v4608_v1  ;;  %v4142_v37 = vcombine.low %v4693_v3, %v1940_v34  ;;  %v587_v38 = vmul.f32 %v4309_v32, %v4699_v4 }
  0x23   : > { %v729_v35 = vsel %vm710_vm9, %v726_v8, %v728_v30  ;;  %768 = vst.msk [vmem:[#allocation2 + $0x48] sm:$0xff] %vm760_vm10, %v727_v9  ;;  %v1944_v10 = vsel %vm1908_vm4, 65537, %v4608_v1  ;;  %v4143_v40 = vcombine.low %v4693_v3, %v1942_v36  ;;  %v588_v41 = vmul.f32 %v4310_v33, %v4699_v4 }
  0x24   : > { %769 = vst.msk [vmem:[#allocation2 + $0x50] sm:$0xff] %vm760_vm10, %v729_v35  ;;  %v4144_v44 = vcombine.low %v4693_v3, %v1944_v10  ;;  %v2086_v45 = vshrl.u32 %v4142_v37, 16  ;;  %v2089_v46 = vshll.u32 %v4142_v37, 16  ;;  %v626_v50 = vadd.f32 %v4736_v24, %v587_v38 }
  0x25   : > { %v4812_v39 = vld [vmem:[#allocation2 + $0x8] sm:$0xff]  ;;  %v2095_v48 = vshrl.u32 %v4143_v40, 16  ;;  %v2098_v49 = vshll.u32 %v4143_v40, 16  ;;  %v627_v59 = vadd.f32 %v4736_v24, %v588_v41  ;;  %v1938_v16 = vsel %vm1902_vm6, 65537, %v4608_v1 }
  0x26   : > { %v4824_v43 = vsel %vm2176_vm13, 0, %v4812_v39  ;;  %v2088_v51 = vrot.slane %v2086_v45, 3  ;;  %v2091_v53 = vrot.slane %v2089_v46, 4  ;;  %v2104_v54 = vshrl.u32 %v4144_v44, 16 }
  0x27   : > { %v2424_v47 = vrot.slane %v4824_v43, 1  ;;  %v2107_v55 = vshll.u32 %v4144_v44, 16  ;;  %v2097_v57 = vrot.slane %v2095_v48, 3  ;;  %v2100_v58 = vrot.slane %v2098_v49, 4 }
  0x28   : > { %v2092_v63 = vor.u32 %v2091_v53, %v2088_v51  ;;  %v2106_v0 = vrot.slane %v2104_v54, 3  ;;  %v658_v13 = vmax.f32 %v626_v50, 0.0  ;;  %v659_v15 = vmax.f32 %v627_v59, 0.0  ;;  %v4347_v50 = vld [vmem:[%s4714_s12 + $0x8] sm:$0xff]  }
  0x29   : > { %v2425_v56 = vsel %vm2422_vm12, %v2423_v25, %v2424_v47  ;;  %v2109_v6 = vrot.slane %v2107_v55, 4  ;;  %v2101_v14 = vor.u32 %v2100_v58, %v2097_v57  ;;  %v4326_v17 = vunpack.c.h.bf16 %v4786_v28 }
  0x2a   : > { %2460 = vrot.lane.b32.xlu1 %v2425_v56, %s4610_s15  ;;  %v4840_v19 = vld [vmem:[#allocation2 + $0x48] sm:$0xff]  ;;  %v4141_v22 = vcombine.low %v4693_v3, %v1938_v16  ;;  %v4329_v23 = vunpack.c.l.bf16 %v4357_v62  ;;  %v4330_v25 = vunpack.c.h.bf16 %v4357_v62  ;;  %v4848_v31 = vpack.c.bf16 %v659_v15, %v658_v13 }
  0x2b   : > { %v4842_v20 = vor.u32 %v2109_v6, %v2106_v0  ;;  %v4845_v27 = vld [vmem:[#allocation2 + $0x50] sm:$0xff]  ;;  %v2102_v8 = vsel %vm2013_vm7, %v2092_v63, %v2101_v14  ;;  %v595_v32 = vmul.f32 %v4325_v18, %v4699_v4  ;;  %v596_v33 = vmul.f32 %v4326_v17, %v4699_v4 }
  0x2c   : > { %vm2184_vm8 = vcmp.ne.s16.totalorder %v2102_v8, 0  ;;  %v2077_v9 = vshrl.u32 %v4141_v22, 16  ;;  %v2080_v34 = vshll.u32 %v4141_v22, 16  ;;  %v722_v35 = vrot.slane %v4848_v31, 4 }
  0x2d   : > { %v2111_v28 = vsel %vm2013_vm7, %v2101_v14, %v4842_v20  ;;  %v4855_v7 = vsel %vm2184_vm8, 0, %v4840_v19  ;;  %v597_v36 = vmul.f32 %v4329_v23, %v4699_v4  ;;  %v598_v42 = vmul.f32 %v4330_v25, %v4699_v4 }
  0x2e   : > { %vm2185_vm11 = vcmp.ne.s16.totalorder %v2111_v28, 0  ;;  %v2440_v18 = vrot.slane %v4855_v7, 1  ;;  %v2079_v38 = vrot.slane %v2077_v9, 3  ;;  %v2082_v10 = vrot.slane %v2080_v34, 4 }
  0x2f   : > { %v4860_v37 = vsel %vm2185_vm11, 0, %v4845_v27  ;;  %v725_v41 = vsel %vm710_vm9, %v722_v35, %v724_v29  ;;  %v634_v44 = vadd.f32 %v4736_v24, %v595_v32  ;;  %v635_v46 = vadd.f32 %v4736_v24, %v596_v33 }
  0x30   : > { %v2442_v40 = vrot.slane %v4860_v37, 1  ;;  %767 = vst.msk [vmem:[#allocation2 + $0x40] sm:$0xff] %vm760_vm10, %v725_v41  ;;  %v4872_v45 = vor.u32 %v2082_v10, %v2079_v38  ;;  %v636_v48 = vadd.f32 %v4736_v24, %v597_v36  ;;  %v1057_v49 = vand.u32 15, %v4723_v11 }
  0x31   : > { %v637_v29 = vadd.f32 %v4736_v24, %v598_v42  ;;  %v666_v51 = vmax.f32 %v634_v44, 0.0  ;;  %v1071_v53 = vand.u32 15, %v4726_v12  ;;  %v667_v55 = vmax.f32 %v635_v46, 0.0  ;;  %v4358_v44 = vld [vmem:[%s4714_s12 + $0x60] sm:$0xff]  }
  0x32   : > { %v2443_v21 = vsel %vm2422_vm12, %v2440_v18, %v2442_v40  ;;  %v2093_v54 = vsel %vm2013_vm7, %v4872_v45, %v2092_v63  ;;  %v668_v56 = vmax.f32 %v636_v48, 0.0  ;;  %vm1801_vm13 = vcmp.eq.s32.totalorder %v1057_v49, 15 }
  0x33   : > { %2478 = vrot.lane.b32.xlu0 %v2443_v21, %s4610_s15  ;;  %vm2183_vm14 = vcmp.ne.s16.totalorder %v2093_v54, 0  ;;  %v669_v11 = vmax.f32 %v637_v29, 0.0  ;;  %vm1803_vm15 = vcmp.eq.s32.totalorder %v1071_v53, 15  ;;  %vm1910_vm1 = vmpackc.low %vm1801_vm13, %vm1801_vm13  ;;  %v4289_v57 = vunpack.c.l.bf16 %v4347_v50 }
  0x34   : > { %v688_v58 = vpack.c.bf16 %v667_v55, %v666_v51  ;;  %vm1912_vm2 = vmpackc.low %vm1803_vm15, %vm1803_vm15  ;;  %v1946_v59 = vsel %vm1910_vm1, 65537, %v4608_v1  ;;  %v4290_v62 = vunpack.c.h.bf16 %v4347_v50  ;;  %v861_v12 = vadd.s32 40, %v4690_v2 }
  0x35   : > { %v4888_v0 = vpack.c.bf16 %v669_v11, %v668_v56  ;;  %v1948_v6 = vsel %vm1912_vm2, 65537, %v4608_v1  ;;  %v4145_v63 = vcombine.low %v4693_v3, %v1946_v59  ;;  %v577_v13 = vmul.f32 %v4289_v57, %v4699_v4 }
  0x36   : > { %v730_v14 = vrot.slane %v688_v58, 4  ;;  %v4146_v15 = vcombine.low %v4693_v3, %v1948_v6  ;;  %v578_v16 = vmul.f32 %v4290_v62, %v4699_v4  ;;  %v931_v17 = vand.u32 15, %v861_v12 }
  0x37   : > { %v4895_v22 = vld [vmem:[#allocation2 + $0x40] sm:$0xff]  ;;  %v732_v23 = vrot.slane %v4888_v0, 4  ;;  %v2113_v25 = vshrl.u32 %v4145_v63, 16  ;;  %v2116_v8 = vshll.u32 %v4145_v63, 16  ;;  %v616_v32 = vadd.f32 %v4736_v24, %v577_v13 }
  0x38   : > { %v4901_v33 = vsel %vm2183_vm14, 0, %v4895_v22  ;;  %v731_v28 = vsel %vm710_vm9, %v728_v30, %v730_v14  ;;  %v2122_v9 = vshrl.u32 %v4146_v15, 16  ;;  %v2125_v34 = vshll.u32 %v4146_v15, 16 }
  0x39   : > { %vm2213_vm3 = vsmask.f32 7424  ;;  %v2438_v7 = vrot.slane %v4901_v33, 1  ;;  %v733_v36 = vsel %vm710_vm9, %v730_v14, %v732_v23  ;;  %770 = vst.msk [vmem:[#allocation2 + $0x58] sm:$0xff] %vm760_vm10, %v731_v28  ;;  %v2115_v38 = vrot.slane %v2113_v25, 3 }
  0x3a   : > { %v2118_v10 = vrot.slane %v2116_v8, 4  ;;  %771 = vst.msk [vmem:[#allocation2 + $0x60] sm:$0xff] %vm760_vm10, %v733_v36  ;;  %v2124_v41 = vrot.slane %v2122_v9, 3  ;;  %v2127_v42 = vrot.slane %v2125_v34, 4  ;;  %v617_v26 = vadd.f32 %v4736_v24, %v578_v16 }
  0x3b   : > { %v648_v30 = vmax.f32 %v616_v32, 0.0  ;;  %v2441_v46 = vsel %vm2422_vm12, %v2438_v7, %v2440_v18  ;;  %vm1783_vm4 = vcmp.eq.s32.totalorder %v931_v17, 15  ;;  %v2215_v49 = vshrl.u32 %v4767_v61, 16 }
  0x3c   : > { %v2119_v48 = vor.u32 %v2118_v10, %v2115_v38  ;;  %2476 = vrot.lane.b32.xlu1 %v2441_v46, %s4610_s15  ;;  %v4919_v50 = vor.u32 %v2127_v42, %v2124_v41  ;;  %v649_v21 = vmax.f32 %v617_v26, 0.0  ;;  %vm1892_vm5 = vmpackc.low %vm1783_vm4, %vm1783_vm4  ;;  %v2217_v29 = vshll.u32 %v4767_v61, 16  ;;  %v4348_v41 = vld [vmem:[%s4714_s12 + $0x10] sm:$0xff]  }
  0x3d   : > { %v2222_v51 = vshll.u32 %v4812_v39, 16  ;;  %v1928_v54 = vsel %vm1892_vm5, 65537, %v4608_v1  ;;  %v2226_v18 = vshrl.u32 %v4812_v39, 16  ;;  %v4333_v55 = vunpack.c.l.bf16 %v4358_v44 }
  0x3e   : > { %v2120_v53 = vsel %vm2013_vm7, %v4842_v20, %v2119_v48  ;;  %v2129_v56 = vsel %vm2013_vm7, %v2119_v48, %v4919_v50  ;;  %v4929_v11 = vpack.c.bf16 %v649_v21, %v648_v30  ;;  %v4136_v57 = vcombine.low %v4693_v3, %v1928_v54 }
  0x3f   : > { %vm2186_vm6 = vcmp.ne.s16.totalorder %v2120_v53, 0  ;;  %vm2187_vm8 = vcmp.ne.s16.totalorder %v2129_v56, 0  ;;  %v2219_v61 = vrot.slane %v2217_v29, 1  ;;  %v2224_v58 = vrot.slane %v2222_v51, 1 }
  0x40   : > { %v4334_v59 = vunpack.c.h.bf16 %v4358_v44  ;;  %v4932_v62 = vld [vmem:[#allocation2 + $0x58] sm:$0xff]  ;;  %v712_v20 = vrot.slane %v4929_v11, 4  ;;  %v2032_v12 = vshrl.u32 %v4136_v57, 16  ;;  %v2035_v6 = vshll.u32 %v4136_v57, 16 }
  0x41   : > { %v599_v39 = vmul.f32 %v4333_v55, %v4699_v4  ;;  %v4936_v63 = vld [vmem:[#allocation2 + $0x60] sm:$0xff]  ;;  %v2205_v13 = vsel %vm2186_vm6, 0, %v4932_v62  ;;  %v2220_v14 = vor.u32 %v2219_v61, %v2215_v49  ;;  %v4939_v15 = vor.u32 %v2226_v18, %v2224_v58 }
  0x42   : > { %v600_v16 = vmul.f32 %v4334_v59, %v4699_v4  ;;  %v4943_v17 = vsel %vm2187_vm8, 0, %v4936_v63  ;;  %v2444_v25 = vrot.slane %v2205_v13, 1  ;;  %v713_v8 = vsel %vm710_vm9, %v711_v60, %v712_v20 }
  0x43   : > { %v2034_v32 = vrot.slane %v2032_v12, 3  ;;  %v2446_v28 = vrot.slane %v4943_v17, 1  ;;  %761 = vst.msk [vmem:[#allocation2 + $0x10] sm:$0xff] %vm760_vm10, %v713_v8  ;;  %v2037_v9 = vrot.slane %v2035_v6, 4  ;;  %v2225_v34 = vsel %vm2213_vm3, %v2220_v14, %v2224_v58 }
  0x44   : > { %v638_v36 = vadd.f32 %v4736_v24, %v599_v39  ;;  %v2445_v38 = vsel %vm2422_vm12, %v2442_v40, %v2444_v25  ;;  %v639_v10 = vadd.f32 %v4736_v24, %v600_v16  ;;  %v883_v52 = vadd.s32 216, %v4690_v2 }
  0x45   : > { %v2278_v60 = vshll.u32 %v4895_v22, 16  ;;  %v2447_v42 = vsel %vm2422_vm12, %v2444_v25, %v2446_v28  ;;  %2480 = vrot.lane.b32.xlu1 %v2445_v38, %s4610_s15  ;;  %v4965_v26 = vor.u32 %v2037_v9, %v2034_v32  ;;  %v2282_v37 = vshrl.u32 %v4895_v22, 16 }
  0x46   : > { %v670_v30 = vmax.f32 %v638_v36, 0.0  ;;  %2482 = vrot.lane.b32.xlu0 %v2447_v42, %s4610_s15  ;;  %v671_v40 = vmax.f32 %v639_v10, 0.0  ;;  %v1085_v44 = vand.u32 15, %v883_v52  ;;  %v2286_v48 = vshll.u32 %v4840_v19, 16 }
  0x47   : > { %v4969_v46 = vrot.slane %v2278_v60, 1  ;;  %v2039_v49 = vsel %vm2013_vm7, %v4770_v5, %v4965_v26  ;;  %v4293_v21 = vunpack.c.l.bf16 %v4348_v41  ;;  %v4294_v29 = vunpack.c.h.bf16 %v4348_v41 }
  0x48   : > { %v863_v51 = vadd.s32 56, %v4690_v2  ;;  %vm2177_vm11 = vcmp.ne.s16.totalorder %v2039_v49, 0  ;;  %v4976_v53 = vpack.c.bf16 %v671_v40, %v670_v30  ;;  %vm1805_vm13 = vcmp.eq.s32.totalorder %v1085_v44, 15 }
  0x49   : > { %v2284_v22 = vor.u32 %v2282_v37, %v4969_v46  ;;  %2365 = vrot.lane.b32.xlu1 %v2225_v34, %s4611_s16  ;;  %vm1914_vm14 = vmpackc.low %vm1805_vm13, %vm1805_vm13  ;;  %v2288_v54 = vrot.slane %v2286_v48, 1  ;;  %v579_v18 = vmul.f32 %v4293_v21, %v4699_v4  ;;  %v580_v55 = vmul.f32 %v4294_v29, %v4699_v4 }
  0x4a   : > { %v945_v5 = vand.u32 15, %v863_v51  ;;  %v4982_v56 = vld [vmem:[#allocation2 + $0x10] sm:$0xff]  ;;  %v734_v57 = vrot.slane %v4976_v53, 4  ;;  %v1950_v61 = vsel %vm1914_vm14, 65537, %v4608_v1  ;;  %v2290_v58 = vshrl.u32 %v4840_v19, 16 }
  0x4b   : > { %v2294_v59 = vshll.u32 %v4845_v27, 16  ;;  %v4990_v12 = vsel %vm2177_vm11, 0, %v4982_v56  ;;  %v2230_v6 = vshll.u32 %v4982_v56, 16  ;;  %v4147_v39 = vcombine.low %v4693_v3, %v1950_v61 }
  0x4c   : > { %v2289_v13 = vsel %vm2213_vm3, %v2284_v22, %v2288_v54  ;;  %v2426_v14 = vrot.slane %v4990_v12, 1  ;;  %v735_v19 = vsel %vm710_vm9, %v732_v23, %v734_v57  ;;  %v618_v16 = vadd.f32 %v4736_v24, %v579_v18 }
  0x4d   : > { %v619_v25 = vadd.f32 %v4736_v24, %v580_v55  ;;  %v2232_v8 = vrot.slane %v2230_v6, 1  ;;  %772 = vst.msk [vmem:[#allocation2 + $0x68] sm:$0xff] %vm760_vm10, %v735_v19  ;;  %v2131_v32 = vshrl.u32 %v4147_v39, 16  ;;  %v2134_v9 = vshll.u32 %v4147_v39, 16  ;;  %v4360_v19 = vld [vmem:[%s4714_s12 + $0x70] sm:$0xff]  }
  0x4e   : > { %vm1785_vm15 = vcmp.eq.s32.totalorder %v945_v5, 15  ;;  %v2427_v34 = vsel %vm2422_vm12, %v2424_v47, %v2426_v14  ;;  %v650_v36 = vmax.f32 %v618_v16, 0.0  ;;  %v2292_v23 = vor.u32 %v2290_v58, %v2288_v54  ;;  %v4359_v5 = vld [vmem:[%s4714_s12 + $0x68] sm:$0xff]  }
  0x4f   : > { %v651_v0 = vmax.f32 %v619_v25, 0.0  ;;  %vm1894_vm1 = vmpackc.low %vm1785_vm15, %vm1785_vm15  ;;  %2462 = vrot.lane.b32.xlu0 %v2427_v34, %s4610_s15  ;;  %v2233_v38 = vsel %vm2213_vm3, %v4939_v15, %v2232_v8  ;;  %v2133_v10 = vrot.slane %v2131_v32, 3  ;;  %v2136_v52 = vrot.slane %v2134_v9, 4  ;;  %v4349_v34 = vld [vmem:[%s4714_s12 + $0x18] sm:$0xff]  }
  0x50   : > { %v1930_v60 = vsel %vm1894_vm1, 65537, %v4608_v1  ;;  %v2296_v43 = vrot.slane %v2294_v59, 1  ;;  %v2298_v47 = vshrl.u32 %v4845_v27, 16  ;;  %v2302_v37 = vshll.u32 %v4932_v62, 16 }
  0x51   : > { %v5013_v41 = vpack.c.bf16 %v651_v0, %v650_v36  ;;  %v4137_v42 = vcombine.low %v4693_v3, %v1930_v60  ;;  %v5017_v30 = vor.u32 %v2136_v52, %v2133_v10  ;;  %v2306_v40 = vshrl.u32 %v4932_v62, 16 }
  0x52   : > { %v2310_v15 = vshll.u32 %v4936_v63, 16  ;;  %v2297_v21 = vsel %vm2213_vm3, %v2292_v23, %v2296_v43  ;;  %v2300_v29 = vor.u32 %v2298_v47, %v2296_v43  ;;  %v2304_v51 = vrot.slane %v2302_v37, 1 }
  0x53   : > { %v714_v44 = vrot.slane %v5013_v41, 4  ;;  %v2041_v48 = vshrl.u32 %v4137_v42, 16  ;;  %v2044_v49 = vshll.u32 %v4137_v42, 16  ;;  %2367 = vrot.lane.b32.xlu0 %v2233_v38, %s4611_s16  ;;  %v2138_v27 = vsel %vm2013_vm7, %v4919_v50, %v5017_v30 }
  0x54   : > { %v2312_v22 = vrot.slane %v2310_v15, 1  ;;  %v1337_v62 = vld [vmem:[#allocation2 + $0x68] sm:$0xff]  ;;  %vm2188_vm2 = vcmp.ne.s16.totalorder %v2138_v27, 0  ;;  %v5038_v50 = vsel %vm2213_vm3, %v2300_v29, %v2304_v51  ;;  %v2308_v58 = vor.u32 %v2306_v40, %v2304_v51 }
  0x55   : > { %v715_v54 = vsel %vm710_vm9, %v712_v20, %v714_v44  ;;  %v2043_v18 = vrot.slane %v2041_v48, 3  ;;  %v2046_v55 = vrot.slane %v2044_v49, 4  ;;  %v5034_v61 = vsel %vm2188_vm2, 0, %v1337_v62 }
  0x56   : > { %762 = vst.msk [vmem:[#allocation2 + $0x18] sm:$0xff] %vm760_vm10, %v715_v54  ;;  %v2314_v59 = vshrl.u32 %v4936_v63, 16  ;;  %v2448_v6 = vrot.slane %v5034_v61, 1  ;;  %v2318_v11 = vshll.u32 %v1337_v62, 16  ;;  %v2234_v20 = vshrl.u32 %v4982_v56, 16  ;;  %v4561_v54 = vld [vmem:[%s6067_s3] sm:$0xff]  }
  0x57   : > { %v5042_v39 = vor.u32 %v2046_v55, %v2043_v18  ;;  %2381 = vrot.lane.b32.xlu0 %v2289_v13, %s4611_s16  ;;  %v2313_v16 = vsel %vm2213_vm3, %v2308_v58, %v2312_v22  ;;  %v4337_v32 = vunpack.c.l.bf16 %v4359_v5  ;;  %v4338_v9 = vunpack.c.h.bf16 %v4359_v5  ;;  %4524 = vmatprep.subr.bf16.mxu1 %v4561_v54  ;;  %v4567_v61 = vld [vmem:[%s6068_s4] ss:$0 sm:$0xff] }
  0x58   : > { %v2316_v25 = vor.u32 %v2314_v59, %v2312_v22  ;;  %v2449_v63 = vsel %vm2422_vm12, %v2446_v28, %v2448_v6  ;;  %v2320_v56 = vrot.slane %v2318_v11, 1  ;;  %v2236_v0 = vor.u32 %v2234_v20, %v2232_v8  ;;  %v4350_v59 = vld [vmem:[%s4714_s12 + $0x20] sm:$0xff]   ;;  %4416 = vmatprep.subr.bf16.mxu0 %v4561_v54  ;;  %4526 = vmatpush3.bf16.msra.mxu1 %v4561_v54 }
  0x59   : > { %v2048_v36 = vsel %vm2013_vm7, %v4965_v26, %v5042_v39  ;;  %2484 = vrot.lane.b32.xlu1 %v2449_v63, %s4610_s15  ;;  %v4341_v13 = vunpack.c.l.bf16 %v4360_v19  ;;  %v4342_v23 = vunpack.c.h.bf16 %v4360_v19  ;;  %v601_v38 = vmul.f32 %v4337_v32, %v4699_v4  ;;  %4417 = vmatpush3.bf16.msra.mxu0 %v4561_v54 }
  0x5a   : > { %vm2178_vm4 = vcmp.ne.s16.totalorder %v2048_v36, 0  ;;  %v5060_v10 = vsel %vm2213_vm3, %v2316_v25, %v2320_v56  ;;  %v602_v17 = vmul.f32 %v4338_v9, %v4699_v4  ;;  %v2322_v52 = vshrl.u32 %v1337_v62, 16 }
  0x5b   : > { %v4297_v28 = vunpack.c.l.bf16 %v4349_v34  ;;  %2383 = vrot.lane.b32.xlu0 %v2297_v21, %s4611_s16  ;;  %v603_v26 = vmul.f32 %v4341_v13, %v4699_v4  ;;  %v604_v8 = vmul.f32 %v4342_v23, %v4699_v4  ;;  %v640_v60 = vadd.f32 %v4736_v24, %v601_v38 }
  0x5c   : > { %v4298_v42 = vunpack.c.h.bf16 %v4349_v34  ;;  %v641_v47 = vadd.f32 %v4736_v24, %v602_v17  ;;  %v5068_v37 = vor.u32 %v2322_v52, %v2320_v56  ;;  %v885_v15 = vadd.s32 232, %v4690_v2  ;;  %v5100_v56 = vld [vmem:[%s6067_s3 + $0x8] ss:$0 sps:$4 sm:$0xff]  }
  0x5d   : > { %v1327_v43 = vld [vmem:[#allocation2 + $0x18] sm:$0xff]  ;;  %v581_v40 = vmul.f32 %v4297_v28, %v4699_v4  ;;  %v642_v21 = vadd.f32 %v4736_v24, %v603_v26  ;;  %v643_v27 = vadd.f32 %v4736_v24, %v604_v8  ;;  %v672_v51 = vmax.f32 %v640_v60, 0.0  ;;  %4529 = vmatprep.subr.msk.bf16.mxu1 %vm710_vm9, %v5100_v56  ;;  %4528 = vmatprep.subr.msk.bf16.mxu0 %vm710_vm9, %v5100_v56 }
  0x5e   : > { %v5073_v48 = vsel %vm2178_vm4, 0, %v1327_v43  ;;  %v2238_v49 = vshll.u32 %v1327_v43, 16  ;;  %v673_v22 = vmax.f32 %v641_v47, 0.0  ;;  %v582_v62 = vmul.f32 %v4298_v42, %v4699_v4  ;;  %v5111_v26 = vld [vmem:[%s4714_s12 + $0x78] sm:$0xff]  }
  0x5f   : > { %v2428_v29 = vrot.slane %v5073_v48, 1  ;;  %2387 = vrot.lane.b32.xlu0 %v2313_v16, %s4611_s16  ;;  %v674_v55 = vmax.f32 %v642_v21, 0.0  ;;  %v675_v5 = vmax.f32 %v643_v27, 0.0  ;;  %v620_v58 = vadd.f32 %v4736_v24, %v581_v40 }
  0x60   : > { %v2240_v18 = vrot.slane %v2238_v49, 1  ;;  %v691_v20 = vpack.c.bf16 %v673_v22, %v672_v51  ;;  %v621_v19 = vadd.f32 %v4736_v24, %v582_v62  ;;  %v2242_v25 = vshrl.u32 %v1327_v43, 16 }
  0x61   : > { %v2429_v11 = vsel %vm2422_vm12, %v2426_v14, %v2428_v29  ;;  %v5093_v32 = vpack.c.bf16 %v675_v5, %v674_v55  ;;  %v652_v9 = vmax.f32 %v620_v58, 0.0  ;;  %v1099_v34 = vand.u32 15, %v885_v15 }
  0x62   : > { %2464 = vrot.lane.b32.xlu1 %v2429_v11, %s4610_s15  ;;  %v2241_v16 = vsel %vm2213_vm3, %v2236_v0, %v2240_v18  ;;  %v736_v63 = vrot.slane %v691_v20, 4  ;;  %v653_v12 = vmax.f32 %v621_v19, 0.0  ;;  %v5095_v36 = vor.u32 %v2242_v25, %v2240_v18 }
  0x63   : > { %v4301_v14 = vunpack.c.l.bf16 %v4350_v59  ;;  %2369 = vrot.lane.b32.xlu0 %v2241_v16, %s4611_s16  ;;  %v738_v0 = vrot.slane %v5093_v32, 4  ;;  %vm1807_vm5 = vcmp.eq.s32.totalorder %v1099_v34, 15  ;;  %v4302_v13 = vunpack.c.h.bf16 %v4350_v59 }
  0x64   : > { %v887_v23 = vadd.s32 248, %v4690_v2  ;;  %v737_v38 = vsel %vm710_vm9, %v734_v57, %v736_v63  ;;  %v681_v17 = vpack.c.bf16 %v653_v12, %v652_v9  ;;  %vm1916_vm6 = vmpackc.low %vm1807_vm5, %vm1807_vm5  ;;  %v865_v28 = vadd.s32 72, %v4690_v2 }
  0x65   : > { %v583_v52 = vmul.f32 %v4301_v14, %v4699_v4  ;;  %v739_v53 = vsel %vm710_vm9, %v736_v63, %v738_v0  ;;  %773 = vst.msk [vmem:[#allocation2 + $0x70] sm:$0xff] %vm760_vm10, %v737_v38  ;;  %v1952_v57 = vsel %vm1916_vm6, 65537, %v4608_v1  ;;  %v584_v8 = vmul.f32 %v4302_v13, %v4699_v4 }
  0x66   : > { %2385 = vrot.lane.b32.xlu1 %v5038_v50, %s4611_s16  ;;  %v1113_v60 = vand.u32 15, %v887_v23  ;;  %774 = vst.msk [vmem:[#allocation2 + $0x78] sm:$0xff] %vm760_vm10, %v739_v53  ;;  %v716_v42 = vrot.slane %v681_v17, 4  ;;  %v4148_v43 = vcombine.low %v4693_v3, %v1952_v57  ;;  %v867_v50 = vadd.s32 88, %v4690_v2 }
  0x67   : > { %v622_v47 = vadd.f32 %v4736_v24, %v583_v52  ;;  %v623_v40 = vadd.f32 %v4736_v24, %v584_v8  ;;  %v959_v15 = vand.u32 15, %v865_v28  ;;  %v4345_v49 = vunpack.c.l.bf16 %v5111_v26 }
  0x68   : > { %vm1809_vm8 = vcmp.eq.s32.totalorder %v1113_v60, 15  ;;  %v717_v21 = vsel %vm710_vm9, %v714_v44, %v716_v42  ;;  %v2140_v27 = vshrl.u32 %v4148_v43, 16  ;;  %v2143_v51 = vshll.u32 %v4148_v43, 16 }
  0x69   : > { %v654_v22 = vmax.f32 %v622_v47, 0.0  ;;  %vm1918_vm11 = vmpackc.low %vm1809_vm8, %vm1809_vm8  ;;  %763 = vst.msk [vmem:[#allocation2 + $0x20] sm:$0xff] %vm760_vm10, %v717_v21  ;;  %v655_v62 = vmax.f32 %v623_v40, 0.0  ;;  %v973_v18 = vand.u32 15, %v867_v50  ;;  %vm1787_vm13 = vcmp.eq.s32.totalorder %v959_v15, 15 }
  0x6a   : > { %2389 = vrot.lane.b32.xlu1 %v5060_v10, %s4611_s16  ;;  %v1954_v54 = vsel %vm1918_vm11, 65537, %v4608_v1  ;;  %v2142_v55 = vrot.slane %v2140_v27, 3  ;;  %v2145_v5 = vrot.slane %v2143_v51, 4  ;;  %vm1896_vm14 = vmpackc.low %vm1787_vm13, %vm1787_vm13  ;;  %v4346_v44 = vunpack.c.h.bf16 %v5111_v26 }
  0x6b   : > { %v4149_v41 = vcombine.low %v4693_v3, %v1954_v54  ;;  %v5140_v58 = vpack.c.bf16 %v655_v62, %v654_v22  ;;  %vm1789_vm15 = vcmp.eq.s32.totalorder %v973_v18, 15  ;;  %v1932_v59 = vsel %vm1896_vm14, 65537, %v4608_v1  ;;  %v4351_v18 = vld [vmem:[%s4714_s12 + $0x28] sm:$0xff]  }
  0x6c   : > { %v605_v10 = vmul.f32 %v4345_v49, %v4699_v4  ;;  %v1338_v11 = vld [vmem:[#allocation2 + $0x70] sm:$0xff]  ;;  %v2146_v20 = vor.u32 %v2145_v5, %v2142_v55  ;;  %vm1898_vm1 = vmpackc.low %vm1789_vm15, %vm1789_vm15  ;;  %v4138_v16 = vcombine.low %v4693_v3, %v1932_v59 }
  0x6d   : > { %v2149_v19 = vshrl.u32 %v4149_v41, 16  ;;  %v2152_v25 = vshll.u32 %v4149_v41, 16  ;;  %v5145_v9 = vld [vmem:[#allocation2 + $0x78] sm:$0xff]  ;;  %v2326_v34 = vshll.u32 %v1338_v11, 16  ;;  %v2330_v63 = vshrl.u32 %v1338_v11, 16 }
  0x6e   : > { %v718_v12 = vrot.slane %v5140_v58, 4  ;;  %v1934_v14 = vsel %vm1898_vm1, 65537, %v4608_v1  ;;  %v2334_v13 = vshll.u32 %v5145_v9, 16  ;;  %v2147_v4 = vsel %vm2013_vm7, %v5017_v30, %v2146_v20 }
  0x6f   : > { %v2151_v23 = vrot.slane %v2149_v19, 3  ;;  %v2154_v38 = vrot.slane %v2152_v25, 4  ;;  %v2328_v17 = vrot.slane %v2326_v34, 1  ;;  %vm2189_vm2 = vcmp.ne.s16.totalorder %v2147_v4, 0 }
  0x70   : > { %v719_v52 = vsel %vm710_vm9, %v716_v42, %v718_v12  ;;  %v4139_v28 = vcombine.low %v4693_v3, %v1934_v14  ;;  %v5156_v26 = vrot.slane %v2334_v13, 1  ;;  %v1328_v53 = vld [vmem:[#allocation2 + $0x20] sm:$0xff]  ;;  %v2208_v57 = vsel %vm2189_vm2, 0, %v1338_v11 }
  0x71   : > { %764 = vst.msk [vmem:[#allocation2 + $0x28] sm:$0xff] %vm760_vm10, %v719_v52  ;;  %v5159_v8 = vor.u32 %v2154_v38, %v2151_v23  ;;  %v2050_v60 = vshrl.u32 %v4138_v16, 16  ;;  %v2332_v30 = vor.u32 %v2330_v63, %v2328_v17  ;;  %v2329_v43 = vsel %vm2213_vm3, %v5068_v37, %v2328_v17 }
  0x72   : > { %v2246_v47 = vshll.u32 %v1328_v53, 16  ;;  %v2450_v50 = vrot.slane %v2208_v57, 1  ;;  %2391 = vrot.lane.b32.xlu0 %v2329_v43, %s4611_s16  ;;  %v2250_v42 = vshrl.u32 %v1328_v53, 16  ;;  %v2053_v49 = vshll.u32 %v4138_v16, 16 }
  0x73   : > { %v2156_v40 = vsel %vm2013_vm7, %v2146_v20, %v5159_v8  ;;  %v2052_v15 = vrot.slane %v2050_v60, 3  ;;  %v2337_v21 = vsel %vm2213_vm3, %v2332_v30, %v5156_v26  ;;  %v2059_v62 = vshrl.u32 %v4139_v28, 16  ;;  %v4568_v30 = vld [vmem:[%s6069_s5] ss:$0 sm:$0xff] }
  0x74   : > { %v2248_v27 = vrot.slane %v2246_v47, 1  ;;  %v2451_v51 = vsel %vm2422_vm12, %v2448_v6, %v2450_v50  ;;  %vm2190_vm4 = vcmp.ne.s16.totalorder %v2156_v40, 0  ;;  %2393 = vrot.lane.b32.xlu1 %v2337_v21, %s4611_s16  ;;  %v2055_v22 = vrot.slane %v2053_v49, 4 }
  0x75   : > { %v5173_v37 = vsel %vm2190_vm4, 0, %v5145_v9  ;;  %v2062_v54 = vshll.u32 %v4139_v28, 16  ;;  %v606_v6 = vmul.f32 %v4567_v61, %v4346_v44  ;;  %v2061_v59 = vrot.slane %v2059_v62, 3 }
  0x76   : > { %v2249_v55 = vsel %vm2213_vm3, %v5095_v36, %v2248_v27  ;;  %v2452_v5 = vrot.slane %v5173_v37, 1  ;;  %2486 = vrot.lane.b32.xlu0 %v2451_v51, %s4610_s15  ;;  %v2056_v41 = vor.u32 %v2055_v22, %v2052_v15  ;;  %v644_v20 = vadd.f32 %v4736_v24, %v605_v10 }
  0x77   : > { %v2064_v11 = vrot.slane %v2062_v54, 4  ;;  %v2252_v25 = vor.u32 %v2250_v42, %v2248_v27  ;;  %v645_v16 = vadd.f32 %v4736_v24, %v606_v6  ;;  %v4305_v34 = vunpack.c.l.bf16 %v4351_v18 }
  0x78   : > { %v5184_v19 = vld [vmem:[#allocation2 + $0x28] sm:$0xff]  ;;  %v2453_v36 = vsel %vm2422_vm12, %v2450_v50, %v2452_v5  ;;  %2371 = vrot.lane.b32.xlu1 %v2249_v55, %s4611_s16  ;;  %v2057_v63 = vsel %vm2013_vm7, %v5042_v39, %v2056_v41  ;;  %v676_v10 = vmax.f32 %v644_v20, 0.0  ;;  %v4306_v4 = vunpack.c.h.bf16 %v4351_v18 }
  0x79   : > { %v2254_v44 = vshll.u32 %v5184_v19, 16  ;;  %v5194_v14 = vor.u32 %v2064_v11, %v2061_v59  ;;  %vm2179_vm5 = vcmp.ne.s16.totalorder %v2057_v63, 0  ;;  %v677_v13 = vmax.f32 %v645_v16, 0.0 }
  0x7a   : > { %2488 = vrot.lane.b32.xlu0 %v2453_v36, %s4610_s15  ;;  %v2198_v38 = vsel %vm2179_vm5, 0, %v1328_v53  ;;  %v585_v17 = vmul.f32 %v4567_v61, %v4305_v34  ;;  %v586_v57 = vmul.f32 %v4567_v61, %v4306_v4  ;;  %v889_v15 = vadd.s32 264, %v4690_v2 }
  0x7b   : > { %v5196_v23 = vrot.slane %v2254_v44, 1  ;;  %v2066_v24 = vsel %vm2013_vm7, %v2056_v41, %v5194_v14  ;;  %v2430_v52 = vrot.slane %v2198_v38, 1  ;;  %v693_v28 = vpack.c.bf16 %v677_v13, %v676_v10 }
  0x7c   : > { %vm2180_vm6 = vcmp.ne.s16.totalorder %v2066_v24, 0  ;;  %v624_v43 = vadd.f32 %v4568_v30, %v585_v17  ;;  %v625_v42 = vadd.f32 %v4568_v30, %v586_v57  ;;  %v891_v49 = vadd.s32 280, %v4690_v2 }
  0x7d   : > { %v2257_v39 = vsel %vm2213_vm3, %v2252_v25, %v5196_v23  ;;  %v5204_v60 = vsel %vm2180_vm6, 0, %v5184_v19  ;;  %v2431_v47 = vsel %vm2422_vm12, %v2428_v29, %v2430_v52  ;;  %v740_v50 = vrot.slane %v693_v28, 4 }
  0x7e   : > { %2373 = vrot.lane.b32.xlu1 %v2257_v39, %s4611_s16  ;;  %v2432_v53 = vrot.slane %v5204_v60, 1  ;;  %2466 = vrot.lane.b32.xlu0 %v2431_v47, %s4610_s15  ;;  %v656_v40 = vmax.f32 %v624_v43, 0.0  ;;  %v657_v48 = vmax.f32 %v625_v42, 0.0  ;;  %v869_v29 = vadd.s32 104, %v4690_v2 }
  0x7f   : > { %v741_v27 = vsel %vm710_vm9, %v738_v0, %v740_v50  ;;  %776 = vst.msk [vmem:[#allocation2 + $0x88] sm:$0xf] %vm500_vm0, %v740_v50  ;;  %v1127_v51 = vand.u32 15, %v889_v15  ;;  %v1141_v22 = vand.u32 15, %v891_v49  ;;  %v2338_v18 = vshrl.u32 %v5145_v9, 16 }
  0x80   : > { %v2433_v21 = vsel %vm2422_vm12, %v2430_v52, %v2432_v53  ;;  %775 = vst.msk [vmem:[#allocation2 + $0x80] sm:$0xff] %vm760_vm10, %v741_v27  ;;  %v683_v62 = vpack.c.bf16 %v657_v48, %v656_v40  ;;  %v987_v54 = vand.u32 15, %v869_v29  ;;  %v2258_v11 = vshrl.u32 %v5184_v19, 16 }
  0x81   : > { %vm1811_vm8 = vcmp.eq.s32.totalorder %v1127_v51, 15  ;;  %vm1813_vm11 = vcmp.eq.s32.totalorder %v1141_v22, 15  ;;  %v2340_v59 = vor.u32 %v2338_v18, %v5156_v26  ;;  %v858_v22 = vadd.s32 16, %v4690_v2 }
  0x82   : > { %2468 = vrot.lane.b32.xlu1 %v2433_v21, %s4610_s15  ;;  %v720_v32 = vrot.slane %v683_v62, 4  ;;  %vm1920_vm13 = vmpackc.low %vm1811_vm8, %vm1811_vm8  ;;  %vm1791_vm14 = vcmp.eq.s32.totalorder %v987_v54, 15  ;;  %v2260_v50 = vor.u32 %v2258_v11, %v5196_v23 }
  0x83   : > { %v1956_v0 = vsel %vm1920_vm13, 65537, %v4608_v1  ;;  %vm1922_vm15 = vmpackc.low %vm1813_vm11, %vm1813_vm11 }
  0x84   : > { %v721_v55 = vsel %vm710_vm9, %v718_v12, %v720_v32  ;;  %v4150_v61 = vcombine.low %v4693_v3, %v1956_v0  ;;  %v723_v6 = vsel %vm710_vm9, %v720_v32, %v722_v35  ;;  %v1958_v9 = vsel %vm1922_vm15, 65537, %v4608_v1  ;;  %vm1900_vm1 = vmpackc.low %vm1791_vm14, %vm1791_vm14 }
  0x85   : > { %765 = vst.msk [vmem:[#allocation2 + $0x30] sm:$0xff] %vm760_vm10, %v721_v55  ;;  %766 = vst.msk [vmem:[#allocation2 + $0x38] sm:$0xff] %vm760_vm10, %v723_v6  ;;  %v4151_v58 = vcombine.low %v4693_v3, %v1958_v9  ;;  %v1936_v12 = vsel %vm1900_vm1, 65537, %v4608_v1 }
  0x86   : > { %v5237_v41 = vld [vmem:[#allocation2 + $0x88] sm:$0xff]  ;;  %v2158_v20 = vshrl.u32 %v4150_v61, 16  ;;  %v2161_v25 = vshll.u32 %v4150_v61, 16  ;;  %v4140_v36 = vcombine.low %v4693_v3, %v1936_v12 }
  0x87   : > { %v5245_v31 = vld [vmem:[#allocation2 + $0x80] sm:$0xff]  ;;  %v2350_v35 = vshll.u32 %v5237_v41, 16  ;;  %v2167_v34 = vshrl.u32 %v4151_v58, 16  ;;  %v2170_v19 = vshll.u32 %v4151_v58, 16 }
  0x88   : > { %v2342_v26 = vshll.u32 %v5245_v31, 16  ;;  %v2346_v16 = vshrl.u32 %v5245_v31, 16  ;;  %v2160_v63 = vrot.slane %v2158_v20, 3  ;;  %v2163_v10 = vrot.slane %v2161_v25, 4  ;;  %v1814_v20 = vld [vmem:[#allocation2 + $0x90] sm:$0x1f] }
  0x89   : > { %v5251_v44 = vrot.slane %v2350_v35, 1  ;;  %v2068_v13 = vshrl.u32 %v4140_v36, 16  ;;  %v2169_v24 = vrot.slane %v2167_v34, 3  ;;  %v2172_v38 = vrot.slane %v2170_v19, 4 }
  0x8a   : > { %v2344_v4 = vrot.slane %v2342_v26, 1  ;;  %v2071_v17 = vshll.u32 %v4140_v36, 16  ;;  %v2164_v52 = vor.u32 %v2163_v10, %v2160_v63  ;;  %v910_v25 = vand.u32 15, %v858_v22 }
  0x8b   : > { %v2070_v28 = vrot.slane %v2068_v13, 3  ;;  %v2173_v30 = vor.u32 %v2172_v38, %v2169_v24  ;;  %v2354_v26 = vshrl.u32 %v5237_v41, 16  ;;  %v870_v34 = vadd.s32 112, %v4690_v2 }
  0x8c   : > { %v2348_v57 = vor.u32 %v2346_v16, %v2344_v4  ;;  %v2345_v39 = vsel %vm2213_vm3, %v2340_v59, %v2344_v4  ;;  %v2073_v43 = vrot.slane %v2071_v17, 4  ;;  %v5255_v47 = vld [vmem:[#allocation2 + $0x30] sm:$0xff]  ;;  %v2165_v42 = vsel %vm2013_vm7, %v5159_v8, %v2164_v52  ;;  %v5260_v40 = vld [vmem:[#allocation2 + $0x38] sm:$0xff] }
  0x8d   : > { %2395 = vrot.lane.b32.xlu0 %v2345_v39, %s4611_s16  ;;  %v2262_v49 = vshll.u32 %v5255_v47, 16  ;;  %vm2191_vm2 = vcmp.ne.s16.totalorder %v2165_v42, 0  ;;  %v2266_v21 = vshrl.u32 %v5255_v47, 16  ;;  %v2270_v48 = vshll.u32 %v5260_v40, 16 }
  0x8e   : > { %v2353_v15 = vsel %vm2213_vm3, %v2348_v57, %v5251_v44  ;;  %v2210_v27 = vsel %vm2191_vm2, 0, %v5245_v31  ;;  %v2174_v23 = vsel %vm2013_vm7, %v2164_v52, %v2173_v30  ;;  %v2074_v29 = vor.u32 %v2073_v43, %v2070_v28 }
  0x8f   : > { %2397 = vrot.lane.b32.xlu1 %v2353_v15, %s4611_s16  ;;  %v2264_v8 = vrot.slane %v2262_v49, 1  ;;  %v2454_v51 = vrot.slane %v2210_v27, 1  ;;  %vm2192_vm4 = vcmp.ne.s16.totalorder %v2174_v23, 0  ;;  %v2272_v62 = vrot.slane %v2270_v48, 1 }
  0x90   : > { %v2211_v54 = vsel %vm2192_vm4, 0, %v5237_v41  ;;  %v2075_v18 = vsel %vm2013_vm7, %v5194_v14, %v2074_v29  ;;  %v2084_v32 = vsel %vm2013_vm7, %v2074_v29, %v4872_v45  ;;  %v2274_v9 = vshrl.u32 %v5260_v40, 16  ;;  %v1342_v14 = vld [vmem:[#allocation2 + $0x90] sm:$0xf] }
  0x91   : > { %v2265_v0 = vsel %vm2213_vm3, %v2260_v50, %v2264_v8  ;;  %v2455_v55 = vsel %vm2422_vm12, %v2452_v5, %v2454_v51  ;;  %v2268_v61 = vor.u32 %v2266_v21, %v2264_v8  ;;  %v2456_v6 = vrot.slane %v2211_v54, 1  ;;  %v1379_v8 = vld [vmem:[#allocation2] sm:$0xf8] }
  0x92   : > { %2490 = vrot.lane.b32.xlu0 %v2455_v55, %s4610_s15  ;;  %vm2181_vm5 = vcmp.ne.s16.totalorder %v2075_v18, 0  ;;  %vm2182_vm6 = vcmp.ne.s16.totalorder %v2084_v32, 0  ;;  %v896_v59 = vand.u32 15, %v4690_v2  ;;  %v2358_v35 = vshll.u32 %v1342_v14, 16 }
  0x93   : > { %2375 = vrot.lane.b32.xlu1 %v2265_v0, %s4611_s16  ;;  %v2273_v45 = vsel %vm2213_vm3, %v2268_v61, %v2272_v62  ;;  %v2457_v11 = vsel %vm2422_vm12, %v2454_v51, %v2456_v6  ;;  %v2200_v37 = vsel %vm2181_vm5, 0, %v5255_v47  ;;  %v2201_v5 = vsel %vm2182_vm6, 0, %v5260_v40 }
  0x94   : > { %v2434_v58 = vrot.slane %v2200_v37, 1  ;;  %v2436_v12 = vrot.slane %v2201_v5, 1  ;;  %vm2193_vm8 = vcmp.ne.s16.totalorder %v2173_v30, 0  ;;  %v2276_v36 = vor.u32 %v2274_v9, %v2272_v62 }
  0x95   : > { %vm5291_vm11 = vcmp.eq.s32.totalorder %v896_v59, 0  ;;  %v872_v10 = vadd.s32 128, %v4690_v2  ;;  %v2212_v13 = vsel %vm2193_vm8, 0, %v1814_v20  ;;  %v874_v4 = vadd.s32 144, %v4690_v2 }
  0x96   : > { %2492 = vrot.lane.b32.xlu0 %v2457_v11, %s4610_s15  ;;  %v2437_v19 = vsel %vm2422_vm12, %v2434_v58, %v2436_v12  ;;  %v2435_v63 = vsel %vm2422_vm12, %v2432_v53, %v2434_v58  ;;  %v2360_v24 = vrot.slane %v2358_v35, 1  ;;  %vm1452_vm13 = vmpackc.low %vm5291_vm11, %vm5291_vm11  ;;  %vm5305_vm14 = vcmp.eq.s32.totalorder %v910_v25, 0  ;;  %v5388_v11 = vld [vmem:[%s6067_s3 + $0x18] sm:$0xff]  }
  0x97   : > { %2377 = vrot.lane.b32.xlu1 %v2273_v45, %s4611_s16  ;;  %v2281_v60 = vsel %vm2213_vm3, %v2276_v36, %v4969_v46  ;;  %v2356_v53 = vor.u32 %v2354_v26, %v5251_v44  ;;  %v994_v38 = vand.u32 15, %v870_v34  ;;  %v876_v17 = vadd.s32 160, %v4690_v2  ;;  %vm1454_vm15 = vmpackc.low %vm5305_vm14, %vm5305_vm14  ;;  %v5383_v45 = vld [vmem:[%s6067_s3 + $0xc] sm:$0xff]  }
  0x98   : > { %v2439_v52 = vsel %vm2422_vm12, %v2436_v12, %v2438_v7  ;;  %v2458_v28 = vrot.slane %v2212_v13, 1  ;;  %v1008_v57 = vand.u32 15, %v872_v10  ;;  %v878_v39 = vadd.s32 176, %v4690_v2 }
  0x99   : > { %v1488_v30 = vsel %vm1452_vm13, 65537, %v4608_v1  ;;  %v1022_v43 = vand.u32 15, %v874_v4  ;;  %v1036_v50 = vand.u32 15, %v876_v17  ;;  %v2362_v46 = vshrl.u32 %v1342_v14, 16 }
  0x9a   : > { %2470 = vrot.lane.b32.xlu0 %v2435_v63, %s4610_s15  ;;  %vm5325_vm1 = vcmp.eq.s32.totalorder %v994_v38, 0  ;;  %v1050_v7 = vand.u32 15, %v878_v39  ;;  %v2361_v44 = vsel %vm2213_vm3, %v2356_v53, %v2360_v24  ;;  %v2459_v42 = vsel %vm2422_vm12, %v2456_v6, %v2458_v28 }
  0x9b   : > { %2472 = vrot.lane.b32.xlu1 %v2437_v19, %s4610_s15  ;;  %v4116_v15 = vcombine.low %v1488_v30, %v4693_v3  ;;  %vm5332_vm2 = vcmp.eq.s32.totalorder %v1008_v57, 0  ;;  %vm5336_vm4 = vcmp.eq.s32.totalorder %v1022_v43, 0  ;;  %v880_v27 = vadd.s32 192, %v4690_v2  ;;  %vm1466_vm3 = vmpackc.low %vm5325_vm1, %vm5325_vm1 }
  0x9c   : > { %v1490_v48 = vsel %vm1454_vm15, 65537, %v4608_v1  ;;  %vm5345_vm5 = vcmp.eq.s32.totalorder %v1036_v50, 0  ;;  %v2364_v29 = vor.u32 %v2362_v46, %v2360_v24  ;;  %vm1468_vm12 = vmpackc.low %vm5332_vm2, %vm5332_vm2  ;;  %vm5354_vm6 = vcmp.eq.s32.totalorder %v1050_v7, 0  ;;  %v5394_v35 = vpop.permute.xlu1 %2460  ;;  %v4570_v7 = vld [vmem:[#allocation2 + $0x40] sm:$0xff] }
  0x9d   : > { %v1580_v51 = vshrl.u32 %v4116_v15, 16  ;;  %v1583_v22 = vshll.u32 %v4116_v15, 16  ;;  %vm1470_vm8 = vmpackc.low %vm5336_vm4, %vm5336_vm4  ;;  %v4117_v62 = vcombine.low %v1490_v48, %v4693_v3  ;;  %v1064_v54 = vand.u32 15, %v880_v27 }
  0x9e   : > { %2379 = vrot.lane.b32.xlu0 %v2281_v60, %s4611_s16  ;;  %vm1472_vm11 = vmpackc.low %vm5345_vm5, %vm5345_vm5  ;;  %v1502_v18 = vsel %vm1466_vm3, 65537, %v4608_v1  ;;  %v1504_v32 = vsel %vm1468_vm12, 65537, %v4608_v1  ;;  %v1506_v61 = vsel %vm1470_vm8, 65537, %v4608_v1  ;;  %v860_v12 = vadd.s32 32, %v4690_v2 }
  0x9f   : > { %2474 = vrot.lane.b32.xlu1 %v2439_v52, %s4610_s15  ;;  %vm1474_vm13 = vmpackc.low %vm5354_vm6, %vm5354_vm6  ;;  %vm1367_vm14 = vcmp.eq.s32.totalorder %v1064_v54, 0  ;;  %v1582_v0 = vrot.slane %v1580_v51, 4  ;;  %v1585_v55 = vrot.slane %v1583_v22, 5  ;;  %v1588_v6 = vshrl.u32 %v4117_v62, 16 }
  0xa0   : > { %vm1476_vm15 = vmpackc.low %vm1367_vm14, %vm1367_vm14  ;;  %v1591_v9 = vshll.u32 %v4117_v62, 16  ;;  %v1508_v14 = vsel %vm1472_vm11, 65537, %v4608_v1  ;;  %v1510_v59 = vsel %vm1474_vm13, 65537, %v4608_v1  ;;  %v4123_v37 = vcombine.low %v1502_v18, %v4693_v3 }
  0xa1   : > { %v4124_v5 = vcombine.low %v1504_v32, %v4693_v3  ;;  %v1512_v58 = vsel %vm1476_vm15, 65537, %v4608_v1  ;;  %v4125_v20 = vcombine.low %v1506_v61, %v4693_v3  ;;  %v2792_v25 = vsel %vm710_vm9, %v5100_v56, 0 }
  0xa2   : > { %2399 = vrot.lane.b32.xlu0 %v2361_v44, %s4611_s16  ;;  %v1586_v36 = vor.u32 %v1585_v55, %v1582_v0  ;;  %v4126_v26 = vcombine.low %v1508_v14, %v4693_v3  ;;  %v4127_v16 = vcombine.low %v1510_v59, %v4693_v3  ;;  %4527 = vmatpush3.bf16.msra.mxu1 %v2792_v25  ;;  %vm1578_vm1 = vsmask.f32 3328 }
  0xa3   : > { %2494 = vrot.lane.b32.xlu1 %v2459_v42, %s4610_s15  ;;  %4419 = vmatpush3.bf16.msra.mxu0 %v2792_v25  ;;  %v1590_v34 = vrot.slane %v1588_v6, 4  ;;  %v1593_v19 = vrot.slane %v1591_v9, 5  ;;  %v4128_v63 = vcombine.low %v1512_v58, %v4693_v3  ;;  %v1642_v10 = vshrl.u32 %v4123_v37, 16 }
  0xa4   : > { %4452 = vmatprep.subr.bf16.mxu1 %v5383_v45  ;;  %4488 = vmatprep.subr.bf16.mxu0 %v5388_v11  ;;  %v1645_v13 = vshll.u32 %v4123_v37, 16  ;;  %v1651_v4 = vshrl.u32 %v4124_v5, 16  ;;  %v924_v56 = vand.u32 15, %v860_v12  ;;  %v1654_v24 = vshll.u32 %v4124_v5, 16 }
  0xa5   : > { %v1660_v41 = vshrl.u32 %v4125_v20, 16  ;;  %v1663_v60 = vshll.u32 %v4125_v20, 16  ;;  %v882_v53 = vadd.s32 208, %v4690_v2  ;;  %vm1740_vm2 = vcmp.ne.s16.totalorder %v1586_v36, 0 }
  0xa6   : > { %2401 = vrot.lane.b32.xlu0 %v2364_v29, %s4611_s16  ;;  %v1669_v38 = vshrl.u32 %v4126_v26, 16  ;;  %v1672_v17 = vshll.u32 %v4126_v26, 16  ;;  %v1678_v52 = vshrl.u32 %v4127_v16, 16  ;;  %v1681_v57 = vshll.u32 %v4127_v16, 16  ;;  %v5414_v29 = vpop.permute.xlu0 %2478  ;;  %s5811_s16 = scalar_lea.vmem %s6071_s7, %s6114_s26 }
  0xa7   : > { %2496 = vrot.lane.b32.xlu1 %v2458_v28, %s4610_s15  ;;  %v1687_v39 = vshrl.u32 %v4128_v63, 16  ;;  %v1690_v30 = vshll.u32 %v4128_v63, 16  ;;  %v884_v43 = vadd.s32 224, %v4690_v2  ;;  %v1644_v50 = vrot.slane %v1642_v10, 4 }
  0xa8   : > { %v1647_v46 = vrot.slane %v1645_v13, 5  ;;  %v1653_v33 = vrot.slane %v1651_v4, 4  ;;  %vm5408_vm4 = vcmp.eq.s32.totalorder %v924_v56, 0  ;;  %v1656_v44 = vrot.slane %v1654_v24, 5 }
  0xa9   : > { %v1662_v42 = vrot.slane %v1660_v41, 4  ;;  %v1665_v15 = vrot.slane %v1663_v60, 5  ;;  %v1078_v49 = vand.u32 15, %v882_v53  ;;  %v5412_v21 = vor.u32 %v1593_v19, %v1590_v34  ;;  %vm1456_vm3 = vmpackc.low %vm5408_vm4, %vm5408_vm4 }
  0xaa   : > { %v1671_v27 = vrot.slane %v1669_v38, 4  ;;  %v1674_v48 = vrot.slane %v1672_v17, 5  ;;  %v1680_v23 = vrot.slane %v1678_v52, 4  ;;  %v1683_v51 = vrot.slane %v1681_v57, 5 }
  0xab   : > { %v1689_v22 = vrot.slane %v1687_v39, 4  ;;  %v1692_v62 = vrot.slane %v1690_v30, 5  ;;  %v1092_v54 = vand.u32 15, %v884_v43  ;;  %v5421_v32 = vor.u32 %v1647_v46, %v1644_v50  ;;  %v4569_v46 = vld [vmem:[#allocation2 + $0x8] sm:$0xff] }
  0xac   : > { %v1657_v0 = vor.u32 %v1656_v44, %v1653_v33  ;;  %v1666_v55 = vor.u32 %v1665_v15, %v1662_v42  ;;  %vm5423_vm5 = vcmp.eq.s32.totalorder %v1078_v49, 0  ;;  %v1759_v6 = vsel %vm1740_vm2, 0, %v1379_v8  ;;  %v4571_v49 = vld [vmem:[#allocation2 + $0x48] sm:$0xff] }
  0xad   : > { %v1595_v9 = vsel %vm1578_vm1, %v1586_v36, %v5412_v21  ;;  %v1675_v14 = vor.u32 %v1674_v48, %v1671_v27  ;;  %v1492_v59 = vsel %vm1456_vm3, 65537, %v4608_v1  ;;  %v1684_v37 = vor.u32 %v1683_v51, %v1680_v23  ;;  %vm1478_vm8 = vmpackc.low %vm5423_vm5, %vm5423_vm5  ;;  %v4572_v51 = vld [vmem:[#allocation2 + $0x50] sm:$0xff] }
  0xae   : > { %v5405_v28 = vpop.permute.xlu1 %2476  ;;  %v5431_v5 = vor.u32 %v1692_v62, %v1689_v22  ;;  %vm5433_vm12 = vcmp.eq.s32.totalorder %v1092_v54, 0  ;;  %v862_v12 = vadd.s32 48, %v4690_v2  ;;  %vm2555_vm6 = vcmask 130048   ;;  %v4573_v62 = vld [vmem:[#allocation2 + $0x58] sm:$0xff] }
  0xaf   : > { %v864_v20 = vadd.s32 64, %v4690_v2  ;;  %v1658_v26 = vsel %vm1578_vm1, %v5421_v32, %v1657_v0  ;;  %v1667_v16 = vsel %vm1578_vm1, %v1657_v0, %v1666_v55  ;;  %v4118_v34 = vcombine.low %v1492_v59, %v4693_v3  ;;  %vm1480_vm13 = vmpackc.low %vm5433_vm12, %vm5433_vm12  ;;  %v4574_v0 = vld [vmem:[#allocation2 + $0x60] sm:$0xff] }
  0xb0   : > { %v888_v19 = vadd.s32 256, %v4690_v2  ;;  %vm1741_vm11 = vcmp.ne.s16.totalorder %v1595_v9, 0  ;;  %v1676_v10 = vsel %vm1578_vm1, %v1666_v55, %v1675_v14  ;;  %v1685_v13 = vsel %vm1578_vm1, %v1675_v14, %v1684_v37 }
  0xb1   : > { %v1694_v4 = vsel %vm1578_vm1, %v1684_v37, %v5431_v5  ;;  %v1514_v56 = vsel %vm1478_vm8, 65537, %v4608_v1  ;;  %v938_v24 = vand.u32 15, %v862_v12  ;;  %vm1748_vm14 = vcmp.ne.s16.totalorder %v1658_v26, 0 }
  0xb2   : > { %vm1749_vm15 = vcmp.ne.s16.totalorder %v1667_v16, 0  ;;  %v952_v60 = vand.u32 15, %v864_v20  ;;  %v1597_v53 = vshrl.u32 %v4118_v34, 16  ;;  %v1600_v38 = vshll.u32 %v4118_v34, 16 }
  0xb3   : > { %v1516_v17 = vsel %vm1480_vm13, 65537, %v4608_v1  ;;  %v1120_v52 = vand.u32 15, %v888_v19  ;;  %vm1750_vm2 = vcmp.ne.s16.totalorder %v1676_v10, 0  ;;  %vm1751_vm4 = vcmp.ne.s16.totalorder %v1685_v13, 0 }
  0xb4   : > { %vm1752_vm3 = vcmp.ne.s16.totalorder %v1694_v4, 0  ;;  %v4129_v57 = vcombine.low %v1514_v56, %v4693_v3  ;;  %vm5462_vm5 = vcmp.eq.s32.totalorder %v938_v24, 0  ;;  %v1760_v33 = vsel %vm1741_vm11, 0, %v4569_v46 }
  0xb5   : > { %v1767_v44 = vsel %vm1748_vm14, 0, %v4570_v7  ;;  %v4130_v42 = vcombine.low %v1516_v17, %v4693_v3  ;;  %vm5470_vm12 = vcmp.eq.s32.totalorder %v952_v60, 0  ;;  %v1768_v27 = vsel %vm1749_vm15, 0, %v4571_v49  ;;  %vm1458_vm11 = vmpackc.low %vm5462_vm5, %vm5462_vm5 }
  0xb6   : > { %v1599_v48 = vrot.slane %v1597_v53, 4  ;;  %v1602_v23 = vrot.slane %v1600_v38, 5  ;;  %vm5475_vm8 = vcmp.eq.s32.totalorder %v1120_v52, 0  ;;  %vm2741_vm13 = vcmask 195584   ;;  %vm1460_vm14 = vmpackc.low %vm5470_vm12, %vm5470_vm12 }
  0xb7   : > { %v5419_v18 = vpop.permute.xlu1 %2480  ;;  %v5480_v22 = vsel %vm1750_vm2, 0, %v4572_v51  ;;  %v5483_v54 = vsel %vm1751_vm4, 0, %v4573_v62  ;;  %v5486_v55 = vsel %vm1752_vm3, 0, %v4574_v0  ;;  %v5492_v61 = vadd.s32 240, %v4690_v2  ;;  %vm1484_vm15 = vmpackc.low %vm5475_vm8, %vm5475_vm8 }
  0xb8   : > { %v5442_v25 = vpop.permute.xlu0 %2482  ;;  %v1696_v59 = vshrl.u32 %v4129_v57, 16  ;;  %v1699_v12 = vshll.u32 %v4129_v57, 16  ;;  %v1705_v20 = vshrl.u32 %v4130_v42, 16  ;;  %v5503_v16 = vor.u32 %v1602_v23, %v1599_v48 }
  0xb9   : > { %v1708_v34 = vshll.u32 %v4130_v42, 16  ;;  %v1494_v10 = vsel %vm1458_vm11, 65537, %v4608_v1  ;;  %v5512_v13 = vsel %vm1460_vm14, 65537, %v4608_v1 }
  0xba   : > { %v1698_v24 = vrot.slane %v1696_v59, 4 }
  0xbb   : > { %v2366_v36 = vpop.permute.xlu1 %2365  ;;  %v5529_v42 = vrot.slane %v1708_v34, 5 }
  0xbc   : > { %v2500_v63 = vsel %vm760_vm10, %v1759_v6, %v2366_v36  ;;  %v890_v36 = vadd.s32 272, %v4690_v2 }
  0xbd   : > { %v2557_v41 = vsel %vm2555_vm6, %v2500_v63, %v5394_v35  ;;  %v868_v35 = vadd.s32 96, %v4690_v2 }
  0xbe   : > { %v2597_v30 = vshrl.u32 %v2557_v41, 16  ;;  %v2600_v43 = vshll.u32 %v2557_v41, 16  ;;  %v1520_v41 = vsel %vm1484_vm15, 65537, %v4608_v1  ;;  %v1134_v60 = vand.u32 15, %v890_v36 }
  0xbf   : > { %v980_v37 = vand.u32 15, %v868_v35 }
  0xc0   : > { %v2599_v6 = vrot.slane %v2597_v30, 3  ;;  %v2602_v9 = vrot.slane %v2600_v43, 4  ;;  %v1701_v30 = vrot.slane %v1699_v12, 5  ;;  %v5522_v43 = vrot.slane %v1705_v20, 4 }
  0xc1   : > { %v2463_v39 = vpop.permute.xlu0 %2462  ;;  %vm1355_vm2 = vcmp.eq.s32.totalorder %v980_v37, 0  ;;  %vm1377_vm3 = vcmp.eq.s32.totalorder %v1134_v60, 0 }
  0xc2   : > { %vm1464_vm4 = vmpackc.low %vm1355_vm2, %vm1355_vm2  ;;  %v2603_v56 = vor.u32 %v2602_v9, %v2599_v6 }
  0xc3   : > { %v1500_v52 = vsel %vm1464_vm4, 65537, %v4608_v1  ;;  %vm1486_vm12 = vmpackc.low %vm1377_vm3, %vm1377_vm3 }
  0xc4   : > { %v4122_v15 = vcombine.low %v1500_v52, %v4693_v3 }
  0xc5   : > { %v2368_v14 = vpop.permute.xlu0 %2367 }
  0xc6   : > { %v2503_v58 = vsel %vm760_vm10, %v1760_v33, %v2368_v14  ;;  %v4132_v33 = vcombine.low %v1520_v41, %v4693_v3  ;;  %v1633_v51 = vshrl.u32 %v4122_v15, 16  ;;  %v1636_v62 = vshll.u32 %v4122_v15, 16 }
  0xc7   : > { %v2559_v26 = vsel %vm2555_vm6, %v2503_v58, %v2463_v39  ;;  %v1604_v39 = vsel %vm1578_vm1, %v5412_v21, %v5503_v16  ;;  %v1522_v14 = vsel %vm1486_vm12, 65537, %v4608_v1 }
  0xc8   : > { %v2604_v19 = vshrl.u32 %v2559_v26, 16  ;;  %v2607_v63 = vshll.u32 %v2559_v26, 16  ;;  %vm1742_vm5 = vcmp.ne.s16.totalorder %v1604_v39, 0  ;;  %v1723_v9 = vshrl.u32 %v4132_v33, 16  ;;  %v4575_v26 = vld [vmem:[#allocation2 + $0x10] sm:$0xff] }
  0xc9   : > { %v2382_v4 = vpop.permute.xlu0 %2381  ;;  %v1635_v37 = vrot.slane %v1633_v51, 4  ;;  %v1638_v58 = vrot.slane %v1636_v62, 5  ;;  %v4133_v12 = vcombine.low %v1522_v14, %v4693_v3  ;;  %v1761_v34 = vsel %vm1742_vm5, 0, %v4575_v26 }
  0xca   : > { %v2606_v53 = vrot.slane %v2604_v19, 3  ;;  %v2609_v38 = vrot.slane %v2607_v63, 4  ;;  %v2524_v17 = vsel %vm760_vm10, %v1767_v44, %v2382_v4  ;;  %v1725_v52 = vrot.slane %v1723_v9, 4 }
  0xcb   : > { %v2573_v57 = vsel %vm2555_vm6, %v2524_v17, %v5405_v28  ;;  %v5527_v7 = vpop.permute.xlu1 %2484  ;;  %v5532_v28 = vcombine.low %v1494_v10, %v4693_v3  ;;  %v5550_v4 = vor.u32 %v1638_v58, %v1635_v37 }
  0xcc   : > { %v2660_v50 = vshrl.u32 %v2573_v57, 16  ;;  %v2663_v35 = vshll.u32 %v2573_v57, 16  ;;  %v5524_v46 = vor.u32 %v2609_v38, %v2606_v53  ;;  %v1735_v38 = vshll.u32 %v4133_v12, 16 }
  0xcd   : > { %v2384_v44 = vpop.permute.xlu0 %2383  ;;  %v1606_v51 = vshrl.u32 %v5532_v28, 16 }
  0xce   : > { %v2662_v21 = vrot.slane %v2660_v50, 3  ;;  %v2527_v49 = vsel %vm760_vm10, %v1768_v27, %v2384_v44  ;;  %v2611_v48 = vsel %vm2013_vm7, %v2603_v56, %v5524_v46  ;;  %v2665_v23 = vrot.slane %v2663_v35, 4 }
  0xcf   : > { %v2575_v8 = vsel %vm2555_vm6, %v2527_v49, %v5414_v29  ;;  %4420 = vmatprep.mubr.msk.bf16.mxu0 %vm2741_vm13, %v2611_v48  ;;  %v1726_v27 = vshll.u32 %v4132_v33, 16  ;;  %v1732_v56 = vshrl.u32 %v4133_v12, 16  ;;  %v1702_v35 = vor.u32 %v1701_v30, %v1698_v24 }
  0xd0   : > { %v2668_v0 = vshrl.u32 %v2575_v8, 16  ;;  %v2671_v6 = vshll.u32 %v2575_v8, 16  ;;  %v5548_v10 = vor.u32 %v2665_v23, %v2662_v21  ;;  %v4120_v33 = vcombine.low %v5512_v13, %v4693_v3 }
  0xd1   : > { %v2388_v59 = vpop.permute.xlu0 %2387  ;;  %v1728_v57 = vrot.slane %v1726_v27, 5  ;;  %v1734_v39 = vrot.slane %v1732_v56, 4  ;;  %v1609_v13 = vshll.u32 %v5532_v28, 16  ;;  %v1703_v26 = vsel %vm1578_vm1, %v5431_v5, %v1702_v35 }
  0xd2   : > { %v2670_v20 = vrot.slane %v2668_v0, 3  ;;  %v2673_v36 = vrot.slane %v2671_v6, 4  ;;  %v2533_v29 = vsel %vm760_vm10, %v5483_v54, %v2388_v59  ;;  %v5555_v54 = vsel %vm1578_vm1, %v5550_v4, %v5421_v32 }
  0xd3   : > { %v2579_v63 = vsel %vm2555_vm6, %v2533_v29, %v5442_v25  ;;  %v1737_v32 = vrot.slane %v1735_v38, 5  ;;  %v5573_v30 = vor.u32 %v1728_v57, %v1725_v52  ;;  %v1618_v37 = vshll.u32 %v4120_v33, 16 }
  0xd4   : > { %v2465_v19 = vpop.permute.xlu1 %2464  ;;  %v2684_v41 = vshrl.u32 %v2579_v63, 16  ;;  %v2687_v60 = vshll.u32 %v2579_v63, 16  ;;  %v2674_v53 = vor.u32 %v2673_v36, %v2670_v20  ;;  %v5590_v29 = vor.u32 %v5529_v42, %v5522_v43 }
  0xd5   : > { %v2370_v17 = vpop.permute.xlu0 %2369  ;;  %v5575_v62 = vor.u32 %v1737_v32, %v1734_v39  ;;  %v1611_v43 = vrot.slane %v1609_v13, 5  ;;  %v1620_v42 = vrot.slane %v1618_v37, 5  ;;  %vm1753_vm8 = vcmp.ne.s16.totalorder %v1703_v26, 0 }
  0xd6   : > { %v2506_v25 = vsel %vm760_vm10, %v1761_v34, %v2370_v17  ;;  %v5560_v50 = vsel %vm2013_vm7, %v5548_v10, %v2674_v53  ;;  %v2686_v15 = vrot.slane %v2684_v41, 3  ;;  %v2689_v21 = vrot.slane %v2687_v60, 4 }
  0xd7   : > { %v2561_v49 = vsel %vm2555_vm6, %v2506_v25, %v2465_v19  ;;  %4436 = vmatprep.mubr.msk.bf16.mxu1 %vm2741_vm13, %v5560_v50  ;;  %v5580_v58 = vsel %vm1578_vm1, %v5573_v30, %v5575_v62  ;;  %v1106_v34 = vand.u32 15, %v5492_v61  ;;  %v4566_v19 = vld [vmem:[%s6067_s3 + $0x20] ss:$0 sps:$4 sm:$0xff]   ;;  %v1608_v41 = vrot.slane %v1606_v51, 4  ;;  %v4565_v61 = vld [vmem:[%s6067_s3 + $0x14] ss:$0 sps:$4 sm:$0xff]  }
  0xd8   : > { %v2386_v44 = vpop.permute.xlu1 %2385  ;;  %v2612_v23 = vshrl.u32 %v2561_v49, 16  ;;  %v2615_v8 = vshll.u32 %v2561_v49, 16  ;;  %v2690_v59 = vor.u32 %v2689_v21, %v2686_v15  ;;  %v3296_v57 = vsel %vm710_vm9, %v4566_v19, 0  ;;  %v4576_v15 = vld [vmem:[#allocation2 + $0x68] sm:$0xff] }
  0xd9   : > { %v2530_v48 = vsel %vm760_vm10, %v5480_v22, %v2386_v44  ;;  %v1615_v22 = vshrl.u32 %v4120_v33, 16  ;;  %vm5623_vm11 = vcmp.eq.s32.totalorder %v1106_v34, 0  ;;  %v1612_v39 = vor.u32 %v1611_v43, %v1608_v41  ;;  %v4579_v34 = vld [vmem:[#allocation2 + $0x20] sm:$0xff] }
  0xda   : > { %v2577_v24 = vsel %vm2555_vm6, %v2530_v48, %v5419_v18  ;;  %v2614_v9 = vrot.slane %v2612_v23, 3  ;;  %v2617_v14 = vrot.slane %v2615_v8, 4  ;;  %v1772_v21 = vsel %vm1753_vm8, 0, %v4576_v15  ;;  %vm1482_vm14 = vmpackc.low %vm5623_vm11, %vm5623_vm11 }
  0xdb   : > { %v2676_v0 = vshrl.u32 %v2577_v24, 16  ;;  %v2679_v6 = vshll.u32 %v2577_v24, 16  ;;  %v1617_v5 = vrot.slane %v1615_v22, 4  ;;  %v1518_v51 = vsel %vm1482_vm14, 65537, %v4608_v1  ;;  %v4577_v24 = vld [vmem:[#allocation2 + $0x70] sm:$0xff] }
  0xdc   : > { %v2390_v27 = vpop.permute.xlu1 %2389  ;;  %v5584_v20 = vor.u32 %v2617_v14, %v2614_v9  ;;  %vm1757_vm14 = vcmp.ne.s16.totalorder %v5580_v58, 0  ;;  %v4582_v58 = vld [vmem:[#allocation2 + $0x88] sm:$0xff] }
  0xdd   : > { %v2678_v18 = vrot.slane %v2676_v0, 3  ;;  %v2681_v12 = vrot.slane %v2679_v6, 4  ;;  %v2536_v28 = vsel %vm760_vm10, %v5486_v55, %v2390_v27  ;;  %v5631_v44 = vor.u32 %v1620_v42, %v1617_v5 }
  0xde   : > { %v2581_v36 = vsel %vm2555_vm6, %v2536_v28, %v5527_v7  ;;  %v5601_v7 = vsel %vm2013_vm7, %v5524_v46, %v5584_v20  ;;  %v866_v46 = vadd.s32 80, %v4690_v2  ;;  %v3012_v2 = vsel %vm710_vm9, %v4565_v61, 0 }
  0xdf   : > { %v2682_v63 = vor.u32 %v2681_v12, %v2678_v18  ;;  %v2692_v55 = vshrl.u32 %v2581_v36, 16  ;;  %v2695_v56 = vshll.u32 %v2581_v36, 16  ;;  %4421 = vmatmul.mubr.msk.bf16.vlgmr.msra.gmra.mrb[0].mxu0 %vm2741_vm13, %v5601_v7  ;;  %v1622_v23 = vsel %vm1578_vm1, %v1612_v39, %v5631_v44  ;;  %v4578_v12 = vld [vmem:[#allocation2 + $0x18] sm:$0xff] }
  0xe0   : > { %4489 = vmatpush3.bf16.msra.mxu0 %v5388_v11  ;;  %v1712_v11 = vsel %vm1578_vm1, %v1702_v35, %v5590_v29  ;;  %v1613_v35 = vsel %vm1578_vm1, %v5503_v16, %v1612_v39  ;;  %vm1744_vm4 = vcmp.ne.s16.totalorder %v1622_v23, 0 }
  0xe1   : > { %v2694_v60 = vrot.slane %v2692_v55, 3  ;;  %v2697_v38 = vrot.slane %v2695_v56, 4  ;;  %v5609_v17 = vsel %vm2013_vm7, %v2674_v53, %v2682_v63  ;;  %v5612_v52 = vsel %vm2013_vm7, %v2682_v63, %v2690_v59  ;;  %4531 = vmatprep.subr.msk.bf16.mxu0 %vm710_vm9, %v4566_v19 }
  0xe2   : > { %4437 = vmatmul.mubr.msk.bf16.vlgmr.msra.gmra.mrb[0].mxu1 %vm2741_vm13, %v5609_v17  ;;  %vm1754_vm15 = vcmp.ne.s16.totalorder %v1712_v11, 0  ;;  %vm1743_vm2 = vcmp.ne.s16.totalorder %v1613_v35, 0  ;;  %v1763_v19 = vsel %vm1744_vm4, 0, %v4579_v34 }
  0xe3   : > { %4440 = vmatprep.mubr.msk.bf16.mxu1 %vm2741_vm13, %v5612_v52  ;;  %4453 = vmatpush3.bf16.msra.mxu1 %v5383_v45  ;;  %v2698_v25 = vor.u32 %v2697_v38, %v2694_v60  ;;  %v966_v45 = vand.u32 15, %v866_v46  ;;  %v1773_v13 = vsel %vm1754_vm15, 0, %v4577_v24  ;;  %v1762_v28 = vsel %vm1743_vm2, 0, %v4578_v12  ;;  %v4580_v12 = vld [vmem:[#allocation2 + $0x78] sm:$0xff] }
  0xe4   : > { %4530 = vmatprep.subr.msk.bf16.mxu1 %vm710_vm9, %v4565_v61  ;;  %v2392_v33 = vpop.permute.xlu0 %2391  ;;  %4491 = vmatpush3.bf16.msra.mxu0 %v3296_v57  ;;  %vm1758_vm15 = vcmp.ne.s16.totalorder %v5575_v62, 0 }
  0xe5   : > { %v2539_v32 = vsel %vm760_vm10, %v1772_v21, %v2392_v33  ;;  %v5642_v8 = vsel %vm2013_vm7, %v2690_v59, %v2698_v25  ;;  %vm5648_vm9 = vcmp.eq.s32.totalorder %v966_v45, 0  ;;  %v4131_v59 = vcombine.low %v1518_v51, %v4693_v3 }
  0xe6   : > { %v2394_v49 = vpop.permute.xlu1 %2393  ;;  %vm1462_vm3 = vmpackc.low %vm5648_vm9, %vm5648_vm9 }
  0xe7   : > { %4455 = vmatpush3.bf16.msra.mxu1 %v3012_v2  ;;  %v2542_v27 = vsel %vm760_vm10, %v1773_v13, %v2394_v49  ;;  %v1714_v41 = vshrl.u32 %v4131_v59, 16  ;;  %v1717_v43 = vshll.u32 %v4131_v59, 16  ;;  %v1498_v5 = vsel %vm1462_vm3, 65537, %v4608_v1 }
  0xe8   : > { %v2487_v48 = vpop.permute.xlu0 %2486  ;;  %v4121_v21 = vcombine.low %v1498_v5, %v4693_v3 }
  0xe9   : > { %v2583_v0 = vsel %vm2555_vm6, %v2539_v32, %v2487_v48  ;;  %v1716_v33 = vrot.slane %v1714_v41, 4  ;;  %v1719_v15 = vrot.slane %v1717_v43, 5 }
  0xea   : > { %4441 = vmatmul.mubr.msk.bf16.gmra.mrb[4].mxu1 %vm2741_vm13, %v5642_v8  ;;  %v2372_v6 = vpop.permute.xlu1 %2371  ;;  %v2700_v9 = vshrl.u32 %v2583_v0, 16  ;;  %v2703_v14 = vshll.u32 %v2583_v0, 16  ;;  %v1624_v0 = vshrl.u32 %v4121_v21, 16  ;;  %v1627_v16 = vshll.u32 %v4121_v21, 16 }
  0xeb   : > { %v2509_v42 = vsel %vm760_vm10, %v1762_v28, %v2372_v6  ;;  %v1720_v13 = vor.u32 %v1719_v15, %v1716_v33 }
  0xec   : > { %v2702_v22 = vrot.slane %v2700_v9, 3  ;;  %v2705_v37 = vrot.slane %v2703_v14, 4  ;;  %v2489_v18 = vpop.permute.xlu0 %2488  ;;  %v1626_v59 = vrot.slane %v1624_v0, 4 }
  0xed   : > { %v2585_v36 = vsel %vm2555_vm6, %v2542_v27, %v2489_v18  ;;  %v1721_v14 = vsel %vm1578_vm1, %v5590_v29, %v1720_v13  ;;  %v1629_v27 = vrot.slane %v1627_v16, 5 }
  0xee   : > { %v2706_v26 = vor.u32 %v2705_v37, %v2702_v22  ;;  %v2708_v63 = vshrl.u32 %v2585_v36, 16  ;;  %v2711_v55 = vshll.u32 %v2585_v36, 16  ;;  %vm1755_vm5 = vcmp.ne.s16.totalorder %v1721_v14, 0 }
  0xef   : > { %v1730_v22 = vsel %vm1578_vm1, %v1720_v13, %v5573_v30  ;;  %v1630_v37 = vor.u32 %v1629_v27, %v1626_v59  ;;  %v1774_v28 = vsel %vm1755_vm5, 0, %v4580_v12 }
  0xf0   : > { %v2374_v56 = vpop.permute.xlu1 %2373  ;;  %v2710_v61 = vrot.slane %v2708_v63, 3  ;;  %v2713_v60 = vrot.slane %v2711_v55, 4  ;;  %v2467_v38 = vpop.permute.xlu0 %2466  ;;  %v5661_v46 = vsel %vm2013_vm7, %v2698_v25, %v2706_v26  ;;  %vm1756_vm12 = vcmp.ne.s16.totalorder %v1730_v22, 0 }
  0xf1   : > { %v2512_v57 = vsel %vm760_vm10, %v1763_v19, %v2374_v56  ;;  %v2563_v53 = vsel %vm2555_vm6, %v2509_v42, %v2467_v38  ;;  %4444 = vmatprep.mubr.msk.bf16.mxu1 %vm2741_vm13, %v5661_v46  ;;  %v1640_v36 = vsel %vm1578_vm1, %v1630_v37, %v5550_v4  ;;  %v1631_v29 = vsel %vm1578_vm1, %v5631_v44, %v1630_v37 }
  0xf2   : > { %v5667_v11 = vor.u32 %v2713_v60, %v2710_v61  ;;  %v2620_v39 = vshrl.u32 %v2563_v53, 16  ;;  %v2623_v2 = vshll.u32 %v2563_v53, 16  ;;  %vm1746_vm8 = vcmp.ne.s16.totalorder %v1640_v36, 0  ;;  %v4581_v61 = vld [vmem:[#allocation2 + $0x28] sm:$0xff] }
  0xf3   : > { %v1775_v63 = vsel %vm1756_vm12, 0, %v5245_v31  ;;  %vm1745_vm11 = vcmp.ne.s16.totalorder %v1631_v29, 0  ;;  %v1765_v41 = vsel %vm1746_vm8, 0, %v5255_v47  ;;  %vm1747_vm1 = vcmp.ne.s16.totalorder %v5555_v54, 0 }
  0xf4   : > { %v2469_v1 = vpop.permute.xlu1 %2468  ;;  %v2622_v25 = vrot.slane %v2620_v39, 3  ;;  %v2625_v49 = vrot.slane %v2623_v2, 4  ;;  %v5673_v35 = vsel %vm2013_vm7, %v2706_v26, %v5667_v11  ;;  %v1764_v60 = vsel %vm1745_vm11, 0, %v4581_v61 }
  0xf5   : > { %v2565_v45 = vsel %vm2555_vm6, %v2512_v57, %v2469_v1  ;;  %4445 = vmatmul.mubr.msk.bf16.gmra.mrb[8].mxu1 %vm2741_vm13, %v5673_v35  ;;  %v1766_v54 = vsel %vm1747_vm1, 0, %v5260_v40  ;;  %v1776_v22 = vsel %vm1757_vm14, 0, %v4582_v58 }
  0xf6   : > { %v2628_v32 = vshrl.u32 %v2565_v45, 16  ;;  %v2631_v48 = vshll.u32 %v2565_v45, 16  ;;  %v2626_v23 = vor.u32 %v2625_v49, %v2622_v25 }
  0xf8   : > { %v2630_v51 = vrot.slane %v2628_v32, 3  ;;  %v2633_v24 = vrot.slane %v2631_v48, 4  ;;  %v5679_v3 = vsel %vm2013_vm7, %v5584_v20, %v2626_v23 }
  0xf9   : > { %4424 = vmatprep.mubr.msk.bf16.mxu0 %vm2741_vm13, %v5679_v3 }
  0xfa   : > { %v5681_v6 = vor.u32 %v2633_v24, %v2630_v51 }
  0xfc   : > { %v5687_v9 = vsel %vm2013_vm7, %v2626_v23, %v5681_v6 }
  0xfd   : > { %4425 = vmatmul.mubr.msk.bf16.gmra.mrb[4].mxu0 %vm2741_vm13, %v5687_v9 }
  0xff   : > { %v2396_v20 = vpop.permute.xlu0 %2395 }
 0x100   : > { %v2545_v26 = vsel %vm760_vm10, %v1774_v28, %v2396_v20 }
 0x101   : > { %v2398_v18 = vpop.permute.xlu1 %2397 }
 0x102   : > { %v2548_v4 = vsel %vm760_vm10, %v1775_v63, %v2398_v18 }
 0x104   : > { %v2491_v19 = vpop.permute.xlu0 %2490 }
 0x105   : > { %v2376_v34 = vpop.permute.xlu1 %2375  ;;  %v2587_v30 = vsel %vm2555_vm6, %v2545_v26, %v2491_v19 }
 0x106   : > { %v2716_v55 = vshrl.u32 %v2587_v30, 16  ;;  %v2719_v56 = vshll.u32 %v2587_v30, 16  ;;  %v2515_v2 = vsel %vm760_vm10, %v1764_v60, %v2376_v34 }
 0x108   : > { %v2718_v43 = vrot.slane %v2716_v55, 3  ;;  %v2721_v5 = vrot.slane %v2719_v56, 4  ;;  %v2493_v44 = vpop.permute.xlu0 %2492 }
 0x109   : > { %v2378_v42 = vpop.permute.xlu1 %2377  ;;  %v2589_v38 = vsel %vm2555_vm6, %v2548_v4, %v2493_v44 }
 0x10a   : > { %v2722_v31 = vor.u32 %v2721_v5, %v2718_v43  ;;  %v2518_v57 = vsel %vm760_vm10, %v1765_v41, %v2378_v42  ;;  %v2724_v53 = vshrl.u32 %v2589_v38, 16  ;;  %v2727_v39 = vshll.u32 %v2589_v38, 16 }
 0x10c   : > { %v2726_v47 = vrot.slane %v2724_v53, 3  ;;  %v2729_v1 = vrot.slane %v2727_v39, 4  ;;  %v2471_v15 = vpop.permute.xlu0 %2470  ;;  %v5710_v21 = vsel %vm2013_vm7, %v5667_v11, %v2722_v31 }
 0x10d   : > { %v2473_v33 = vpop.permute.xlu1 %2472  ;;  %v2567_v25 = vsel %vm2555_vm6, %v2515_v2, %v2471_v15  ;;  %4448 = vmatprep.mubr.msk.bf16.mxu1 %vm2741_vm13, %v5710_v21 }
 0x10e   : > { %v2569_v45 = vsel %vm2555_vm6, %v2518_v57, %v2473_v33  ;;  %v2730_v49 = vor.u32 %v2729_v1, %v2726_v47  ;;  %v2636_v23 = vshrl.u32 %v2567_v25, 16  ;;  %v2639_v51 = vshll.u32 %v2567_v25, 16 }
 0x10f   : > { %v2644_v32 = vshrl.u32 %v2569_v45, 16  ;;  %v2647_v48 = vshll.u32 %v2569_v45, 16  ;;  %v4612_v45 = vmov 0.0  }
 0x110   : > { %v2638_v11 = vrot.slane %v2636_v23, 3  ;;  %v2380_v0 = vpop.permute.xlu0 %2379  ;;  %v5719_v14 = vsel %vm2013_vm7, %v2722_v31, %v2730_v49  ;;  %v2641_v59 = vrot.slane %v2639_v51, 4 }
 0x111   : > { %v2646_v24 = vrot.slane %v2644_v32, 3  ;;  %v2649_v13 = vrot.slane %v2647_v48, 4  ;;  %v2475_v16 = vpop.permute.xlu1 %2474  ;;  %v2521_v27 = vsel %vm760_vm10, %v1766_v54, %v2380_v0  ;;  %4449 = vmatmul.mubr.msk.bf16.gmra.mrb[12].mxu1 %vm2741_vm13, %v5719_v14 }
 0x112   : > { %v2571_v20 = vsel %vm2555_vm6, %v2521_v27, %v2475_v16  ;;  %4456 = vmatprep.mubr.msk.bf16.mxu1 %vm2741_vm13, %v5601_v7  ;;  %v2642_v37 = vor.u32 %v2641_v59, %v2638_v11 }
 0x113   : > { %v2650_v40 = vor.u32 %v2649_v13, %v2646_v24  ;;  %v2652_v18 = vshrl.u32 %v2571_v20, 16  ;;  %v2655_v12 = vshll.u32 %v2571_v20, 16 }
 0x114   : > { %v2400_v28 = vpop.permute.xlu0 %2399  ;;  %v2643_v19 = vsel %vm2013_vm7, %v5681_v6, %v2642_v37 }
 0x115   : > { %v2495_v36 = vpop.permute.xlu1 %2494  ;;  %v2654_v29 = vrot.slane %v2652_v18, 3  ;;  %v2657_v26 = vrot.slane %v2655_v12, 4  ;;  %v2551_v34 = vsel %vm760_vm10, %v1776_v22, %v2400_v28  ;;  %4428 = vmatprep.mubr.msk.bf16.mxu0 %vm2741_vm13, %v2643_v19  ;;  %v2651_v7 = vsel %vm2013_vm7, %v2642_v37, %v2650_v40 }
 0x116   : > { %v2591_v63 = vsel %vm2555_vm6, %v2551_v34, %v2495_v36  ;;  %4429 = vmatmul.mubr.msk.bf16.gmra.mrb[8].mxu0 %vm2741_vm13, %v2651_v7 }
 0x117   : > { %v2658_v30 = vor.u32 %v2657_v26, %v2654_v29  ;;  %v2991_v55 = vshrl.u32 %v2591_v63, 16  ;;  %v2994_v56 = vshll.u32 %v2591_v63, 16 }
 0x119   : > { %v2993_v41 = vrot.slane %v2991_v55, 3  ;;  %v2996_v4 = vrot.slane %v2994_v56, 4  ;;  %4457 = vmatmul.mubr.msk.bf16.vlgmr.msra.gmra.mrb[16].mxu1 %vm2741_vm13, %v5679_v3  ;;  %v2659_v43 = vsel %vm2013_vm7, %v2650_v40, %v2658_v30  ;;  %v2667_v42 = vsel %vm2013_vm7, %v2658_v30, %v5548_v10  ;;  %v4583_v10 = vld [vmem:[#allocation2 + $0x90] sm:$0xf] }
 0x11a   : > { %4432 = vmatprep.mubr.msk.bf16.mxu0 %vm2741_vm13, %v2659_v43  ;;  %4460 = vmatprep.mubr.msk.bf16.mxu1 %vm2741_vm13, %v5687_v9 }
 0x11b   : > { %v2997_v6 = vor.u32 %v2996_v4, %v2993_v41 }
 0x11d   : > { %v2998_v5 = vsel %vm2013_vm7, %v2730_v49, %v2997_v6 }
 0x11e   : > { %4433 = vmatmul.mubr.msk.bf16.gmra.mrb[12].mxu0 %vm2741_vm13, %v2667_v42 }
 0x11f   : > { %4492 = vmatprep.mubr.msk.bf16.mxu0 %vm2741_vm13, %v5679_v3  ;;  %v2497_v3 = vpop.permute.xlu1 %2496 }
 0x121   : > { %4461 = vmatmul.mubr.msk.bf16.gmra.mrb[20].mxu1 %vm2741_vm13, %v2643_v19 }
 0x122   : > { %4464 = vmatprep.mubr.msk.bf16.mxu1 %vm2741_vm13, %v2651_v7 }
 0x126   : > { %4493 = vmatmul.mubr.msk.bf16.vlgmr.msra.gmra.mrb[16].mxu0 %vm2741_vm13, %v5687_v9 }
 0x127   : > { %4496 = vmatprep.mubr.msk.bf16.mxu0 %vm2741_vm13, %v2643_v19 }
 0x129   : > { %4465 = vmatmul.mubr.msk.bf16.gmra.mrb[24].mxu1 %vm2741_vm13, %v2659_v43 }
 0x12a   : > { %4468 = vmatprep.mubr.msk.bf16.mxu1 %vm2741_vm13, %v2667_v42 }
 0x12e   : > { %4497 = vmatmul.mubr.msk.bf16.gmra.mrb[20].mxu0 %vm2741_vm13, %v2651_v7 }
 0x12f   : > { %4500 = vmatprep.mubr.msk.bf16.mxu0 %vm2741_vm13, %v2659_v43 }
 0x131   : > { %4469 = vmatmul.mubr.msk.bf16.gmra.mrb[28].mxu1 %vm2741_vm13, %v5560_v50 }
 0x132   : > { %4472 = vmatprep.mubr.msk.bf16.mxu1 %vm2741_vm13, %v5609_v17 }
 0x136   : > { %4501 = vmatmul.mubr.msk.bf16.gmra.mrb[24].mxu0 %vm2741_vm13, %v2667_v42 }
 0x137   : > { %4504 = vmatprep.mubr.msk.bf16.mxu0 %vm2741_vm13, %v5560_v50  ;;  %v1777_v50 = vsel %vm1758_vm15, 0, %v4583_v10 }
 0x139   : > { %4473 = vmatmul.mubr.msk.bf16.gmra.mrb[32].mxu1 %vm2741_vm13, %v5612_v52 }
 0x13a   : > { %4476 = vmatprep.mubr.msk.bf16.mxu1 %vm2741_vm13, %v5642_v8 }
 0x13e   : > { %4505 = vmatmul.mubr.msk.bf16.gmra.mrb[28].mxu0 %vm2741_vm13, %v5609_v17  ;;  %v2402_v17 = vpop.permute.xlu0 %2401 }
 0x13f   : > { %4508 = vmatprep.mubr.msk.bf16.mxu0 %vm2741_vm13, %v5612_v52  ;;  %v2554_v52 = vsel %vm760_vm10, %v1777_v50, %v2402_v17 }
 0x140   : > { %v2593_v62 = vsel %vm2555_vm6, %v2554_v52, %v2497_v3 }
 0x141   : > { %4477 = vmatmul.mubr.msk.bf16.gmra.mrb[36].mxu1 %vm2741_vm13, %v5661_v46 }
 0x142   : > { %4480 = vmatprep.mubr.msk.bf16.mxu1 %vm2741_vm13, %v5673_v35 }
 0x146   : > { %4509 = vmatmul.mubr.msk.bf16.gmra.mrb[32].mxu0 %vm2741_vm13, %v5642_v8  ;;  %v3275_v8 = vshrl.u32 %v2593_v62, 16 }
 0x147   : > { %4512 = vmatprep.mubr.msk.bf16.mxu0 %vm2741_vm13, %v5661_v46  ;;  %v3278_v46 = vshll.u32 %v2593_v62, 16 }
 0x148   : > { %v3277_v9 = vrot.slane %v3275_v8, 3 }
 0x149   : > { %4481 = vmatmul.mubr.msk.bf16.gmra.mrb[40].mxu1 %vm2741_vm13, %v5710_v21  ;;  %v3280_v44 = vrot.slane %v3278_v46, 4 }
 0x14a   : > { %4484 = vmatprep.mubr.msk.bf16.mxu1 %vm2741_vm13, %v5719_v14 }
 0x14b   : > { %v3281_v61 = vor.u32 %v3280_v44, %v3277_v9 }
 0x14d   : > { %v3282_v60 = vsel %vm2013_vm7, %v2997_v6, %v3281_v61  ;;  %vm497_vm7 = vcmask 57344  }
 0x14e   : > { %4513 = vmatmul.mubr.msk.bf16.gmra.mrb[36].mxu0 %vm2741_vm13, %v5673_v35  ;;  %498 = vst.msk [vmem:[%s5811_s16] sm:$0x1] %vm497_vm7, %v4612_v45  ;;  %499 = vst.msk [vmem:[%s5817_s19] sm:$0x1] %vm497_vm7, %v4612_v45 }
 0x14f   : > { %4516 = vmatprep.mubr.msk.bf16.mxu0 %vm2741_vm13, %v5710_v21 }
 0x151   : > { %4485 = vmatmul.mubr.msk.bf16.gmra.mrb[44].mxu1 %vm2741_vm13, %v2998_v5 }
 0x156   : > { %4517 = vmatmul.mubr.msk.bf16.gmra.mrb[40].mxu0 %vm2741_vm13, %v5719_v14 }
 0x157   : > { %4520 = vmatprep.mubr.msk.bf16.mxu0 %vm2741_vm13, %v2998_v5 }
 0x15e   : > { %4521 = vmatmul.mubr.msk.bf16.gmra.mrb[44].mxu0 %vm2741_vm13, %v3282_v60 }
 0x1b2   : > { %v4422_v35 = vpop.f32.mrb[0].mxu0 }
 0x1b3   : > { %2957 = vst.msk [vmem:[#allocation3 + $0x10] sm:$0xff] %vm760_vm10, %v4422_v35  ;;  %v2828_v38 = vpop.f32.mrb[1].mxu0 }
 0x1b4   : > { %2955 = vst.msk [vmem:[#allocation3] sm:$0xff] %vm760_vm10, %v2828_v38  ;;  %v4423_v57 = vpop.f32.mrb[2].mxu0 }
 0x1b5   : > { %v4438_v31 = vpop.f32.mrb[0].mxu1  ;;  %2958 = vst.msk [vmem:[#allocation3 + $0x18] sm:$0xff] %vm760_vm10, %v4423_v57  ;;  %v2831_v39 = vpop.f32.mrb[3].mxu0 }
 0x1b6   : > { %2973 = vst.msk [vmem:[#allocation3 + $0x90] sm:$0xff] %vm760_vm10, %v4438_v31  ;;  %v2892_v53 = vpop.f32.mrb[1].mxu1  ;;  %2956 = vst.msk [vmem:[#allocation3 + $0x8] sm:$0xff] %vm760_vm10, %v2831_v39 }
 0x1b7   : > { %2971 = vst.msk [vmem:[#allocation3 + $0x80] sm:$0xff] %vm760_vm10, %v2892_v53  ;;  %v4439_v2 = vpop.f32.mrb[2].mxu1 }
 0x1b8   : > { %2974 = vst.msk [vmem:[#allocation3 + $0x98] sm:$0xff] %vm760_vm10, %v4439_v2  ;;  %v2895_v47 = vpop.f32.mrb[3].mxu1 }
 0x1b9   : > { %2972 = vst.msk [vmem:[#allocation3 + $0x88] sm:$0xff] %vm760_vm10, %v2895_v47 }
 0x1ba   : > { %v3177_v20 = vld [vmem:[#allocation3 + $0x10] sm:$0xff] }
 0x1bb   : > { %v3175_v18 = vld [vmem:[#allocation3] sm:$0xff] }
 0x1bc   : > { %v3178_v36 = vld [vmem:[#allocation3 + $0x18] sm:$0xff] }
 0x1bd   : > { %v4442_v1 = vpop.f32.mrb[4].mxu1  ;;  %v3176_v34 = vld [vmem:[#allocation3 + $0x8] sm:$0xff] }
 0x1be   : > { %2977 = vst.msk [vmem:[#allocation3 + $0xb0] sm:$0xff] %vm760_vm10, %v4442_v1  ;;  %v2908_v33 = vpop.f32.mrb[5].mxu1 }
 0x1bf   : > { %2975 = vst.msk [vmem:[#allocation3 + $0xa0] sm:$0xff] %vm760_vm10, %v2908_v33  ;;  %v4443_v15 = vpop.f32.mrb[6].mxu1 }
 0x1c0   : > { %2978 = vst.msk [vmem:[#allocation3 + $0xb8] sm:$0xff] %vm760_vm10, %v4443_v15  ;;  %v2911_v21 = vpop.f32.mrb[7].mxu1 }
 0x1c1   : > { %2976 = vst.msk [vmem:[#allocation3 + $0xa8] sm:$0xff] %vm760_vm10, %v2911_v21 }
 0x1c8   : > { %v4446_v25 = vpop.f32.mrb[8].mxu1 }
 0x1c9   : > { %2981 = vst.msk [vmem:[#allocation3 + $0xd0] sm:$0xff] %vm760_vm10, %v4446_v25  ;;  %v2924_v54 = vpop.f32.mrb[9].mxu1 }
 0x1ca   : > { %2979 = vst.msk [vmem:[#allocation3 + $0xc0] sm:$0xff] %vm760_vm10, %v2924_v54  ;;  %v4447_v49 = vpop.f32.mrb[10].mxu1 }
 0x1cb   : > { %2982 = vst.msk [vmem:[#allocation3 + $0xd8] sm:$0xff] %vm760_vm10, %v4447_v49  ;;  %v2927_v32 = vpop.f32.mrb[11].mxu1 }
 0x1cc   : > { %2980 = vst.msk [vmem:[#allocation3 + $0xc8] sm:$0xff] %vm760_vm10, %v2927_v32 }
 0x1d0   : > { %v4426_v48 = vpop.f32.mrb[4].mxu0 }
 0x1d1   : > { %2961 = vst.msk [vmem:[#allocation3 + $0x30] sm:$0xff] %vm760_vm10, %v4426_v48  ;;  %v2844_v23 = vpop.f32.mrb[5].mxu0 }
 0x1d2   : > { %2959 = vst.msk [vmem:[#allocation3 + $0x20] sm:$0xff] %vm760_vm10, %v2844_v23  ;;  %v4427_v51 = vpop.f32.mrb[6].mxu0 }
 0x1d3   : > { %2962 = vst.msk [vmem:[#allocation3 + $0x38] sm:$0xff] %vm760_vm10, %v4427_v51  ;;  %v2847_v24 = vpop.f32.mrb[7].mxu0 }
 0x1d4   : > { %2960 = vst.msk [vmem:[#allocation3 + $0x28] sm:$0xff] %vm760_vm10, %v2847_v24 }
 0x1d8   : > { %v3181_v56 = vld [vmem:[#allocation3 + $0x30] sm:$0xff] }
 0x1d9   : > { %v3179_v6 = vld [vmem:[#allocation3 + $0x20] sm:$0xff] }
 0x1da   : > { %v3182_v10 = vld [vmem:[#allocation3 + $0x38] sm:$0xff] }
 0x1db   : > { %v3180_v52 = vld [vmem:[#allocation3 + $0x28] sm:$0xff] }
 0x1e4   : > { %v4450_v13 = vpop.f32.mrb[12].mxu1 }
 0x1e5   : > { %2985 = vst.msk [vmem:[#allocation3 + $0xf0] sm:$0xff] %vm760_vm10, %v4450_v13  ;;  %v2940_v11 = vpop.f32.mrb[13].mxu1 }
 0x1e6   : > { %2983 = vst.msk [vmem:[#allocation3 + $0xe0] sm:$0xff] %vm760_vm10, %v2940_v11  ;;  %v4451_v0 = vpop.f32.mrb[14].mxu1 }
 0x1e7   : > { %2986 = vst.msk [vmem:[#allocation3 + $0xf8] sm:$0xff] %vm760_vm10, %v4451_v0  ;;  %v2943_v16 = vpop.f32.mrb[15].mxu1 }
 0x1e8   : > { %2984 = vst.msk [vmem:[#allocation3 + $0xe8] sm:$0xff] %vm760_vm10, %v2943_v16 }
 0x1e9   : > { %v4430_v14 = vpop.f32.mrb[8].mxu0 }
 0x1ea   : > { %2965 = vst.msk [vmem:[#allocation3 + $0x50] sm:$0xff] %vm760_vm10, %v4430_v14  ;;  %v2860_v59 = vpop.f32.mrb[9].mxu0 }
 0x1eb   : > { %2963 = vst.msk [vmem:[#allocation3 + $0x40] sm:$0xff] %vm760_vm10, %v2860_v59  ;;  %v4431_v27 = vpop.f32.mrb[10].mxu0 }
 0x1ec   : > { %v4458_v40 = vpop.f32.mrb[16].mxu1  ;;  %2966 = vst.msk [vmem:[#allocation3 + $0x58] sm:$0xff] %vm760_vm10, %v4431_v27  ;;  %v2863_v58 = vpop.f32.mrb[11].mxu0 }
 0x1ed   : > { %v3209_v22 = vadd.f32 %v4458_v40, %v3177_v20  ;;  %v3048_v37 = vpop.f32.mrb[17].mxu1  ;;  %2964 = vst.msk [vmem:[#allocation3 + $0x48] sm:$0xff] %vm760_vm10, %v2863_v58 }
 0x1ee   : > { %v3207_v12 = vadd.f32 %v3175_v18, %v3048_v37  ;;  %v4459_v28 = vpop.f32.mrb[18].mxu1 }
 0x1ef   : > { %3241 = vst.msk [vmem:[#allocation3 + $0x10] sm:$0xff] %vm760_vm10, %v3209_v22  ;;  %v3210_v29 = vadd.f32 %v4459_v28, %v3178_v36  ;;  %v3051_v26 = vpop.f32.mrb[19].mxu1 }
 0x1f0   : > { %3239 = vst.msk [vmem:[#allocation3] sm:$0xff] %vm760_vm10, %v3207_v12  ;;  %v3208_v19 = vadd.f32 %v3176_v34, %v3051_v26 }
 0x1f1   : > { %3242 = vst.msk [vmem:[#allocation3 + $0x18] sm:$0xff] %vm760_vm10, %v3210_v29  ;;  %v4434_v63 = vpop.f32.mrb[12].mxu0  ;;  %v3185_v31 = vld [vmem:[#allocation3 + $0x50] sm:$0xff] }
 0x1f2   : > { %3240 = vst.msk [vmem:[#allocation3 + $0x8] sm:$0xff] %vm760_vm10, %v3208_v19  ;;  %2969 = vst.msk [vmem:[#allocation3 + $0x70] sm:$0xff] %vm760_vm10, %v4434_v63  ;;  %v2876_v7 = vpop.f32.mrb[13].mxu0  ;;  %v3183_v1 = vld [vmem:[#allocation3 + $0x40] sm:$0xff] }
 0x1f3   : > { %2967 = vst.msk [vmem:[#allocation3 + $0x60] sm:$0xff] %vm760_vm10, %v2876_v7  ;;  %v4435_v30 = vpop.f32.mrb[14].mxu0  ;;  %v3186_v45 = vld [vmem:[#allocation3 + $0x58] sm:$0xff] }
 0x1f4   : > { %v4462_v55 = vpop.f32.mrb[20].mxu1  ;;  %2970 = vst.msk [vmem:[#allocation3 + $0x78] sm:$0xff] %vm760_vm10, %v4435_v30  ;;  %v2879_v41 = vpop.f32.mrb[15].mxu0  ;;  %v3184_v49 = vld [vmem:[#allocation3 + $0x48] sm:$0xff] }
 0x1f5   : > { %v3213_v4 = vadd.f32 %v4462_v55, %v3181_v56  ;;  %v3064_v43 = vpop.f32.mrb[21].mxu1  ;;  %2968 = vst.msk [vmem:[#allocation3 + $0x68] sm:$0xff] %vm760_vm10, %v2879_v41 }
 0x1f6   : > { %v3211_v5 = vadd.f32 %v3179_v6, %v3064_v43  ;;  %v4463_v42 = vpop.f32.mrb[22].mxu1  ;;  %v3461_v8 = vld [vmem:[#allocation3 + $0x10] sm:$0xff] }
 0x1f7   : > { %3245 = vst.msk [vmem:[#allocation3 + $0x30] sm:$0xff] %vm760_vm10, %v3213_v4  ;;  %v3214_v50 = vadd.f32 %v4463_v42, %v3182_v10  ;;  %v3067_v17 = vpop.f32.mrb[23].mxu1  ;;  %v3459_v44 = vld [vmem:[#allocation3] sm:$0xff] }
 0x1f8   : > { %3243 = vst.msk [vmem:[#allocation3 + $0x20] sm:$0xff] %vm760_vm10, %v3211_v5  ;;  %v3212_v3 = vadd.f32 %v3180_v52, %v3067_v17  ;;  %v3462_v35 = vld [vmem:[#allocation3 + $0x18] sm:$0xff] }
 0x1f9   : > { %3246 = vst.msk [vmem:[#allocation3 + $0x38] sm:$0xff] %vm760_vm10, %v3214_v50  ;;  %v4494_v62 = vpop.f32.mrb[16].mxu0  ;;  %v3460_v2 = vld [vmem:[#allocation3 + $0x8] sm:$0xff]  ;;  %v3189_v58 = vld [vmem:[#allocation3 + $0x70] sm:$0xff] }
 0x1fa   : > { %3244 = vst.msk [vmem:[#allocation3 + $0x28] sm:$0xff] %vm760_vm10, %v3212_v3  ;;  %v3493_v46 = vadd.f32 %v4494_v62, %v3461_v8  ;;  %v3332_v9 = vpop.f32.mrb[17].mxu0  ;;  %v3187_v43 = vld [vmem:[#allocation3 + $0x60] sm:$0xff] }
 0x1fb   : > { %v3491_v61 = vadd.f32 %v3459_v44, %v3332_v9  ;;  %v4495_v60 = vpop.f32.mrb[18].mxu0  ;;  %v3190_v50 = vld [vmem:[#allocation3 + $0x78] sm:$0xff] }
 0x1fc   : > { %v4466_v38 = vpop.f32.mrb[24].mxu1  ;;  %3525 = vst.msk [vmem:[#allocation3 + $0x10] sm:$0xff] %vm760_vm10, %v3493_v46  ;;  %v3494_v57 = vadd.f32 %v4495_v60, %v3462_v35  ;;  %v3335_v39 = vpop.f32.mrb[19].mxu0  ;;  %v3188_v17 = vld [vmem:[#allocation3 + $0x68] sm:$0xff] }
 0x1fd   : > { %v3217_v53 = vadd.f32 %v4466_v38, %v3185_v31  ;;  %v3080_v47 = vpop.f32.mrb[25].mxu1  ;;  %3523 = vst.msk [vmem:[#allocation3] sm:$0xff] %vm760_vm10, %v3491_v61  ;;  %v3492_v33 = vadd.f32 %v3460_v2, %v3335_v39 }
 0x1fe   : > { %v3215_v15 = vadd.f32 %v3183_v1, %v3080_v47  ;;  %v4467_v21 = vpop.f32.mrb[26].mxu1  ;;  %3526 = vst.msk [vmem:[#allocation3 + $0x18] sm:$0xff] %vm760_vm10, %v3494_v57  ;;  %v3465_v23 = vld [vmem:[#allocation3 + $0x30] sm:$0xff] }
 0x1ff   : > { %3249 = vst.msk [vmem:[#allocation3 + $0x50] sm:$0xff] %vm760_vm10, %v3217_v53  ;;  %v3218_v25 = vadd.f32 %v4467_v21, %v3186_v45  ;;  %v3083_v54 = vpop.f32.mrb[27].mxu1  ;;  %3524 = vst.msk [vmem:[#allocation3 + $0x8] sm:$0xff] %vm760_vm10, %v3492_v33  ;;  %v3463_v13 = vld [vmem:[#allocation3 + $0x20] sm:$0xff] }
 0x200   : > { %3247 = vst.msk [vmem:[#allocation3 + $0x40] sm:$0xff] %vm760_vm10, %v3215_v15  ;;  %v3216_v32 = vadd.f32 %v3184_v49, %v3083_v54  ;;  %v3466_v14 = vld [vmem:[#allocation3 + $0x38] sm:$0xff] }
 0x201   : > { %3250 = vst.msk [vmem:[#allocation3 + $0x58] sm:$0xff] %vm760_vm10, %v3218_v25  ;;  %v4498_v48 = vpop.f32.mrb[20].mxu0  ;;  %v3464_v4 = vld [vmem:[#allocation3 + $0x28] sm:$0xff] }
 0x202   : > { %3248 = vst.msk [vmem:[#allocation3 + $0x48] sm:$0xff] %vm760_vm10, %v3216_v32  ;;  %v3497_v51 = vadd.f32 %v4498_v48, %v3465_v23  ;;  %v3348_v24 = vpop.f32.mrb[21].mxu0 }
 0x203   : > { %v3557_v11 = vld [vmem:[#allocation3 + $0x10] sm:$0xff]  ;;  %v3495_v0 = vadd.f32 %v3463_v13, %v3348_v24  ;;  %v4499_v16 = vpop.f32.mrb[22].mxu0 }
 0x204   : > { %v4470_v59 = vpop.f32.mrb[28].mxu1  ;;  %v4253_v27 = vpack.c.bf16 %v3557_v11, %v3557_v11  ;;  %v3555_v40 = vld [vmem:[#allocation3] sm:$0xff]  ;;  %3529 = vst.msk [vmem:[#allocation3 + $0x30] sm:$0xff] %vm760_vm10, %v3497_v51  ;;  %v3498_v20 = vadd.f32 %v4499_v16, %v3466_v14  ;;  %v3351_v22 = vpop.f32.mrb[23].mxu0  ;;  %v3751_v26 = vsel %vm760_vm10, %v3557_v11, 0.0  ;;  %v3823_v34 = vmul.f32 %v3557_v11, %v3557_v11 }
 0x205   : > { %v3096_v37 = vpop.f32.mrb[29].mxu1  ;;  %v4251_v18 = vpack.c.bf16 %v3555_v40, %v3555_v40  ;;  %v3821_v12 = vmul.f32 %v3555_v40, %v3555_v40  ;;  %v3558_v28 = vld [vmem:[#allocation3 + $0x18] sm:$0xff]  ;;  %3527 = vst.msk [vmem:[#allocation3 + $0x20] sm:$0xff] %vm760_vm10, %v3495_v0  ;;  %v3221_v36 = vadd.f32 %v4470_v59, %v3189_v58  ;;  %v3748_v30 = vsel %vm760_vm10, %v3555_v40, 0.0 }
 0x206   : > { %v4471_v29 = vpop.f32.mrb[30].mxu1  ;;  %3717 = vst.msk [vmem:[%s5864_s22 + $0x8] sm:$0xf] %vm500_vm0, %v4253_v27  ;;  %v4254_v19 = vpack.c.bf16 %v3558_v28, %v3558_v28  ;;  %v3556_v63 = vld [vmem:[#allocation3 + $0x8] sm:$0xff]  ;;  %v3824_v6 = vmul.f32 %v3558_v28, %v3558_v28  ;;  %v3496_v42 = vadd.f32 %v3464_v4, %v3351_v22  ;;  %v3219_v10 = vadd.f32 %v3187_v43, %v3096_v37  ;;  %v3469_v9 = vld [vmem:[#allocation3 + $0x50] sm:$0xff] }
 0x207   : > { %3530 = vst.msk [vmem:[#allocation3 + $0x38] sm:$0xff] %vm760_vm10, %v3498_v20  ;;  %v3099_v7 = vpop.f32.mrb[31].mxu1  ;;  %v4252_v55 = vpack.c.bf16 %v3556_v63, %v3556_v63  ;;  %v3749_v56 = vsel %vm760_vm10, %v3556_v63, 0.0  ;;  %v3822_v41 = vmul.f32 %v3556_v63, %v3556_v63  ;;  %3253 = vst.msk [vmem:[#allocation3 + $0x70] sm:$0xff] %vm760_vm10, %v3221_v36  ;;  %v3853_v52 = vsel %vm760_vm10, %v3821_v12, 0.0  ;;  %v3467_v38 = vld [vmem:[#allocation3 + $0x40] sm:$0xff] }
 0x208   : > { %3715 = vst.msk [vmem:[%s5864_s22] sm:$0xf] %vm500_vm0, %v4251_v18  ;;  %3718 = vst.msk [vmem:[%s5864_s22 + $0xc] sm:$0xf] %vm500_vm0, %v4254_v19  ;;  %v3750_v5 = vadd.f32 %v3749_v56, %v3748_v30  ;;  %v3222_v62 = vadd.f32 %v4471_v29, %v3190_v50  ;;  %v3220_v8 = vadd.f32 %v3188_v17, %v3099_v7  ;;  %v3856_v31 = vsel %vm760_vm10, %v3823_v34, 0.0  ;;  %v3470_v11 = vld [vmem:[#allocation3 + $0x58] sm:$0xff] }
 0x209   : > { %3716 = vst.msk [vmem:[%s5864_s22 + $0x4] sm:$0xf] %vm500_vm0, %v4252_v55  ;;  %v3854_v3 = vsel %vm760_vm10, %v3822_v41, 0.0  ;;  %v4502_v46 = vpop.f32.mrb[24].mxu0  ;;  %v3753_v47 = vsel %vm760_vm10, %v3558_v28, 0.0  ;;  %v3858_v1 = vsel %vm760_vm10, %v3824_v6, 0.0 }
 0x20a   : > { %v3752_v44 = vadd.f32 %v3751_v26, %v3750_v5  ;;  %v3855_v61 = vadd.f32 %v3854_v3, %v3853_v52  ;;  %3528 = vst.msk [vmem:[#allocation3 + $0x28] sm:$0xff] %vm760_vm10, %v3496_v42  ;;  %3251 = vst.msk [vmem:[#allocation3 + $0x60] sm:$0xff] %vm760_vm10, %v3219_v10  ;;  %v3501_v60 = vadd.f32 %v4502_v46, %v3469_v9  ;;  %v3364_v35 = vpop.f32.mrb[25].mxu0  ;;  %v3193_v27 = vld [vmem:[#allocation3 + $0x90] sm:$0xff]  ;;  %v3468_v40 = vld [vmem:[#allocation3 + $0x48] sm:$0xff] }
 0x20b   : > { %v3561_v57 = vld [vmem:[#allocation3 + $0x30] sm:$0xff]  ;;  %3254 = vst.msk [vmem:[#allocation3 + $0x78] sm:$0xff] %vm760_vm10, %v3222_v62  ;;  %3252 = vst.msk [vmem:[#allocation3 + $0x68] sm:$0xff] %vm760_vm10, %v3220_v8  ;;  %v3499_v53 = vadd.f32 %v3467_v38, %v3364_v35  ;;  %v4503_v39 = vpop.f32.mrb[26].mxu0  ;;  %v3191_v20 = vld [vmem:[#allocation3 + $0x80] sm:$0xff] }
 0x20c   : > { %v4474_v2 = vpop.f32.mrb[32].mxu1  ;;  %v3857_v33 = vadd.f32 %v3856_v31, %v3855_v61  ;;  %v4257_v15 = vpack.c.bf16 %v3561_v57, %v3561_v57  ;;  %v3559_v21 = vld [vmem:[#allocation3 + $0x20] sm:$0xff]  ;;  %3533 = vst.msk [vmem:[#allocation3 + $0x50] sm:$0xff] %vm760_vm10, %v3501_v60  ;;  %v3367_v45 = vpop.f32.mrb[27].mxu0  ;;  %v3754_v49 = vadd.f32 %v3753_v47, %v3752_v44  ;;  %v3502_v59 = vadd.f32 %v4503_v39, %v3470_v11  ;;  %v3194_v12 = vld [vmem:[#allocation3 + $0x98] sm:$0xff]  ;;  %v3192_v28 = vld [vmem:[#allocation3 + $0x88] sm:$0xff] }
 0x20d   : > { %v3112_v25 = vpop.f32.mrb[33].mxu1  ;;  %v4255_v54 = vpack.c.bf16 %v3559_v21, %v3559_v21  ;;  %v3755_v32 = vsel %vm760_vm10, %v3559_v21, 0.0  ;;  %v3825_v48 = vmul.f32 %v3559_v21, %v3559_v21  ;;  %3531 = vst.msk [vmem:[#allocation3 + $0x40] sm:$0xff] %vm760_vm10, %v3499_v53  ;;  %v3827_v58 = vmul.f32 %v3561_v57, %v3561_v57 }
 0x20e   : > { %v3562_v23 = vld [vmem:[#allocation3 + $0x38] sm:$0xff]  ;;  %v4475_v51 = vpop.f32.mrb[34].mxu1  ;;  %3721 = vst.msk [vmem:[%s5864_s22 + $0x18] sm:$0xf] %vm500_vm0, %v4257_v15  ;;  %v3859_v24 = vadd.f32 %v3858_v1, %v3857_v33  ;;  %v3756_v16 = vadd.f32 %v3755_v32, %v3754_v49  ;;  %v3225_v22 = vadd.f32 %v4474_v2, %v3193_v27  ;;  %v3500_v37 = vadd.f32 %v3468_v40, %v3367_v45  ;;  %v3473_v7 = vld [vmem:[#allocation3 + $0x70] sm:$0xff]  ;;  %v3195_v15 = vld [vmem:[#allocation3 + $0xa0] sm:$0xff] }
 0x20f   : > { %v4258_v13 = vpack.c.bf16 %v3562_v23, %v3562_v23  ;;  %v3115_v0 = vpop.f32.mrb[35].mxu1  ;;  %3719 = vst.msk [vmem:[%s5864_s22 + $0x10] sm:$0xf] %vm500_vm0, %v4255_v54  ;;  %v3860_v14 = vsel %vm760_vm10, %v3825_v48, 0.0  ;;  %v3223_v18 = vadd.f32 %v3191_v20, %v3112_v25  ;;  %v3828_v29 = vmul.f32 %v3562_v23, %v3562_v23  ;;  %v3198_v32 = vld [vmem:[#allocation3 + $0xb8] sm:$0xff]  ;;  %v3196_v48 = vld [vmem:[#allocation3 + $0xa8] sm:$0xff] }
 0x210   : > { %v3861_v36 = vadd.f32 %v3860_v14, %v3859_v24  ;;  %3534 = vst.msk [vmem:[#allocation3 + $0x58] sm:$0xff] %vm760_vm10, %v3502_v59  ;;  %v3226_v34 = vadd.f32 %v4475_v51, %v3194_v12  ;;  %v3224_v19 = vadd.f32 %v3192_v28, %v3115_v0  ;;  %3257 = vst.msk [vmem:[#allocation3 + $0x90] sm:$0xff] %vm760_vm10, %v3225_v22  ;;  %v3759_v6 = vsel %vm760_vm10, %v3561_v57, 0.0  ;;  %v3197_v57 = vld [vmem:[#allocation3 + $0xb0] sm:$0xff] }
 0x211   : > { %3722 = vst.msk [vmem:[%s5864_s22 + $0x1c] sm:$0xf] %vm500_vm0, %v4258_v13  ;;  %v3560_v26 = vld [vmem:[#allocation3 + $0x28] sm:$0xff]  ;;  %v4506_v63 = vpop.f32.mrb[28].mxu0  ;;  %v3471_v43 = vld [vmem:[#allocation3 + $0x60] sm:$0xff]  ;;  %v3864_v52 = vsel %vm760_vm10, %v3827_v58, 0.0 }
 0x212   : > { %v4256_v30 = vpack.c.bf16 %v3560_v26, %v3560_v26  ;;  %v3757_v55 = vsel %vm760_vm10, %v3560_v26, 0.0  ;;  %v3826_v56 = vmul.f32 %v3560_v26, %v3560_v26  ;;  %3532 = vst.msk [vmem:[#allocation3 + $0x48] sm:$0xff] %vm760_vm10, %v3500_v37  ;;  %3255 = vst.msk [vmem:[#allocation3 + $0x80] sm:$0xff] %vm760_vm10, %v3223_v18  ;;  %v3505_v41 = vadd.f32 %v4506_v63, %v3473_v7  ;;  %v3380_v4 = vpop.f32.mrb[29].mxu0  ;;  %v3474_v31 = vld [vmem:[#allocation3 + $0x78] sm:$0xff]  ;;  %v3472_v33 = vld [vmem:[#allocation3 + $0x68] sm:$0xff] }
 0x213   : > { %v3758_v5 = vadd.f32 %v3757_v55, %v3756_v16  ;;  %v5906_v42 = vld [vmem:[#allocation3 + $0x50] sm:$0xff]  ;;  %3258 = vst.msk [vmem:[#allocation3 + $0x98] sm:$0xff] %vm760_vm10, %v3226_v34  ;;  %3256 = vst.msk [vmem:[#allocation3 + $0x88] sm:$0xff] %vm760_vm10, %v3224_v19  ;;  %v3503_v10 = vadd.f32 %v3471_v43, %v3380_v4  ;;  %v4507_v50 = vpop.f32.mrb[30].mxu0  ;;  %v3761_v3 = vsel %vm760_vm10, %v3562_v23, 0.0  ;;  %v3866_v61 = vsel %vm760_vm10, %v3828_v29, 0.0 }
 0x214   : > { %v4478_v17 = vpop.f32.mrb[36].mxu1  ;;  %3720 = vst.msk [vmem:[%s5864_s22 + $0x14] sm:$0xf] %vm500_vm0, %v4256_v30  ;;  %v3862_v62 = vsel %vm760_vm10, %v3826_v56, 0.0  ;;  %v4261_v8 = vpack.c.bf16 %v5906_v42, %v5906_v42  ;;  %v3563_v46 = vld [vmem:[#allocation3 + $0x40] sm:$0xff]  ;;  %v3383_v9 = vpop.f32.mrb[31].mxu0  ;;  %v3506_v47 = vadd.f32 %v4507_v50, %v3474_v31  ;;  %v3831_v23 = vmul.f32 %v5906_v42, %v5906_v42 }
 0x215   : > { %3537 = vst.msk [vmem:[#allocation3 + $0x70] sm:$0xff] %vm760_vm10, %v3505_v41  ;;  %v3128_v44 = vpop.f32.mrb[37].mxu1  ;;  %v3760_v60 = vadd.f32 %v3759_v6, %v3758_v5  ;;  %v3863_v35 = vadd.f32 %v3862_v62, %v3861_v36  ;;  %v4259_v38 = vpack.c.bf16 %v3563_v46, %v3563_v46  ;;  %3535 = vst.msk [vmem:[#allocation3 + $0x60] sm:$0xff] %vm760_vm10, %v3503_v10  ;;  %v3763_v39 = vsel %vm760_vm10, %v3563_v46, 0.0 }
 0x216   : > { %v4479_v53 = vpop.f32.mrb[38].mxu1  ;;  %3725 = vst.msk [vmem:[%s5864_s22 + $0x28] sm:$0xf] %vm500_vm0, %v4261_v8  ;;  %v3829_v2 = vmul.f32 %v3563_v46, %v3563_v46  ;;  %v3229_v1 = vadd.f32 %v4478_v17, %v3197_v57  ;;  %v3504_v54 = vadd.f32 %v3472_v33, %v3383_v9  ;;  %v3227_v49 = vadd.f32 %v3195_v15, %v3128_v44  ;;  %v3201_v17 = vld [vmem:[#allocation3 + $0xd0] sm:$0xff] }
 0x217   : > { %v3131_v21 = vpop.f32.mrb[39].mxu1  ;;  %v3865_v45 = vadd.f32 %v3864_v52, %v3863_v35  ;;  %3723 = vst.msk [vmem:[%s5864_s22 + $0x20] sm:$0xf] %vm500_vm0, %v4259_v38  ;;  %v3762_v25 = vadd.f32 %v3761_v3, %v3760_v60  ;;  %v3566_v24 = vld [vmem:[#allocation3 + $0x58] sm:$0xff]  ;;  %v3230_v13 = vadd.f32 %v4479_v53, %v3198_v32  ;;  %v3477_v37 = vld [vmem:[#allocation3 + $0x90] sm:$0xff]  ;;  %v3767_v7 = vsel %vm760_vm10, %v5906_v42, 0.0 }
 0x218   : > { %v3868_v51 = vsel %vm760_vm10, %v3829_v2, 0.0  ;;  %3538 = vst.msk [vmem:[#allocation3 + $0x78] sm:$0xff] %vm760_vm10, %v3506_v47  ;;  %3261 = vst.msk [vmem:[#allocation3 + $0xb0] sm:$0xff] %vm760_vm10, %v3229_v1  ;;  %v3228_v11 = vadd.f32 %v3196_v48, %v3131_v21  ;;  %v4262_v14 = vpack.c.bf16 %v3566_v24, %v3566_v24  ;;  %v3832_v40 = vmul.f32 %v3566_v24, %v3566_v24 }
 0x219   : > { %v3764_v0 = vadd.f32 %v3763_v39, %v3762_v25  ;;  %v3867_v16 = vadd.f32 %v3866_v61, %v3865_v45  ;;  %v3564_v59 = vld [vmem:[#allocation3 + $0x48] sm:$0xff]  ;;  %3536 = vst.msk [vmem:[#allocation3 + $0x68] sm:$0xff] %vm760_vm10, %v3504_v54  ;;  %3259 = vst.msk [vmem:[#allocation3 + $0xa0] sm:$0xff] %vm760_vm10, %v3227_v49  ;;  %v4510_v27 = vpop.f32.mrb[32].mxu0  ;;  %v3475_v12 = vld [vmem:[#allocation3 + $0x80] sm:$0xff]  ;;  %v3872_v30 = vsel %vm760_vm10, %v3831_v23, 0.0 }
 0x21a   : > { %v4260_v20 = vpack.c.bf16 %v3564_v59, %v3564_v59  ;;  %v3765_v58 = vsel %vm760_vm10, %v3564_v59, 0.0  ;;  %v3830_v22 = vmul.f32 %v3564_v59, %v3564_v59  ;;  %3262 = vst.msk [vmem:[#allocation3 + $0xb8] sm:$0xff] %vm760_vm10, %v3230_v13  ;;  %3260 = vst.msk [vmem:[#allocation3 + $0xa8] sm:$0xff] %vm760_vm10, %v3228_v11  ;;  %v3396_v18 = vpop.f32.mrb[33].mxu0  ;;  %v3509_v26 = vadd.f32 %v4510_v27, %v3477_v37  ;;  %v3478_v42 = vld [vmem:[#allocation3 + $0x98] sm:$0xff]  ;;  %v3476_v9 = vld [vmem:[#allocation3 + $0x88] sm:$0xff] }
 0x21b   : > { %v3869_v28 = vadd.f32 %v3868_v51, %v3867_v16  ;;  %3726 = vst.msk [vmem:[%s5864_s22 + $0x2c] sm:$0xf] %vm500_vm0, %v4262_v14  ;;  %v3766_v36 = vadd.f32 %v3765_v58, %v3764_v0  ;;  %v3507_v34 = vadd.f32 %v3475_v12, %v3396_v18  ;;  %v4511_v19 = vpop.f32.mrb[34].mxu0  ;;  %v3769_v6 = vsel %vm760_vm10, %v3566_v24, 0.0  ;;  %v3199_v45 = vld [vmem:[#allocation3 + $0xc0] sm:$0xff]  ;;  %v3202_v25 = vld [vmem:[#allocation3 + $0xd8] sm:$0xff] }
 0x21c   : > { %v3569_v29 = vld [vmem:[#allocation3 + $0x70] sm:$0xff]  ;;  %v4482_v63 = vpop.f32.mrb[40].mxu1  ;;  %3724 = vst.msk [vmem:[%s5864_s22 + $0x24] sm:$0xf] %vm500_vm0, %v4260_v20  ;;  %v3870_v55 = vsel %vm760_vm10, %v3830_v22, 0.0  ;;  %v3567_v41 = vld [vmem:[#allocation3 + $0x60] sm:$0xff]  ;;  %v3510_v8 = vadd.f32 %v4511_v19, %v3478_v42 }
 0x21d   : > { %v4265_v56 = vpack.c.bf16 %v3569_v29, %v3569_v29  ;;  %v3399_v4 = vpop.f32.mrb[35].mxu0  ;;  %v3144_v43 = vpop.f32.mrb[41].mxu1  ;;  %v3768_v5 = vadd.f32 %v3767_v7, %v3766_v36  ;;  %v3871_v10 = vadd.f32 %v3870_v55, %v3869_v28  ;;  %v4263_v50 = vpack.c.bf16 %v3567_v41, %v3567_v41  ;;  %3541 = vst.msk [vmem:[#allocation3 + $0x90] sm:$0xff] %vm760_vm10, %v3509_v26  ;;  %v3200_v51 = vld [vmem:[#allocation3 + $0xc8] sm:$0xff]  ;;  %v3205_v58 = vld [vmem:[#allocation3 + $0xf0] sm:$0xff] }
 0x21e   : > { %3539 = vst.msk [vmem:[#allocation3 + $0x80] sm:$0xff] %vm760_vm10, %v3507_v34  ;;  %v4483_v52 = vpop.f32.mrb[42].mxu1  ;;  %v3771_v3 = vsel %vm760_vm10, %v3567_v41, 0.0  ;;  %v3833_v62 = vmul.f32 %v3567_v41, %v3567_v41  ;;  %v3233_v46 = vadd.f32 %v4482_v63, %v3201_v17  ;;  %v3874_v61 = vsel %vm760_vm10, %v3832_v40, 0.0  ;;  %3542 = vst.msk [vmem:[#allocation3 + $0x98] sm:$0xff] %vm760_vm10, %v3510_v8 }
 0x21f   : > { %3729 = vst.msk [vmem:[%s5864_s22 + $0x38] sm:$0xf] %vm500_vm0, %v4265_v56  ;;  %v3147_v44 = vpop.f32.mrb[43].mxu1  ;;  %v3873_v60 = vadd.f32 %v3872_v30, %v3871_v10  ;;  %3727 = vst.msk [vmem:[%s5864_s22 + $0x30] sm:$0xf] %vm500_vm0, %v4263_v50  ;;  %v3770_v35 = vadd.f32 %v3769_v6, %v3768_v5  ;;  %v3570_v38 = vld [vmem:[#allocation3 + $0x78] sm:$0xff]  ;;  %v3508_v31 = vadd.f32 %v3476_v9, %v3399_v4 }
 0x220   : > { %v3775_v57 = vsel %vm760_vm10, %v3569_v29, 0.0  ;;  %v3835_v53 = vmul.f32 %v3569_v29, %v3569_v29  ;;  %v3876_v39 = vsel %vm760_vm10, %v3833_v62, 0.0  ;;  %v4266_v2 = vpack.c.bf16 %v3570_v38, %v3570_v38  ;;  %v3568_v47 = vld [vmem:[#allocation3 + $0x68] sm:$0xff]  ;;  %3265 = vst.msk [vmem:[#allocation3 + $0xd0] sm:$0xff] %vm760_vm10, %v3233_v46  ;;  %v3481_v24 = vld [vmem:[#allocation3 + $0xb0] sm:$0xff]  ;;  %v3479_v59 = vld [vmem:[#allocation3 + $0xa0] sm:$0xff] }
 0x221   : > { %v3772_v1 = vadd.f32 %v3771_v3, %v3770_v35  ;;  %v3875_v33 = vadd.f32 %v3874_v61, %v3873_v60  ;;  %v4264_v15 = vpack.c.bf16 %v3568_v47, %v3568_v47  ;;  %v3773_v21 = vsel %vm760_vm10, %v3568_v47, 0.0  ;;  %3540 = vst.msk [vmem:[#allocation3 + $0x88] sm:$0xff] %vm760_vm10, %v3508_v31  ;;  %v4514_v54 = vpop.f32.mrb[36].mxu0  ;;  %v3482_v40 = vld [vmem:[#allocation3 + $0xb8] sm:$0xff]  ;;  %v3203_v6 = vld [vmem:[#allocation3 + $0xe0] sm:$0xff] }
 0x222   : > { %3730 = vst.msk [vmem:[%s5864_s22 + $0x3c] sm:$0xf] %vm500_vm0, %v4266_v2  ;;  %v3836_v49 = vmul.f32 %v3570_v38, %v3570_v38  ;;  %v3834_v32 = vmul.f32 %v3568_v47, %v3568_v47  ;;  %v3231_v48 = vadd.f32 %v3199_v45, %v3144_v43  ;;  %v3234_v23 = vadd.f32 %v4483_v52, %v3202_v25  ;;  %v3412_v13 = vpop.f32.mrb[37].mxu0  ;;  %v3480_v43 = vld [vmem:[#allocation3 + $0xa8] sm:$0xff]  ;;  %v3206_v35 = vld [vmem:[#allocation3 + $0xf8] sm:$0xff] }
 0x223   : > { %v3877_v11 = vadd.f32 %v3876_v39, %v3875_v33  ;;  %3728 = vst.msk [vmem:[%s5864_s22 + $0x34] sm:$0xf] %vm500_vm0, %v4264_v15  ;;  %v3774_v0 = vadd.f32 %v3773_v21, %v3772_v1  ;;  %v3232_v16 = vadd.f32 %v3200_v51, %v3147_v44  ;;  %v3513_v14 = vadd.f32 %v4514_v54, %v3481_v24  ;;  %v4515_v27 = vpop.f32.mrb[38].mxu0 }
 0x224   : > { %v4486_v20 = vpop.f32.mrb[44].mxu1  ;;  %v3878_v22 = vsel %vm760_vm10, %v3834_v32, 0.0  ;;  %v3573_v37 = vld [vmem:[#allocation3 + $0x90] sm:$0xff]  ;;  %3263 = vst.msk [vmem:[#allocation3 + $0xc0] sm:$0xff] %vm760_vm10, %v3231_v48  ;;  %3266 = vst.msk [vmem:[#allocation3 + $0xd8] sm:$0xff] %vm760_vm10, %v3234_v23  ;;  %v3511_v12 = vadd.f32 %v3479_v59, %v3412_v13  ;;  %v3514_v28 = vadd.f32 %v4515_v27, %v3482_v40  ;;  %v3415_v29 = vpop.f32.mrb[39].mxu0 }
 0x225   : > { %v3571_v18 = vld [vmem:[#allocation3 + $0x80] sm:$0xff]  ;;  %v3237_v36 = vadd.f32 %v4486_v20, %v3205_v58  ;;  %v3160_v26 = vpop.f32.mrb[45].mxu1  ;;  %v3880_v34 = vsel %vm760_vm10, %v3835_v53, 0.0  ;;  %v3776_v19 = vadd.f32 %v3775_v57, %v3774_v0  ;;  %v3879_v63 = vadd.f32 %v3878_v22, %v3877_v11  ;;  %3264 = vst.msk [vmem:[#allocation3 + $0xc8] sm:$0xff] %vm760_vm10, %v3232_v16  ;;  %3545 = vst.msk [vmem:[#allocation3 + $0xb0] sm:$0xff] %vm760_vm10, %v3513_v14  ;;  %v3574_v42 = vld [vmem:[#allocation3 + $0x98] sm:$0xff] }
 0x226   : > { %v4269_v7 = vpack.c.bf16 %v3573_v37, %v3573_v37  ;;  %v4487_v30 = vpop.f32.mrb[46].mxu1  ;;  %v3777_v55 = vsel %vm760_vm10, %v3570_v38, 0.0  ;;  %v4267_v56 = vpack.c.bf16 %v3571_v18, %v3571_v18  ;;  %v3779_v41 = vsel %vm760_vm10, %v3571_v18, 0.0  ;;  %3543 = vst.msk [vmem:[#allocation3 + $0xa0] sm:$0xff] %vm760_vm10, %v3511_v12  ;;  %3546 = vst.msk [vmem:[#allocation3 + $0xb8] sm:$0xff] %vm760_vm10, %v3514_v28  ;;  %v3204_v38 = vld [vmem:[#allocation3 + $0xe8] sm:$0xff] }
 0x227   : > { %v3837_v4 = vmul.f32 %v3571_v18, %v3571_v18  ;;  %3269 = vst.msk [vmem:[#allocation3 + $0xf0] sm:$0xff] %vm760_vm10, %v3237_v36  ;;  %v3163_v5 = vpop.f32.mrb[47].mxu1  ;;  %v3881_v10 = vadd.f32 %v3880_v34, %v3879_v63  ;;  %v3778_v50 = vadd.f32 %v3777_v55, %v3776_v19  ;;  %v3512_v17 = vadd.f32 %v3480_v43, %v3415_v29  ;;  %v3485_v47 = vld [vmem:[#allocation3 + $0xd0] sm:$0xff] }
 0x228   : > { %3733 = vst.msk [vmem:[%s5864_s22 + $0x48] sm:$0xf] %vm500_vm0, %v4269_v7  ;;  %v3235_v52 = vadd.f32 %v3203_v6, %v3160_v26  ;;  %v3882_v3 = vsel %vm760_vm10, %v3836_v49, 0.0  ;;  %3731 = vst.msk [vmem:[%s5864_s22 + $0x40] sm:$0xf] %vm500_vm0, %v4267_v56  ;;  %v4270_v8 = vpack.c.bf16 %v3574_v42, %v3574_v42  ;;  %v3572_v46 = vld [vmem:[#allocation3 + $0x88] sm:$0xff]  ;;  %v3839_v9 = vmul.f32 %v3573_v37, %v3573_v37 }
 0x229   : > { %v3884_v62 = vsel %vm760_vm10, %v3837_v4, 0.0  ;;  %v3780_v44 = vadd.f32 %v3779_v41, %v3778_v50  ;;  %v3883_v61 = vadd.f32 %v3882_v3, %v3881_v10  ;;  %v4268_v60 = vpack.c.bf16 %v3572_v46, %v3572_v46  ;;  %3544 = vst.msk [vmem:[#allocation3 + $0xa8] sm:$0xff] %vm760_vm10, %v3512_v17  ;;  %v4518_v31 = vpop.f32.mrb[40].mxu0 }
 0x22a   : > { %3267 = vst.msk [vmem:[#allocation3 + $0xe0] sm:$0xff] %vm760_vm10, %v3235_v52  ;;  %v3781_v57 = vsel %vm760_vm10, %v3572_v46, 0.0  ;;  %v3838_v53 = vmul.f32 %v3572_v46, %v3572_v46  ;;  %v3238_v39 = vadd.f32 %v4487_v30, %v3206_v35  ;;  %v3236_v2 = vadd.f32 %v3204_v38, %v3163_v5  ;;  %v3428_v1 = vpop.f32.mrb[41].mxu0 }
 0x22b   : > { %3734 = vst.msk [vmem:[%s5864_s22 + $0x4c] sm:$0xf] %vm500_vm0, %v4270_v8  ;;  %v3783_v33 = vsel %vm760_vm10, %v3573_v37, 0.0  ;;  %v3885_v15 = vadd.f32 %v3884_v62, %v3883_v61  ;;  %3732 = vst.msk [vmem:[%s5864_s22 + $0x44] sm:$0xf] %vm500_vm0, %v4268_v60  ;;  %v3782_v21 = vadd.f32 %v3781_v57, %v3780_v44  ;;  %v3517_v45 = vadd.f32 %v4518_v31, %v3485_v47  ;;  %v3483_v25 = vld [vmem:[#allocation3 + $0xc0] sm:$0xff] }
 0x22c   : > { %v4519_v54 = vpop.f32.mrb[42].mxu0  ;;  %v3486_v49 = vld [vmem:[#allocation3 + $0xd8] sm:$0xff]  ;;  %v3840_v32 = vmul.f32 %v3574_v42, %v3574_v42  ;;  %v3886_v48 = vsel %vm760_vm10, %v3838_v53, 0.0  ;;  %v3577_v23 = vld [vmem:[#allocation3 + $0xb0] sm:$0xff]  ;;  %3270 = vst.msk [vmem:[#allocation3 + $0xf8] sm:$0xff] %vm760_vm10, %v3238_v39  ;;  %3268 = vst.msk [vmem:[#allocation3 + $0xe8] sm:$0xff] %vm760_vm10, %v3236_v2  ;;  %v3515_v51 = vadd.f32 %v3483_v25, %v3428_v1 }
 0x22d   : > { %v3518_v24 = vadd.f32 %v4519_v54, %v3486_v49  ;;  %v3431_v13 = vpop.f32.mrb[43].mxu0  ;;  %v3888_v11 = vsel %vm760_vm10, %v3839_v9, 0.0  ;;  %v3784_v0 = vadd.f32 %v3783_v33, %v3782_v21  ;;  %v3887_v16 = vadd.f32 %v3886_v48, %v3885_v15  ;;  %v3575_v59 = vld [vmem:[#allocation3 + $0xa0] sm:$0xff]  ;;  %v3578_v27 = vld [vmem:[#allocation3 + $0xb8] sm:$0xff]  ;;  %3549 = vst.msk [vmem:[#allocation3 + $0xd0] sm:$0xff] %vm760_vm10, %v3517_v45  ;;  %v3484_v28 = vld [vmem:[#allocation3 + $0xc8] sm:$0xff] }
 0x22e   : > { %v4273_v14 = vpack.c.bf16 %v3577_v23, %v3577_v23  ;;  %v3785_v40 = vsel %vm760_vm10, %v3574_v42, 0.0  ;;  %v4271_v20 = vpack.c.bf16 %v3575_v59, %v3575_v59  ;;  %v3787_v58 = vsel %vm760_vm10, %v3575_v59, 0.0  ;;  %3547 = vst.msk [vmem:[#allocation3 + $0xc0] sm:$0xff] %vm760_vm10, %v3515_v51  ;;  %v3489_v56 = vld [vmem:[#allocation3 + $0xf0] sm:$0xff] }
 0x22f   : > { %v3841_v22 = vmul.f32 %v3575_v59, %v3575_v59  ;;  %3550 = vst.msk [vmem:[#allocation3 + $0xd8] sm:$0xff] %vm760_vm10, %v3518_v24  ;;  %v3889_v37 = vadd.f32 %v3888_v11, %v3887_v16  ;;  %v3786_v18 = vadd.f32 %v3785_v40, %v3784_v0  ;;  %v4274_v12 = vpack.c.bf16 %v3578_v27, %v3578_v27 }
 0x230   : > { %3737 = vst.msk [vmem:[%s5864_s22 + $0x58] sm:$0xf] %vm500_vm0, %v4273_v14  ;;  %v3890_v36 = vsel %vm760_vm10, %v3840_v32, 0.0  ;;  %3735 = vst.msk [vmem:[%s5864_s22 + $0x50] sm:$0xf] %vm500_vm0, %v4271_v20  ;;  %v3576_v26 = vld [vmem:[#allocation3 + $0xa8] sm:$0xff]  ;;  %v3516_v34 = vadd.f32 %v3484_v28, %v3431_v13  ;;  %v3843_v41 = vmul.f32 %v3577_v23, %v3577_v23  ;;  %v3844_v62 = vmul.f32 %v3578_v27, %v3578_v27 }
 0x231   : > { %v3892_v29 = vsel %vm760_vm10, %v3841_v22, 0.0  ;;  %v3788_v19 = vadd.f32 %v3787_v58, %v3786_v18  ;;  %v3891_v63 = vadd.f32 %v3890_v36, %v3889_v37  ;;  %3738 = vst.msk [vmem:[%s5864_s22 + $0x5c] sm:$0xf] %vm500_vm0, %v4274_v12  ;;  %v4272_v7 = vpack.c.bf16 %v3576_v26, %v3576_v26  ;;  %v4522_v55 = vpop.f32.mrb[44].mxu0  ;;  %v3487_v5 = vld [vmem:[#allocation3 + $0xe0] sm:$0xff] }
 0x232   : > { %v3789_v30 = vsel %vm760_vm10, %v3576_v26, 0.0  ;;  %v3842_v4 = vmul.f32 %v3576_v26, %v3576_v26  ;;  %3548 = vst.msk [vmem:[#allocation3 + $0xc8] sm:$0xff] %vm760_vm10, %v3516_v34  ;;  %v3521_v43 = vadd.f32 %v4522_v55, %v3489_v56  ;;  %v3444_v6 = vpop.f32.mrb[45].mxu0  ;;  %v3791_v3 = vsel %vm760_vm10, %v3577_v23, 0.0 }
 0x233   : > { %v3893_v10 = vadd.f32 %v3892_v29, %v3891_v63  ;;  %3736 = vst.msk [vmem:[%s5864_s22 + $0x54] sm:$0xf] %vm500_vm0, %v4272_v7  ;;  %v3790_v50 = vadd.f32 %v3789_v30, %v3788_v19  ;;  %v3519_v42 = vadd.f32 %v3487_v5, %v3444_v6  ;;  %v4523_v17 = vpop.f32.mrb[46].mxu0  ;;  %v3490_v52 = vld [vmem:[#allocation3 + $0xf8] sm:$0xff]  ;;  %v3793_v61 = vsel %vm760_vm10, %v3578_v27, 0.0  ;;  %v3488_v21 = vld [vmem:[#allocation3 + $0xe8] sm:$0xff] }
 0x234   : > { %v3894_v8 = vsel %vm760_vm10, %v3842_v4, 0.0  ;;  %v3581_v46 = vld [vmem:[#allocation3 + $0xd0] sm:$0xff]  ;;  %3553 = vst.msk [vmem:[#allocation3 + $0xf0] sm:$0xff] %vm760_vm10, %v3521_v43  ;;  %v3522_v9 = vadd.f32 %v4523_v17, %v3490_v52  ;;  %v3447_v44 = vpop.f32.mrb[47].mxu0  ;;  %v3896_v53 = vsel %vm760_vm10, %v3843_v41, 0.0  ;;  %v3898_v45 = vsel %vm760_vm10, %v3844_v62, 0.0 }
 0x235   : > { %v3792_v60 = vadd.f32 %v3791_v3, %v3790_v50  ;;  %v3895_v35 = vadd.f32 %v3894_v8, %v3893_v10  ;;  %v4277_v38 = vpack.c.bf16 %v3581_v46, %v3581_v46  ;;  %v3579_v31 = vld [vmem:[#allocation3 + $0xc0] sm:$0xff]  ;;  %3551 = vst.msk [vmem:[#allocation3 + $0xe0] sm:$0xff] %vm760_vm10, %v3519_v42  ;;  %v3520_v54 = vadd.f32 %v3488_v21, %v3447_v44  ;;  %v3820_v21 = vld [vmem:[%s5817_s19] sm:$0x1] }
 0x236   : > { %v3582_v57 = vld [vmem:[#allocation3 + $0xd8] sm:$0xff]  ;;  %v4275_v39 = vpack.c.bf16 %v3579_v31, %v3579_v31  ;;  %v3795_v2 = vsel %vm760_vm10, %v3579_v31, 0.0  ;;  %v3845_v47 = vmul.f32 %v3579_v31, %v3579_v31  ;;  %3554 = vst.msk [vmem:[#allocation3 + $0xf8] sm:$0xff] %vm760_vm10, %v3522_v9  ;;  %v3847_v23 = vmul.f32 %v3581_v46, %v3581_v46 }
 0x237   : > { %v3897_v1 = vadd.f32 %v3896_v53, %v3895_v35  ;;  %3741 = vst.msk [vmem:[%s5864_s22 + $0x68] sm:$0xf] %vm500_vm0, %v4277_v38  ;;  %v3794_v33 = vadd.f32 %v3793_v61, %v3792_v60  ;;  %v4278_v15 = vpack.c.bf16 %v3582_v57, %v3582_v57  ;;  %v3799_v14 = vsel %vm760_vm10, %v3581_v46, 0.0 }
 0x238   : > { %3739 = vst.msk [vmem:[%s5864_s22 + $0x60] sm:$0xf] %vm500_vm0, %v4275_v39  ;;  %v3900_v25 = vsel %vm760_vm10, %v3845_v47, 0.0  ;;  %v3848_v59 = vmul.f32 %v3582_v57, %v3582_v57  ;;  %v3801_v58 = vsel %vm760_vm10, %v3582_v57, 0.0  ;;  %v3904_v28 = vsel %vm760_vm10, %v3847_v23, 0.0 }
 0x239   : > { %v3796_v49 = vadd.f32 %v3795_v2, %v3794_v33  ;;  %v3899_v32 = vadd.f32 %v3898_v45, %v3897_v1  ;;  %3742 = vst.msk [vmem:[%s5864_s22 + $0x6c] sm:$0xf] %vm500_vm0, %v4278_v15  ;;  %v3580_v48 = vld [vmem:[#allocation3 + $0xc8] sm:$0xff] }
 0x23a   : > { %v4276_v51 = vpack.c.bf16 %v3580_v48, %v3580_v48  ;;  %v3797_v24 = vsel %vm760_vm10, %v3580_v48, 0.0  ;;  %v3846_v13 = vmul.f32 %v3580_v48, %v3580_v48  ;;  %3552 = vst.msk [vmem:[#allocation3 + $0xe8] sm:$0xff] %vm760_vm10, %v3520_v54  ;;  %v3906_v63 = vsel %vm760_vm10, %v3848_v59, 0.0  ;;  %v3747_v1 = vld [vmem:[%s5811_s16] sm:$0x1] }
 0x23b   : > { %v3901_v11 = vadd.f32 %v3900_v25, %v3899_v32  ;;  %v3798_v0 = vadd.f32 %v3797_v24, %v3796_v49  ;;  %v3585_v16 = vld [vmem:[#allocation3 + $0xf0] sm:$0xff] }
 0x23c   : > { %3740 = vst.msk [vmem:[%s5864_s22 + $0x64] sm:$0xf] %vm500_vm0, %v4276_v51  ;;  %v3902_v27 = vsel %vm760_vm10, %v3846_v13, 0.0  ;;  %v4281_v40 = vpack.c.bf16 %v3585_v16, %v3585_v16  ;;  %v3583_v20 = vld [vmem:[#allocation3 + $0xe0] sm:$0xff]  ;;  %v3851_v41 = vmul.f32 %v3585_v16, %v3585_v16  ;;  %v3807_v50 = vsel %vm760_vm10, %v3585_v16, 0.0 }
 0x23d   : > { %v3800_v22 = vadd.f32 %v3799_v14, %v3798_v0  ;;  %v3903_v37 = vadd.f32 %v3902_v27, %v3901_v11  ;;  %v4279_v18 = vpack.c.bf16 %v3583_v20, %v3583_v20  ;;  %v3586_v12 = vld [vmem:[#allocation3 + $0xf8] sm:$0xff]  ;;  %v3803_v36 = vsel %vm760_vm10, %v3583_v20, 0.0 }
 0x23e   : > { %3745 = vst.msk [vmem:[%s5864_s22 + $0x78] sm:$0xf] %vm500_vm0, %v4281_v40  ;;  %v3849_v29 = vmul.f32 %v3583_v20, %v3583_v20  ;;  %v4282_v26 = vpack.c.bf16 %v3586_v12, %v3586_v12  ;;  %v3852_v42 = vmul.f32 %v3586_v12, %v3586_v12  ;;  %v3912_v62 = vsel %vm760_vm10, %v3851_v41, 0.0 }
 0x23f   : > { %v3905_v34 = vadd.f32 %v3904_v28, %v3903_v37  ;;  %3743 = vst.msk [vmem:[%s5864_s22 + $0x70] sm:$0xf] %vm500_vm0, %v4279_v18  ;;  %v3802_v19 = vadd.f32 %v3801_v58, %v3800_v22  ;;  %v3809_v8 = vsel %vm760_vm10, %v3586_v12, 0.0 }
 0x240   : > { %v3908_v7 = vsel %vm760_vm10, %v3849_v29, 0.0  ;;  %3746 = vst.msk [vmem:[%s5864_s22 + $0x7c] sm:$0xf] %vm500_vm0, %v4282_v26  ;;  %v3914_v44 = vsel %vm760_vm10, %v3852_v42, 0.0 }
 0x241   : > { %v3804_v30 = vadd.f32 %v3803_v36, %v3802_v19  ;;  %v3907_v55 = vadd.f32 %v3906_v63, %v3905_v34  ;;  %v3584_v56 = vld [vmem:[#allocation3 + $0xe8] sm:$0xff] }
 0x242   : > { %v4280_v4 = vpack.c.bf16 %v3584_v56, %v3584_v56  ;;  %v3805_v43 = vsel %vm760_vm10, %v3584_v56, 0.0  ;;  %v3850_v6 = vmul.f32 %v3584_v56, %v3584_v56 }
 0x243   : > { %v3909_v5 = vadd.f32 %v3908_v7, %v3907_v55  ;;  %v3806_v10 = vadd.f32 %v3805_v43, %v3804_v30 }
 0x244   : > { %3744 = vst.msk [vmem:[%s5864_s22 + $0x74] sm:$0xf] %vm500_vm0, %v4280_v4  ;;  %v3910_v17 = vsel %vm760_vm10, %v3850_v6, 0.0 }
 0x245   : > { %v3808_v52 = vadd.f32 %v3807_v50, %v3806_v10  ;;  %v3911_v3 = vadd.f32 %v3910_v17, %v3909_v5 }
 0x247   : > { %v3810_v46 = vadd.f32 %v3809_v8, %v3808_v52  ;;  %v3913_v9 = vadd.f32 %v3912_v62, %v3911_v3 }
 0x249   : > { %v3811_v61 = vrot.slane %v3810_v46, 4  ;;  %v3915_v60 = vadd.f32 %v3914_v44, %v3913_v9 }
 0x24b   : > { %v3812_v35 = vadd.f32 %v3811_v61, %v3810_v46  ;;  %v3916_v38 = vrot.slane %v3915_v60, 4 }
 0x24d   : > { %v3813_v31 = vrot.slane %v3812_v35, 2  ;;  %v3917_v57 = vadd.f32 %v3916_v38, %v3915_v60 }
 0x24f   : > { %v3814_v53 = vadd.f32 %v3813_v31, %v3812_v35  ;;  %v3918_v39 = vrot.slane %v3917_v57, 2 }
 0x251   : > { %v3815_v2 = vrot.slane %v3814_v53, 1  ;;  %v3919_v47 = vadd.f32 %v3918_v39, %v3917_v57 }
 0x253   : > { %v3816_v33 = vadd.f32 %v3815_v2, %v3814_v53  ;;  %v3920_v15 = vrot.slane %v3919_v47, 1 }
 0x255   : > { %v3817_v45 = vadd.f32 %v3816_v33, %v3747_v1  ;;  %v3921_v25 = vadd.f32 %v3920_v15, %v3919_v47 }
 0x257   : > { %3819 = vst.msk [vmem:[%s5811_s16] sm:$0x1] %vm497_vm7, %v3817_v45  ;;  %v3922_v54 = vadd.f32 %v3921_v25, %v3820_v21 }
 0x259   : > { %3923 = vst.msk [vmem:[%s5817_s19] sm:$0x1] %vm497_vm7, %v3922_v54 }
 0x25a PF: > { %s19_s27 = sadd.s32 1, %s4606_s27   ;;  %s6109_s26 = smov %s4602_s2 }
 0x25b   : > { %p16_p5 = scmp.ge.s32.totalorder %s19_s27, 4   ;;  %s6110_s2 = smov %s6112_s28 }
 0x25d   :  { %18 = sbr.rel (!%p16_p5) target bundleno = 2 (0x2), region = 126 }

// kernel: double_conv.3
= control target key start
LH: loop header
LB: loop body
LE: loop exit
PB: predicated region body
PF: predicated region fallthrough
CT: control target
= control target key end

     0   :  { %s4417_s26 = smov 0   ;;  %s4419_s2 = smov 0   ;;  %s5626_s0 = inlined_call_operand.vmem [shape: bf16[2,256,4], index: 0, kind: input, shape index: {}, may-alias: {0,1,2}]   ;;  %s5627_s1 = inlined_call_operand.vmem [shape: bf16[2,256,4], index: 1, kind: input, shape index: {}, may-alias: {0,1,2}]   ;;  %s5628_s2 = inlined_call_operand.vmem [shape: bf16[2,256,4], index: 2, kind: input, shape index: {}, may-alias: {0,1,2}]   ;;  %s5629_s3 = inlined_call_operand.vmem [shape: bf16[3,12,8], index: 3, kind: input, shape index: {}]   ;;  %s5630_s4 = inlined_call_operand.vmem [shape: f32[1,4], index: 4, kind: input, shape index: {}, may-alias: {4,5}]   ;;  %s5631_s5 = inlined_call_operand.vmem [shape: f32[1,4], index: 5, kind: input, shape index: {}, may-alias: {4,5}]   ;;  %s5632_s6 = inlined_call_operand.vmem [shape: bf16[2,256,8], index: 6, kind: output, shape index: {0}]   ;;  %s5633_s7 = inlined_call_operand.vmem [shape: f32[2,1,8], index: 7, kind: output, shape index: {1}]   ;;  %s5634_s8 = inlined_call_operand.vmem [shape: f32[2,1,8], index: 8, kind: output, shape index: {2}]  }
   0x1   :  { %s4421_s27 = smov 0  }
   0x2 LB: > { %s31_s4 = sadd.s32 1, %s4361_s2  ;;  %p3926_p0 = scmp.ge.s32.totalorder %s4365_s27, 1  ;;  %s4365_s27 = sphi %s4421_s27, %s19_s27   ;;  %s4361_s2 = sphi %s4419_s2, %s5680_s2   ;;  %s4357_s26 = sphi %s4417_s26, %s5679_s26  }
   0x3   : > { %p33_p1 = scmp.ge.s32.totalorder %s31_s4, 2  ;;  %p354_p2 = scmp.lt.s32.totalorder %s4365_s27, 3 }
   0x5   : > { %s5682_s4 = smov (%p33_p1, %s31_s4), 0  ;;  %p355_p3 = pnand %p3926_p0, %p354_p2 }
   0x6   : > { %p429_p4 = scmp.lt.s32.totalorder (!%p355_p3), %s4357_s26, 1  ;;  %vm500_vm0 = vcmask (!%p355_p3), 27648   ;;  %vm502_vm1 = vcmask (!%p355_p3), 31748   ;;  %v4367_v0 = vmov (!%p355_p3), 0   ;;  %v694_v1 = vlaneseq (!%p355_p3)  ;;  %s4369_s9 = smov (!%p355_p3), 4  }
   0x7   : > { %358 = sbr.rel (%p355_p3) target bundleno = 563 (0x233), region = 44  ;;  %671 = vst.msk [vmem:[#allocation2] sm:$0xf0] (!%p355_p3), %vm502_vm1, %v4367_v0  ;;  %503 = vst.msk [vmem:[#allocation2 + $0x90] sm:$0xf0] (!%p355_p3), %vm502_vm1, %v4367_v0  ;;  %vm4368_vm2 = vmmov (!%p355_p3), 0  }
   0x8   : > { %672 = vst.msk [vmem:[#allocation2 + $0x8] sm:$0xf] (!%p355_p3), %vm500_vm0, %v4367_v0  ;;  %501 = vst.msk [vmem:[#allocation2] sm:$0xf] (!%p355_p3), %vm500_vm0, %v4367_v0  ;;  %vm635_vm4 = vcmask (!%p355_p3), 31744   ;;  %v4449_v2 = vshrl.u32 (!%p355_p3), %v694_v1, 7 }
   0x9   : > { %692 = vst.msk [vmem:[#allocation2 + $0x88] sm:$0xf0] (!%p355_p3), %vm502_vm1, %v4367_v0  ;;  %vm1292_vm3 = vmpackc.low (!%p355_p3), %vm4368_vm2, %vm4368_vm2  ;;  %vm2052_vm5 = vsmask.f32 (!%p355_p3), 7424  ;;  %vm1852_vm13 = vsmask.f32 (!%p355_p3), 4352 }
   0xa   : > { %693 = vst.msk [vmem:[#allocation2 + $0x90] sm:$0xf] (!%p355_p3), %vm500_vm0, %v4367_v0  ;;  %v4453_v3 = vsel (!%p355_p3), %vm1292_vm3, 65537, %v4367_v0  ;;  %v710_v4 = vadd.s32 (!%p355_p3), 120, %v4449_v2  ;;  %v712_v5 = vadd.s32 (!%p355_p3), 136, %v4449_v2  ;;  %v714_v6 = vadd.s32 (!%p355_p3), 152, %v4449_v2 }
   0xb   : > { %v716_v7 = vadd.s32 (!%p355_p3), 168, %v4449_v2  ;;  %v4487_v23 = vadd.s32 (!%p355_p3), 184, %v4449_v2  ;;  %v4493_v28 = vadd.s32 (!%p355_p3), 200, %v4449_v2  ;;  %v4505_v33 = vadd.s32 (!%p355_p3), 216, %v4449_v2  ;;  %s4370_s10 = smov (!%p355_p3), 8  }
   0xc   : > { %v840_v12 = vand.u32 (!%p355_p3), 15, %v710_v4  ;;  %v854_v13 = vand.u32 (!%p355_p3), 15, %v712_v5  ;;  %v868_v17 = vand.u32 (!%p355_p3), 15, %v714_v6  ;;  %vm2261_vm15 = vcmask (!%p355_p3), 1046528  }
   0xd   : > { %v882_v27 = vand.u32 (!%p355_p3), 15, %v716_v7  ;;  %v896_v32 = vand.u32 (!%p355_p3), 15, %v4487_v23  ;;  %v910_v44 = vand.u32 (!%p355_p3), 15, %v4493_v28 }
   0xe   : > { %s5684_s26 = smov (!%p429_p4, %s4357_s26), 1  ;;  %v4468_v9 = vld [vmem:[#allocation2] sm:$0xf0]  ;;  %vm1632_vm6 = vcmp.eq.s32.totalorder %v840_v12, 15  ;;  %vm1634_vm7 = vcmp.eq.s32.totalorder %v854_v13, 15  ;;  %vm4482_vm8 = vcmp.eq.s32.totalorder %v868_v17, 15 }
   0xf   : > { %s4081_s5 = sshll.u32 %s5684_s26, 7  ;;  %v2054_v14 = vshrl.u32 %v4468_v9, 16  ;;  %v2056_v15 = vshll.u32 %v4468_v9, 16  ;;  %vm1741_vm9 = vmpackc.low %vm1632_vm6, %vm1632_vm6  ;;  %vm4522_vm12 = vcmp.eq.s32.totalorder %v882_v27, 15  ;;  %s5379_s19 = scalar_lea.vmem %s5633_s7, %s5684_s26 }
  0x10   : > { %s4460_s30 = scalar_lea.vmem %s5626_s0, %s4081_s5  ;;  %vm1743_vm10 = vmpackc.low %vm1634_vm7, %vm1634_vm7  ;;  %v1777_v25 = vsel %vm1741_vm9, 65537, %v4367_v0  ;;  %s5385_s22 = scalar_lea.vmem %s5634_s8, %s5684_s26 }
  0x11   : > { %v4306_v8 = vld [vmem:[%s4460_s30] ss:$0 sps:$4 sm:$0xff]   ;;  %v4307_v10 = vld [vmem:[%s4460_s30 + $0x34] sm:$0xff]   ;;  %v4309_v16 = vld [vmem:[%s4460_s30 + $0x44] sm:$0xff]   ;;  %v2058_v18 = vrot.slane %v2056_v15, 1  ;;  %v1779_v30 = vsel %vm1743_vm10, 65537, %v4367_v0  ;;  %v3981_v31 = vcombine.low %v4453_v3, %v1777_v25  ;;  %s5433_s25 = scalar_lea.vmem %s5632_s6, %s4081_s5 }
  0x12   : > { %634 = vst.msk [vmem:[#allocation2 + $0x8] sm:$0xf0] %vm502_vm1, %v4306_v8  ;;  %v4308_v11 = vld [vmem:[%s4460_s30 + $0x3c] sm:$0xff]   ;;  %v4310_v19 = vld [vmem:[%s4460_s30 + $0x4c] sm:$0xff]   ;;  %v4311_v20 = vld [vmem:[%s4460_s30 + $0x54] sm:$0xff]   ;;  %v4510_v36 = vcombine.low %v4453_v3, %v1779_v30  ;;  %vm1640_vm1 = vcmp.eq.s32.totalorder %v896_v32, 15 }
  0x13   : > { %642 = vst.msk [vmem:[#allocation2 + $0x40] sm:$0xff] %vm635_vm4, %v4307_v10  ;;  %643 = vst.msk [vmem:[#allocation2 + $0x48] sm:$0xff] %vm635_vm4, %v4308_v11  ;;  %v4312_v21 = vld [vmem:[%s4460_s30 + $0x5c] sm:$0xff]   ;;  %v2059_v24 = vor.u32 %v2058_v18, %v2054_v14  ;;  %v4313_v26 = vld [vmem:[%s4460_s30 + $0x4] sm:$0xff]   ;;  %v1916_v42 = vshrl.u32 %v3981_v31, 16  ;;  %v1919_v43 = vshll.u32 %v3981_v31, 16 }
  0x14   : > { %644 = vst.msk [vmem:[#allocation2 + $0x50] sm:$0xff] %vm635_vm4, %v4309_v16  ;;  %645 = vst.msk [vmem:[#allocation2 + $0x58] sm:$0xff] %vm635_vm4, %v4310_v19  ;;  %v4314_v38 = vld [vmem:[%s4460_s30 + $0xc] sm:$0xff]   ;;  %v4315_v45 = vld [vmem:[%s4460_s30 + $0x64] sm:$0xff]   ;;  %v1925_v54 = vshrl.u32 %v4510_v36, 16 }
  0x15   : > { %646 = vst.msk [vmem:[#allocation2 + $0x60] sm:$0xff] %vm635_vm4, %v4311_v20  ;;  %647 = vst.msk [vmem:[#allocation2 + $0x68] sm:$0xff] %vm635_vm4, %v4312_v21  ;;  %v1918_v52 = vrot.slane %v1916_v42, 3  ;;  %v1921_v53 = vrot.slane %v1919_v43, 4  ;;  %v4316_v55 = vld [vmem:[%s4460_s30 + $0x6c] sm:$0xff]   ;;  %v4317_v11 = vld [vmem:[%s4460_s30 + $0x14] sm:$0xff]  }
  0x16   : > { %vm1745_vm11 = vmpackc.low %vm4482_vm8, %vm4482_vm8  ;;  %636 = vst.msk [vmem:[#allocation2 + $0x10] sm:$0xff] %vm635_vm4, %v4313_v26  ;;  %v1927_v15 = vrot.slane %v1925_v54, 3  ;;  %v4318_v17 = vld [vmem:[%s4460_s30 + $0x1c] sm:$0xff]   ;;  %v4319_v22 = vld [vmem:[%s4460_s30 + $0x74] sm:$0xff]   ;;  %v1928_v26 = vshll.u32 %v4510_v36, 16 }
  0x17   : > { %v1781_v35 = vsel %vm1745_vm11, 65537, %v4367_v0  ;;  %637 = vst.msk [vmem:[#allocation2 + $0x18] sm:$0xff] %vm635_vm4, %v4314_v38  ;;  %648 = vst.msk [vmem:[#allocation2 + $0x70] sm:$0xff] %vm635_vm4, %v4315_v45  ;;  %v4549_v4 = vor.u32 %v1921_v53, %v1918_v52  ;;  %v4320_v53 = vld [vmem:[%s4460_s30 + $0x7c] ss:$0 sps:$4 sm:$0xff]  }
  0x18   : > { %v4520_v41 = vcombine.low %v4453_v3, %v1781_v35  ;;  %649 = vst.msk [vmem:[#allocation2 + $0x78] sm:$0xff] %vm635_vm4, %v4316_v55  ;;  %638 = vst.msk [vmem:[#allocation2 + $0x20] sm:$0xff] %vm635_vm4, %v4317_v11  ;;  %v1930_v42 = vrot.slane %v1928_v26, 4  ;;  %v4322_v55 = vld [vmem:[%s4460_s30 + $0x2c] sm:$0xff]  }
  0x19   : > { %v4495_v29 = vld [vmem:[#allocation2 + $0x8] sm:$0xff]  ;;  %vm1747_vm14 = vmpackc.low %vm4522_vm12, %vm4522_vm12  ;;  %639 = vst.msk [vmem:[#allocation2 + $0x28] sm:$0xff] %vm635_vm4, %v4318_v17 }
  0x1a   : > { %v2061_v34 = vshll.u32 %v4495_v29, 16  ;;  %v2065_v37 = vshrl.u32 %v4495_v29, 16  ;;  %v4515_v39 = vld [vmem:[#allocation2 + $0x40] sm:$0xff]  ;;  %v4517_v40 = vld [vmem:[#allocation2 + $0x48] sm:$0xff]  ;;  %v1934_v27 = vshrl.u32 %v4520_v41, 16  ;;  %650 = vst.msk [vmem:[#allocation2 + $0x80] sm:$0xff] %vm635_vm4, %v4319_v22  ;;  %vm1749_vm2 = vmpackc.low %vm1640_vm1, %vm1640_vm1 }
  0x1b   : > { %v2117_v47 = vshll.u32 %v4515_v39, 16  ;;  %v2121_v48 = vshrl.u32 %v4515_v39, 16  ;;  %v2125_v49 = vshll.u32 %v4517_v40, 16  ;;  %v4531_v50 = vld [vmem:[#allocation2 + $0x50] sm:$0xff]  ;;  %v2129_v51 = vshrl.u32 %v4517_v40, 16  ;;  %v4540_v59 = vld [vmem:[#allocation2 + $0x58] sm:$0xff] }
  0x1c   : > { %v2063_v46 = vrot.slane %v2061_v34, 1  ;;  %v2133_v60 = vshll.u32 %v4531_v50, 16  ;;  %v2137_v61 = vshrl.u32 %v4531_v50, 16  ;;  %v2141_v62 = vshll.u32 %v4540_v59, 16  ;;  %v4546_v63 = vld [vmem:[#allocation2 + $0x60] sm:$0xff]  ;;  %v4553_v8 = vld [vmem:[#allocation2 + $0x68] sm:$0xff] }
  0x1d   : > { %v4538_v57 = vrot.slane %v2117_v47, 1  ;;  %v2127_v58 = vrot.slane %v2125_v49, 1  ;;  %v2145_v1 = vshrl.u32 %v4540_v59, 16  ;;  %v2149_v10 = vshll.u32 %v4546_v63, 16  ;;  %v4559_v16 = vld [vmem:[#allocation2 + $0x10] sm:$0xff]  ;;  %v4321_v47 = vld [vmem:[%s4460_s30 + $0x24] sm:$0xff]  }
  0x1e   : > { %v2064_v56 = vsel %vm2052_vm5, %v2059_v24, %v2063_v46  ;;  %v2135_v6 = vrot.slane %v2133_v60, 1  ;;  %v2143_v12 = vrot.slane %v2141_v62, 1  ;;  %v2153_v13 = vshrl.u32 %v4546_v63, 16  ;;  %v4579_v38 = vld [vmem:[#allocation2 + $0x18] sm:$0xff]  ;;  %640 = vst.msk [vmem:[#allocation2 + $0x30] sm:$0xff] %vm635_vm4, %v4321_v47  ;;  %641 = vst.msk [vmem:[#allocation2 + $0x38] sm:$0xff] %vm635_vm4, %v4322_v55 }
  0x1f   : > { %2204 = vrot.lane.b32.xlu1 %v2064_v56, %s4369_s9  ;;  %v2123_v5 = vor.u32 %v2121_v48, %v4538_v57  ;;  %v2131_v7 = vor.u32 %v2129_v51, %v2127_v58  ;;  %v2157_v14 = vshll.u32 %v4553_v8, 16  ;;  %v2151_v21 = vrot.slane %v2149_v10, 1  ;;  %651 = vst.msk [vmem:[#allocation2 + $0x88] sm:$0xf] %vm500_vm0, %v4320_v53 }
  0x20   : > { %v2139_v19 = vor.u32 %v2137_v61, %v2135_v6  ;;  %v2147_v25 = vor.u32 %v2145_v1, %v2143_v12  ;;  %v1937_v34 = vshll.u32 %v4520_v41, 16  ;;  %v2067_v35 = vor.u32 %v2065_v37, %v2063_v46 }
  0x21   : > { %v2128_v18 = vsel %vm2052_vm5, %v2123_v5, %v2127_v58  ;;  %v2136_v20 = vsel %vm2052_vm5, %v2131_v7, %v2135_v6  ;;  %v4567_v24 = vrot.slane %v2157_v14, 1  ;;  %v2155_v31 = vor.u32 %v2153_v13, %v2151_v21 }
  0x22   : > { %2220 = vrot.lane.b32.xlu0 %v2128_v18, %s4369_s9  ;;  %v2144_v30 = vsel %vm2052_vm5, %v2139_v19, %v2143_v12  ;;  %v2152_v36 = vsel %vm2052_vm5, %v2147_v25, %v2151_v21  ;;  %v1936_v43 = vrot.slane %v1934_v27, 3  ;;  %v2069_v45 = vshll.u32 %v4559_v16, 16 }
  0x23   : > { %2224 = vrot.lane.b32.xlu1 %v2144_v30, %s4369_s9  ;;  %v2160_v41 = vsel %vm2052_vm5, %v2155_v31, %v4567_v24  ;;  %v1939_v48 = vrot.slane %v1937_v34, 4  ;;  %v1783_v37 = vsel %vm1747_vm14, 65537, %v4367_v0  ;;  %v1931_v46 = vor.u32 %v1930_v42, %v1927_v15 }
  0x24   : > { %v2071_v49 = vrot.slane %v2069_v45, 1  ;;  %v3984_v51 = vcombine.low %v4453_v3, %v1783_v37  ;;  %v2073_v52 = vshrl.u32 %v4559_v16, 16  ;;  %v1785_v32 = vsel %vm1749_vm2, 65537, %v4367_v0 }
  0x25   : > { %v1940_v23 = vor.u32 %v1939_v48, %v1936_v43  ;;  %v2077_v54 = vshll.u32 %v4579_v38, 16  ;;  %v1932_v56 = vsel %vm1852_vm13, %v4549_v4, %v1931_v46  ;;  %v3985_v60 = vcombine.low %v4453_v3, %v1785_v32 }
  0x26   : > { %2222 = vrot.lane.b32.xlu0 %v2136_v20, %s4369_s9  ;;  %v2072_v58 = vsel %vm2052_vm5, %v2067_v35, %v2071_v49  ;;  %v1943_v61 = vshrl.u32 %v3984_v51, 16  ;;  %vm2022_vm3 = vcmp.ne.s16.totalorder %v1932_v56, 0  ;;  %v1946_v1 = vshll.u32 %v3984_v51, 16 }
  0x27   : > { %2228 = vrot.lane.b32.xlu1 %v2160_v41, %s4369_s9  ;;  %v1941_v62 = vsel %vm1852_vm13, %v1931_v46, %v1940_v23  ;;  %v2075_v5 = vor.u32 %v2073_v52, %v2071_v49  ;;  %v4615_v28 = vsel %vm2022_vm3, 0, %v4515_v39  ;;  %v1952_v7 = vshrl.u32 %v3985_v60, 16 }
  0x28   : > { %vm2023_vm6 = vcmp.ne.s16.totalorder %v1941_v62, 0  ;;  %v1945_v6 = vrot.slane %v1943_v61, 3  ;;  %v2277_v11 = vrot.slane %v4615_v28, 1  ;;  %v1948_v12 = vrot.slane %v1946_v1, 4  ;;  %v4323_v28 = vld [vmem:[%s5629_s3] sm:$0x3f]  }
  0x29   : > { %v2042_v10 = vsel %vm2023_vm6, 0, %v4517_v40  ;;  %v1955_v13 = vshll.u32 %v3985_v60, 16  ;;  %v1954_v15 = vrot.slane %v1952_v7, 3  ;;  %v4619_v17 = vrot.slane %v2077_v54, 1 }
  0x2a   : > { %2226 = vrot.lane.b32.xlu0 %v2152_v36, %s4369_s9  ;;  %v2279_v14 = vrot.slane %v2042_v10, 1  ;;  %v924_v18 = vand.u32 15, %v4505_v33  ;;  %v1949_v19 = vor.u32 %v1948_v12, %v1945_v6  ;;  %vm1642_vm0 = vcmp.eq.s32.totalorder %v910_v44, 15 }
  0x2b   : > { %v1957_v20 = vrot.slane %v1955_v13, 4  ;;  %v696_v39 = vadd.s32 8, %v4449_v2  ;;  %v2080_v40 = vsel %vm2052_vm5, %v2075_v5, %v4619_v17  ;;  %vm1751_vm8 = vmpackc.low %vm1642_vm0, %vm1642_vm0  ;;  %v698_v22 = vadd.s32 24, %v4449_v2 }
  0x2c   : > { %v2280_v21 = vsel %vm2261_vm15, %v2277_v11, %v2279_v14  ;;  %vm1644_vm7 = vcmp.eq.s32.totalorder %v924_v18, 15  ;;  %v1950_v33 = vsel %vm1852_vm13, %v1940_v23, %v1949_v19  ;;  %v1787_v26 = vsel %vm1751_vm8, 65537, %v4367_v0  ;;  %v4663_v18 = vld [vmem:[#allocation2 + $0x70] sm:$0xff] }
  0x2d   : > { %2315 = vrot.lane.b32.xlu1 %v2280_v21, %s4370_s10  ;;  %v1958_v25 = vor.u32 %v1957_v20, %v1954_v15  ;;  %vm1753_vm9 = vmpackc.low %vm1644_vm7, %vm1644_vm7  ;;  %v742_v27 = vand.u32 15, %v696_v39  ;;  %vm2024_vm10 = vcmp.ne.s16.totalorder %v1950_v33, 0  ;;  %v3986_v31 = vcombine.low %v4453_v3, %v1787_v26 }
  0x2e   : > { %2206 = vrot.lane.b32.xlu0 %v2072_v58, %s4369_s9  ;;  %v1789_v30 = vsel %vm1753_vm9, 65537, %v4367_v0  ;;  %v756_v34 = vand.u32 15, %v698_v22  ;;  %v2043_v36 = vsel %vm2024_vm10, 0, %v4531_v50  ;;  %v700_v60 = vadd.s32 40, %v4449_v2 }
  0x2f   : > { %v1959_v35 = vsel %vm1852_vm13, %v1949_v19, %v1958_v25  ;;  %v3987_v42 = vcombine.low %v4453_v3, %v1789_v30  ;;  %vm4638_vm11 = vcmp.eq.s32.totalorder %v742_v27, 15  ;;  %v2281_v45 = vrot.slane %v2043_v36, 1  ;;  %v4680_v36 = vld [vmem:[#allocation2 + $0x78] sm:$0xff] }
  0x30   : > { %vm2025_vm12 = vcmp.ne.s16.totalorder %v1959_v35, 0  ;;  %v1961_v47 = vshrl.u32 %v3986_v31, 16  ;;  %v1964_v41 = vshll.u32 %v3986_v31, 16  ;;  %vm1727_vm14 = vmpackc.low %vm4638_vm11, %vm4638_vm11  ;;  %vm1620_vm1 = vcmp.eq.s32.totalorder %v756_v34, 15 }
  0x31   : > { %v2044_v48 = vsel %vm2025_vm12, 0, %v4540_v59  ;;  %v1970_v37 = vshrl.u32 %v3987_v42, 16  ;;  %v1973_v50 = vshll.u32 %v3987_v42, 16  ;;  %v2282_v52 = vsel %vm2261_vm15, %v2279_v14, %v2281_v45  ;;  %vm1729_vm2 = vmpackc.low %vm1620_vm1, %vm1620_vm1 }
  0x32   : > { %2208 = vrot.lane.b32.xlu0 %v2080_v40, %s4369_s9  ;;  %v2283_v46 = vrot.slane %v2044_v48, 1  ;;  %v1963_v49 = vrot.slane %v1961_v47, 3  ;;  %v1966_v51 = vrot.slane %v1964_v41, 4  ;;  %v1763_v32 = vsel %vm1727_vm14, 65537, %v4367_v0 }
  0x33   : > { %v1972_v53 = vrot.slane %v1970_v37, 3  ;;  %v1975_v23 = vrot.slane %v1973_v50, 4  ;;  %v1765_v54 = vsel %vm1729_vm2, 65537, %v4367_v0  ;;  %v3974_v59 = vcombine.low %v4453_v3, %v1763_v32 }
  0x34   : > { %v2284_v44 = vsel %vm2261_vm15, %v2281_v45, %v2283_v46  ;;  %v1967_v55 = vor.u32 %v1966_v51, %v1963_v49  ;;  %v3975_v56 = vcombine.low %v4453_v3, %v1765_v54  ;;  %v702_v61 = vadd.s32 56, %v4449_v2  ;;  %v4689_v54 = vld [vmem:[#allocation2 + $0x20] sm:$0xff] }
  0x35   : > { %2319 = vrot.lane.b32.xlu1 %v2284_v44, %s4370_s10  ;;  %v4655_v58 = vor.u32 %v1975_v23, %v1972_v53  ;;  %v1854_v1 = vshrl.u32 %v3974_v59, 16  ;;  %v1857_v5 = vshll.u32 %v3974_v59, 16  ;;  %v770_v12 = vand.u32 15, %v700_v60 }
  0x36   : > { %2317 = vrot.lane.b32.xlu0 %v2282_v52, %s4370_s10  ;;  %v1968_v62 = vsel %vm1852_vm13, %v1958_v25, %v1967_v55  ;;  %v1862_v6 = vshrl.u32 %v3975_v56, 16  ;;  %v1865_v10 = vshll.u32 %v3975_v56, 16  ;;  %v784_v33 = vand.u32 15, %v702_v61 }
  0x37   : > { %v1977_v7 = vsel %vm1852_vm13, %v1967_v55, %v4655_v58  ;;  %vm2026_vm3 = vcmp.ne.s16.totalorder %v1968_v62, 0  ;;  %v1856_v14 = vrot.slane %v1854_v1, 3  ;;  %v1859_v15 = vrot.slane %v1857_v5, 4  ;;  %v4696_v62 = vld [vmem:[#allocation2 + $0x28] sm:$0xff] }
  0x38   : > { %vm2027_vm6 = vcmp.ne.s16.totalorder %v1977_v7, 0  ;;  %v2045_v13 = vsel %vm2026_vm3, 0, %v4546_v63  ;;  %v1864_v39 = vrot.slane %v1862_v6, 3  ;;  %v1867_v21 = vrot.slane %v1865_v10, 4 }
  0x39   : > { %v4666_v19 = vsel %vm2027_vm6, 0, %v4553_v8  ;;  %v2285_v20 = vrot.slane %v2045_v13, 1  ;;  %v1860_v22 = vor.u32 %v1859_v15, %v1856_v14  ;;  %vm1622_vm0 = vcmp.eq.s32.totalorder %v770_v12, 15 }
  0x3a   : > { %v2287_v40 = vrot.slane %v4666_v19, 1  ;;  %v1868_v25 = vor.u32 %v1867_v21, %v1864_v39  ;;  %vm1731_vm7 = vmpackc.low %vm1622_vm0, %vm1622_vm0  ;;  %v2165_v63 = vshll.u32 %v4663_v18, 16  ;;  %vm1624_vm9 = vcmp.eq.s32.totalorder %v784_v33, 15 }
  0x3b   : > { %v2286_v26 = vsel %vm2261_vm15, %v2283_v46, %v2285_v20  ;;  %vm2014_vm8 = vcmp.ne.s16.totalorder %v1860_v22, 0  ;;  %v1767_v30 = vsel %vm1731_vm7, 65537, %v4367_v0  ;;  %vm1733_vm10 = vmpackc.low %vm1624_vm9, %vm1624_vm9  ;;  %v2169_v46 = vshrl.u32 %v4663_v18, 16 }
  0x3c   : > { %v2288_v27 = vsel %vm2261_vm15, %v2285_v20, %v2287_v40  ;;  %2321 = vrot.lane.b32.xlu0 %v2286_v26, %s4370_s10  ;;  %v1869_v31 = vsel %vm1852_vm13, %v1860_v22, %v1868_v25  ;;  %v2033_v34 = vsel %vm2014_vm8, 0, %v4468_v9  ;;  %v3976_v35 = vcombine.low %v4453_v3, %v1767_v30 }
  0x3d   : > { %2323 = vrot.lane.b32.xlu1 %v2288_v27, %s4370_s10  ;;  %vm2015_vm11 = vcmp.ne.s16.totalorder %v1869_v31, 0  ;;  %v2262_v42 = vrot.slane %v2033_v34, 1  ;;  %v1769_v43 = vsel %vm1733_vm10, 65537, %v4367_v0  ;;  %v2167_v50 = vrot.slane %v2165_v63, 1 }
  0x3e   : > { %v2034_v45 = vsel %vm2015_vm11, 0, %v4495_v29  ;;  %v3977_v47 = vcombine.low %v4453_v3, %v1769_v43  ;;  %v1871_v41 = vshrl.u32 %v3976_v35, 16  ;;  %v1874_v48 = vshll.u32 %v3976_v35, 16 }
  0x3f   : > { %v2263_v37 = vrot.slane %v2034_v45, 1  ;;  %v2173_v9 = vshll.u32 %v4680_v36, 16  ;;  %v2161_v32 = vshrl.u32 %v4553_v8, 16  ;;  %v2081_v59 = vshrl.u32 %v4579_v38, 16 }
  0x40   : > { %v1873_v49 = vrot.slane %v1871_v41, 3  ;;  %v1876_v51 = vrot.slane %v1874_v48, 4  ;;  %v1880_v52 = vshrl.u32 %v3977_v47, 16  ;;  %v1883_v53 = vshll.u32 %v3977_v47, 16  ;;  %v4734_v47 = vld [vmem:[#allocation2 + $0x80] sm:$0xff] }
  0x41   : > { %v2264_v23 = vsel %vm2261_vm15, %v2262_v42, %v2263_v37  ;;  %v2171_v56 = vor.u32 %v2169_v46, %v2167_v50  ;;  %v4693_v60 = vrot.slane %v2173_v9, 1  ;;  %v724_v61 = vadd.s32 232, %v4449_v2 }
  0x42   : > { %2299 = vrot.lane.b32.xlu1 %v2264_v23, %s4370_s10  ;;  %v1877_v29 = vor.u32 %v1876_v51, %v1873_v49  ;;  %v1882_v44 = vrot.slane %v1880_v52, 3  ;;  %v1885_v55 = vrot.slane %v1883_v53, 4  ;;  %v2085_v8 = vshll.u32 %v4689_v54, 16  ;;  %v4743_v52 = vld [vmem:[#allocation2 + $0x88] sm:$0xff] }
  0x43   : > { %v726_v6 = vadd.s32 248, %v4449_v2  ;;  %v2163_v7 = vor.u32 %v2161_v32, %v4567_v24  ;;  %v938_v10 = vand.u32 15, %v724_v61  ;;  %v704_v12 = vadd.s32 72, %v4449_v2 }
  0x44   : > { %v1878_v1 = vsel %vm1852_vm13, %v1868_v25, %v1877_v29  ;;  %v4699_v5 = vor.u32 %v1885_v55, %v1882_v44  ;;  %v2083_v15 = vor.u32 %v2081_v59, %v4619_v17  ;;  %v2093_v20 = vshll.u32 %v4696_v62, 16 }
  0x45   : > { %vm2016_vm12 = vcmp.ne.s16.totalorder %v1878_v1, 0  ;;  %vm1646_vm1 = vcmp.eq.s32.totalorder %v938_v10, 15  ;;  %v952_v21 = vand.u32 15, %v726_v6  ;;  %v2087_v24 = vrot.slane %v2085_v8, 1 }
  0x46   : > { %v1887_v13 = vsel %vm1852_vm13, %v1877_v29, %v4699_v5  ;;  %v2035_v14 = vsel %vm2016_vm12, 0, %v4559_v16  ;;  %vm1755_vm2 = vmpackc.low %vm1646_vm1, %vm1646_vm1  ;;  %v706_v33 = vadd.s32 88, %v4449_v2  ;;  %v798_v25 = vand.u32 15, %v704_v12 }
  0x47   : > { %vm2017_vm14 = vcmp.ne.s16.totalorder %v1887_v13, 0  ;;  %v2265_v39 = vrot.slane %v2035_v14, 1  ;;  %v1791_v17 = vsel %vm1755_vm2, 65537, %v4367_v0  ;;  %vm1648_vm3 = vcmp.eq.s32.totalorder %v952_v21, 15 }
  0x48   : > { %v4711_v22 = vsel %vm2017_vm14, 0, %v4579_v38  ;;  %v3988_v63 = vcombine.low %v4453_v3, %v1791_v17  ;;  %vm1757_vm6 = vmpackc.low %vm1648_vm3, %vm1648_vm3  ;;  %v812_v27 = vand.u32 15, %v706_v33  ;;  %vm4719_vm0 = vcmp.eq.s32.totalorder %v798_v25, 15 }
  0x49   : > { %v2267_v26 = vrot.slane %v4711_v22, 1  ;;  %v2266_v16 = vsel %vm2261_vm15, %v2263_v37, %v2265_v39  ;;  %v2168_v31 = vsel %vm2052_vm5, %v2163_v7, %v2167_v50  ;;  %v2089_v34 = vshrl.u32 %v4689_v54, 16  ;;  %vm1735_vm7 = vmpackc.low %vm4719_vm0, %vm4719_vm0 }
  0x4a   : > { %2301 = vrot.lane.b32.xlu0 %v2266_v16, %s4370_s10  ;;  %v1793_v35 = vsel %vm1757_vm6, 65537, %v4367_v0  ;;  %v1979_v42 = vshrl.u32 %v3988_v63, 16  ;;  %v1982_v43 = vshll.u32 %v3988_v63, 16  ;;  %vm1628_vm8 = vcmp.eq.s32.totalorder %v812_v27, 15 }
  0x4b   : > { %v2268_v30 = vsel %vm2261_vm15, %v2265_v39, %v2267_v26  ;;  %v3989_v45 = vcombine.low %v4453_v3, %v1793_v35  ;;  %v2176_v41 = vsel %vm2052_vm5, %v2171_v56, %v4693_v60  ;;  %v2088_v48 = vsel %vm2052_vm5, %v2083_v15, %v2087_v24  ;;  %vm1737_vm9 = vmpackc.low %vm1628_vm8, %vm1628_vm8  ;;  %v4777_v35 = vld [vmem:[#allocation2 + $0x30] sm:$0xff] }
  0x4c   : > { %2303 = vrot.lane.b32.xlu1 %v2268_v30, %s4370_s10  ;;  %v4739_v37 = vrot.slane %v2093_v20, 1  ;;  %v1771_v50 = vsel %vm1735_vm7, 65537, %v4367_v0  ;;  %v1981_v46 = vrot.slane %v1979_v42, 3  ;;  %v1984_v9 = vrot.slane %v1982_v43, 4 }
  0x4d   : > { %v1988_v49 = vshrl.u32 %v3989_v45, 16  ;;  %v1991_v51 = vshll.u32 %v3989_v45, 16  ;;  %v2091_v53 = vor.u32 %v2089_v34, %v2087_v24  ;;  %v1773_v23 = vsel %vm1737_vm9, 65537, %v4367_v0 }
  0x4e   : > { %2230 = vrot.lane.b32.xlu0 %v2168_v31, %s4369_s9  ;;  %v3978_v32 = vcombine.low %v4453_v3, %v1771_v50  ;;  %v2181_v29 = vshll.u32 %v4734_v47, 16  ;;  %v1985_v44 = vor.u32 %v1984_v9, %v1981_v46  ;;  %v3979_v56 = vcombine.low %v4453_v3, %v1773_v23 }
  0x4f   : > { %v1990_v55 = vrot.slane %v1988_v49, 3  ;;  %v1993_v59 = vrot.slane %v1991_v51, 4  ;;  %v2185_v8 = vshrl.u32 %v4734_v47, 16  ;;  %v2189_v6 = vshll.u32 %v4743_v52, 16 }
  0x50   : > { %2232 = vrot.lane.b32.xlu1 %v2176_v41, %s4369_s9  ;;  %v1889_v61 = vshrl.u32 %v3978_v32, 16  ;;  %v1892_v1 = vshll.u32 %v3978_v32, 16  ;;  %v1986_v7 = vsel %vm1852_vm13, %v4655_v58, %v1985_v44  ;;  %v1898_v12 = vshrl.u32 %v3979_v56, 16 }
  0x51   : > { %v4754_v10 = vor.u32 %v1993_v59, %v1990_v55  ;;  %v1901_v13 = vshll.u32 %v3979_v56, 16  ;;  %vm2028_vm10 = vcmp.ne.s16.totalorder %v1986_v7, 0  ;;  %v2183_v20 = vrot.slane %v2181_v29, 1 }
  0x52   : > { %v1891_v14 = vrot.slane %v1889_v61, 3  ;;  %v1894_v15 = vrot.slane %v1892_v1, 4  ;;  %v2047_v39 = vsel %vm2028_vm10, 0, %v4663_v18  ;;  %v1900_v24 = vrot.slane %v1898_v12, 3 }
  0x53   : > { %v1995_v21 = vsel %vm1852_vm13, %v1985_v44, %v4754_v10  ;;  %v1903_v33 = vrot.slane %v1901_v13, 4  ;;  %v2289_v25 = vrot.slane %v2047_v39, 1  ;;  %v2096_v58 = vsel %vm2052_vm5, %v2091_v53, %v4739_v37 }
  0x54   : > { %2210 = vrot.lane.b32.xlu1 %v2088_v48, %s4369_s9  ;;  %vm2029_vm11 = vcmp.ne.s16.totalorder %v1995_v21, 0  ;;  %v1895_v16 = vor.u32 %v1894_v15, %v1891_v14  ;;  %v4767_v27 = vrot.slane %v2189_v6, 1  ;;  %v728_v18 = vadd.s32 264, %v4449_v2 }
  0x55   : > { %v4763_v17 = vsel %vm2029_vm11, 0, %v4680_v36  ;;  %v4765_v63 = vor.u32 %v1903_v33, %v1900_v24  ;;  %v2290_v38 = vsel %vm2261_vm15, %v2287_v40, %v2289_v25  ;;  %v2177_v34 = vshrl.u32 %v4680_v36, 16 }
  0x56   : > { %v2291_v30 = vrot.slane %v4763_v17, 1  ;;  %v1896_v31 = vsel %vm1852_vm13, %v4699_v5, %v1895_v16  ;;  %2325 = vrot.lane.b32.xlu0 %v2290_v38, %s4370_s10  ;;  %v2187_v19 = vor.u32 %v2185_v8, %v2183_v20  ;;  %v966_v43 = vand.u32 15, %v728_v18  ;;  %v1653_v17 = vld [vmem:[#allocation2 + $0x90] sm:$0x1f] }
  0x57   : > { %v1905_v42 = vsel %vm1852_vm13, %v1895_v16, %v4765_v63  ;;  %vm2018_vm12 = vcmp.ne.s16.totalorder %v1896_v31, 0  ;;  %v2097_v36 = vshrl.u32 %v4696_v62, 16  ;;  %v2101_v48 = vshll.u32 %v4777_v35, 16 }
  0x58   : > { %2212 = vrot.lane.b32.xlu1 %v2096_v58, %s4369_s9  ;;  %v2292_v40 = vsel %vm2261_vm15, %v2289_v25, %v2291_v30  ;;  %vm2019_vm14 = vcmp.ne.s16.totalorder %v1905_v42, 0  ;;  %v2037_v5 = vsel %vm2018_vm12, 0, %v4689_v54  ;;  %vm1650_vm1 = vcmp.eq.s32.totalorder %v966_v43, 15 }
  0x59   : > { %v4789_v45 = vsel %vm2019_vm14, 0, %v4696_v62  ;;  %v2269_v41 = vrot.slane %v2037_v5, 1  ;;  %vm1759_vm2 = vmpackc.low %vm1650_vm1, %vm1650_vm1  ;;  %v730_v46 = vadd.s32 280, %v4449_v2  ;;  %v2192_v9 = vsel %vm2052_vm5, %v2187_v19, %v4767_v27  ;;  %v4799_v62 = vld [vmem:[#allocation2 + $0x38] sm:$0xff] }
  0x5a   : > { %v2271_v50 = vrot.slane %v4789_v45, 1  ;;  %2327 = vrot.lane.b32.xlu0 %v2292_v40, %s4370_s10  ;;  %v2179_v54 = vor.u32 %v2177_v34, %v4693_v60  ;;  %v1795_v49 = vsel %vm1759_vm2, 65537, %v4367_v0  ;;  %v708_v51 = vadd.s32 104, %v4449_v2 }
  0x5b   : > { %v2270_v23 = vsel %vm2261_vm15, %v2267_v26, %v2269_v41  ;;  %v3990_v32 = vcombine.low %v4453_v3, %v1795_v49  ;;  %v980_v29 = vand.u32 15, %v730_v46  ;;  %v2099_v60 = vor.u32 %v2097_v36, %v4739_v37  ;;  %v1181_v49 = vld [vmem:[#allocation2 + $0x90] sm:$0xf] }
  0x5c   : > { %v2272_v53 = vsel %vm2261_vm15, %v2269_v41, %v2271_v50  ;;  %v2103_v44 = vrot.slane %v2101_v48, 1  ;;  %v2105_v55 = vshrl.u32 %v4777_v35, 16  ;;  %v826_v59 = vand.u32 15, %v708_v51 }
  0x5d   : > { %2307 = vrot.lane.b32.xlu1 %v2272_v53, %s4370_s10  ;;  %v1997_v56 = vshrl.u32 %v3990_v32, 16  ;;  %v2000_v61 = vshll.u32 %v3990_v32, 16  ;;  %v2109_v1 = vshll.u32 %v4799_v62, 16  ;;  %vm1652_vm3 = vcmp.eq.s32.totalorder %v980_v29, 15 }
  0x5e   : > { %2305 = vrot.lane.b32.xlu0 %v2270_v23, %s4370_s10  ;;  %vm1761_vm6 = vmpackc.low %vm1652_vm3, %vm1652_vm3  ;;  %vm1630_vm0 = vcmp.eq.s32.totalorder %v826_v59, 15  ;;  %v2184_v22 = vsel %vm2052_vm5, %v2179_v54, %v2183_v20  ;;  %v2104_v37 = vsel %vm2052_vm5, %v2099_v60, %v2103_v44  ;;  %v2107_v14 = vor.u32 %v2105_v55, %v2103_v44 }
  0x5f   : > { %v1999_v26 = vrot.slane %v1997_v56, 3  ;;  %v2002_v8 = vrot.slane %v2000_v61, 4  ;;  %v1797_v6 = vsel %vm1761_vm6, 65537, %v4367_v0  ;;  %vm1739_vm7 = vmpackc.low %vm1630_vm0, %vm1630_vm0  ;;  %v2111_v15 = vrot.slane %v2109_v1, 1 }
  0x60   : > { %v3991_v7 = vcombine.low %v4453_v3, %v1797_v6  ;;  %v1775_v12 = vsel %vm1739_vm7, 65537, %v4367_v0  ;;  %v2113_v36 = vshrl.u32 %v4799_v62, 16  ;;  %v2193_v32 = vshrl.u32 %v4743_v52, 16 }
  0x61   : > { %2236 = vrot.lane.b32.xlu1 %v2192_v9, %s4369_s9  ;;  %v2003_v13 = vor.u32 %v2002_v8, %v1999_v26  ;;  %v3980_v39 = vcombine.low %v4453_v3, %v1775_v12  ;;  %v2112_v38 = vsel %vm2052_vm5, %v2107_v14, %v2111_v15  ;;  %v709_v29 = vadd.s32 112, %v4449_v2  ;;  %v4875_v8 = vld [vmem:[%s5629_s3 + $0x8] sm:$0x3f]   ;;  %v4888_v12 = vld [vmem:[%s5629_s3 + $0x10] sm:$0x3f]  }
  0x62   : > { %2234 = vrot.lane.b32.xlu0 %v2184_v22, %s4369_s9  ;;  %v2006_v20 = vshrl.u32 %v3991_v7, 16  ;;  %v2009_v21 = vshll.u32 %v3991_v7, 16  ;;  %v2115_v53 = vor.u32 %v2113_v36, %v2111_v15  ;;  %v711_v55 = vadd.s32 128, %v4449_v2 }
  0x63   : > { %v2004_v24 = vsel %vm1852_vm13, %v4754_v10, %v2003_v13  ;;  %v1907_v33 = vshrl.u32 %v3980_v39, 16  ;;  %v1910_v25 = vshll.u32 %v3980_v39, 16  ;;  %v735_v59 = vand.u32 15, %v4449_v2 }
  0x64   : > { %vm2030_vm8 = vcmp.ne.s16.totalorder %v2004_v24, 0  ;;  %v2008_v58 = vrot.slane %v2006_v20, 3  ;;  %v2011_v16 = vrot.slane %v2009_v21, 4  ;;  %v2120_v45 = vsel %vm2052_vm5, %v2115_v53, %v4538_v57 }
  0x65   : > { %2214 = vrot.lane.b32.xlu1 %v2104_v37, %s4369_s9  ;;  %v2049_v18 = vsel %vm2030_vm8, 0, %v4734_v47  ;;  %v1909_v31 = vrot.slane %v1907_v33, 3  ;;  %v1912_v34 = vrot.slane %v1910_v25, 4  ;;  %v833_v56 = vand.u32 15, %v709_v29 }
  0x66   : > { %v2293_v42 = vrot.slane %v2049_v18, 1  ;;  %v2012_v19 = vor.u32 %v2011_v16, %v2008_v58  ;;  %v847_v61 = vand.u32 15, %v711_v55  ;;  %v713_v1 = vadd.s32 144, %v4449_v2 }
  0x67   : > { %v1913_v43 = vor.u32 %v1912_v34, %v1909_v31  ;;  %v715_v22 = vadd.s32 160, %v4449_v2  ;;  %vm4867_vm14 = vcmp.eq.s32.totalorder %v735_v59, 0  ;;  %v2201_v26 = vshrl.u32 %v1181_v49, 16 }
  0x68   : > { %v2294_v10 = vsel %vm2261_vm15, %v2291_v30, %v2293_v42  ;;  %v2013_v40 = vsel %vm1852_vm13, %v2003_v13, %v2012_v19  ;;  %vm2032_vm12 = vcmp.ne.s16.totalorder %v2012_v19, 0  ;;  %vm2624_vm1 = vcmask 1045504  }
  0x69   : > { %2216 = vrot.lane.b32.xlu1 %v2112_v38, %s4369_s9  ;;  %2329 = vrot.lane.b32.xlu0 %v2294_v10, %s4370_s10  ;;  %vm2031_vm9 = vcmp.ne.s16.totalorder %v2013_v40, 0  ;;  %v1914_v47 = vsel %vm1852_vm13, %v4765_v63, %v1913_v43  ;;  %v1923_v5 = vsel %vm1852_vm13, %v1913_v43, %v4549_v4  ;;  %v2051_v51 = vsel %vm2032_vm12, 0, %v1653_v17 }
  0x6a   : > { %v2050_v41 = vsel %vm2031_vm9, 0, %v4743_v52  ;;  %vm2020_vm10 = vcmp.ne.s16.totalorder %v1914_v47, 0  ;;  %vm2021_vm11 = vcmp.ne.s16.totalorder %v1923_v5, 0  ;;  %v2297_v44 = vrot.slane %v2051_v51, 1  ;;  %4274 = vmatprep.subr.msk.bf16.mxu1 %vm2624_vm1, %v4323_v28  ;;  %4273 = vmatprep.subr.msk.bf16.mxu0 %vm2624_vm1, %v4323_v28 }
  0x6b   : > { %v2295_v30 = vrot.slane %v2050_v41, 1  ;;  %v2039_v48 = vsel %vm2020_vm10, 0, %v4777_v35  ;;  %v2040_v46 = vsel %vm2021_vm11, 0, %v4799_v62  ;;  %v2197_v62 = vshll.u32 %v1181_v49, 16 }
  0x6c   : > { %v2273_v9 = vrot.slane %v2039_v48, 1  ;;  %v2275_v54 = vrot.slane %v2040_v46, 1  ;;  %v2195_v52 = vor.u32 %v2193_v32, %v4767_v27  ;;  %v717_v27 = vadd.s32 176, %v4449_v2 }
  0x6d   : > { %v2296_v63 = vsel %vm2261_vm15, %v2293_v42, %v2295_v30  ;;  %v719_v7 = vadd.s32 192, %v4449_v2  ;;  %vm4890_vm2 = vcmp.eq.s32.totalorder %v847_v61, 0  ;;  %v861_v14 = vand.u32 15, %v713_v1 }
  0x6e   : > { %2331 = vrot.lane.b32.xlu0 %v2296_v63, %s4370_s10  ;;  %v2276_v4 = vsel %vm2261_vm15, %v2273_v9, %v2275_v54  ;;  %v2274_v23 = vsel %vm2261_vm15, %v2271_v50, %v2273_v9  ;;  %v2278_v60 = vsel %vm2261_vm15, %v2275_v54, %v2277_v11  ;;  %v2199_v50 = vrot.slane %v2197_v62, 1  ;;  %vm1307_vm6 = vmpackc.low %vm4890_vm2, %vm4890_vm2 }
  0x6f   : > { %2311 = vrot.lane.b32.xlu1 %v2276_v4, %s4370_s10  ;;  %v2298_v11 = vsel %vm2261_vm15, %v2295_v30, %v2297_v44  ;;  %vm4879_vm15 = vcmp.eq.s32.totalorder %v833_v56, 0  ;;  %v2626_v15 = vsel %vm2624_vm1, %v4323_v28, 0  ;;  %v875_v39 = vand.u32 15, %v715_v22 }
  0x70   : > { %v2200_v6 = vsel %vm2052_vm5, %v2195_v52, %v2199_v50  ;;  %vm1291_vm5 = vmpackc.low %vm4867_vm14, %vm4867_vm14  ;;  %4272 = vmatpush3.bf16.msra.mxu1 %v2626_v15  ;;  %4170 = vmatpush3.bf16.msra.mxu0 %v2626_v15  ;;  %v889_v20 = vand.u32 15, %v717_v27  ;;  %v2203_v21 = vor.u32 %v2201_v26, %v2199_v50  ;;  %v903_v24 = vand.u32 15, %v719_v7 }
  0x71   : > { %vm1305_vm3 = vmpackc.low %vm4879_vm15, %vm4879_vm15  ;;  %4275 = vmatprep.subr.msk.bf16.mxu1 %vm2624_vm1, %v4875_v8  ;;  %4276 = vmatprep.subr.msk.bf16.mxu0 %vm2624_vm1, %v4888_v12  ;;  %vm4911_vm0 = vcmp.eq.s32.totalorder %v861_v14, 0  ;;  %v1327_v25 = vsel %vm1291_vm5, 65537, %v4367_v0  ;;  %vm4917_vm7 = vcmp.eq.s32.totalorder %v875_v39, 0  ;;  %v1343_v18 = vsel %vm1307_vm6, 65537, %v4367_v0 }
  0x72   : > { %2309 = vrot.lane.b32.xlu0 %v2274_v23, %s4370_s10  ;;  %v1341_v58 = vsel %vm1305_vm3, 65537, %v4367_v0  ;;  %vm4922_vm8 = vcmp.eq.s32.totalorder %v889_v20, 0  ;;  %v697_v31 = vadd.s32 16, %v4449_v2  ;;  %vm1309_vm9 = vmpackc.low %vm4911_vm0, %vm4911_vm0  ;;  %vm4931_vm10 = vcmp.eq.s32.totalorder %v903_v24, 0 }
  0x73   : > { %2313 = vrot.lane.b32.xlu1 %v2278_v60, %s4370_s10  ;;  %v3956_v42 = vcombine.low %v1327_v25, %v4453_v3  ;;  %v3963_v19 = vcombine.low %v1341_v58, %v4453_v3  ;;  %vm1311_vm11 = vmpackc.low %vm4917_vm7, %vm4917_vm7  ;;  %v3964_v43 = vcombine.low %v1343_v18, %v4453_v3  ;;  %v1345_v40 = vsel %vm1309_vm9, 65537, %v4367_v0  ;;  %v1218_v18 = vld [vmem:[#allocation2] sm:$0xf8] }
  0x74   : > { %vm1313_vm12 = vmpackc.low %vm4922_vm8, %vm4922_vm8  ;;  %v749_v10 = vand.u32 15, %v697_v31  ;;  %v1347_v47 = vsel %vm1311_vm11, 65537, %v4367_v0  ;;  %v3965_v54 = vcombine.low %v1345_v40, %v4453_v3  ;;  %v699_v4 = vadd.s32 32, %v4449_v2 }
  0x75   : > { %vm1315_vm14 = vmpackc.low %vm4931_vm10, %vm4931_vm10  ;;  %v1419_v5 = vshrl.u32 %v3956_v42, 16  ;;  %v1422_v36 = vshll.u32 %v3956_v42, 16  ;;  %v1481_v41 = vshrl.u32 %v3963_v19, 16  ;;  %v1349_v17 = vsel %vm1313_vm12, 65537, %v4367_v0 }
  0x76   : > { %2218 = vrot.lane.b32.xlu0 %v2120_v45, %s4369_s9  ;;  %v1484_v30 = vshll.u32 %v3963_v19, 16  ;;  %v1490_v48 = vshrl.u32 %v3964_v43, 16  ;;  %v1493_v46 = vshll.u32 %v3964_v43, 16  ;;  %v1351_v9 = vsel %vm1315_vm14, 65537, %v4367_v0 }
  0x77   : > { %2333 = vrot.lane.b32.xlu1 %v2298_v11, %s4370_s10  ;;  %v3966_v49 = vcombine.low %v1347_v47, %v4453_v3  ;;  %vm4953_vm15 = vcmp.eq.s32.totalorder %v749_v10, 0  ;;  %v3967_v51 = vcombine.low %v1349_v17, %v4453_v3  ;;  %v1421_v53 = vrot.slane %v1419_v5, 4 }
  0x78   : > { %v1424_v23 = vrot.slane %v1422_v36, 5  ;;  %v3968_v32 = vcombine.low %v1351_v9, %v4453_v3  ;;  %v1483_v62 = vrot.slane %v1481_v41, 4  ;;  %v1486_v29 = vrot.slane %v1484_v30, 5  ;;  %vm1293_vm2 = vmpackc.low %vm4953_vm15, %vm4953_vm15 }
  0x79   : > { %v1492_v60 = vrot.slane %v1490_v48, 4  ;;  %v1499_v55 = vshrl.u32 %v3965_v54, 16  ;;  %v1502_v59 = vshll.u32 %v3965_v54, 16  ;;  %v1508_v45 = vshrl.u32 %v3966_v49, 16 }
  0x7a   : > { %2238 = vrot.lane.b32.xlu0 %v2200_v6, %s4369_s9  ;;  %v1511_v52 = vshll.u32 %v3966_v49, 16  ;;  %v1517_v56 = vshrl.u32 %v3967_v51, 16  ;;  %v1520_v28 = vshll.u32 %v3967_v51, 16  ;;  %v763_v11 = vand.u32 15, %v699_v4  ;;  %v4326_v4 = vld [vmem:[#allocation2 + $0x40] sm:$0xff] }
  0x7b   : > { %2335 = vrot.lane.b32.xlu1 %v2297_v44, %s4370_s10  ;;  %v1495_v44 = vrot.slane %v1493_v46, 5  ;;  %v1526_v61 = vshrl.u32 %v3968_v32, 16  ;;  %v1529_v1 = vshll.u32 %v3968_v32, 16  ;;  %v1329_v22 = vsel %vm1293_vm2, 65537, %v4367_v0 }
  0x7c   : > { %v4966_v57 = vor.u32 %v1424_v23, %v1421_v53  ;;  %vm1417_vm5 = vsmask.f32 3328  ;;  %v4968_v27 = vor.u32 %v1486_v29, %v1483_v62  ;;  %v1501_v6 = vrot.slane %v1499_v55, 4 }
  0x7d   : > { %v1496_v26 = vor.u32 %v1495_v44, %v1492_v60  ;;  %v1504_v37 = vrot.slane %v1502_v59, 5  ;;  %v1510_v7 = vrot.slane %v1508_v45, 4  ;;  %v1513_v13 = vrot.slane %v1511_v52, 5 }
  0x7e   : > { %2240 = vrot.lane.b32.xlu0 %v2203_v21, %s4369_s9  ;;  %v1519_v15 = vrot.slane %v1517_v56, 4  ;;  %v1522_v39 = vrot.slane %v1520_v28, 5  ;;  %v3957_v20 = vcombine.low %v1329_v22, %v4453_v3  ;;  %vm4971_vm3 = vcmp.eq.s32.totalorder %v763_v11, 0 }
  0x7f   : > { %v1528_v24 = vrot.slane %v1526_v61, 4  ;;  %v1531_v33 = vrot.slane %v1529_v1, 5  ;;  %vm1579_vm6 = vcmp.ne.s16.totalorder %v4966_v57, 0  ;;  %v1497_v58 = vsel %vm1417_vm5, %v4968_v27, %v1496_v26  ;;  %vm1295_vm0 = vmpackc.low %vm4971_vm3, %vm4971_vm3 }
  0x80   : > { %v1505_v16 = vor.u32 %v1504_v37, %v1501_v6  ;;  %v1514_v38 = vor.u32 %v1513_v13, %v1510_v7  ;;  %v1523_v34 = vor.u32 %v1522_v39, %v1519_v15  ;;  %v1427_v42 = vshrl.u32 %v3957_v20, 16  ;;  %v4328_v37 = vld [vmem:[#allocation2 + $0x48] sm:$0xff]  ;;  %v4329_v15 = vld [vmem:[#allocation2 + $0x60] sm:$0xff] }
  0x81   : > { %v1430_v19 = vshll.u32 %v3957_v20, 16  ;;  %v4985_v43 = vor.u32 %v1531_v33, %v1528_v24  ;;  %v721_v10 = vadd.s32 208, %v4449_v2  ;;  %v1331_v40 = vsel %vm1295_vm0, 65537, %v4367_v0  ;;  %v4330_v20 = vld [vmem:[#allocation2 + $0x58] sm:$0xff] }
  0x82   : > { %v727_v47 = vadd.s32 256, %v4449_v2  ;;  %v4990_v5 = vsel %vm1579_vm6, 0, %v1218_v18  ;;  %vm1587_vm7 = vcmp.ne.s16.totalorder %v1497_v58, 0  ;;  %v1506_v36 = vsel %vm1417_vm5, %v1496_v26, %v1505_v16  ;;  %v4327_v26 = vld [vmem:[#allocation2 + $0x50] sm:$0xff] }
  0x83   : > { %v1515_v17 = vsel %vm1417_vm5, %v1505_v16, %v1514_v38  ;;  %v1524_v30 = vsel %vm1417_vm5, %v1514_v38, %v1523_v34  ;;  %v1429_v46 = vrot.slane %v1427_v42, 4  ;;  %v1432_v9 = vrot.slane %v1430_v19, 5 }
  0x84   : > { %v1533_v54 = vsel %vm1417_vm5, %v1523_v34, %v4985_v43  ;;  %v3958_v49 = vcombine.low %v1331_v40, %v4453_v3  ;;  %v917_v63 = vand.u32 15, %v721_v10  ;;  %v707_v51 = vadd.s32 96, %v4449_v2 }
  0x85   : > { %v1606_v53 = vsel %vm1587_vm7, 0, %v4326_v4  ;;  %vm1588_vm8 = vcmp.ne.s16.totalorder %v1506_v36, 0  ;;  %vm2394_vm9 = vcmask 64512   ;;  %v959_v23 = vand.u32 15, %v727_v47 }
  0x86   : > { %vm1589_vm10 = vcmp.ne.s16.totalorder %v1515_v17, 0  ;;  %vm1590_vm11 = vcmp.ne.s16.totalorder %v1524_v30, 0  ;;  %v723_v32 = vadd.s32 224, %v4449_v2  ;;  %v819_v62 = vand.u32 15, %v707_v51 }
  0x87   : > { %vm1591_vm12 = vcmp.ne.s16.totalorder %v1533_v54, 0  ;;  %v5004_v29 = vor.u32 %v1432_v9, %v1429_v46  ;;  %v701_v44 = vadd.s32 48, %v4449_v2  ;;  %v5010_v55 = vadd.s32 64, %v4449_v2 }
  0x88   : > { %v1436_v52 = vshrl.u32 %v3958_v49, 16  ;;  %vm5013_vm14 = vcmp.eq.s32.totalorder %v917_v63, 0  ;;  %vm5017_vm15 = vcmp.eq.s32.totalorder %v819_v62, 0  ;;  %v1439_v61 = vshll.u32 %v3958_v49, 16 }
  0x89   : > { %vm5022_vm2 = vcmp.eq.s32.totalorder %v959_v23, 0  ;;  %vm1303_vm3 = vmpackc.low %vm5017_vm15, %vm5017_vm15  ;;  %v5031_v22 = vsel %vm2624_vm1, %v4888_v12, 0  ;;  %v1608_v6 = vsel %vm1589_vm10, 0, %v4327_v26  ;;  %v1607_v7 = vsel %vm1588_vm8, 0, %v4328_v37 }
  0x8a   : > { %v931_v13 = vand.u32 15, %v723_v32  ;;  %v5037_v39 = vsel %vm1591_vm12, 0, %v4329_v15  ;;  %v1609_v21 = vsel %vm1590_vm11, 0, %v4330_v20  ;;  %vm1317_vm6 = vmpackc.low %vm5013_vm14, %vm5013_vm14  ;;  %v1339_v12 = vsel %vm1303_vm3, 65537, %v4367_v0 }
  0x8b   : > { %v5054_v58 = vsel %vm1417_vm5, %v4966_v57, %v5004_v29  ;;  %v777_v16 = vand.u32 15, %v701_v44  ;;  %v791_v18 = vand.u32 15, %v5010_v55  ;;  %v5059_v38 = vsel %vm2624_vm1, %v4875_v8, 0  ;;  %vm1323_vm0 = vmpackc.low %vm5022_vm2, %vm5022_vm2 }
  0x8c   : > { %v1438_v42 = vrot.slane %v1436_v52, 4  ;;  %v1441_v19 = vrot.slane %v1439_v61, 5  ;;  %vm2575_vm7 = vcmask 97280   ;;  %v5065_v10 = vadd.s32 240, %v4449_v2 }
  0x8d   : > { %vm5067_vm8 = vcmp.eq.s32.totalorder %v931_v13, 0  ;;  %v1353_v40 = vsel %vm1317_vm6, 65537, %v4367_v0  ;;  %v3962_v8 = vcombine.low %v1339_v12, %v4453_v3  ;;  %v1359_v9 = vsel %vm1323_vm0, 65537, %v4367_v0 }
  0x8e   : > { %v3972_v44 = vcombine.low %v1359_v9, %v4453_v3  ;;  %vm5088_vm11 = vcmp.eq.s32.totalorder %v777_v16, 0  ;;  %vm5092_vm12 = vcmp.eq.s32.totalorder %v791_v18, 0  ;;  %vm1319_vm14 = vmpackc.low %vm5067_vm8, %vm5067_vm8  ;;  %vm1580_vm3 = vcmp.ne.s16.totalorder %v5054_v58, 0 }
  0x8f   : > { %v1472_v63 = vshrl.u32 %v3962_v8, 16  ;;  %v1475_v51 = vshll.u32 %v3962_v8, 16  ;;  %vm1299_vm15 = vmpackc.low %vm5092_vm12, %vm5092_vm12 }
  0x90   : > { %v1562_v15 = vshrl.u32 %v3972_v44, 16  ;;  %v1565_v20 = vshll.u32 %v3972_v44, 16  ;;  %vm1297_vm2 = vmpackc.low %vm5088_vm11, %vm5088_vm11 }
  0x91   : > { %v4963_v50 = vpop.permute.xlu1 %2204  ;;  %v1474_v55 = vrot.slane %v1472_v63, 4  ;;  %v1477_v56 = vrot.slane %v1475_v51, 5  ;;  %v1335_v51 = vsel %vm1299_vm15, 65537, %v4367_v0 }
  0x92   : > { %v1564_v57 = vrot.slane %v1562_v15, 4 }
  0x93   : > { %v5102_v37 = vor.u32 %v1477_v56, %v1474_v55  ;;  %v2339_v56 = vsel %vm635_vm4, %v4990_v5, %v4963_v50 }
  0x94   : > { %v2221_v14 = vpop.permute.xlu0 %2220 }
  0x95   : > { %v4975_v25 = vpop.permute.xlu1 %2224  ;;  %v2363_v59 = vsel %vm635_vm4, %v1606_v53, %v2221_v14  ;;  %v729_v14 = vadd.s32 272, %v4449_v2  ;;  %v5116_v18 = vsel %vm1417_vm5, %v5102_v37, %v4968_v27  ;;  %v1355_v27 = vsel %vm1319_vm14, 65537, %v4367_v0 }
  0x96   : > { %v2369_v36 = vsel %vm635_vm4, %v1608_v6, %v4975_v25 }
  0x97   : > { %v973_v47 = vand.u32 15, %v729_v14  ;;  %v5105_v14 = vor.u32 %v1441_v19, %v1438_v42 }
  0x98   : > { %v4983_v31 = vpop.permute.xlu0 %2222 }
  0x99   : > { %v4993_v41 = vpop.permute.xlu1 %2228  ;;  %v2366_v17 = vsel %vm635_vm4, %v1607_v7, %v4983_v31  ;;  %vm5079_vm1 = vcmp.eq.s32.totalorder %v973_v47, 0 }
  0x9a   : > { %vm1325_vm10 = vmpackc.low %vm5079_vm1, %vm5079_vm1  ;;  %v2375_v42 = vsel %vm635_vm4, %v5037_v39, %v4993_v41  ;;  %v3969_v39 = vcombine.low %v1353_v40, %v4453_v3 }
  0x9b   : > { %v1361_v1 = vsel %vm1325_vm10, 65537, %v4367_v0 }
  0x9c   : > { %v4997_v48 = vpop.permute.xlu0 %2226  ;;  %v3973_v7 = vcombine.low %v1361_v1, %v4453_v3  ;;  %v1538_v44 = vshll.u32 %v3969_v39, 16 }
  0x9f   : > { %v2316_v45 = vpop.permute.xlu1 %2315 }
  0xa0   : > { %v5006_v60 = vpop.permute.xlu0 %2206  ;;  %v2412_v11 = vsel %vm2394_vm9, %v2363_v59, %v2316_v45 }
  0xa1   : > { %v2498_v24 = vshrl.u32 %v2412_v11, 16  ;;  %v2501_v34 = vshll.u32 %v2412_v11, 16 }
  0xa3   : > { %v2500_v30 = vrot.slane %v2498_v24, 3  ;;  %v2503_v53 = vrot.slane %v2501_v34, 4  ;;  %v2372_v24 = vsel %vm635_vm4, %v1609_v21, %v4997_v48  ;;  %v1571_v34 = vshrl.u32 %v3973_v7, 16 }
  0xa4   : > { %v5040_v33 = vpop.permute.xlu0 %2208 }
  0xa5   : > { %v5097_v26 = vor.u32 %v2503_v53, %v2500_v30  ;;  %v1567_v30 = vrot.slane %v1565_v20, 5  ;;  %v3970_v53 = vcombine.low %v1355_v27, %v4453_v3 }
  0xa7   : > { %v2320_v54 = vpop.permute.xlu1 %2319 }
  0xa8   : > { %v2318_v46 = vpop.permute.xlu0 %2317  ;;  %v2416_v23 = vsel %vm2394_vm9, %v2369_v36, %v2320_v54  ;;  %v1573_v54 = vrot.slane %v1571_v34, 4 }
  0xa9   : > { %v2414_v49 = vsel %vm2394_vm9, %v2366_v17, %v2318_v46  ;;  %v2514_v31 = vshrl.u32 %v2416_v23, 16  ;;  %v2517_v62 = vshll.u32 %v2416_v23, 16  ;;  %v1333_v23 = vsel %vm1297_vm2, 65537, %v4367_v0 }
  0xaa   : > { %v2506_v25 = vshrl.u32 %v2414_v49, 16  ;;  %v2509_v32 = vshll.u32 %v2414_v49, 16  ;;  %v1574_v49 = vshll.u32 %v3973_v7, 16  ;;  %v3959_v1 = vcombine.low %v1333_v23, %v4453_v3 }
  0xab   : > { %v2516_v28 = vrot.slane %v2514_v31, 3  ;;  %v2519_v11 = vrot.slane %v2517_v62, 4  ;;  %v1535_v62 = vshrl.u32 %v3969_v39, 16  ;;  %v1544_v7 = vshrl.u32 %v3970_v53, 16 }
  0xac   : > { %v2508_v59 = vrot.slane %v2506_v25, 3  ;;  %v2511_v45 = vrot.slane %v2509_v32, 4  ;;  %v1576_v25 = vrot.slane %v1574_v49, 5 }
  0xad   : > { %v2520_v13 = vor.u32 %v2519_v11, %v2516_v28  ;;  %v945_v28 = vand.u32 15, %v5065_v10  ;;  %v705_v11 = vadd.s32 80, %v4449_v2  ;;  %v1537_v5 = vrot.slane %v1535_v62, 4  ;;  %v4331_v10 = vld [vmem:[#allocation2 + $0x8] sm:$0xff] }
  0xae   : > { %v2512_v6 = vor.u32 %v2511_v45, %v2508_v59  ;;  %v2322_v12 = vpop.permute.xlu0 %2321  ;;  %v3960_v59 = vcombine.low %v1335_v51, %v4453_v3  ;;  %v5157_v45 = vor.u32 %v1567_v30, %v1564_v57  ;;  %v5159_v52 = vor.u32 %v1576_v25, %v1573_v54 }
  0xaf   : > { %v2324_v19 = vpop.permute.xlu1 %2323  ;;  %v2418_v8 = vsel %vm2394_vm9, %v2372_v24, %v2322_v12  ;;  %v1599_v2 = vsel %vm1580_vm3, 0, %v4331_v10  ;;  %v4332_v24 = vld [vmem:[#allocation2 + $0x10] sm:$0xff]  ;;  %vm5183_vm0 = vcmp.eq.s32.totalorder %v945_v28, 0  ;;  %v1546_v58 = vrot.slane %v1544_v7, 4 }
  0xb0   : > { %v5111_v16 = vsel %vm1852_vm13, %v5097_v26, %v2512_v6  ;;  %v5125_v48 = vsel %vm1852_vm13, %v2512_v6, %v2520_v13  ;;  %v2420_v21 = vsel %vm2394_vm9, %v2375_v42, %v2324_v19  ;;  %v2522_v47 = vshrl.u32 %v2418_v8, 16  ;;  %vm1321_vm8 = vmpackc.low %vm5183_vm0, %vm5183_vm0 }
  0xb1   : > { %4187 = vmatprep.mubr.msk.bf16.mxu1 %vm2575_vm7, %v5111_v16  ;;  %v2525_v41 = vshll.u32 %v2418_v8, 16  ;;  %v2530_v36 = vshrl.u32 %v2420_v21, 16  ;;  %v2533_v17 = vshll.u32 %v2420_v21, 16  ;;  %v5179_v50 = vsel %vm1417_vm5, %v5157_v45, %v5159_v52 }
  0xb2   : > { %4188 = vmatmul.mubr.msk.bf16.vlgmr.msra.gmra.mrb[0].mxu1 %vm2575_vm7, %v5125_v48  ;;  %v2524_v46 = vrot.slane %v2522_v47, 3  ;;  %v1540_v6 = vrot.slane %v1538_v44, 5  ;;  %v1454_v15 = vshrl.u32 %v3960_v59, 16  ;;  %v1457_v20 = vshll.u32 %v3960_v59, 16 }
  0xb3   : > { %4204 = vmatpush3.bf16.msra.mxu1 %v5059_v38  ;;  %v2527_v9 = vrot.slane %v2525_v41, 4  ;;  %v2532_v40 = vrot.slane %v2530_v36, 3  ;;  %v2535_v63 = vrot.slane %v2533_v17, 4  ;;  %v1443_v38 = vsel %vm1417_vm5, %v5004_v29, %v5105_v14 }
  0xb4   : > { %v2300_v31 = vpop.permute.xlu1 %2299  ;;  %vm1581_vm6 = vcmp.ne.s16.totalorder %v1443_v38, 0  ;;  %v1445_v19 = vshrl.u32 %v3959_v1, 16  ;;  %v1448_v8 = vshll.u32 %v3959_v1, 16  ;;  %v805_v21 = vand.u32 15, %v705_v11 }
  0xb5   : > { %v2528_v4 = vor.u32 %v2527_v9, %v2524_v46  ;;  %v5151_v32 = vor.u32 %v2535_v63, %v2532_v40  ;;  %v2396_v61 = vsel %vm2394_vm9, %v2339_v56, %v2300_v31  ;;  %v1600_v12 = vsel %vm1581_vm6, 0, %v4332_v24 }
  0xb6   : > { %v2435_v34 = vshrl.u32 %v2396_v61, 16  ;;  %v2438_v42 = vshll.u32 %v2396_v61, 16  ;;  %v2342_v47 = vsel %vm635_vm4, %v1599_v2, %v5006_v60  ;;  %v1541_v39 = vor.u32 %v1540_v6, %v1537_v5 }
  0xb7   : > { %v5154_v55 = vsel %vm1852_vm13, %v2520_v13, %v2528_v4  ;;  %v5168_v29 = vsel %vm1852_vm13, %v2528_v4, %v5151_v32  ;;  %v1547_v13 = vshll.u32 %v3970_v53, 16  ;;  %v2345_v17 = vsel %vm635_vm4, %v1600_v12, %v5040_v33  ;;  %v4333_v12 = vld [vmem:[#allocation2 + $0x68] sm:$0xff] }
  0xb8   : > { %4191 = vmatprep.mubr.msk.bf16.mxu1 %vm2575_vm7, %v5154_v55  ;;  %v1456_v30 = vrot.slane %v1454_v15, 4  ;;  %v1459_v46 = vrot.slane %v1457_v20, 5  ;;  %v2437_v9 = vrot.slane %v2435_v34, 3  ;;  %v2440_v54 = vrot.slane %v2438_v42, 4 }
  0xb9   : > { %v1549_v36 = vrot.slane %v1547_v13, 5  ;;  %v1447_v51 = vrot.slane %v1445_v19, 4  ;;  %v1450_v4 = vrot.slane %v1448_v8, 5  ;;  %vm5196_vm1 = vcmp.eq.s32.totalorder %v805_v21, 0 }
  0xba   : > { %4192 = vmatmul.mubr.msk.bf16.gmra.mrb[4].mxu1 %vm2575_vm7, %v5168_v29  ;;  %v1542_v62 = vsel %vm1417_vm5, %v4985_v43, %v1541_v39  ;;  %v5204_v44 = vor.u32 %v1459_v46, %v1456_v30  ;;  %v1357_v59 = vsel %vm1321_vm8, 65537, %v4367_v0  ;;  %v2441_v61 = vor.u32 %v2440_v54, %v2437_v9  ;;  %vm1301_vm10 = vmpackc.low %vm5196_vm1, %vm5196_vm1  ;;  %v4336_v9 = vld [vmem:[#allocation2 + $0x18] sm:$0xff] }
  0xbb   : > { %v5200_v31 = vor.u32 %v1549_v36, %v1546_v58  ;;  %v1451_v5 = vor.u32 %v1450_v4, %v1447_v51  ;;  %vm1592_vm11 = vcmp.ne.s16.totalorder %v1542_v62, 0  ;;  %v3971_v13 = vcombine.low %v1357_v59, %v4453_v3  ;;  %v4335_v58 = vld [vmem:[#allocation2 + $0x20] sm:$0xff] }
  0xbc   : > { %v2302_v41 = vpop.permute.xlu0 %2301  ;;  %v1337_v24 = vsel %vm1301_vm10, 65537, %v4367_v0  ;;  %v1611_v34 = vsel %vm1592_vm11, 0, %v4333_v12  ;;  %vm1596_vm8 = vcmp.ne.s16.totalorder %v5179_v50, 0  ;;  %vm1597_vm1 = vcmp.ne.s16.totalorder %v5159_v52, 0 }
  0xbd   : > { %v2398_v57 = vsel %vm2394_vm9, %v2342_v47, %v2302_v41  ;;  %v1551_v10 = vsel %vm1417_vm5, %v1541_v39, %v5200_v31  ;;  %v1461_v2 = vsel %vm1417_vm5, %v1451_v5, %v5204_v44  ;;  %v1452_v42 = vsel %vm1417_vm5, %v5105_v14, %v1451_v5  ;;  %v4334_v41 = vld [vmem:[#allocation2 + $0x70] sm:$0xff] }
  0xbe   : > { %v2304_v49 = vpop.permute.xlu1 %2303  ;;  %v2442_v40 = vshrl.u32 %v2398_v57, 16  ;;  %v2445_v63 = vshll.u32 %v2398_v57, 16  ;;  %vm1593_vm12 = vcmp.ne.s16.totalorder %v1551_v10, 0  ;;  %vm1583_vm14 = vcmp.ne.s16.totalorder %v1461_v2, 0 }
  0xbf   : > { %v2400_v60 = vsel %vm2394_vm9, %v2345_v17, %v2304_v49  ;;  %v1553_v19 = vshrl.u32 %v3971_v13, 16  ;;  %v1556_v8 = vshll.u32 %v3971_v13, 16  ;;  %v3961_v27 = vcombine.low %v1337_v24, %v4453_v3 }
  0xc0   : > { %v2450_v33 = vshrl.u32 %v2400_v60, 16  ;;  %v2453_v23 = vshll.u32 %v2400_v60, 16  ;;  %v2444_v25 = vrot.slane %v2442_v40, 3  ;;  %v2447_v38 = vrot.slane %v2445_v63, 4  ;;  %v2231_v7 = vpop.permute.xlu0 %2230 }
  0xc1   : > { %v2378_v21 = vsel %vm635_vm4, %v1611_v34, %v2231_v7  ;;  %vm1582_vm15 = vcmp.ne.s16.totalorder %v1452_v42, 0  ;;  %v1612_v39 = vsel %vm1593_vm12, 0, %v4334_v41  ;;  %v1602_v36 = vsel %vm1583_vm14, 0, %v4335_v58 }
  0xc2   : > { %v2452_v56 = vrot.slane %v2450_v33, 3  ;;  %v2455_v28 = vrot.slane %v2453_v23, 4  ;;  %v2233_v11 = vpop.permute.xlu1 %2232  ;;  %v2448_v1 = vor.u32 %v2447_v38, %v2444_v25  ;;  %v1555_v30 = vrot.slane %v1553_v19, 4 }
  0xc3   : > { %v1558_v46 = vrot.slane %v1556_v8, 5  ;;  %v1601_v54 = vsel %vm1582_vm15, 0, %v4336_v9  ;;  %v1466_v49 = vshll.u32 %v3961_v27, 16  ;;  %v2381_v3 = vsel %vm635_vm4, %v1612_v39, %v2233_v11  ;;  %v4338_v9 = vld [vmem:[#allocation2 + $0x80] sm:$0xff] }
  0xc4   : > { %v5210_v6 = vor.u32 %v2455_v28, %v2452_v56  ;;  %v2449_v43 = vsel %vm1852_vm13, %v2441_v61, %v2448_v1 }
  0xc5   : > { %4171 = vmatprep.mubr.msk.bf16.mxu0 %vm2575_vm7, %v2449_v43  ;;  %v1559_v38 = vor.u32 %v1558_v46, %v1555_v30  ;;  %v1468_v28 = vrot.slane %v1466_v49, 5 }
  0xc6   : > { %v2211_v15 = vpop.permute.xlu1 %2210  ;;  %v5221_v20 = vsel %vm1852_vm13, %v2448_v1, %v5210_v6 }
  0xc7   : > { %4172 = vmatmul.mubr.msk.bf16.vlgmr.msra.gmra.mrb[0].mxu0 %vm2575_vm7, %v5221_v20  ;;  %v2348_v62 = vsel %vm635_vm4, %v1601_v54, %v2211_v15  ;;  %v1560_v24 = vsel %vm1417_vm5, %v5200_v31, %v1559_v38  ;;  %v1569_v39 = vsel %vm1417_vm5, %v1559_v38, %v5157_v45 }
  0xc8   : > { %4238 = vmatpush3.bf16.msra.mxu0 %v5031_v22  ;;  %v2326_v0 = vpop.permute.xlu0 %2325  ;;  %v1463_v22 = vshrl.u32 %v3961_v27, 16  ;;  %vm1594_vm2 = vcmp.ne.s16.totalorder %v1560_v24, 0  ;;  %vm1595_vm6 = vcmp.ne.s16.totalorder %v1569_v39, 0 }
  0xc9   : > { %v2422_v14 = vsel %vm2394_vm9, %v2378_v21, %v2326_v0  ;;  %v1614_v54 = vsel %vm1595_vm6, 0, %v4338_v9 }
  0xca   : > { %v2213_v47 = vpop.permute.xlu1 %2212  ;;  %v2538_v17 = vshrl.u32 %v2422_v14, 16  ;;  %v2541_v57 = vshll.u32 %v2422_v14, 16  ;;  %v1465_v56 = vrot.slane %v1463_v22, 4  ;;  %v4337_v14 = vld [vmem:[#allocation2 + $0x78] sm:$0xff] }
  0xcb   : > { %v2351_v60 = vsel %vm635_vm4, %v1602_v36, %v2213_v47  ;;  %v1613_v58 = vsel %vm1594_vm2, 0, %v4337_v14 }
  0xcc   : > { %v2540_v40 = vrot.slane %v2538_v17, 3  ;;  %v2543_v63 = vrot.slane %v2541_v57, 4  ;;  %v2328_v51 = vpop.permute.xlu0 %2327  ;;  %v1469_v27 = vor.u32 %v1468_v28, %v1465_v56 }
  0xcd   : > { %v2424_v4 = vsel %vm2394_vm9, %v2381_v3, %v2328_v51  ;;  %v4339_v51 = vld [vmem:[#allocation2 + $0x28] sm:$0xff] }
  0xce   : > { %v2544_v53 = vor.u32 %v2543_v63, %v2540_v40  ;;  %v2546_v33 = vshrl.u32 %v2424_v4, 16  ;;  %v2549_v23 = vshll.u32 %v2424_v4, 16  ;;  %v1479_v47 = vsel %vm1417_vm5, %v1469_v27, %v5102_v37 }
  0xcf   : > { %v2308_v25 = vpop.permute.xlu1 %2307  ;;  %vm1585_vm3 = vcmp.ne.s16.totalorder %v1479_v47, 0  ;;  %v1470_v45 = vsel %vm1417_vm5, %v5204_v44, %v1469_v27  ;;  %vm1586_vm5 = vcmp.ne.s16.totalorder %v5116_v18, 0 }
  0xd0   : > { %v2404_v59 = vsel %vm2394_vm9, %v2351_v60, %v2308_v25  ;;  %v2548_v61 = vrot.slane %v2546_v33, 3  ;;  %v2551_v11 = vrot.slane %v2549_v23, 4  ;;  %v2306_v7 = vpop.permute.xlu0 %2305  ;;  %v5240_v13 = vsel %vm1852_vm13, %v5151_v32, %v2544_v53 }
  0xd1   : > { %v2466_v1 = vshrl.u32 %v2404_v59, 16  ;;  %v2469_v5 = vshll.u32 %v2404_v59, 16  ;;  %v2402_v43 = vsel %vm2394_vm9, %v2348_v62, %v2306_v7  ;;  %4195 = vmatprep.mubr.msk.bf16.mxu1 %vm2575_vm7, %v5240_v13  ;;  %v1604_v46 = vsel %vm1585_vm3, 0, %v4777_v35 }
  0xd2   : > { %v2552_v10 = vor.u32 %v2551_v11, %v2548_v61  ;;  %v2458_v2 = vshrl.u32 %v2402_v43, 16  ;;  %v2461_v42 = vshll.u32 %v2402_v43, 16  ;;  %vm1584_vm0 = vcmp.ne.s16.totalorder %v1470_v45, 0  ;;  %v4340_v43 = vld [vmem:[#allocation2 + $0x38] sm:$0xff] }
  0xd3   : > { %v2237_v15 = vpop.permute.xlu1 %2236  ;;  %v2468_v12 = vrot.slane %v2466_v1, 3  ;;  %v2471_v34 = vrot.slane %v2469_v5, 4  ;;  %v1603_v4 = vsel %vm1584_vm0, 0, %v4339_v51 }
  0xd4   : > { %v2460_v19 = vrot.slane %v2458_v2, 3  ;;  %v5247_v8 = vsel %vm1852_vm13, %v2544_v53, %v2552_v10  ;;  %v2463_v21 = vrot.slane %v2461_v42, 4  ;;  %v2235_v32 = vpop.permute.xlu0 %2234  ;;  %v2387_v44 = vsel %vm635_vm4, %v1614_v54, %v2237_v15 }
  0xd5   : > { %4196 = vmatmul.mubr.msk.bf16.gmra.mrb[8].mxu1 %vm2575_vm7, %v5247_v8  ;;  %v5253_v41 = vor.u32 %v2471_v34, %v2468_v12  ;;  %v2384_v37 = vsel %vm635_vm4, %v1613_v58, %v2235_v32  ;;  %v1605_v2 = vsel %vm1586_vm5, 0, %v4340_v43 }
  0xd6   : > { %v2464_v31 = vor.u32 %v2463_v21, %v2460_v19 }
  0xd7   : > { %v2215_v0 = vpop.permute.xlu1 %2214 }
  0xd8   : > { %v5259_v36 = vsel %vm1852_vm13, %v5210_v6, %v2464_v31  ;;  %v5263_v17 = vsel %vm1852_vm13, %v2464_v31, %v5253_v41  ;;  %v2354_v28 = vsel %vm635_vm4, %v1603_v4, %v2215_v0  ;;  %v4341_v31 = vld [vmem:[#allocation2 + $0x88] sm:$0xff] }
  0xd9   : > { %4175 = vmatprep.mubr.msk.bf16.mxu0 %vm2575_vm7, %v5259_v36  ;;  %v1615_v50 = vsel %vm1596_vm8, 0, %v4341_v31 }
  0xda   : > { %4176 = vmatmul.mubr.msk.bf16.gmra.mrb[4].mxu0 %vm2575_vm7, %v5263_v17 }
  0xdb   : > { %v2330_v57 = vpop.permute.xlu0 %2329  ;;  %v2217_v30 = vpop.permute.xlu1 %2216 }
  0xdc   : > { %v2426_v6 = vsel %vm2394_vm9, %v2384_v37, %v2330_v57  ;;  %v2357_v63 = vsel %vm635_vm4, %v1604_v46, %v2217_v30 }
  0xdd   : > { %v2554_v22 = vshrl.u32 %v2426_v6, 16  ;;  %v2557_v49 = vshll.u32 %v2426_v6, 16 }
  0xdf   : > { %v2556_v3 = vrot.slane %v2554_v22, 3  ;;  %v2559_v40 = vrot.slane %v2557_v49, 4 }
  0xe0   : > { %v2332_v60 = vpop.permute.xlu0 %2331 }
  0xe1   : > { %v2560_v53 = vor.u32 %v2559_v40, %v2556_v3  ;;  %v2428_v33 = vsel %vm2394_vm9, %v2387_v44, %v2332_v60  ;;  %v2312_v23 = vpop.permute.xlu1 %2311 }
  0xe2   : > { %v2562_v25 = vshrl.u32 %v2428_v33, 16  ;;  %v2565_v35 = vshll.u32 %v2428_v33, 16  ;;  %v2408_v38 = vsel %vm2394_vm9, %v2357_v63, %v2312_v23 }
  0xe3   : > { %v2482_v62 = vshrl.u32 %v2408_v38, 16  ;;  %v2485_v59 = vshll.u32 %v2408_v38, 16  ;;  %v5280_v56 = vsel %vm1852_vm13, %v2552_v10, %v2560_v53 }
  0xe4   : > { %v2564_v61 = vrot.slane %v2562_v25, 3  ;;  %v2567_v11 = vrot.slane %v2565_v35, 4  ;;  %v2310_v1 = vpop.permute.xlu0 %2309  ;;  %4199 = vmatprep.mubr.msk.bf16.mxu1 %vm2575_vm7, %v5280_v56 }
  0xe5   : > { %v2484_v5 = vrot.slane %v2482_v62, 3  ;;  %v2406_v7 = vsel %vm2394_vm9, %v2354_v28, %v2310_v1  ;;  %v2314_v15 = vpop.permute.xlu1 %2313  ;;  %v2487_v24 = vrot.slane %v2485_v59, 4 }
  0xe6   : > { %v2568_v18 = vor.u32 %v2567_v11, %v2564_v61  ;;  %v2474_v12 = vshrl.u32 %v2406_v7, 16  ;;  %v2477_v34 = vshll.u32 %v2406_v7, 16  ;;  %v4371_v11 = vmov 0.0  }
  0xe7   : > { %v2488_v32 = vor.u32 %v2487_v24, %v2484_v5 }
  0xe8   : > { %v2476_v10 = vrot.slane %v2474_v12, 3  ;;  %v2479_v42 = vrot.slane %v2477_v34, 4  ;;  %v2219_v19 = vpop.permute.xlu0 %2218  ;;  %v5288_v27 = vsel %vm1852_vm13, %v2560_v53, %v2568_v18 }
  0xe9   : > { %v2360_v21 = vsel %vm635_vm4, %v1605_v2, %v2219_v19  ;;  %4200 = vmatmul.mubr.msk.bf16.gmra.mrb[12].mxu1 %vm2575_vm7, %v5288_v27  ;;  %v2334_v58 = vpop.permute.xlu1 %2333 }
  0xea   : > { %v2480_v0 = vor.u32 %v2479_v42, %v2476_v10  ;;  %v2410_v47 = vsel %vm2394_vm9, %v2360_v21, %v2314_v15  ;;  %4205 = vmatprep.mubr.msk.bf16.mxu1 %vm2575_vm7, %v5221_v20 }
  0xeb   : > { %v2490_v39 = vshrl.u32 %v2410_v47, 16  ;;  %v2493_v14 = vshll.u32 %v2410_v47, 16 }
  0xec   : > { %v2239_v37 = vpop.permute.xlu0 %2238  ;;  %v2481_v45 = vsel %vm1852_vm13, %v5253_v41, %v2480_v0  ;;  %v2489_v57 = vsel %vm1852_vm13, %v2480_v0, %v2488_v32 }
  0xed   : > { %v2492_v30 = vrot.slane %v2490_v39, 3  ;;  %v2495_v6 = vrot.slane %v2493_v14, 4  ;;  %v2390_v46 = vsel %vm635_vm4, %v1615_v50, %v2239_v37  ;;  %4179 = vmatprep.mubr.msk.bf16.mxu0 %vm2575_vm7, %v2481_v45 }
  0xee   : > { %v2430_v9 = vsel %vm2394_vm9, %v2390_v46, %v2334_v58  ;;  %4180 = vmatmul.mubr.msk.bf16.gmra.mrb[8].mxu0 %vm2575_vm7, %v2489_v57 }
  0xef   : > { %v2496_v20 = vor.u32 %v2495_v6, %v2492_v30  ;;  %v2824_v54 = vshrl.u32 %v2430_v9, 16  ;;  %v2827_v22 = vshll.u32 %v2430_v9, 16 }
  0xf1   : > { %v2826_v49 = vrot.slane %v2824_v54, 3  ;;  %v2829_v3 = vrot.slane %v2827_v22, 4  ;;  %4206 = vmatmul.mubr.msk.bf16.vlgmr.msra.gmra.mrb[16].mxu1 %vm2575_vm7, %v5259_v36  ;;  %v2497_v41 = vsel %vm1852_vm13, %v2488_v32, %v2496_v20  ;;  %v2505_v63 = vsel %vm1852_vm13, %v2496_v20, %v5097_v26  ;;  %v4342_v26 = vld [vmem:[#allocation2 + $0x90] sm:$0xf] }
  0xf2   : > { %4183 = vmatprep.mubr.msk.bf16.mxu0 %vm2575_vm7, %v2497_v41  ;;  %4209 = vmatprep.mubr.msk.bf16.mxu1 %vm2575_vm7, %v5263_v17 }
  0xf3   : > { %v2830_v40 = vor.u32 %v2829_v3, %v2826_v49 }
  0xf5   : > { %v2831_v44 = vsel %vm1852_vm13, %v2568_v18, %v2830_v40 }
  0xf6   : > { %4184 = vmatmul.mubr.msk.bf16.gmra.mrb[12].mxu0 %vm2575_vm7, %v2505_v63 }
  0xf7   : > { %4239 = vmatprep.mubr.msk.bf16.mxu0 %vm2575_vm7, %v5259_v36  ;;  %v2336_v36 = vpop.permute.xlu1 %2335 }
  0xf9   : > { %4210 = vmatmul.mubr.msk.bf16.gmra.mrb[20].mxu1 %vm2575_vm7, %v2481_v45 }
  0xfa   : > { %4213 = vmatprep.mubr.msk.bf16.mxu1 %vm2575_vm7, %v2489_v57 }
  0xfe   : > { %4240 = vmatmul.mubr.msk.bf16.vlgmr.msra.gmra.mrb[16].mxu0 %vm2575_vm7, %v5263_v17 }
  0xff   : > { %4243 = vmatprep.mubr.msk.bf16.mxu0 %vm2575_vm7, %v2481_v45 }
 0x101   : > { %4214 = vmatmul.mubr.msk.bf16.gmra.mrb[24].mxu1 %vm2575_vm7, %v2497_v41 }
 0x102   : > { %4217 = vmatprep.mubr.msk.bf16.mxu1 %vm2575_vm7, %v2505_v63 }
 0x106   : > { %4244 = vmatmul.mubr.msk.bf16.gmra.mrb[20].mxu0 %vm2575_vm7, %v2489_v57 }
 0x107   : > { %4247 = vmatprep.mubr.msk.bf16.mxu0 %vm2575_vm7, %v2497_v41 }
 0x109   : > { %4218 = vmatmul.mubr.msk.bf16.gmra.mrb[28].mxu1 %vm2575_vm7, %v5111_v16 }
 0x10a   : > { %4221 = vmatprep.mubr.msk.bf16.mxu1 %vm2575_vm7, %v5125_v48 }
 0x10e   : > { %4248 = vmatmul.mubr.msk.bf16.gmra.mrb[24].mxu0 %vm2575_vm7, %v2505_v63 }
 0x10f   : > { %4251 = vmatprep.mubr.msk.bf16.mxu0 %vm2575_vm7, %v5111_v16  ;;  %v1616_v16 = vsel %vm1597_vm1, 0, %v4342_v26 }
 0x111   : > { %4222 = vmatmul.mubr.msk.bf16.gmra.mrb[32].mxu1 %vm2575_vm7, %v5154_v55 }
 0x112   : > { %4225 = vmatprep.mubr.msk.bf16.mxu1 %vm2575_vm7, %v5168_v29 }
 0x116   : > { %4252 = vmatmul.mubr.msk.bf16.gmra.mrb[28].mxu0 %vm2575_vm7, %v5125_v48  ;;  %v2241_v48 = vpop.permute.xlu0 %2240 }
 0x117   : > { %4255 = vmatprep.mubr.msk.bf16.mxu0 %vm2575_vm7, %v5154_v55  ;;  %v2393_v55 = vsel %vm635_vm4, %v1616_v16, %v2241_v48  ;;  %vm497_vm4 = vcmask 57344  }
 0x118   : > { %v2432_v52 = vsel %vm2394_vm9, %v2393_v55, %v2336_v36  ;;  %498 = vst.msk [vmem:[%s5379_s19] sm:$0x1] %vm497_vm4, %v4371_v11  ;;  %499 = vst.msk [vmem:[%s5385_s22] sm:$0x1] %vm497_vm4, %v4371_v11 }
 0x119   : > { %4226 = vmatmul.mubr.msk.bf16.gmra.mrb[36].mxu1 %vm2575_vm7, %v5240_v13 }
 0x11a   : > { %4229 = vmatprep.mubr.msk.bf16.mxu1 %vm2575_vm7, %v5247_v8 }
 0x11e   : > { %4256 = vmatmul.mubr.msk.bf16.gmra.mrb[32].mxu0 %vm2575_vm7, %v5168_v29  ;;  %v3103_v29 = vshrl.u32 %v2432_v52, 16 }
 0x11f   : > { %4259 = vmatprep.mubr.msk.bf16.mxu0 %vm2575_vm7, %v5240_v13  ;;  %v3106_v13 = vshll.u32 %v2432_v52, 16 }
 0x120   : > { %v3105_v17 = vrot.slane %v3103_v29, 3 }
 0x121   : > { %4230 = vmatmul.mubr.msk.bf16.gmra.mrb[40].mxu1 %vm2575_vm7, %v5280_v56  ;;  %v3108_v60 = vrot.slane %v3106_v13, 4 }
 0x122   : > { %4233 = vmatprep.mubr.msk.bf16.mxu1 %vm2575_vm7, %v5288_v27 }
 0x123   : > { %v3109_v51 = vor.u32 %v3108_v60, %v3105_v17 }
 0x125   : > { %v3110_v4 = vsel %vm1852_vm13, %v2830_v40, %v3109_v51  ;;  %vm3539_vm13 = vcmask 60416  }
 0x126   : > { %4260 = vmatmul.mubr.msk.bf16.gmra.mrb[36].mxu0 %vm2575_vm7, %v5247_v8 }
 0x127   : > { %4263 = vmatprep.mubr.msk.bf16.mxu0 %vm2575_vm7, %v5280_v56 }
 0x129   : > { %4234 = vmatmul.mubr.msk.bf16.gmra.mrb[44].mxu1 %vm2575_vm7, %v2831_v44 }
 0x12e   : > { %4264 = vmatmul.mubr.msk.bf16.gmra.mrb[40].mxu0 %vm2575_vm7, %v5288_v27 }
 0x12f   : > { %4267 = vmatprep.mubr.msk.bf16.mxu0 %vm2575_vm7, %v2831_v44 }
 0x136   : > { %4268 = vmatmul.mubr.msk.bf16.gmra.mrb[44].mxu0 %vm2575_vm7, %v3110_v4 }
 0x185   : > { %v4189_v8 = vpop.f32.mrb[0].mxu1 }
 0x186   : > { %2807 = vst.msk [vmem:[#allocation3 + $0x90] sm:$0xff] %vm2394_vm9, %v4189_v8  ;;  %v2726_v53 = vpop.f32.mrb[1].mxu1 }
 0x187   : > { %2805 = vst.msk [vmem:[#allocation3 + $0x80] sm:$0xff] %vm2394_vm9, %v2726_v53  ;;  %v4190_v33 = vpop.f32.mrb[2].mxu1 }
 0x188   : > { %2808 = vst.msk [vmem:[#allocation3 + $0x98] sm:$0xff] %vm2394_vm9, %v4190_v33  ;;  %v2729_v23 = vpop.f32.mrb[3].mxu1 }
 0x189   : > { %2806 = vst.msk [vmem:[#allocation3 + $0x88] sm:$0xff] %vm2394_vm9, %v2729_v23 }
 0x18d   : > { %v4193_v25 = vpop.f32.mrb[4].mxu1 }
 0x18e   : > { %2811 = vst.msk [vmem:[#allocation3 + $0xb0] sm:$0xff] %vm2394_vm9, %v4193_v25  ;;  %v2742_v35 = vpop.f32.mrb[5].mxu1 }
 0x18f   : > { %2809 = vst.msk [vmem:[#allocation3 + $0xa0] sm:$0xff] %vm2394_vm9, %v2742_v35  ;;  %v4194_v38 = vpop.f32.mrb[6].mxu1 }
 0x190   : > { %2812 = vst.msk [vmem:[#allocation3 + $0xb8] sm:$0xff] %vm2394_vm9, %v4194_v38  ;;  %v2745_v62 = vpop.f32.mrb[7].mxu1 }
 0x191   : > { %2810 = vst.msk [vmem:[#allocation3 + $0xa8] sm:$0xff] %vm2394_vm9, %v2745_v62 }
 0x19a   : > { %v4173_v59 = vpop.f32.mrb[0].mxu0 }
 0x19b   : > { %2791 = vst.msk [vmem:[#allocation3 + $0x10] sm:$0xff] %vm2394_vm9, %v4173_v59  ;;  %v2662_v56 = vpop.f32.mrb[1].mxu0 }
 0x19c   : > { %2789 = vst.msk [vmem:[#allocation3] sm:$0xff] %vm2394_vm9, %v2662_v56  ;;  %v4174_v28 = vpop.f32.mrb[2].mxu0 }
 0x19d   : > { %2792 = vst.msk [vmem:[#allocation3 + $0x18] sm:$0xff] %vm2394_vm9, %v4174_v28  ;;  %v2665_v61 = vpop.f32.mrb[3].mxu0 }
 0x19e   : > { %2790 = vst.msk [vmem:[#allocation3 + $0x8] sm:$0xff] %vm2394_vm9, %v2665_v61 }
 0x1a2   : > { %v3006_v47 = vld [vmem:[#allocation3 + $0x10] sm:$0xff] }
 0x1a3   : > { %v3004_v39 = vld [vmem:[#allocation3] sm:$0xff] }
 0x1a4   : > { %v3007_v37 = vld [vmem:[#allocation3 + $0x18] sm:$0xff] }
 0x1a5   : > { %v3005_v30 = vld [vmem:[#allocation3 + $0x8] sm:$0xff] }
 0x1a8   : > { %v4197_v1 = vpop.f32.mrb[8].mxu1 }
 0x1a9   : > { %2815 = vst.msk [vmem:[#allocation3 + $0xd0] sm:$0xff] %vm2394_vm9, %v4197_v1  ;;  %v2758_v5 = vpop.f32.mrb[9].mxu1 }
 0x1aa   : > { %2813 = vst.msk [vmem:[#allocation3 + $0xc0] sm:$0xff] %vm2394_vm9, %v2758_v5  ;;  %v4198_v7 = vpop.f32.mrb[10].mxu1 }
 0x1ab   : > { %2816 = vst.msk [vmem:[#allocation3 + $0xd8] sm:$0xff] %vm2394_vm9, %v4198_v7  ;;  %v2761_v43 = vpop.f32.mrb[11].mxu1 }
 0x1ac   : > { %2814 = vst.msk [vmem:[#allocation3 + $0xc8] sm:$0xff] %vm2394_vm9, %v2761_v43 }
 0x1ad   : > { %v4177_v2 = vpop.f32.mrb[4].mxu0 }
 0x1ae   : > { %2795 = vst.msk [vmem:[#allocation3 + $0x30] sm:$0xff] %vm2394_vm9, %v4177_v2  ;;  %v2678_v15 = vpop.f32.mrb[5].mxu0 }
 0x1af   : > { %2793 = vst.msk [vmem:[#allocation3 + $0x20] sm:$0xff] %vm2394_vm9, %v2678_v15  ;;  %v4178_v18 = vpop.f32.mrb[6].mxu0 }
 0x1b0   : > { %2796 = vst.msk [vmem:[#allocation3 + $0x38] sm:$0xff] %vm2394_vm9, %v4178_v18  ;;  %v2681_v24 = vpop.f32.mrb[7].mxu0 }
 0x1b1   : > { %2794 = vst.msk [vmem:[#allocation3 + $0x28] sm:$0xff] %vm2394_vm9, %v2681_v24 }
 0x1b5   : > { %v3010_v49 = vld [vmem:[#allocation3 + $0x30] sm:$0xff] }
 0x1b6   : > { %v3008_v40 = vld [vmem:[#allocation3 + $0x20] sm:$0xff] }
 0x1b7   : > { %v3011_v26 = vld [vmem:[#allocation3 + $0x38] sm:$0xff] }
 0x1b8   : > { %v3009_v55 = vld [vmem:[#allocation3 + $0x28] sm:$0xff] }
 0x1bc   : > { %v4201_v12 = vpop.f32.mrb[12].mxu1 }
 0x1bd   : > { %2819 = vst.msk [vmem:[#allocation3 + $0xf0] sm:$0xff] %vm2394_vm9, %v4201_v12  ;;  %v2774_v34 = vpop.f32.mrb[13].mxu1 }
 0x1be   : > { %2817 = vst.msk [vmem:[#allocation3 + $0xe0] sm:$0xff] %vm2394_vm9, %v2774_v34  ;;  %v4202_v10 = vpop.f32.mrb[14].mxu1 }
 0x1bf   : > { %2820 = vst.msk [vmem:[#allocation3 + $0xf8] sm:$0xff] %vm2394_vm9, %v4202_v10  ;;  %v2777_v42 = vpop.f32.mrb[15].mxu1 }
 0x1c0   : > { %2818 = vst.msk [vmem:[#allocation3 + $0xe8] sm:$0xff] %vm2394_vm9, %v2777_v42 }
 0x1c1   : > { %v4181_v19 = vpop.f32.mrb[8].mxu0 }
 0x1c2   : > { %2799 = vst.msk [vmem:[#allocation3 + $0x50] sm:$0xff] %vm2394_vm9, %v4181_v19  ;;  %v2694_v27 = vpop.f32.mrb[9].mxu0 }
 0x1c3   : > { %2797 = vst.msk [vmem:[#allocation3 + $0x40] sm:$0xff] %vm2394_vm9, %v2694_v27  ;;  %v4182_v21 = vpop.f32.mrb[10].mxu0 }
 0x1c4   : > { %2800 = vst.msk [vmem:[#allocation3 + $0x58] sm:$0xff] %vm2394_vm9, %v4182_v21  ;;  %v2697_v32 = vpop.f32.mrb[11].mxu0  ;;  %v4207_v0 = vpop.f32.mrb[16].mxu1 }
 0x1c5   : > { %2798 = vst.msk [vmem:[#allocation3 + $0x48] sm:$0xff] %vm2394_vm9, %v2697_v32  ;;  %v3038_v31 = vadd.f32 %v4207_v0, %v3006_v47  ;;  %v2877_v50 = vpop.f32.mrb[17].mxu1 }
 0x1c6   : > { %v3036_v14 = vadd.f32 %v3004_v39, %v2877_v50  ;;  %v4208_v58 = vpop.f32.mrb[18].mxu1 }
 0x1c7   : > { %3070 = vst.msk [vmem:[#allocation3 + $0x10] sm:$0xff] %vm2394_vm9, %v3038_v31  ;;  %v3039_v45 = vadd.f32 %v4208_v58, %v3007_v37  ;;  %v2880_v57 = vpop.f32.mrb[19].mxu1 }
 0x1c8   : > { %3068 = vst.msk [vmem:[#allocation3] sm:$0xff] %vm2394_vm9, %v3036_v14  ;;  %v3037_v6 = vadd.f32 %v3005_v30, %v2880_v57 }
 0x1c9   : > { %3071 = vst.msk [vmem:[#allocation3 + $0x18] sm:$0xff] %vm2394_vm9, %v3039_v45  ;;  %v4185_v46 = vpop.f32.mrb[12].mxu0  ;;  %v3014_v23 = vld [vmem:[#allocation3 + $0x50] sm:$0xff] }
 0x1ca   : > { %3069 = vst.msk [vmem:[#allocation3 + $0x8] sm:$0xff] %vm2394_vm9, %v3037_v6  ;;  %2803 = vst.msk [vmem:[#allocation3 + $0x70] sm:$0xff] %vm2394_vm9, %v4185_v46  ;;  %v2710_v9 = vpop.f32.mrb[13].mxu0  ;;  %v3012_v56 = vld [vmem:[#allocation3 + $0x40] sm:$0xff] }
 0x1cb   : > { %2801 = vst.msk [vmem:[#allocation3 + $0x60] sm:$0xff] %vm2394_vm9, %v2710_v9  ;;  %v4186_v20 = vpop.f32.mrb[14].mxu0  ;;  %v3015_v11 = vld [vmem:[#allocation3 + $0x58] sm:$0xff] }
 0x1cc   : > { %2804 = vst.msk [vmem:[#allocation3 + $0x78] sm:$0xff] %vm2394_vm9, %v4186_v20  ;;  %v2713_v54 = vpop.f32.mrb[15].mxu0  ;;  %v4211_v22 = vpop.f32.mrb[20].mxu1  ;;  %v3013_v7 = vld [vmem:[#allocation3 + $0x48] sm:$0xff] }
 0x1cd   : > { %2802 = vst.msk [vmem:[#allocation3 + $0x68] sm:$0xff] %vm2394_vm9, %v2713_v54  ;;  %v3042_v3 = vadd.f32 %v4211_v22, %v3010_v49  ;;  %v2893_v41 = vpop.f32.mrb[21].mxu1 }
 0x1ce   : > { %v3040_v63 = vadd.f32 %v3008_v40, %v2893_v41  ;;  %v4212_v44 = vpop.f32.mrb[22].mxu1  ;;  %v3285_v29 = vld [vmem:[#allocation3 + $0x10] sm:$0xff] }
 0x1cf   : > { %3074 = vst.msk [vmem:[#allocation3 + $0x30] sm:$0xff] %vm2394_vm9, %v3042_v3  ;;  %v3043_v16 = vadd.f32 %v4212_v44, %v3011_v26  ;;  %v2896_v48 = vpop.f32.mrb[23].mxu1  ;;  %v3283_v60 = vld [vmem:[#allocation3] sm:$0xff] }
 0x1d0   : > { %3072 = vst.msk [vmem:[#allocation3 + $0x20] sm:$0xff] %vm2394_vm9, %v3040_v63  ;;  %v3041_v36 = vadd.f32 %v3009_v55, %v2896_v48  ;;  %v3286_v8 = vld [vmem:[#allocation3 + $0x18] sm:$0xff] }
 0x1d1   : > { %3075 = vst.msk [vmem:[#allocation3 + $0x38] sm:$0xff] %vm2394_vm9, %v3043_v16  ;;  %v4241_v52 = vpop.f32.mrb[16].mxu0  ;;  %v3284_v35 = vld [vmem:[#allocation3 + $0x8] sm:$0xff]  ;;  %v3018_v47 = vld [vmem:[#allocation3 + $0x70] sm:$0xff] }
 0x1d2   : > { %3073 = vst.msk [vmem:[#allocation3 + $0x28] sm:$0xff] %vm2394_vm9, %v3041_v36  ;;  %v3317_v13 = vadd.f32 %v4241_v52, %v3285_v29  ;;  %v3156_v17 = vpop.f32.mrb[17].mxu0  ;;  %v3016_v3 = vld [vmem:[#allocation3 + $0x60] sm:$0xff] }
 0x1d3   : > { %v3315_v51 = vadd.f32 %v3283_v60, %v3156_v17  ;;  %v4242_v4 = vpop.f32.mrb[18].mxu0  ;;  %v3019_v16 = vld [vmem:[#allocation3 + $0x78] sm:$0xff] }
 0x1d4   : > { %3349 = vst.msk [vmem:[#allocation3 + $0x10] sm:$0xff] %vm2394_vm9, %v3317_v13  ;;  %v3318_v53 = vadd.f32 %v4242_v4, %v3286_v8  ;;  %v4215_v33 = vpop.f32.mrb[24].mxu1  ;;  %v3159_v25 = vpop.f32.mrb[19].mxu0  ;;  %v3017_v48 = vld [vmem:[#allocation3 + $0x68] sm:$0xff] }
 0x1d5   : > { %3347 = vst.msk [vmem:[#allocation3] sm:$0xff] %vm2394_vm9, %v3315_v51  ;;  %v3046_v38 = vadd.f32 %v4215_v33, %v3014_v23  ;;  %v3316_v62 = vadd.f32 %v3284_v35, %v3159_v25  ;;  %v2909_v59 = vpop.f32.mrb[25].mxu1 }
 0x1d6   : > { %3350 = vst.msk [vmem:[#allocation3 + $0x18] sm:$0xff] %vm2394_vm9, %v3318_v53  ;;  %v3044_v28 = vadd.f32 %v3012_v56, %v2909_v59  ;;  %v4216_v61 = vpop.f32.mrb[26].mxu1  ;;  %v3289_v15 = vld [vmem:[#allocation3 + $0x30] sm:$0xff] }
 0x1d7   : > { %3078 = vst.msk [vmem:[#allocation3 + $0x50] sm:$0xff] %vm2394_vm9, %v3046_v38  ;;  %3348 = vst.msk [vmem:[#allocation3 + $0x8] sm:$0xff] %vm2394_vm9, %v3316_v62  ;;  %v3047_v1 = vadd.f32 %v4216_v61, %v3015_v11  ;;  %v2912_v5 = vpop.f32.mrb[27].mxu1  ;;  %v3287_v12 = vld [vmem:[#allocation3 + $0x20] sm:$0xff] }
 0x1d8   : > { %3076 = vst.msk [vmem:[#allocation3 + $0x40] sm:$0xff] %vm2394_vm9, %v3044_v28  ;;  %v3045_v43 = vadd.f32 %v3013_v7, %v2912_v5  ;;  %v3290_v19 = vld [vmem:[#allocation3 + $0x38] sm:$0xff] }
 0x1d9   : > { %3079 = vst.msk [vmem:[#allocation3 + $0x58] sm:$0xff] %vm2394_vm9, %v3047_v1  ;;  %v4245_v2 = vpop.f32.mrb[20].mxu0  ;;  %v3288_v49 = vld [vmem:[#allocation3 + $0x28] sm:$0xff] }
 0x1da   : > { %3077 = vst.msk [vmem:[#allocation3 + $0x48] sm:$0xff] %vm2394_vm9, %v3045_v43  ;;  %v3321_v18 = vadd.f32 %v4245_v2, %v3289_v15  ;;  %v3172_v24 = vpop.f32.mrb[21].mxu0 }
 0x1db   : > { %v3381_v34 = vld [vmem:[#allocation3 + $0x10] sm:$0xff]  ;;  %v3319_v10 = vadd.f32 %v3287_v12, %v3172_v24  ;;  %v4246_v42 = vpop.f32.mrb[22].mxu0 }
 0x1dc   : > { %v4088_v27 = vpack.c.bf16 %v3381_v34, %v3381_v34  ;;  %v3379_v21 = vld [vmem:[#allocation3] sm:$0xff]  ;;  %3353 = vst.msk [vmem:[#allocation3 + $0x30] sm:$0xff] %vm2394_vm9, %v3321_v18  ;;  %v3322_v32 = vadd.f32 %v4246_v42, %v3290_v19  ;;  %v4219_v0 = vpop.f32.mrb[28].mxu1  ;;  %v3175_v31 = vpop.f32.mrb[23].mxu0  ;;  %v3576_v45 = vsel %vm2394_vm9, %v3381_v34, 0.0  ;;  %v3648_v57 = vmul.f32 %v3381_v34, %v3381_v34 }
 0x1dd   : > { %v4086_v50 = vpack.c.bf16 %v3379_v21, %v3379_v21  ;;  %v3646_v39 = vmul.f32 %v3379_v21, %v3379_v21  ;;  %v3382_v14 = vld [vmem:[#allocation3 + $0x18] sm:$0xff]  ;;  %3351 = vst.msk [vmem:[#allocation3 + $0x20] sm:$0xff] %vm2394_vm9, %v3319_v10  ;;  %v3050_v58 = vadd.f32 %v4219_v0, %v3018_v47  ;;  %v2925_v37 = vpop.f32.mrb[29].mxu1  ;;  %v3573_v9 = vsel %vm2394_vm9, %v3379_v21, 0.0 }
 0x1de   : > { %3542 = vst.msk [vmem:[%s5433_s25 + $0x8] sm:$0xf] %vm3539_vm13, %v4088_v27  ;;  %v4089_v30 = vpack.c.bf16 %v3382_v14, %v3382_v14  ;;  %v3380_v6 = vld [vmem:[#allocation3 + $0x8] sm:$0xff]  ;;  %v4220_v46 = vpop.f32.mrb[30].mxu1  ;;  %v3649_v40 = vmul.f32 %v3382_v14, %v3382_v14  ;;  %v3320_v44 = vadd.f32 %v3288_v49, %v3175_v31  ;;  %v3048_v26 = vadd.f32 %v3016_v3, %v2925_v37  ;;  %v3293_v17 = vld [vmem:[#allocation3 + $0x50] sm:$0xff] }
 0x1df   : > { %3354 = vst.msk [vmem:[#allocation3 + $0x38] sm:$0xff] %vm2394_vm9, %v3322_v32  ;;  %v4087_v20 = vpack.c.bf16 %v3380_v6, %v3380_v6  ;;  %v3574_v54 = vsel %vm2394_vm9, %v3380_v6, 0.0  ;;  %v3647_v22 = vmul.f32 %v3380_v6, %v3380_v6  ;;  %3082 = vst.msk [vmem:[#allocation3 + $0x70] sm:$0xff] %vm2394_vm9, %v3050_v58  ;;  %v2928_v41 = vpop.f32.mrb[31].mxu1  ;;  %v3678_v55 = vsel %vm2394_vm9, %v3646_v39, 0.0  ;;  %v3291_v53 = vld [vmem:[#allocation3 + $0x40] sm:$0xff] }
 0x1e0   : > { %3540 = vst.msk [vmem:[%s5433_s25] sm:$0xf] %vm3539_vm13, %v4086_v50  ;;  %3543 = vst.msk [vmem:[%s5433_s25 + $0xc] sm:$0xf] %vm3539_vm13, %v4089_v30  ;;  %v3575_v63 = vadd.f32 %v3574_v54, %v3573_v9  ;;  %v3051_v52 = vadd.f32 %v4220_v46, %v3019_v16  ;;  %v3049_v29 = vadd.f32 %v3017_v48, %v2928_v41  ;;  %v3681_v33 = vsel %vm2394_vm9, %v3648_v57, 0.0  ;;  %v3294_v12 = vld [vmem:[#allocation3 + $0x58] sm:$0xff] }
 0x1e1   : > { %3541 = vst.msk [vmem:[%s5433_s25 + $0x4] sm:$0xf] %vm3539_vm13, %v4087_v20  ;;  %v3679_v36 = vsel %vm2394_vm9, %v3647_v22, 0.0  ;;  %v4249_v13 = vpop.f32.mrb[24].mxu0  ;;  %v3578_v38 = vsel %vm2394_vm9, %v3382_v14, 0.0  ;;  %v3683_v62 = vsel %vm2394_vm9, %v3649_v40, 0.0 }
 0x1e2   : > { %v3577_v60 = vadd.f32 %v3576_v45, %v3575_v63  ;;  %v3680_v51 = vadd.f32 %v3679_v36, %v3678_v55  ;;  %3352 = vst.msk [vmem:[#allocation3 + $0x28] sm:$0xff] %vm2394_vm9, %v3320_v44  ;;  %3080 = vst.msk [vmem:[#allocation3 + $0x60] sm:$0xff] %vm2394_vm9, %v3048_v26  ;;  %v3325_v4 = vadd.f32 %v4249_v13, %v3293_v17  ;;  %v3188_v8 = vpop.f32.mrb[25].mxu0  ;;  %v3022_v27 = vld [vmem:[#allocation3 + $0x90] sm:$0xff]  ;;  %v3292_v21 = vld [vmem:[#allocation3 + $0x48] sm:$0xff] }
 0x1e3   : > { %v3385_v23 = vld [vmem:[#allocation3 + $0x30] sm:$0xff]  ;;  %3083 = vst.msk [vmem:[#allocation3 + $0x78] sm:$0xff] %vm2394_vm9, %v3051_v52  ;;  %3081 = vst.msk [vmem:[#allocation3 + $0x68] sm:$0xff] %vm2394_vm9, %v3049_v29  ;;  %v3323_v25 = vadd.f32 %v3291_v53, %v3188_v8  ;;  %v4250_v35 = vpop.f32.mrb[26].mxu0  ;;  %v3020_v32 = vld [vmem:[#allocation3 + $0x80] sm:$0xff] }
 0x1e4   : > { %v3682_v59 = vadd.f32 %v3681_v33, %v3680_v51  ;;  %v4092_v56 = vpack.c.bf16 %v3385_v23, %v3385_v23  ;;  %v3383_v28 = vld [vmem:[#allocation3 + $0x20] sm:$0xff]  ;;  %3357 = vst.msk [vmem:[#allocation3 + $0x50] sm:$0xff] %vm2394_vm9, %v3325_v4  ;;  %v4223_v61 = vpop.f32.mrb[32].mxu1  ;;  %v3191_v11 = vpop.f32.mrb[27].mxu0  ;;  %v3579_v5 = vadd.f32 %v3578_v38, %v3577_v60  ;;  %v3326_v19 = vadd.f32 %v4250_v35, %v3294_v12  ;;  %v3023_v14 = vld [vmem:[#allocation3 + $0x98] sm:$0xff]  ;;  %v3021_v58 = vld [vmem:[#allocation3 + $0x88] sm:$0xff] }
 0x1e5   : > { %v4090_v1 = vpack.c.bf16 %v3383_v28, %v3383_v28  ;;  %v3580_v7 = vsel %vm2394_vm9, %v3383_v28, 0.0  ;;  %v3650_v43 = vmul.f32 %v3383_v28, %v3383_v28  ;;  %3355 = vst.msk [vmem:[#allocation3 + $0x40] sm:$0xff] %vm2394_vm9, %v3323_v25  ;;  %v2941_v15 = vpop.f32.mrb[33].mxu1  ;;  %v3652_v47 = vmul.f32 %v3385_v23, %v3385_v23  ;;  %v3026_v33 = vld [vmem:[#allocation3 + $0xb0] sm:$0xff] }
 0x1e6   : > { %v3386_v2 = vld [vmem:[#allocation3 + $0x38] sm:$0xff]  ;;  %3546 = vst.msk [vmem:[%s5433_s25 + $0x18] sm:$0xf] %vm3539_vm13, %v4092_v56  ;;  %v3684_v18 = vadd.f32 %v3683_v62, %v3682_v59  ;;  %v4224_v34 = vpop.f32.mrb[34].mxu1  ;;  %v3581_v10 = vadd.f32 %v3580_v7, %v3579_v5  ;;  %v3054_v31 = vadd.f32 %v4223_v61, %v3022_v27  ;;  %v3324_v50 = vadd.f32 %v3292_v21, %v3191_v11  ;;  %v3297_v9 = vld [vmem:[#allocation3 + $0x70] sm:$0xff]  ;;  %v3024_v56 = vld [vmem:[#allocation3 + $0xa0] sm:$0xff] }
 0x1e7   : > { %v4093_v24 = vpack.c.bf16 %v3386_v2, %v3386_v2  ;;  %3544 = vst.msk [vmem:[%s5433_s25 + $0x10] sm:$0xf] %vm3539_vm13, %v4090_v1  ;;  %v3685_v42 = vsel %vm2394_vm9, %v3650_v43, 0.0  ;;  %v2944_v0 = vpop.f32.mrb[35].mxu1  ;;  %v3052_v39 = vadd.f32 %v3020_v32, %v2941_v15  ;;  %v3653_v45 = vmul.f32 %v3386_v2, %v3386_v2  ;;  %v3027_v7 = vld [vmem:[#allocation3 + $0xb8] sm:$0xff] }
 0x1e8   : > { %v3686_v37 = vadd.f32 %v3685_v42, %v3684_v18  ;;  %3358 = vst.msk [vmem:[#allocation3 + $0x58] sm:$0xff] %vm2394_vm9, %v3326_v19  ;;  %v3055_v30 = vadd.f32 %v4224_v34, %v3023_v14  ;;  %v3053_v6 = vadd.f32 %v3021_v58, %v2944_v0  ;;  %3086 = vst.msk [vmem:[#allocation3 + $0x90] sm:$0xff] %vm2394_vm9, %v3054_v31  ;;  %v3584_v40 = vsel %vm2394_vm9, %v3385_v23, 0.0 }
 0x1e9   : > { %3547 = vst.msk [vmem:[%s5433_s25 + $0x1c] sm:$0xf] %vm3539_vm13, %v4093_v24  ;;  %v3384_v57 = vld [vmem:[#allocation3 + $0x28] sm:$0xff]  ;;  %v4253_v46 = vpop.f32.mrb[28].mxu0  ;;  %v3295_v41 = vld [vmem:[#allocation3 + $0x60] sm:$0xff]  ;;  %v3689_v48 = vsel %vm2394_vm9, %v3652_v47, 0.0 }
 0x1ea   : > { %v4091_v20 = vpack.c.bf16 %v3384_v57, %v3384_v57  ;;  %v3582_v54 = vsel %vm2394_vm9, %v3384_v57, 0.0  ;;  %v3651_v22 = vmul.f32 %v3384_v57, %v3384_v57  ;;  %3356 = vst.msk [vmem:[#allocation3 + $0x48] sm:$0xff] %vm2394_vm9, %v3324_v50  ;;  %3084 = vst.msk [vmem:[#allocation3 + $0x80] sm:$0xff] %vm2394_vm9, %v3052_v39  ;;  %v3329_v49 = vadd.f32 %v4253_v46, %v3297_v9  ;;  %v3204_v3 = vpop.f32.mrb[29].mxu0  ;;  %v3298_v53 = vld [vmem:[#allocation3 + $0x78] sm:$0xff]  ;;  %v3296_v59 = vld [vmem:[#allocation3 + $0x68] sm:$0xff] }
 0x1eb   : > { %v3583_v63 = vadd.f32 %v3582_v54, %v3581_v10  ;;  %v3389_v44 = vld [vmem:[#allocation3 + $0x50] sm:$0xff]  ;;  %3087 = vst.msk [vmem:[#allocation3 + $0x98] sm:$0xff] %vm2394_vm9, %v3055_v30  ;;  %3085 = vst.msk [vmem:[#allocation3 + $0x88] sm:$0xff] %vm2394_vm9, %v3053_v6  ;;  %v3327_v26 = vadd.f32 %v3295_v41, %v3204_v3  ;;  %v4254_v16 = vpop.f32.mrb[30].mxu0  ;;  %v3586_v55 = vsel %vm2394_vm9, %v3386_v2, 0.0  ;;  %v3691_v60 = vsel %vm2394_vm9, %v3653_v45, 0.0 }
 0x1ec   : > { %3545 = vst.msk [vmem:[%s5433_s25 + $0x14] sm:$0xf] %vm3539_vm13, %v4091_v20  ;;  %v3687_v36 = vsel %vm2394_vm9, %v3651_v22, 0.0  ;;  %v4096_v52 = vpack.c.bf16 %v3389_v44, %v3389_v44  ;;  %v3387_v29 = vld [vmem:[#allocation3 + $0x40] sm:$0xff]  ;;  %v4227_v13 = vpop.f32.mrb[36].mxu1  ;;  %v3207_v17 = vpop.f32.mrb[31].mxu0  ;;  %v3330_v38 = vadd.f32 %v4254_v16, %v3298_v53  ;;  %v3656_v15 = vmul.f32 %v3389_v44, %v3389_v44 }
 0x1ed   : > { %3361 = vst.msk [vmem:[#allocation3 + $0x70] sm:$0xff] %vm2394_vm9, %v3329_v49  ;;  %v3585_v51 = vadd.f32 %v3584_v40, %v3583_v63  ;;  %v3688_v4 = vadd.f32 %v3687_v36, %v3686_v37  ;;  %v4094_v8 = vpack.c.bf16 %v3387_v29, %v3387_v29  ;;  %3359 = vst.msk [vmem:[#allocation3 + $0x60] sm:$0xff] %vm2394_vm9, %v3327_v26  ;;  %v2957_v23 = vpop.f32.mrb[37].mxu1  ;;  %v3588_v25 = vsel %vm2394_vm9, %v3387_v29, 0.0  ;;  %v3025_v2 = vld [vmem:[#allocation3 + $0xa8] sm:$0xff]  ;;  %v3030_v16 = vld [vmem:[#allocation3 + $0xd0] sm:$0xff] }
 0x1ee   : > { %3550 = vst.msk [vmem:[%s5433_s25 + $0x28] sm:$0xf] %vm3539_vm13, %v4096_v52  ;;  %v3654_v35 = vmul.f32 %v3387_v29, %v3387_v29  ;;  %v3058_v62 = vadd.f32 %v4227_v13, %v3026_v33  ;;  %v4228_v28 = vpop.f32.mrb[38].mxu1  ;;  %v3328_v1 = vadd.f32 %v3296_v59, %v3207_v17  ;;  %v3056_v5 = vadd.f32 %v3024_v56, %v2957_v23 }
 0x1ef   : > { %v3690_v61 = vadd.f32 %v3689_v48, %v3688_v4  ;;  %3548 = vst.msk [vmem:[%s5433_s25 + $0x20] sm:$0xf] %vm3539_vm13, %v4094_v8  ;;  %v3587_v11 = vadd.f32 %v3586_v55, %v3585_v51  ;;  %v2960_v43 = vpop.f32.mrb[39].mxu1  ;;  %v3390_v24 = vld [vmem:[#allocation3 + $0x58] sm:$0xff]  ;;  %v3059_v12 = vadd.f32 %v4228_v28, %v3027_v7  ;;  %v3592_v32 = vsel %vm2394_vm9, %v3389_v44, 0.0  ;;  %v3301_v50 = vld [vmem:[#allocation3 + $0x90] sm:$0xff] }
 0x1f0   : > { %v3693_v18 = vsel %vm2394_vm9, %v3654_v35, 0.0  ;;  %3362 = vst.msk [vmem:[#allocation3 + $0x78] sm:$0xff] %vm2394_vm9, %v3330_v38  ;;  %3090 = vst.msk [vmem:[#allocation3 + $0xb0] sm:$0xff] %vm2394_vm9, %v3058_v62  ;;  %v3057_v34 = vadd.f32 %v3025_v2, %v2960_v43  ;;  %v4097_v19 = vpack.c.bf16 %v3390_v24, %v3390_v24  ;;  %v3697_v46 = vsel %vm2394_vm9, %v3656_v15, 0.0  ;;  %v3029_v15 = vld [vmem:[#allocation3 + $0xc8] sm:$0xff] }
 0x1f1   : > { %v3589_v10 = vadd.f32 %v3588_v25, %v3587_v11  ;;  %v3692_v42 = vadd.f32 %v3691_v60, %v3690_v61  ;;  %v3388_v27 = vld [vmem:[#allocation3 + $0x48] sm:$0xff]  ;;  %3360 = vst.msk [vmem:[#allocation3 + $0x68] sm:$0xff] %vm2394_vm9, %v3328_v1  ;;  %3088 = vst.msk [vmem:[#allocation3 + $0xa0] sm:$0xff] %vm2394_vm9, %v3056_v5  ;;  %v4257_v21 = vpop.f32.mrb[32].mxu0  ;;  %v3299_v14 = vld [vmem:[#allocation3 + $0x80] sm:$0xff]  ;;  %v3657_v9 = vmul.f32 %v3390_v24, %v3390_v24  ;;  %v3594_v41 = vsel %vm2394_vm9, %v3390_v24, 0.0 }
 0x1f2   : > { %v4095_v0 = vpack.c.bf16 %v3388_v27, %v3388_v27  ;;  %v3590_v47 = vsel %vm2394_vm9, %v3388_v27, 0.0  ;;  %v3655_v31 = vmul.f32 %v3388_v27, %v3388_v27  ;;  %3091 = vst.msk [vmem:[#allocation3 + $0xb8] sm:$0xff] %vm2394_vm9, %v3059_v12  ;;  %3089 = vst.msk [vmem:[#allocation3 + $0xa8] sm:$0xff] %vm2394_vm9, %v3057_v34  ;;  %v3220_v39 = vpop.f32.mrb[33].mxu0  ;;  %v3333_v57 = vadd.f32 %v4257_v21, %v3301_v50  ;;  %v3302_v26 = vld [vmem:[#allocation3 + $0x98] sm:$0xff]  ;;  %v3300_v13 = vld [vmem:[#allocation3 + $0x88] sm:$0xff] }
 0x1f3   : > { %v3694_v58 = vadd.f32 %v3693_v18, %v3692_v42  ;;  %3551 = vst.msk [vmem:[%s5433_s25 + $0x2c] sm:$0xf] %vm3539_vm13, %v4097_v19  ;;  %v3591_v37 = vadd.f32 %v3590_v47, %v3589_v10  ;;  %v3331_v30 = vadd.f32 %v3299_v14, %v3220_v39  ;;  %v4258_v6 = vpop.f32.mrb[34].mxu0  ;;  %v3699_v33 = vsel %vm2394_vm9, %v3657_v9, 0.0  ;;  %v3028_v61 = vld [vmem:[#allocation3 + $0xc0] sm:$0xff]  ;;  %v3031_v11 = vld [vmem:[#allocation3 + $0xd8] sm:$0xff] }
 0x1f4   : > { %v3393_v45 = vld [vmem:[#allocation3 + $0x70] sm:$0xff]  ;;  %3549 = vst.msk [vmem:[%s5433_s25 + $0x24] sm:$0xf] %vm3539_vm13, %v4095_v0  ;;  %v3695_v20 = vsel %vm2394_vm9, %v3655_v31, 0.0  ;;  %v3391_v22 = vld [vmem:[#allocation3 + $0x60] sm:$0xff]  ;;  %v4231_v49 = vpop.f32.mrb[40].mxu1  ;;  %v3334_v52 = vadd.f32 %v4258_v6, %v3302_v26 }
 0x1f5   : > { %v4100_v54 = vpack.c.bf16 %v3393_v45, %v3393_v45  ;;  %v3223_v3 = vpop.f32.mrb[35].mxu0  ;;  %v3593_v40 = vadd.f32 %v3592_v32, %v3591_v37  ;;  %v3696_v63 = vadd.f32 %v3695_v20, %v3694_v58  ;;  %v4098_v44 = vpack.c.bf16 %v3391_v22, %v3391_v22  ;;  %3365 = vst.msk [vmem:[#allocation3 + $0x90] sm:$0xff] %vm2394_vm9, %v3333_v57  ;;  %v2973_v48 = vpop.f32.mrb[41].mxu1 }
 0x1f6   : > { %3363 = vst.msk [vmem:[#allocation3 + $0x80] sm:$0xff] %vm2394_vm9, %v3331_v30  ;;  %v3596_v55 = vsel %vm2394_vm9, %v3391_v22, 0.0  ;;  %v3658_v36 = vmul.f32 %v3391_v22, %v3391_v22  ;;  %v3062_v29 = vadd.f32 %v4231_v49, %v3030_v16  ;;  %v4232_v17 = vpop.f32.mrb[42].mxu1  ;;  %v3332_v8 = vadd.f32 %v3300_v13, %v3223_v3  ;;  %3366 = vst.msk [vmem:[#allocation3 + $0x98] sm:$0xff] %vm2394_vm9, %v3334_v52  ;;  %v3034_v22 = vld [vmem:[#allocation3 + $0xf0] sm:$0xff] }
 0x1f7   : > { %3554 = vst.msk [vmem:[%s5433_s25 + $0x38] sm:$0xf] %vm3539_vm13, %v4100_v54  ;;  %v3698_v60 = vadd.f32 %v3697_v46, %v3696_v63  ;;  %3552 = vst.msk [vmem:[%s5433_s25 + $0x30] sm:$0xf] %vm3539_vm13, %v4098_v44  ;;  %v3595_v51 = vadd.f32 %v3594_v41, %v3593_v40  ;;  %v3394_v4 = vld [vmem:[#allocation3 + $0x78] sm:$0xff]  ;;  %v2976_v53 = vpop.f32.mrb[43].mxu1  ;;  %v3660_v23 = vmul.f32 %v3393_v45, %v3393_v45 }
 0x1f8   : > { %v3701_v25 = vsel %vm2394_vm9, %v3658_v36, 0.0  ;;  %v4101_v35 = vpack.c.bf16 %v3394_v4, %v3394_v4  ;;  %v3392_v38 = vld [vmem:[#allocation3 + $0x68] sm:$0xff]  ;;  %3094 = vst.msk [vmem:[#allocation3 + $0xd0] sm:$0xff] %vm2394_vm9, %v3062_v29  ;;  %3364 = vst.msk [vmem:[#allocation3 + $0x88] sm:$0xff] %vm2394_vm9, %v3332_v8  ;;  %v3600_v5 = vsel %vm2394_vm9, %v3393_v45, 0.0  ;;  %v3060_v43 = vadd.f32 %v3028_v61, %v2973_v48  ;;  %v3305_v18 = vld [vmem:[#allocation3 + $0xb0] sm:$0xff] }
 0x1f9   : > { %v3597_v62 = vadd.f32 %v3596_v55, %v3595_v51  ;;  %v3700_v59 = vadd.f32 %v3699_v33, %v3698_v60  ;;  %v4099_v56 = vpack.c.bf16 %v3392_v38, %v3392_v38  ;;  %v3598_v28 = vsel %vm2394_vm9, %v3392_v38, 0.0  ;;  %v4261_v1 = vpop.f32.mrb[36].mxu0  ;;  %v3303_v19 = vld [vmem:[#allocation3 + $0xa0] sm:$0xff]  ;;  %v3306_v21 = vld [vmem:[#allocation3 + $0xb8] sm:$0xff]  ;;  %v3304_v49 = vld [vmem:[#allocation3 + $0xa8] sm:$0xff] }
 0x1fa   : > { %3555 = vst.msk [vmem:[%s5433_s25 + $0x3c] sm:$0xf] %vm3539_vm13, %v4101_v35  ;;  %v3659_v7 = vmul.f32 %v3392_v38, %v3392_v38  ;;  %v3063_v2 = vadd.f32 %v4232_v17, %v3031_v11  ;;  %v3236_v24 = vpop.f32.mrb[37].mxu0  ;;  %v3061_v10 = vadd.f32 %v3029_v15, %v2976_v53  ;;  %v3337_v42 = vadd.f32 %v4261_v1, %v3305_v18  ;;  %v3035_v8 = vld [vmem:[#allocation3 + $0xf8] sm:$0xff]  ;;  %v3033_v38 = vld [vmem:[#allocation3 + $0xe8] sm:$0xff] }
 0x1fb   : > { %v3702_v12 = vadd.f32 %v3701_v25, %v3700_v59  ;;  %3553 = vst.msk [vmem:[%s5433_s25 + $0x34] sm:$0xf] %vm3539_vm13, %v4099_v56  ;;  %v3599_v34 = vadd.f32 %v3598_v28, %v3597_v62  ;;  %v4262_v27 = vpop.f32.mrb[38].mxu0  ;;  %v3661_v32 = vmul.f32 %v3394_v4, %v3394_v4  ;;  %v3335_v50 = vadd.f32 %v3303_v19, %v3236_v24 }
 0x1fc   : > { %v3703_v0 = vsel %vm2394_vm9, %v3659_v7, 0.0  ;;  %v3397_v47 = vld [vmem:[#allocation3 + $0x90] sm:$0xff]  ;;  %3092 = vst.msk [vmem:[#allocation3 + $0xc0] sm:$0xff] %vm2394_vm9, %v3060_v43  ;;  %3095 = vst.msk [vmem:[#allocation3 + $0xd8] sm:$0xff] %vm2394_vm9, %v3063_v2  ;;  %v3338_v39 = vadd.f32 %v4262_v27, %v3306_v21  ;;  %v4235_v14 = vpop.f32.mrb[44].mxu1  ;;  %v3239_v58 = vpop.f32.mrb[39].mxu0 }
 0x1fd   : > { %v3395_v31 = vld [vmem:[#allocation3 + $0x80] sm:$0xff]  ;;  %v3705_v37 = vsel %vm2394_vm9, %v3660_v23, 0.0  ;;  %v3601_v45 = vadd.f32 %v3600_v5, %v3599_v34  ;;  %v3704_v57 = vadd.f32 %v3703_v0, %v3702_v12  ;;  %v4104_v30 = vpack.c.bf16 %v3397_v47, %v3397_v47  ;;  %3093 = vst.msk [vmem:[#allocation3 + $0xc8] sm:$0xff] %vm2394_vm9, %v3061_v10  ;;  %3369 = vst.msk [vmem:[#allocation3 + $0xb0] sm:$0xff] %vm2394_vm9, %v3337_v42  ;;  %v2989_v6 = vpop.f32.mrb[45].mxu1  ;;  %v3398_v63 = vld [vmem:[#allocation3 + $0x98] sm:$0xff] }
 0x1fe   : > { %v3602_v46 = vsel %vm2394_vm9, %v3394_v4, 0.0  ;;  %v4102_v9 = vpack.c.bf16 %v3395_v31, %v3395_v31  ;;  %v3604_v20 = vsel %vm2394_vm9, %v3395_v31, 0.0  ;;  %v3662_v54 = vmul.f32 %v3395_v31, %v3395_v31  ;;  %3367 = vst.msk [vmem:[#allocation3 + $0xa0] sm:$0xff] %vm2394_vm9, %v3335_v50  ;;  %3370 = vst.msk [vmem:[#allocation3 + $0xb8] sm:$0xff] %vm2394_vm9, %v3338_v39  ;;  %v4236_v3 = vpop.f32.mrb[46].mxu1  ;;  %v3032_v4 = vld [vmem:[#allocation3 + $0xe0] sm:$0xff] }
 0x1ff   : > { %v3706_v41 = vadd.f32 %v3705_v37, %v3704_v57  ;;  %3558 = vst.msk [vmem:[%s5433_s25 + $0x48] sm:$0xf] %vm3539_vm13, %v4104_v30  ;;  %v3603_v40 = vadd.f32 %v3602_v46, %v3601_v45  ;;  %v3066_v44 = vadd.f32 %v4235_v14, %v3034_v22  ;;  %v3336_v26 = vadd.f32 %v3304_v49, %v3239_v58  ;;  %v2992_v16 = vpop.f32.mrb[47].mxu1  ;;  %v3396_v29 = vld [vmem:[#allocation3 + $0x88] sm:$0xff]  ;;  %v3309_v11 = vld [vmem:[#allocation3 + $0xd0] sm:$0xff] }
 0x200   : > { %v3707_v48 = vsel %vm2394_vm9, %v3661_v32, 0.0  ;;  %v3608_v55 = vsel %vm2394_vm9, %v3397_v47, 0.0  ;;  %3556 = vst.msk [vmem:[%s5433_s25 + $0x40] sm:$0xf] %vm3539_vm13, %v4102_v9  ;;  %v3709_v36 = vsel %vm2394_vm9, %v3662_v54, 0.0  ;;  %v4105_v52 = vpack.c.bf16 %v3398_v63, %v3398_v63 }
 0x201   : > { %v3664_v13 = vmul.f32 %v3397_v47, %v3397_v47  ;;  %v3605_v17 = vadd.f32 %v3604_v20, %v3603_v40  ;;  %v3708_v60 = vadd.f32 %v3707_v48, %v3706_v41  ;;  %v4103_v51 = vpack.c.bf16 %v3396_v29, %v3396_v29  ;;  %3098 = vst.msk [vmem:[#allocation3 + $0xf0] sm:$0xff] %vm2394_vm9, %v3066_v44  ;;  %v4265_v53 = vpop.f32.mrb[40].mxu0 }
 0x202   : > { %3368 = vst.msk [vmem:[#allocation3 + $0xa8] sm:$0xff] %vm2394_vm9, %v3336_v26  ;;  %v3606_v33 = vsel %vm2394_vm9, %v3396_v29, 0.0  ;;  %v3663_v23 = vmul.f32 %v3396_v29, %v3396_v29  ;;  %v3064_v25 = vadd.f32 %v3032_v4, %v2989_v6  ;;  %v3067_v35 = vadd.f32 %v4236_v3, %v3035_v8  ;;  %v3252_v62 = vpop.f32.mrb[41].mxu0 }
 0x203   : > { %3559 = vst.msk [vmem:[%s5433_s25 + $0x4c] sm:$0xf] %vm3539_vm13, %v4105_v52  ;;  %v3710_v59 = vadd.f32 %v3709_v36, %v3708_v60  ;;  %v3665_v56 = vmul.f32 %v3398_v63, %v3398_v63  ;;  %3557 = vst.msk [vmem:[%s5433_s25 + $0x44] sm:$0xf] %vm3539_vm13, %v4103_v51  ;;  %v3607_v28 = vadd.f32 %v3606_v33, %v3605_v17  ;;  %v3307_v1 = vld [vmem:[#allocation3 + $0xc0] sm:$0xff]  ;;  %v4266_v5 = vpop.f32.mrb[42].mxu0 }
 0x204   : > { %v3065_v61 = vadd.f32 %v3033_v38, %v2992_v16  ;;  %v3310_v7 = vld [vmem:[#allocation3 + $0xd8] sm:$0xff]  ;;  %v3711_v43 = vsel %vm2394_vm9, %v3663_v23, 0.0  ;;  %v3401_v2 = vld [vmem:[#allocation3 + $0xb0] sm:$0xff]  ;;  %3096 = vst.msk [vmem:[#allocation3 + $0xe0] sm:$0xff] %vm2394_vm9, %v3064_v25  ;;  %3099 = vst.msk [vmem:[#allocation3 + $0xf8] sm:$0xff] %vm2394_vm9, %v3067_v35  ;;  %v3341_v15 = vadd.f32 %v4265_v53, %v3309_v11  ;;  %v3339_v18 = vadd.f32 %v3307_v1, %v3252_v62  ;;  %v3255_v12 = vpop.f32.mrb[43].mxu0 }
 0x205   : > { %v3342_v24 = vadd.f32 %v4266_v5, %v3310_v7  ;;  %v3713_v34 = vsel %vm2394_vm9, %v3664_v13, 0.0  ;;  %v3609_v10 = vadd.f32 %v3608_v55, %v3607_v28  ;;  %v3712_v42 = vadd.f32 %v3711_v43, %v3710_v59  ;;  %v3399_v27 = vld [vmem:[#allocation3 + $0xa0] sm:$0xff]  ;;  %v3402_v21 = vld [vmem:[#allocation3 + $0xb8] sm:$0xff]  ;;  %v3308_v58 = vld [vmem:[#allocation3 + $0xc8] sm:$0xff] }
 0x206   : > { %v4108_v19 = vpack.c.bf16 %v3401_v2, %v3401_v2  ;;  %3097 = vst.msk [vmem:[#allocation3 + $0xe8] sm:$0xff] %vm2394_vm9, %v3065_v61  ;;  %v3610_v32 = vsel %vm2394_vm9, %v3398_v63, 0.0  ;;  %v4106_v0 = vpack.c.bf16 %v3399_v27, %v3399_v27  ;;  %v3612_v47 = vsel %vm2394_vm9, %v3399_v27, 0.0  ;;  %3373 = vst.msk [vmem:[#allocation3 + $0xd0] sm:$0xff] %vm2394_vm9, %v3341_v15 }
 0x207   : > { %v3666_v31 = vmul.f32 %v3399_v27, %v3399_v27  ;;  %3371 = vst.msk [vmem:[#allocation3 + $0xc0] sm:$0xff] %vm2394_vm9, %v3339_v18  ;;  %3374 = vst.msk [vmem:[#allocation3 + $0xd8] sm:$0xff] %vm2394_vm9, %v3342_v24  ;;  %v3714_v50 = vadd.f32 %v3713_v34, %v3712_v42  ;;  %v3611_v39 = vadd.f32 %v3610_v32, %v3609_v10  ;;  %v3715_v37 = vsel %vm2394_vm9, %v3665_v56, 0.0 }
 0x208   : > { %3562 = vst.msk [vmem:[%s5433_s25 + $0x58] sm:$0xf] %vm3539_vm13, %v4108_v19  ;;  %v4109_v14 = vpack.c.bf16 %v3402_v21, %v3402_v21  ;;  %3560 = vst.msk [vmem:[%s5433_s25 + $0x50] sm:$0xf] %vm3539_vm13, %v4106_v0  ;;  %v3340_v30 = vadd.f32 %v3308_v58, %v3255_v12  ;;  %v3313_v22 = vld [vmem:[#allocation3 + $0xf0] sm:$0xff]  ;;  %v3668_v49 = vmul.f32 %v3401_v2, %v3401_v2  ;;  %v3616_v63 = vsel %vm2394_vm9, %v3401_v2, 0.0 }
 0x209   : > { %v3717_v45 = vsel %vm2394_vm9, %v3666_v31, 0.0  ;;  %v3400_v57 = vld [vmem:[#allocation3 + $0xa8] sm:$0xff]  ;;  %v3613_v6 = vadd.f32 %v3612_v47, %v3611_v39  ;;  %v3716_v46 = vadd.f32 %v3715_v37, %v3714_v50  ;;  %v4269_v54 = vpop.f32.mrb[44].mxu0  ;;  %v3669_v36 = vmul.f32 %v3402_v21, %v3402_v21 }
 0x20a   : > { %3563 = vst.msk [vmem:[%s5433_s25 + $0x5c] sm:$0xf] %vm3539_vm13, %v4109_v14  ;;  %v4107_v9 = vpack.c.bf16 %v3400_v57, %v3400_v57  ;;  %v3614_v20 = vsel %vm2394_vm9, %v3400_v57, 0.0  ;;  %v3667_v3 = vmul.f32 %v3400_v57, %v3400_v57  ;;  %v3345_v41 = vadd.f32 %v4269_v54, %v3313_v22  ;;  %v3268_v40 = vpop.f32.mrb[45].mxu0 }
 0x20b   : > { %3372 = vst.msk [vmem:[#allocation3 + $0xc8] sm:$0xff] %vm2394_vm9, %v3340_v30  ;;  %v3718_v44 = vadd.f32 %v3717_v45, %v3716_v46  ;;  %v3615_v26 = vadd.f32 %v3614_v20, %v3613_v6  ;;  %v3311_v16 = vld [vmem:[#allocation3 + $0xe0] sm:$0xff]  ;;  %v4270_v48 = vpop.f32.mrb[46].mxu0  ;;  %v3314_v55 = vld [vmem:[#allocation3 + $0xf8] sm:$0xff]  ;;  %v3721_v25 = vsel %vm2394_vm9, %v3668_v49, 0.0  ;;  %v3618_v35 = vsel %vm2394_vm9, %v3402_v21, 0.0 }
 0x20c   : > { %3561 = vst.msk [vmem:[%s5433_s25 + $0x54] sm:$0xf] %vm3539_vm13, %v4107_v9  ;;  %v3719_v52 = vsel %vm2394_vm9, %v3667_v3, 0.0  ;;  %v3343_v29 = vadd.f32 %v3311_v16, %v3268_v40  ;;  %v3346_v13 = vadd.f32 %v4270_v48, %v3314_v55  ;;  %v3271_v17 = vpop.f32.mrb[47].mxu0  ;;  %v3723_v11 = vsel %vm2394_vm9, %v3669_v36, 0.0 }
 0x20d   : > { %3377 = vst.msk [vmem:[#allocation3 + $0xf0] sm:$0xff] %vm2394_vm9, %v3345_v41  ;;  %v3312_v60 = vld [vmem:[#allocation3 + $0xe8] sm:$0xff]  ;;  %v3617_v51 = vadd.f32 %v3616_v63, %v3615_v26  ;;  %v3720_v4 = vadd.f32 %v3719_v52, %v3718_v44  ;;  %v3405_v8 = vld [vmem:[#allocation3 + $0xd0] sm:$0xff] }
 0x20e   : > { %v3403_v53 = vld [vmem:[#allocation3 + $0xc0] sm:$0xff]  ;;  %v3406_v33 = vld [vmem:[#allocation3 + $0xd8] sm:$0xff]  ;;  %v3344_v23 = vadd.f32 %v3312_v60, %v3271_v17  ;;  %v4112_v38 = vpack.c.bf16 %v3405_v8, %v3405_v8  ;;  %3375 = vst.msk [vmem:[#allocation3 + $0xe0] sm:$0xff] %vm2394_vm9, %v3343_v29  ;;  %3378 = vst.msk [vmem:[#allocation3 + $0xf8] sm:$0xff] %vm2394_vm9, %v3346_v13  ;;  %v3672_v5 = vmul.f32 %v3405_v8, %v3405_v8  ;;  %v3624_v19 = vsel %vm2394_vm9, %v3405_v8, 0.0 }
 0x20f   : > { %v4110_v62 = vpack.c.bf16 %v3403_v53, %v3403_v53  ;;  %v3722_v59 = vadd.f32 %v3721_v25, %v3720_v4  ;;  %v3619_v56 = vadd.f32 %v3618_v35, %v3617_v51  ;;  %v3620_v28 = vsel %vm2394_vm9, %v3403_v53, 0.0 }
 0x210   : > { %v3670_v61 = vmul.f32 %v3403_v53, %v3403_v53  ;;  %3376 = vst.msk [vmem:[#allocation3 + $0xe8] sm:$0xff] %vm2394_vm9, %v3344_v23  ;;  %v4113_v1 = vpack.c.bf16 %v3406_v33, %v3406_v33  ;;  %v3673_v27 = vmul.f32 %v3406_v33, %v3406_v33  ;;  %v3729_v0 = vsel %vm2394_vm9, %v3672_v5, 0.0 }
 0x211   : > { %3566 = vst.msk [vmem:[%s5433_s25 + $0x68] sm:$0xf] %vm3539_vm13, %v4112_v38  ;;  %3564 = vst.msk [vmem:[%s5433_s25 + $0x60] sm:$0xf] %vm3539_vm13, %v4110_v62  ;;  %v3621_v7 = vadd.f32 %v3620_v28, %v3619_v56  ;;  %v3724_v43 = vadd.f32 %v3723_v11, %v3722_v59  ;;  %v3626_v14 = vsel %vm2394_vm9, %v3406_v33, 0.0 }
 0x212   : > { %v3725_v2 = vsel %vm2394_vm9, %v3670_v61, 0.0  ;;  %v3404_v15 = vld [vmem:[#allocation3 + $0xc8] sm:$0xff]  ;;  %3567 = vst.msk [vmem:[%s5433_s25 + $0x6c] sm:$0xf] %vm3539_vm13, %v4113_v1  ;;  %v3731_v9 = vsel %vm2394_vm9, %v3673_v27, 0.0 }
 0x213   : > { %v4111_v18 = vpack.c.bf16 %v3404_v15, %v3404_v15  ;;  %v3622_v24 = vsel %vm2394_vm9, %v3404_v15, 0.0  ;;  %v3671_v12 = vmul.f32 %v3404_v15, %v3404_v15  ;;  %v3726_v34 = vadd.f32 %v3725_v2, %v3724_v43  ;;  %v3572_v59 = vld [vmem:[%s5379_s19] sm:$0x1] }
 0x214   : > { %v3623_v10 = vadd.f32 %v3622_v24, %v3621_v7  ;;  %v3409_v42 = vld [vmem:[#allocation3 + $0xf0] sm:$0xff]  ;;  %v3645_v61 = vld [vmem:[%s5385_s22] sm:$0x1] }
 0x215   : > { %3565 = vst.msk [vmem:[%s5433_s25 + $0x64] sm:$0xf] %vm3539_vm13, %v4111_v18  ;;  %v3727_v21 = vsel %vm2394_vm9, %v3671_v12, 0.0  ;;  %v4116_v32 = vpack.c.bf16 %v3409_v42, %v3409_v42  ;;  %v3407_v50 = vld [vmem:[#allocation3 + $0xe0] sm:$0xff]  ;;  %v3410_v39 = vld [vmem:[#allocation3 + $0xf8] sm:$0xff]  ;;  %v3676_v40 = vmul.f32 %v3409_v42, %v3409_v42  ;;  %v3632_v16 = vsel %vm2394_vm9, %v3409_v42, 0.0 }
 0x216   : > { %v3625_v47 = vadd.f32 %v3624_v19, %v3623_v10  ;;  %v3728_v31 = vadd.f32 %v3727_v21, %v3726_v34  ;;  %v4114_v58 = vpack.c.bf16 %v3407_v50, %v3407_v50  ;;  %v3628_v37 = vsel %vm2394_vm9, %v3407_v50, 0.0 }
 0x217   : > { %3570 = vst.msk [vmem:[%s5433_s25 + $0x78] sm:$0xf] %vm3539_vm13, %v4116_v32  ;;  %v3674_v45 = vmul.f32 %v3407_v50, %v3407_v50  ;;  %v3408_v57 = vld [vmem:[#allocation3 + $0xe8] sm:$0xff]  ;;  %v4117_v46 = vpack.c.bf16 %v3410_v39, %v3410_v39  ;;  %v3677_v48 = vmul.f32 %v3410_v39, %v3410_v39  ;;  %v3737_v52 = vsel %vm2394_vm9, %v3676_v40, 0.0 }
 0x218   : > { %v3730_v30 = vadd.f32 %v3729_v0, %v3728_v31  ;;  %v3627_v6 = vadd.f32 %v3626_v14, %v3625_v47  ;;  %3568 = vst.msk [vmem:[%s5433_s25 + $0x70] sm:$0xf] %vm3539_vm13, %v4114_v58  ;;  %v4115_v54 = vpack.c.bf16 %v3408_v57, %v3408_v57  ;;  %v3630_v22 = vsel %vm2394_vm9, %v3408_v57, 0.0 }
 0x219   : > { %v3733_v20 = vsel %vm2394_vm9, %v3674_v45, 0.0  ;;  %3571 = vst.msk [vmem:[%s5433_s25 + $0x7c] sm:$0xf] %vm3539_vm13, %v4117_v46  ;;  %v3675_v41 = vmul.f32 %v3408_v57, %v3408_v57  ;;  %v3634_v29 = vsel %vm2394_vm9, %v3410_v39, 0.0  ;;  %v3739_v60 = vsel %vm2394_vm9, %v3677_v48, 0.0 }
 0x21a   : > { %v3629_v49 = vadd.f32 %v3628_v37, %v3627_v6  ;;  %v3732_v3 = vadd.f32 %v3731_v9, %v3730_v30  ;;  %3569 = vst.msk [vmem:[%s5433_s25 + $0x74] sm:$0xf] %vm3539_vm13, %v4115_v54 }
 0x21b   : > { %v3735_v26 = vsel %vm2394_vm9, %v3675_v41, 0.0 }
 0x21c   : > { %v3734_v63 = vadd.f32 %v3733_v20, %v3732_v3  ;;  %v3631_v44 = vadd.f32 %v3630_v22, %v3629_v49 }
 0x21e   : > { %v3633_v55 = vadd.f32 %v3632_v16, %v3631_v44  ;;  %v3736_v36 = vadd.f32 %v3735_v26, %v3734_v63 }
 0x220   : > { %v3635_v13 = vadd.f32 %v3634_v29, %v3633_v55  ;;  %v3738_v17 = vadd.f32 %v3737_v52, %v3736_v36 }
 0x222   : > { %v3636_v51 = vrot.slane %v3635_v13, 4  ;;  %v3740_v4 = vadd.f32 %v3739_v60, %v3738_v17 }
 0x224   : > { %v3637_v8 = vadd.f32 %v3636_v51, %v3635_v13  ;;  %v3741_v53 = vrot.slane %v3740_v4, 4 }
 0x226   : > { %v3638_v33 = vrot.slane %v3637_v8, 2  ;;  %v3742_v23 = vadd.f32 %v3741_v53, %v3740_v4 }
 0x228   : > { %v3639_v25 = vadd.f32 %v3638_v33, %v3637_v8  ;;  %v3743_v35 = vrot.slane %v3742_v23, 2 }
 0x22a   : > { %v3640_v38 = vrot.slane %v3639_v25, 1  ;;  %v3744_v62 = vadd.f32 %v3743_v35, %v3742_v23 }
 0x22c   : > { %v3641_v56 = vadd.f32 %v3640_v38, %v3639_v25  ;;  %v3745_v28 = vrot.slane %v3744_v62, 1 }
 0x22e   : > { %v3642_v11 = vadd.f32 %v3641_v56, %v3572_v59  ;;  %v3746_v1 = vadd.f32 %v3745_v28, %v3744_v62 }
 0x230   : > { %3644 = vst.msk [vmem:[%s5379_s19] sm:$0x1] %vm497_vm4, %v3642_v11  ;;  %v3747_v5 = vadd.f32 %v3746_v1, %v3645_v61 }
 0x232   : > { %3748 = vst.msk [vmem:[%s5385_s22] sm:$0x1] %vm497_vm4, %v3747_v5 }
 0x233 PF: > { %s19_s27 = sadd.s32 1, %s4365_s27   ;;  %s5679_s26 = smov %s4361_s2 }
 0x234   : > { %p16_p5 = scmp.ge.s32.totalorder %s19_s27, 4   ;;  %s5680_s2 = smov %s5682_s4 }
 0x236   :  { %18 = sbr.rel (!%p16_p5) target bundleno = 2 (0x2), region = 126 }

</bundles_post_ra>
